<compile_context>
chip_gen: v5e
topology: v5e:2x2
jax: 0.10.0
libtpu: 0.0.40
codegen_flags: <defaults>
</compile_context>

<pallas_src>
import functools
import math

import jax
import jax.numpy as jnp
import numpy as np
from jax.experimental import pallas as pl
from jax.experimental.pallas import tpu as pltpu  # noqa: F401


# ----------------------------- Pallas kernel -------------------------------

def _fused_gru_att_kernel(*refs, num_layers, atten):
    """Whole GRU_Att_Layers forward in one grid-less kernel invocation.

    refs layout:
      [x_tm (S,B,F0), h0 (L,B,H), idx (B,1) int32,
       per-layer params:
         attention layer : wax (F,F), ba (1,F), whf (H,Fp+3Hp),
                           wih (F,3Hp), bih (1,3Hp), bhh (1,3Hp)
         plain layer     : wih (F,3Hp), bih (1,3Hp), whh (H,3Hp), bhh (1,3Hp)
       nh_out (L,B,H)]                                  # output
    """
    x_ref, h0_ref, idx_ref = refs[0], refs[1], refs[2]
    pos = 3
    layer_refs = []
    for l in range(num_layers):
        names = (("wax", "ba", "whf", "wih", "bih", "bhh")
                 if atten[l] else ("wih", "bih", "whh", "bhh"))
        layer_refs.append(dict(zip(names, refs[pos:pos + len(names)])))
        pos += len(names)
    nh_ref = refs[pos]

    S, B, _ = x_ref.shape
    H = h0_ref.shape[-1]

    idx = idx_ref[...]                                   # (B, 1) int32
    # Time-major input: each per-step access is a whole-tile leading-axis load.
    xs = [x_ref[t] for t in range(S)]                    # list of (B, F0)

    for l in range(num_layers):
        p = layer_refs[l]
        wih = p["wih"][...]                              # (F, 3*Hp)
        bih = p["bih"][...]                              # (1, 3*Hp)
        bhh = p["bhh"][...]                              # (1, 3*Hp)
        Hp = wih.shape[-1] // 3                          # lane-padded gate width
        F = xs[0].shape[-1]

        if atten[l]:
            wax = p["wax"][...]                          # (F, F)
            ba = p["ba"][...]                            # (1, F)
            whf = p["whf"][...]                          # (H, Fp + 3*Hp) fused [wah | whh]
            Fp = whf.shape[-1] - 3 * Hp
            # h-independent half of the attention logit, hoisted off the
            # recurrence (per-timestep, from clean time-major tiles).
            xa = [jnp.dot(xs[t], wax, preferred_element_type=jnp.float32) + ba
                  for t in range(S)]
        else:
            whh = p["whh"][...]                          # (H, 3*Hp)
            # Whole input projection hoisted off the recurrence.
            gi_pre = [jnp.dot(xs[t], wih, preferred_element_type=jnp.float32) + bih
                      for t in range(S)]

        h = h0_ref[l]                                    # (B, H)
        gathered = jnp.zeros((B, H), jnp.float32)
        outs = []

        for t in range(S):                               # fully unrolled (S small, static)
            if atten[l]:
                # ONE fused h-matmul: [attention logit lanes | gate lanes].
                hf = jnp.dot(h, whf, preferred_element_type=jnp.float32)
                a = jax.nn.sigmoid(xa[t] + hf[:, :F])
                xg = xs[t] * a
                gi = jnp.dot(xg, wih, preferred_element_type=jnp.float32) + bih
                gh = hf[:, Fp:] + bhh                    # (B, 3*Hp), vreg-aligned slice
            else:
                gi = gi_pre[t]
                gh = jnp.dot(h, whh, preferred_element_type=jnp.float32) + bhh

            # nn.GRUCell gate order: r, z, n.  Each gate occupies its own
            # 128-lane-aligned block (width Hp), so these slices start on
            # vreg boundaries and need no XLU lane relayout.
            r = jax.nn.sigmoid(gi[:, 0:H] + gh[:, 0:H])
            z = jax.nn.sigmoid(gi[:, Hp:Hp + H] + gh[:, Hp:Hp + H])
            n = jnp.tanh(gi[:, 2 * Hp:2 * Hp + H] + r * gh[:, 2 * Hp:2 * Hp + H])
            h = (1.0 - z) * n + z * h

            # In-kernel replacement for torch.gather(dim=1, batch_idx).
            gathered = jnp.where(idx == t, h, gathered)

            if l + 1 < num_layers:
                outs.append(h)

        nh_ref[l] = gathered
        if l + 1 < num_layers:
            # dropout(p=0) between layers is the identity.
            # TODO(synk): non-zero training-mode dropout (RNG mask) not implemented.
            xs = outs


# --------------------- parameter fusion (load-time, once) -------------------

def _round_up(x, m):
    return ((x + m - 1) // m) * m


def _pad_last(a, width):
    pad = width - a.shape[-1]
    if pad == 0:
        return a
    return jnp.pad(a, [(0, 0)] * (a.ndim - 1) + [(0, pad)])


def prepare_gru_att_params(layer_params, atten, hidden_size):
    """Fuse per-gate weights ((3,F,H) -> (F,3*Hp)) and lane-pad every gate to a
    128-lane block; fuse [wah | whh] for attention layers.  Call ONCE at
    parameter-load time, not inside the per-call forward."""
    H = hidden_size
    Hp = _round_up(H, 128)
    prepped = []
    for l, p in enumerate(layer_params):
        wih_f = jnp.concatenate([_pad_last(p["wih"][g], Hp) for g in range(3)], axis=1)
        bih_f = jnp.concatenate([_pad_last(p["bih"][g], Hp) for g in range(3)], axis=1)
        whh_f = jnp.concatenate([_pad_last(p["whh"][g], Hp) for g in range(3)], axis=1)
        bhh_f = jnp.concatenate([_pad_last(p["bhh"][g], Hp) for g in range(3)], axis=1)
        if atten[l]:
            F = p["wax"].shape[0]
            Fp = _round_up(F, 128)
            whf = jnp.concatenate([_pad_last(p["wah"], Fp), whh_f], axis=1)  # (H, Fp+3Hp)
            prepped.append({"wax": p["wax"], "ba": p["ba"], "whf": whf,
                            "wih": wih_f, "bih": bih_f, "bhh": bhh_f})
        else:
            prepped.append({"wih": wih_f, "bih": bih_f, "whh": whh_f, "bhh": bhh_f})
    return prepped


# ----------------------------- model wrapper --------------------------------

def gru_att_layers_forward(inputs, hidden, batch_idx, prep_params, atten):
    """Faithful port of GRU_Att_Layers.forward (dropout=0, visual=False).

    inputs:      (B, S, input_size)   batch_first
    hidden:      (num_layers, B, H)
    batch_idx:   (B, 1, H) int32      (torch.gather(dim=1) indices)
    prep_params: output of prepare_gru_att_params (pre-fused, lane-padded)
    returns:     (out (B, H), next_hidden (num_layers, B, H))
    """
    B, S, _ = inputs.shape
    L, _, H = hidden.shape
    assert L == len(prep_params) == len(atten)

    # Time-major layout done in the wrapper (cheap XLA op, keeps the kernel
    # free of in-kernel reshapes / middle-axis slices).
    x_tm = jnp.transpose(inputs, (1, 0, 2)).astype(jnp.float32)       # (S, B, F0)
    # gather index is constant across the hidden dim in this module's use
    # (last valid timestep per batch element); clamp to valid range so an
    # out-of-range index cannot silently drop to zeros.
    idx_col = jnp.clip(batch_idx[:, 0, :1].astype(jnp.int32), 0, S - 1)  # (B, 1)

    args = [x_tm, hidden.astype(jnp.float32), idx_col]
    for l, p in enumerate(prep_params):
        if atten[l]:
            args += [p["wax"], p["ba"], p["whf"], p["wih"], p["bih"], p["bhh"]]
        else:
            args += [p["wih"], p["bih"], p["whh"], p["bhh"]]

    kernel = functools.partial(_fused_gru_att_kernel,
                               num_layers=L, atten=tuple(atten))

    next_hidden = pl.pallas_call(
        kernel,
        out_shape=jax.ShapeDtypeStruct((L, B, H), jnp.float32),
    )(*args)

    out = next_hidden[-1]
    return out, next_hidden


# ------------------------- params / reference / main ------------------------

def init_layer_params(key, in_size, hidden_size, atten):
    k = 1.0 / math.sqrt(hidden_size)
    ks = jax.random.split(key, 7)
    p = {
        "wih": jax.random.uniform(ks[0], (3, in_size, hidden_size), jnp.float32, -k, k),
        "bih": jax.random.uniform(ks[1], (3, 1, hidden_size), jnp.float32, -k, k),
        "whh": jax.random.uniform(ks[2], (3, hidden_size, hidden_size), jnp.float32, -k, k),
        "bhh": jax.random.uniform(ks[3], (3, 1, hidden_size), jnp.float32, -k, k),
    }
    if atten:
        ka = 1.0 / math.sqrt(in_size + hidden_size)
        p["wax"] = jax.random.uniform(ks[4], (in_size, in_size), jnp.float32, -ka, ka)
        p["wah"] = jax.random.uniform(ks[5], (hidden_size, in_size), jnp.float32, -ka, ka)
        p["ba"] = jax.random.uniform(ks[6], (1, in_size), jnp.float32, -ka, ka)
    return p


def _ref_layer(x_bsf, h0, p, atten):
    """Pure-JAX reference for one GRU_Att_Layer."""
    def step(h, xt):
        if atten:
            a = jax.nn.sigmoid(xt @ p["wax"] + h @ p["wah"] + p["ba"])
            xt = xt * a
        i_r = xt @ p["wih"][0] + p["bih"][0]; h_r = h @ p["whh"][0] + p["bhh"][0]
        i_z = xt @ p["wih"][1] + p["bih"][1]; h_z = h @ p["whh"][1] + p["bhh"][1]
        i_n = xt @ p["wih"][2] + p["bih"][2]; h_n = h @ p["whh"][2] + p["bhh"][2]
        r = jax.nn.sigmoid(i_r + h_r)
        z = jax.nn.sigmoid(i_z + h_z)
        n = jnp.tanh(i_n + r * h_n)
        h_new = (1.0 - z) * n + z * h
        return h_new, h_new
    _, outs = jax.lax.scan(step, h0, jnp.transpose(x_bsf, (1, 0, 2)))
    return jnp.transpose(outs, (1, 0, 2))


def _ref_forward(inputs, hidden, batch_idx, layer_params, atten):
    x = inputs
    next_hidden = []
    for i, p in enumerate(layer_params):
        x = _ref_layer(x, hidden[i], p, atten[i])
        next_hidden.append(
            jnp.squeeze(jnp.take_along_axis(x, batch_idx, axis=1), axis=1))
    return next_hidden[-1], jnp.stack(next_hidden, axis=0)


if __name__ == "__main__":
    B, S, I, H = 4, 8, 16, 32
    num_layers = 3
    atten = (True, False, True)

    root = jax.random.PRNGKey(0)
    k_in, k_hid, *k_layers = jax.random.split(root, 2 + num_layers)

    inputs = jax.random.normal(k_in, (B, S, I), jnp.float32)
    hidden = jax.random.normal(k_hid, (num_layers, B, H), jnp.float32)
    # gather(dim=1) indices: last valid timestep per batch element
    lengths = jnp.array([S, S - 1, S, 5], dtype=jnp.int32)
    batch_idx = jnp.broadcast_to((lengths - 1)[:, None, None], (B, 1, H)).astype(jnp.int32)

    sizes = [I] + [H] * (num_layers - 1)
    layer_params = [init_layer_params(k_layers[i], sizes[i], H, atten[i])
                    for i in range(num_layers)]

    # One-time, load-time weight fusion / lane padding (outside the jitted fwd).
    prep_params = prepare_gru_att_params(layer_params, atten, H)
    prep_params = jax.tree_util.tree_map(jax.block_until_ready, prep_params)

    fwd = jax.jit(gru_att_layers_forward, static_argnames=("atten",))
    out, next_hidden = fwd(inputs, hidden, batch_idx, prep_params, atten=atten)
    out = jax.block_until_ready(out)
    next_hidden = jax.block_until_ready(next_hidden)

    ref_out, ref_nh = _ref_forward(inputs, hidden, batch_idx, layer_params, list(atten))
    np.testing.assert_allclose(np.asarray(out), np.asarray(ref_out),
                               rtol=1e-4, atol=1e-4)
    np.testing.assert_allclose(np.asarray(next_hidden), np.asarray(ref_nh),
                               rtol=1e-4, atol=1e-4)
    assert out.shape == (B, H) and next_hidden.shape == (num_layers, B, H)

    print("KERNEL_OK")
</pallas_src>

<mosaic_0001>
module attributes {stable_mosaic.version = 11 : i64} {
  func.func @_fused_gru_att_kernel(%arg0: memref<8x4x16xf32, #tpu.memory_space<vmem>>, %arg1: memref<3x4x32xf32, #tpu.memory_space<vmem>>, %arg2: memref<4x1xi32, #tpu.memory_space<vmem>>, %arg3: memref<16x16xf32, #tpu.memory_space<vmem>>, %arg4: memref<1x16xf32, #tpu.memory_space<vmem>>, %arg5: memref<32x512xf32, #tpu.memory_space<vmem>>, %arg6: memref<16x384xf32, #tpu.memory_space<vmem>>, %arg7: memref<1x384xf32, #tpu.memory_space<vmem>>, %arg8: memref<1x384xf32, #tpu.memory_space<vmem>>, %arg9: memref<32x384xf32, #tpu.memory_space<vmem>>, %arg10: memref<1x384xf32, #tpu.memory_space<vmem>>, %arg11: memref<32x384xf32, #tpu.memory_space<vmem>>, %arg12: memref<1x384xf32, #tpu.memory_space<vmem>>, %arg13: memref<32x32xf32, #tpu.memory_space<vmem>>, %arg14: memref<1x32xf32, #tpu.memory_space<vmem>>, %arg15: memref<32x512xf32, #tpu.memory_space<vmem>>, %arg16: memref<32x384xf32, #tpu.memory_space<vmem>>, %arg17: memref<1x384xf32, #tpu.memory_space<vmem>>, %arg18: memref<1x384xf32, #tpu.memory_space<vmem>>, %arg19: memref<3x4x32xf32, #tpu.memory_space<vmem>>) attributes {dimension_semantics = [], scalar_prefetch = 0 : i64, scratch_operands = 0 : i64, tpu.core_type = #tpu.core_type<tc>} {
    %c0 = arith.constant 0 : index
    %c0_0 = arith.constant 0 : index
    %0 = vector.load %arg2[%c0, %c0_0] : memref<4x1xi32, #tpu.memory_space<vmem>>, vector<4x1xi32>
    %c0_1 = arith.constant 0 : index
    %c0_2 = arith.constant 0 : index
    %c0_3 = arith.constant 0 : index
    %1 = vector.load %arg0[%c0_1, %c0_2, %c0_3] : memref<8x4x16xf32, #tpu.memory_space<vmem>>, vector<1x4x16xf32>
    %2 = vector.shape_cast %1 : vector<1x4x16xf32> to vector<4x16xf32>
    %c1 = arith.constant 1 : index
    %c0_4 = arith.constant 0 : index
    %c0_5 = arith.constant 0 : index
    %3 = vector.load %arg0[%c1, %c0_4, %c0_5] : memref<8x4x16xf32, #tpu.memory_space<vmem>>, vector<1x4x16xf32>
    %4 = vector.shape_cast %3 : vector<1x4x16xf32> to vector<4x16xf32>
    %c2 = arith.constant 2 : index
    %c0_6 = arith.constant 0 : index
    %c0_7 = arith.constant 0 : index
    %5 = vector.load %arg0[%c2, %c0_6, %c0_7] : memref<8x4x16xf32, #tpu.memory_space<vmem>>, vector<1x4x16xf32>
    %6 = vector.shape_cast %5 : vector<1x4x16xf32> to vector<4x16xf32>
    %c3 = arith.constant 3 : index
    %c0_8 = arith.constant 0 : index
    %c0_9 = arith.constant 0 : index
    %7 = vector.load %arg0[%c3, %c0_8, %c0_9] : memref<8x4x16xf32, #tpu.memory_space<vmem>>, vector<1x4x16xf32>
    %8 = vector.shape_cast %7 : vector<1x4x16xf32> to vector<4x16xf32>
    %c4 = arith.constant 4 : index
    %c0_10 = arith.constant 0 : index
    %c0_11 = arith.constant 0 : index
    %9 = vector.load %arg0[%c4, %c0_10, %c0_11] : memref<8x4x16xf32, #tpu.memory_space<vmem>>, vector<1x4x16xf32>
    %10 = vector.shape_cast %9 : vector<1x4x16xf32> to vector<4x16xf32>
    %c5 = arith.constant 5 : index
    %c0_12 = arith.constant 0 : index
    %c0_13 = arith.constant 0 : index
    %11 = vector.load %arg0[%c5, %c0_12, %c0_13] : memref<8x4x16xf32, #tpu.memory_space<vmem>>, vector<1x4x16xf32>
    %12 = vector.shape_cast %11 : vector<1x4x16xf32> to vector<4x16xf32>
    %c6 = arith.constant 6 : index
    %c0_14 = arith.constant 0 : index
    %c0_15 = arith.constant 0 : index
    %13 = vector.load %arg0[%c6, %c0_14, %c0_15] : memref<8x4x16xf32, #tpu.memory_space<vmem>>, vector<1x4x16xf32>
    %14 = vector.shape_cast %13 : vector<1x4x16xf32> to vector<4x16xf32>
    %c7 = arith.constant 7 : index
    %c0_16 = arith.constant 0 : index
    %c0_17 = arith.constant 0 : index
    %15 = vector.load %arg0[%c7, %c0_16, %c0_17] : memref<8x4x16xf32, #tpu.memory_space<vmem>>, vector<1x4x16xf32>
    %16 = vector.shape_cast %15 : vector<1x4x16xf32> to vector<4x16xf32>
    %c0_18 = arith.constant 0 : index
    %c0_19 = arith.constant 0 : index
    %17 = vector.load %arg6[%c0_18, %c0_19] : memref<16x384xf32, #tpu.memory_space<vmem>>, vector<16x384xf32>
    %c0_20 = arith.constant 0 : index
    %c0_21 = arith.constant 0 : index
    %18 = vector.load %arg7[%c0_20, %c0_21] : memref<1x384xf32, #tpu.memory_space<vmem>>, vector<1x384xf32>
    %c0_22 = arith.constant 0 : index
    %c0_23 = arith.constant 0 : index
    %19 = vector.load %arg8[%c0_22, %c0_23] : memref<1x384xf32, #tpu.memory_space<vmem>>, vector<1x384xf32>
    %c0_24 = arith.constant 0 : index
    %c0_25 = arith.constant 0 : index
    %20 = vector.load %arg3[%c0_24, %c0_25] : memref<16x16xf32, #tpu.memory_space<vmem>>, vector<16x16xf32>
    %c0_26 = arith.constant 0 : index
    %c0_27 = arith.constant 0 : index
    %21 = vector.load %arg4[%c0_26, %c0_27] : memref<1x16xf32, #tpu.memory_space<vmem>>, vector<1x16xf32>
    %c0_28 = arith.constant 0 : index
    %c0_29 = arith.constant 0 : index
    %22 = vector.load %arg5[%c0_28, %c0_29] : memref<32x512xf32, #tpu.memory_space<vmem>>, vector<32x512xf32>
    %cst = arith.constant dense<0.000000e+00> : vector<4x16xf32>
    %23 = tpu.matmul %2, %20, %cst {dimension_numbers = #tpu.dot_dimension_numbers<[1], [0], [0], [1], [0, 0, 1, 1], [], []>} : vector<4x16xf32>, vector<16x16xf32>, vector<4x16xf32> -> vector<4x16xf32>
    %24 = vector.broadcast %21 : vector<1x16xf32> to vector<4x16xf32>
    %25 = arith.addf %23, %24 : vector<4x16xf32>
    %cst_30 = arith.constant dense<0.000000e+00> : vector<4x16xf32>
    %26 = tpu.matmul %4, %20, %cst_30 {dimension_numbers = #tpu.dot_dimension_numbers<[1], [0], [0], [1], [0, 0, 1, 1], [], []>} : vector<4x16xf32>, vector<16x16xf32>, vector<4x16xf32> -> vector<4x16xf32>
    %27 = vector.broadcast %21 : vector<1x16xf32> to vector<4x16xf32>
    %28 = arith.addf %26, %27 : vector<4x16xf32>
    %cst_31 = arith.constant dense<0.000000e+00> : vector<4x16xf32>
    %29 = tpu.matmul %6, %20, %cst_31 {dimension_numbers = #tpu.dot_dimension_numbers<[1], [0], [0], [1], [0, 0, 1, 1], [], []>} : vector<4x16xf32>, vector<16x16xf32>, vector<4x16xf32> -> vector<4x16xf32>
    %30 = vector.broadcast %21 : vector<1x16xf32> to vector<4x16xf32>
    %31 = arith.addf %29, %30 : vector<4x16xf32>
    %cst_32 = arith.constant dense<0.000000e+00> : vector<4x16xf32>
    %32 = tpu.matmul %8, %20, %cst_32 {dimension_numbers = #tpu.dot_dimension_numbers<[1], [0], [0], [1], [0, 0, 1, 1], [], []>} : vector<4x16xf32>, vector<16x16xf32>, vector<4x16xf32> -> vector<4x16xf32>
    %33 = vector.broadcast %21 : vector<1x16xf32> to vector<4x16xf32>
    %34 = arith.addf %32, %33 : vector<4x16xf32>
    %cst_33 = arith.constant dense<0.000000e+00> : vector<4x16xf32>
    %35 = tpu.matmul %10, %20, %cst_33 {dimension_numbers = #tpu.dot_dimension_numbers<[1], [0], [0], [1], [0, 0, 1, 1], [], []>} : vector<4x16xf32>, vector<16x16xf32>, vector<4x16xf32> -> vector<4x16xf32>
    %36 = vector.broadcast %21 : vector<1x16xf32> to vector<4x16xf32>
    %37 = arith.addf %35, %36 : vector<4x16xf32>
    %cst_34 = arith.constant dense<0.000000e+00> : vector<4x16xf32>
    %38 = tpu.matmul %12, %20, %cst_34 {dimension_numbers = #tpu.dot_dimension_numbers<[1], [0], [0], [1], [0, 0, 1, 1], [], []>} : vector<4x16xf32>, vector<16x16xf32>, vector<4x16xf32> -> vector<4x16xf32>
    %39 = vector.broadcast %21 : vector<1x16xf32> to vector<4x16xf32>
    %40 = arith.addf %38, %39 : vector<4x16xf32>
    %cst_35 = arith.constant dense<0.000000e+00> : vector<4x16xf32>
    %41 = tpu.matmul %14, %20, %cst_35 {dimension_numbers = #tpu.dot_dimension_numbers<[1], [0], [0], [1], [0, 0, 1, 1], [], []>} : vector<4x16xf32>, vector<16x16xf32>, vector<4x16xf32> -> vector<4x16xf32>
    %42 = vector.broadcast %21 : vector<1x16xf32> to vector<4x16xf32>
    %43 = arith.addf %41, %42 : vector<4x16xf32>
    %cst_36 = arith.constant dense<0.000000e+00> : vector<4x16xf32>
    %44 = tpu.matmul %16, %20, %cst_36 {dimension_numbers = #tpu.dot_dimension_numbers<[1], [0], [0], [1], [0, 0, 1, 1], [], []>} : vector<4x16xf32>, vector<16x16xf32>, vector<4x16xf32> -> vector<4x16xf32>
    %45 = vector.broadcast %21 : vector<1x16xf32> to vector<4x16xf32>
    %46 = arith.addf %44, %45 : vector<4x16xf32>
    %c0_37 = arith.constant 0 : index
    %c0_38 = arith.constant 0 : index
    %c0_39 = arith.constant 0 : index
    %47 = vector.load %arg1[%c0_37, %c0_38, %c0_39] : memref<3x4x32xf32, #tpu.memory_space<vmem>>, vector<1x4x32xf32>
    %48 = vector.shape_cast %47 : vector<1x4x32xf32> to vector<4x32xf32>
    %cst_40 = arith.constant 0.000000e+00 : f32
    %49 = vector.broadcast %cst_40 : f32 to vector<4x32xf32>
    %cst_41 = arith.constant dense<0.000000e+00> : vector<4x512xf32>
    %50 = tpu.matmul %48, %22, %cst_41 {dimension_numbers = #tpu.dot_dimension_numbers<[1], [0], [0], [1], [0, 0, 1, 1], [], []>} : vector<4x32xf32>, vector<32x512xf32>, vector<4x512xf32> -> vector<4x512xf32>
    %51 = vector.extract_strided_slice %50 {offsets = [0, 0], sizes = [4, 16], strides = [1, 1]} : vector<4x512xf32> to vector<4x16xf32>
    %52 = arith.addf %25, %51 : vector<4x16xf32>
    %53 = arith.negf %52 : vector<4x16xf32>
    %54 = math.exp %53 : vector<4x16xf32>
    %cst_42 = arith.constant 1.000000e+00 : f32
    %55 = vector.broadcast %cst_42 : f32 to vector<4x16xf32>
    %56 = arith.addf %55, %54 : vector<4x16xf32>
    %57 = arith.divf %55, %56 : vector<4x16xf32>
    %58 = arith.mulf %2, %57 : vector<4x16xf32>
    %cst_43 = arith.constant dense<0.000000e+00> : vector<4x384xf32>
    %59 = tpu.matmul %58, %17, %cst_43 {dimension_numbers = #tpu.dot_dimension_numbers<[1], [0], [0], [1], [0, 0, 1, 1], [], []>} : vector<4x16xf32>, vector<16x384xf32>, vector<4x384xf32> -> vector<4x384xf32>
    %60 = vector.broadcast %18 : vector<1x384xf32> to vector<4x384xf32>
    %61 = arith.addf %59, %60 : vector<4x384xf32>
    %62 = vector.extract_strided_slice %50 {offsets = [0, 128], sizes = [4, 384], strides = [1, 1]} : vector<4x512xf32> to vector<4x384xf32>
    %63 = vector.broadcast %19 : vector<1x384xf32> to vector<4x384xf32>
    %64 = arith.addf %62, %63 : vector<4x384xf32>
    %65 = vector.extract_strided_slice %61 {offsets = [0, 0], sizes = [4, 32], strides = [1, 1]} : vector<4x384xf32> to vector<4x32xf32>
    %66 = vector.extract_strided_slice %64 {offsets = [0, 0], sizes = [4, 32], strides = [1, 1]} : vector<4x384xf32> to vector<4x32xf32>
    %67 = arith.addf %65, %66 : vector<4x32xf32>
    %68 = arith.negf %67 : vector<4x32xf32>
    %69 = math.exp %68 : vector<4x32xf32>
    %cst_44 = arith.constant 1.000000e+00 : f32
    %70 = vector.broadcast %cst_44 : f32 to vector<4x32xf32>
    %71 = arith.addf %70, %69 : vector<4x32xf32>
    %72 = arith.divf %70, %71 : vector<4x32xf32>
    %73 = vector.extract_strided_slice %61 {offsets = [0, 128], sizes = [4, 32], strides = [1, 1]} : vector<4x384xf32> to vector<4x32xf32>
    %74 = vector.extract_strided_slice %64 {offsets = [0, 128], sizes = [4, 32], strides = [1, 1]} : vector<4x384xf32> to vector<4x32xf32>
    %75 = arith.addf %73, %74 : vector<4x32xf32>
    %76 = arith.negf %75 : vector<4x32xf32>
    %77 = math.exp %76 : vector<4x32xf32>
    %cst_45 = arith.constant 1.000000e+00 : f32
    %78 = vector.broadcast %cst_45 : f32 to vector<4x32xf32>
    %79 = arith.addf %78, %77 : vector<4x32xf32>
    %80 = arith.divf %78, %79 : vector<4x32xf32>
    %81 = vector.extract_strided_slice %61 {offsets = [0, 256], sizes = [4, 32], strides = [1, 1]} : vector<4x384xf32> to vector<4x32xf32>
    %82 = vector.extract_strided_slice %64 {offsets = [0, 256], sizes = [4, 32], strides = [1, 1]} : vector<4x384xf32> to vector<4x32xf32>
    %83 = arith.mulf %72, %82 : vector<4x32xf32>
    %84 = arith.addf %81, %83 : vector<4x32xf32>
    %85 = math.tanh %84 : vector<4x32xf32>
    %cst_46 = arith.constant 1.000000e+00 : f32
    %86 = vector.broadcast %cst_46 : f32 to vector<4x32xf32>
    %87 = arith.subf %86, %80 : vector<4x32xf32>
    %88 = arith.mulf %87, %85 : vector<4x32xf32>
    %89 = arith.mulf %80, %48 : vector<4x32xf32>
    %90 = arith.addf %88, %89 : vector<4x32xf32>
    %c0_i32 = arith.constant 0 : i32
    %91 = vector.broadcast %c0_i32 : i32 to vector<4x1xi32>
    %92 = arith.cmpi eq, %0, %91 : vector<4x1xi32>
    %93 = vector.shape_cast %92 : vector<4x1xi1> to vector<4x1xi1>
    %94 = vector.broadcast %93 : vector<4x1xi1> to vector<4x32xi1>
    %95 = arith.select %94, %90, %49 : vector<4x32xi1>, vector<4x32xf32>
    %cst_47 = arith.constant dense<0.000000e+00> : vector<4x512xf32>
    %96 = tpu.matmul %90, %22, %cst_47 {dimension_numbers = #tpu.dot_dimension_numbers<[1], [0], [0], [1], [0, 0, 1, 1], [], []>} : vector<4x32xf32>, vector<32x512xf32>, vector<4x512xf32> -> vector<4x512xf32>
    %97 = vector.extract_strided_slice %96 {offsets = [0, 0], sizes = [4, 16], strides = [1, 1]} : vector<4x512xf32> to vector<4x16xf32>
    %98 = arith.addf %28, %97 : vector<4x16xf32>
    %99 = arith.negf %98 : vector<4x16xf32>
    %100 = math.exp %99 : vector<4x16xf32>
    %cst_48 = arith.constant 1.000000e+00 : f32
    %101 = vector.broadcast %cst_48 : f32 to vector<4x16xf32>
    %102 = arith.addf %101, %100 : vector<4x16xf32>
    %103 = arith.divf %101, %102 : vector<4x16xf32>
    %104 = arith.mulf %4, %103 : vector<4x16xf32>
    %cst_49 = arith.constant dense<0.000000e+00> : vector<4x384xf32>
    %105 = tpu.matmul %104, %17, %cst_49 {dimension_numbers = #tpu.dot_dimension_numbers<[1], [0], [0], [1], [0, 0, 1, 1], [], []>} : vector<4x16xf32>, vector<16x384xf32>, vector<4x384xf32> -> vector<4x384xf32>
    %106 = vector.broadcast %18 : vector<1x384xf32> to vector<4x384xf32>
    %107 = arith.addf %105, %106 : vector<4x384xf32>
    %108 = vector.extract_strided_slice %96 {offsets = [0, 128], sizes = [4, 384], strides = [1, 1]} : vector<4x512xf32> to vector<4x384xf32>
    %109 = vector.broadcast %19 : vector<1x384xf32> to vector<4x384xf32>
    %110 = arith.addf %108, %109 : vector<4x384xf32>
    %111 = vector.extract_strided_slice %107 {offsets = [0, 0], sizes = [4, 32], strides = [1, 1]} : vector<4x384xf32> to vector<4x32xf32>
    %112 = vector.extract_strided_slice %110 {offsets = [0, 0], sizes = [4, 32], strides = [1, 1]} : vector<4x384xf32> to vector<4x32xf32>
    %113 = arith.addf %111, %112 : vector<4x32xf32>
    %114 = arith.negf %113 : vector<4x32xf32>
    %115 = math.exp %114 : vector<4x32xf32>
    %cst_50 = arith.constant 1.000000e+00 : f32
    %116 = vector.broadcast %cst_50 : f32 to vector<4x32xf32>
    %117 = arith.addf %116, %115 : vector<4x32xf32>
    %118 = arith.divf %116, %117 : vector<4x32xf32>
    %119 = vector.extract_strided_slice %107 {offsets = [0, 128], sizes = [4, 32], strides = [1, 1]} : vector<4x384xf32> to vector<4x32xf32>
    %120 = vector.extract_strided_slice %110 {offsets = [0, 128], sizes = [4, 32], strides = [1, 1]} : vector<4x384xf32> to vector<4x32xf32>
    %121 = arith.addf %119, %120 : vector<4x32xf32>
    %122 = arith.negf %121 : vector<4x32xf32>
    %123 = math.exp %122 : vector<4x32xf32>
    %cst_51 = arith.constant 1.000000e+00 : f32
    %124 = vector.broadcast %cst_51 : f32 to vector<4x32xf32>
    %125 = arith.addf %124, %123 : vector<4x32xf32>
    %126 = arith.divf %124, %125 : vector<4x32xf32>
    %127 = vector.extract_strided_slice %107 {offsets = [0, 256], sizes = [4, 32], strides = [1, 1]} : vector<4x384xf32> to vector<4x32xf32>
    %128 = vector.extract_strided_slice %110 {offsets = [0, 256], sizes = [4, 32], strides = [1, 1]} : vector<4x384xf32> to vector<4x32xf32>
    %129 = arith.mulf %118, %128 : vector<4x32xf32>
    %130 = arith.addf %127, %129 : vector<4x32xf32>
    %131 = math.tanh %130 : vector<4x32xf32>
    %cst_52 = arith.constant 1.000000e+00 : f32
    %132 = vector.broadcast %cst_52 : f32 to vector<4x32xf32>
    %133 = arith.subf %132, %126 : vector<4x32xf32>
    %134 = arith.mulf %133, %131 : vector<4x32xf32>
    %135 = arith.mulf %126, %90 : vector<4x32xf32>
    %136 = arith.addf %134, %135 : vector<4x32xf32>
    %c1_i32 = arith.constant 1 : i32
    %137 = vector.broadcast %c1_i32 : i32 to vector<4x1xi32>
    %138 = arith.cmpi eq, %0, %137 : vector<4x1xi32>
    %139 = vector.shape_cast %138 : vector<4x1xi1> to vector<4x1xi1>
    %140 = vector.broadcast %139 : vector<4x1xi1> to vector<4x32xi1>
    %141 = arith.select %140, %136, %95 : vector<4x32xi1>, vector<4x32xf32>
    %cst_53 = arith.constant dense<0.000000e+00> : vector<4x512xf32>
    %142 = tpu.matmul %136, %22, %cst_53 {dimension_numbers = #tpu.dot_dimension_numbers<[1], [0], [0], [1], [0, 0, 1, 1], [], []>} : vector<4x32xf32>, vector<32x512xf32>, vector<4x512xf32> -> vector<4x512xf32>
    %143 = vector.extract_strided_slice %142 {offsets = [0, 0], sizes = [4, 16], strides = [1, 1]} : vector<4x512xf32> to vector<4x16xf32>
    %144 = arith.addf %31, %143 : vector<4x16xf32>
    %145 = arith.negf %144 : vector<4x16xf32>
    %146 = math.exp %145 : vector<4x16xf32>
    %cst_54 = arith.constant 1.000000e+00 : f32
    %147 = vector.broadcast %cst_54 : f32 to vector<4x16xf32>
    %148 = arith.addf %147, %146 : vector<4x16xf32>
    %149 = arith.divf %147, %148 : vector<4x16xf32>
    %150 = arith.mulf %6, %149 : vector<4x16xf32>
    %cst_55 = arith.constant dense<0.000000e+00> : vector<4x384xf32>
    %151 = tpu.matmul %150, %17, %cst_55 {dimension_numbers = #tpu.dot_dimension_numbers<[1], [0], [0], [1], [0, 0, 1, 1], [], []>} : vector<4x16xf32>, vector<16x384xf32>, vector<4x384xf32> -> vector<4x384xf32>
    %152 = vector.broadcast %18 : vector<1x384xf32> to vector<4x384xf32>
    %153 = arith.addf %151, %152 : vector<4x384xf32>
    %154 = vector.extract_strided_slice %142 {offsets = [0, 128], sizes = [4, 384], strides = [1, 1]} : vector<4x512xf32> to vector<4x384xf32>
    %155 = vector.broadcast %19 : vector<1x384xf32> to vector<4x384xf32>
    %156 = arith.addf %154, %155 : vector<4x384xf32>
    %157 = vector.extract_strided_slice %153 {offsets = [0, 0], sizes = [4, 32], strides = [1, 1]} : vector<4x384xf32> to vector<4x32xf32>
    %158 = vector.extract_strided_slice %156 {offsets = [0, 0], sizes = [4, 32], strides = [1, 1]} : vector<4x384xf32> to vector<4x32xf32>
    %159 = arith.addf %157, %158 : vector<4x32xf32>
    %160 = arith.negf %159 : vector<4x32xf32>
    %161 = math.exp %160 : vector<4x32xf32>
    %cst_56 = arith.constant 1.000000e+00 : f32
    %162 = vector.broadcast %cst_56 : f32 to vector<4x32xf32>
    %163 = arith.addf %162, %161 : vector<4x32xf32>
    %164 = arith.divf %162, %163 : vector<4x32xf32>
    %165 = vector.extract_strided_slice %153 {offsets = [0, 128], sizes = [4, 32], strides = [1, 1]} : vector<4x384xf32> to vector<4x32xf32>
    %166 = vector.extract_strided_slice %156 {offsets = [0, 128], sizes = [4, 32], strides = [1, 1]} : vector<4x384xf32> to vector<4x32xf32>
    %167 = arith.addf %165, %166 : vector<4x32xf32>
    %168 = arith.negf %167 : vector<4x32xf32>
    %169 = math.exp %168 : vector<4x32xf32>
    %cst_57 = arith.constant 1.000000e+00 : f32
    %170 = vector.broadcast %cst_57 : f32 to vector<4x32xf32>
    %171 = arith.addf %170, %169 : vector<4x32xf32>
    %172 = arith.divf %170, %171 : vector<4x32xf32>
    %173 = vector.extract_strided_slice %153 {offsets = [0, 256], sizes = [4, 32], strides = [1, 1]} : vector<4x384xf32> to vector<4x32xf32>
    %174 = vector.extract_strided_slice %156 {offsets = [0, 256], sizes = [4, 32], strides = [1, 1]} : vector<4x384xf32> to vector<4x32xf32>
    %175 = arith.mulf %164, %174 : vector<4x32xf32>
    %176 = arith.addf %173, %175 : vector<4x32xf32>
    %177 = math.tanh %176 : vector<4x32xf32>
    %cst_58 = arith.constant 1.000000e+00 : f32
    %178 = vector.broadcast %cst_58 : f32 to vector<4x32xf32>
    %179 = arith.subf %178, %172 : vector<4x32xf32>
    %180 = arith.mulf %179, %177 : vector<4x32xf32>
    %181 = arith.mulf %172, %136 : vector<4x32xf32>
    %182 = arith.addf %180, %181 : vector<4x32xf32>
    %c2_i32 = arith.constant 2 : i32
    %183 = vector.broadcast %c2_i32 : i32 to vector<4x1xi32>
    %184 = arith.cmpi eq, %0, %183 : vector<4x1xi32>
    %185 = vector.shape_cast %184 : vector<4x1xi1> to vector<4x1xi1>
    %186 = vector.broadcast %185 : vector<4x1xi1> to vector<4x32xi1>
    %187 = arith.select %186, %182, %141 : vector<4x32xi1>, vector<4x32xf32>
    %cst_59 = arith.constant dense<0.000000e+00> : vector<4x512xf32>
    %188 = tpu.matmul %182, %22, %cst_59 {dimension_numbers = #tpu.dot_dimension_numbers<[1], [0], [0], [1], [0, 0, 1, 1], [], []>} : vector<4x32xf32>, vector<32x512xf32>, vector<4x512xf32> -> vector<4x512xf32>
    %189 = vector.extract_strided_slice %188 {offsets = [0, 0], sizes = [4, 16], strides = [1, 1]} : vector<4x512xf32> to vector<4x16xf32>
    %190 = arith.addf %34, %189 : vector<4x16xf32>
    %191 = arith.negf %190 : vector<4x16xf32>
    %192 = math.exp %191 : vector<4x16xf32>
    %cst_60 = arith.constant 1.000000e+00 : f32
    %193 = vector.broadcast %cst_60 : f32 to vector<4x16xf32>
    %194 = arith.addf %193, %192 : vector<4x16xf32>
    %195 = arith.divf %193, %194 : vector<4x16xf32>
    %196 = arith.mulf %8, %195 : vector<4x16xf32>
    %cst_61 = arith.constant dense<0.000000e+00> : vector<4x384xf32>
    %197 = tpu.matmul %196, %17, %cst_61 {dimension_numbers = #tpu.dot_dimension_numbers<[1], [0], [0], [1], [0, 0, 1, 1], [], []>} : vector<4x16xf32>, vector<16x384xf32>, vector<4x384xf32> -> vector<4x384xf32>
    %198 = vector.broadcast %18 : vector<1x384xf32> to vector<4x384xf32>
    %199 = arith.addf %197, %198 : vector<4x384xf32>
    %200 = vector.extract_strided_slice %188 {offsets = [0, 128], sizes = [4, 384], strides = [1, 1]} : vector<4x512xf32> to vector<4x384xf32>
    %201 = vector.broadcast %19 : vector<1x384xf32> to vector<4x384xf32>
    %202 = arith.addf %200, %201 : vector<4x384xf32>
    %203 = vector.extract_strided_slice %199 {offsets = [0, 0], sizes = [4, 32], strides = [1, 1]} : vector<4x384xf32> to vector<4x32xf32>
    %204 = vector.extract_strided_slice %202 {offsets = [0, 0], sizes = [4, 32], strides = [1, 1]} : vector<4x384xf32> to vector<4x32xf32>
    %205 = arith.addf %203, %204 : vector<4x32xf32>
    %206 = arith.negf %205 : vector<4x32xf32>
    %207 = math.exp %206 : vector<4x32xf32>
    %cst_62 = arith.constant 1.000000e+00 : f32
    %208 = vector.broadcast %cst_62 : f32 to vector<4x32xf32>
    %209 = arith.addf %208, %207 : vector<4x32xf32>
    %210 = arith.divf %208, %209 : vector<4x32xf32>
    %211 = vector.extract_strided_slice %199 {offsets = [0, 128], sizes = [4, 32], strides = [1, 1]} : vector<4x384xf32> to vector<4x32xf32>
    %212 = vector.extract_strided_slice %202 {offsets = [0, 128], sizes = [4, 32], strides = [1, 1]} : vector<4x384xf32> to vector<4x32xf32>
    %213 = arith.addf %211, %212 : vector<4x32xf32>
    %214 = arith.negf %213 : vector<4x32xf32>
    %215 = math.exp %214 : vector<4x32xf32>
    %cst_63 = arith.constant 1.000000e+00 : f32
    %216 = vector.broadcast %cst_63 : f32 to vector<4x32xf32>
    %217 = arith.addf %216, %215 : vector<4x32xf32>
    %218 = arith.divf %216, %217 : vector<4x32xf32>
    %219 = vector.extract_strided_slice %199 {offsets = [0, 256], sizes = [4, 32], strides = [1, 1]} : vector<4x384xf32> to vector<4x32xf32>
    %220 = vector.extract_strided_slice %202 {offsets = [0, 256], sizes = [4, 32], strides = [1, 1]} : vector<4x384xf32> to vector<4x32xf32>
    %221 = arith.mulf %210, %220 : vector<4x32xf32>
    %222 = arith.addf %219, %221 : vector<4x32xf32>
    %223 = math.tanh %222 : vector<4x32xf32>
    %cst_64 = arith.constant 1.000000e+00 : f32
    %224 = vector.broadcast %cst_64 : f32 to vector<4x32xf32>
    %225 = arith.subf %224, %218 : vector<4x32xf32>
    %226 = arith.mulf %225, %223 : vector<4x32xf32>
    %227 = arith.mulf %218, %182 : vector<4x32xf32>
    %228 = arith.addf %226, %227 : vector<4x32xf32>
    %c3_i32 = arith.constant 3 : i32
    %229 = vector.broadcast %c3_i32 : i32 to vector<4x1xi32>
    %230 = arith.cmpi eq, %0, %229 : vector<4x1xi32>
    %231 = vector.shape_cast %230 : vector<4x1xi1> to vector<4x1xi1>
    %232 = vector.broadcast %231 : vector<4x1xi1> to vector<4x32xi1>
    %233 = arith.select %232, %228, %187 : vector<4x32xi1>, vector<4x32xf32>
    %cst_65 = arith.constant dense<0.000000e+00> : vector<4x512xf32>
    %234 = tpu.matmul %228, %22, %cst_65 {dimension_numbers = #tpu.dot_dimension_numbers<[1], [0], [0], [1], [0, 0, 1, 1], [], []>} : vector<4x32xf32>, vector<32x512xf32>, vector<4x512xf32> -> vector<4x512xf32>
    %235 = vector.extract_strided_slice %234 {offsets = [0, 0], sizes = [4, 16], strides = [1, 1]} : vector<4x512xf32> to vector<4x16xf32>
    %236 = arith.addf %37, %235 : vector<4x16xf32>
    %237 = arith.negf %236 : vector<4x16xf32>
    %238 = math.exp %237 : vector<4x16xf32>
    %cst_66 = arith.constant 1.000000e+00 : f32
    %239 = vector.broadcast %cst_66 : f32 to vector<4x16xf32>
    %240 = arith.addf %239, %238 : vector<4x16xf32>
    %241 = arith.divf %239, %240 : vector<4x16xf32>
    %242 = arith.mulf %10, %241 : vector<4x16xf32>
    %cst_67 = arith.constant dense<0.000000e+00> : vector<4x384xf32>
    %243 = tpu.matmul %242, %17, %cst_67 {dimension_numbers = #tpu.dot_dimension_numbers<[1], [0], [0], [1], [0, 0, 1, 1], [], []>} : vector<4x16xf32>, vector<16x384xf32>, vector<4x384xf32> -> vector<4x384xf32>
    %244 = vector.broadcast %18 : vector<1x384xf32> to vector<4x384xf32>
    %245 = arith.addf %243, %244 : vector<4x384xf32>
    %246 = vector.extract_strided_slice %234 {offsets = [0, 128], sizes = [4, 384], strides = [1, 1]} : vector<4x512xf32> to vector<4x384xf32>
    %247 = vector.broadcast %19 : vector<1x384xf32> to vector<4x384xf32>
    %248 = arith.addf %246, %247 : vector<4x384xf32>
    %249 = vector.extract_strided_slice %245 {offsets = [0, 0], sizes = [4, 32], strides = [1, 1]} : vector<4x384xf32> to vector<4x32xf32>
    %250 = vector.extract_strided_slice %248 {offsets = [0, 0], sizes = [4, 32], strides = [1, 1]} : vector<4x384xf32> to vector<4x32xf32>
    %251 = arith.addf %249, %250 : vector<4x32xf32>
    %252 = arith.negf %251 : vector<4x32xf32>
    %253 = math.exp %252 : vector<4x32xf32>
    %cst_68 = arith.constant 1.000000e+00 : f32
    %254 = vector.broadcast %cst_68 : f32 to vector<4x32xf32>
    %255 = arith.addf %254, %253 : vector<4x32xf32>
    %256 = arith.divf %254, %255 : vector<4x32xf32>
    %257 = vector.extract_strided_slice %245 {offsets = [0, 128], sizes = [4, 32], strides = [1, 1]} : vector<4x384xf32> to vector<4x32xf32>
    %258 = vector.extract_strided_slice %248 {offsets = [0, 128], sizes = [4, 32], strides = [1, 1]} : vector<4x384xf32> to vector<4x32xf32>
    %259 = arith.addf %257, %258 : vector<4x32xf32>
    %260 = arith.negf %259 : vector<4x32xf32>
    %261 = math.exp %260 : vector<4x32xf32>
    %cst_69 = arith.constant 1.000000e+00 : f32
    %262 = vector.broadcast %cst_69 : f32 to vector<4x32xf32>
    %263 = arith.addf %262, %261 : vector<4x32xf32>
    %264 = arith.divf %262, %263 : vector<4x32xf32>
    %265 = vector.extract_strided_slice %245 {offsets = [0, 256], sizes = [4, 32], strides = [1, 1]} : vector<4x384xf32> to vector<4x32xf32>
    %266 = vector.extract_strided_slice %248 {offsets = [0, 256], sizes = [4, 32], strides = [1, 1]} : vector<4x384xf32> to vector<4x32xf32>
    %267 = arith.mulf %256, %266 : vector<4x32xf32>
    %268 = arith.addf %265, %267 : vector<4x32xf32>
    %269 = math.tanh %268 : vector<4x32xf32>
    %cst_70 = arith.constant 1.000000e+00 : f32
    %270 = vector.broadcast %cst_70 : f32 to vector<4x32xf32>
    %271 = arith.subf %270, %264 : vector<4x32xf32>
    %272 = arith.mulf %271, %269 : vector<4x32xf32>
    %273 = arith.mulf %264, %228 : vector<4x32xf32>
    %274 = arith.addf %272, %273 : vector<4x32xf32>
    %c4_i32 = arith.constant 4 : i32
    %275 = vector.broadcast %c4_i32 : i32 to vector<4x1xi32>
    %276 = arith.cmpi eq, %0, %275 : vector<4x1xi32>
    %277 = vector.shape_cast %276 : vector<4x1xi1> to vector<4x1xi1>
    %278 = vector.broadcast %277 : vector<4x1xi1> to vector<4x32xi1>
    %279 = arith.select %278, %274, %233 : vector<4x32xi1>, vector<4x32xf32>
    %cst_71 = arith.constant dense<0.000000e+00> : vector<4x512xf32>
    %280 = tpu.matmul %274, %22, %cst_71 {dimension_numbers = #tpu.dot_dimension_numbers<[1], [0], [0], [1], [0, 0, 1, 1], [], []>} : vector<4x32xf32>, vector<32x512xf32>, vector<4x512xf32> -> vector<4x512xf32>
    %281 = vector.extract_strided_slice %280 {offsets = [0, 0], sizes = [4, 16], strides = [1, 1]} : vector<4x512xf32> to vector<4x16xf32>
    %282 = arith.addf %40, %281 : vector<4x16xf32>
    %283 = arith.negf %282 : vector<4x16xf32>
    %284 = math.exp %283 : vector<4x16xf32>
    %cst_72 = arith.constant 1.000000e+00 : f32
    %285 = vector.broadcast %cst_72 : f32 to vector<4x16xf32>
    %286 = arith.addf %285, %284 : vector<4x16xf32>
    %287 = arith.divf %285, %286 : vector<4x16xf32>
    %288 = arith.mulf %12, %287 : vector<4x16xf32>
    %cst_73 = arith.constant dense<0.000000e+00> : vector<4x384xf32>
    %289 = tpu.matmul %288, %17, %cst_73 {dimension_numbers = #tpu.dot_dimension_numbers<[1], [0], [0], [1], [0, 0, 1, 1], [], []>} : vector<4x16xf32>, vector<16x384xf32>, vector<4x384xf32> -> vector<4x384xf32>
    %290 = vector.broadcast %18 : vector<1x384xf32> to vector<4x384xf32>
    %291 = arith.addf %289, %290 : vector<4x384xf32>
    %292 = vector.extract_strided_slice %280 {offsets = [0, 128], sizes = [4, 384], strides = [1, 1]} : vector<4x512xf32> to vector<4x384xf32>
    %293 = vector.broadcast %19 : vector<1x384xf32> to vector<4x384xf32>
    %294 = arith.addf %292, %293 : vector<4x384xf32>
    %295 = vector.extract_strided_slice %291 {offsets = [0, 0], sizes = [4, 32], strides = [1, 1]} : vector<4x384xf32> to vector<4x32xf32>
    %296 = vector.extract_strided_slice %294 {offsets = [0, 0], sizes = [4, 32], strides = [1, 1]} : vector<4x384xf32> to vector<4x32xf32>
    %297 = arith.addf %295, %296 : vector<4x32xf32>
    %298 = arith.negf %297 : vector<4x32xf32>
    %299 = math.exp %298 : vector<4x32xf32>
    %cst_74 = arith.constant 1.000000e+00 : f32
    %300 = vector.broadcast %cst_74 : f32 to vector<4x32xf32>
    %301 = arith.addf %300, %299 : vector<4x32xf32>
    %302 = arith.divf %300, %301 : vector<4x32xf32>
    %303 = vector.extract_strided_slice %291 {offsets = [0, 128], sizes = [4, 32], strides = [1, 1]} : vector<4x384xf32> to vector<4x32xf32>
    %304 = vector.extract_strided_slice %294 {offsets = [0, 128], sizes = [4, 32], strides = [1, 1]} : vector<4x384xf32> to vector<4x32xf32>
    %305 = arith.addf %303, %304 : vector<4x32xf32>
    %306 = arith.negf %305 : vector<4x32xf32>
    %307 = math.exp %306 : vector<4x32xf32>
    %cst_75 = arith.constant 1.000000e+00 : f32
    %308 = vector.broadcast %cst_75 : f32 to vector<4x32xf32>
    %309 = arith.addf %308, %307 : vector<4x32xf32>
    %310 = arith.divf %308, %309 : vector<4x32xf32>
    %311 = vector.extract_strided_slice %291 {offsets = [0, 256], sizes = [4, 32], strides = [1, 1]} : vector<4x384xf32> to vector<4x32xf32>
    %312 = vector.extract_strided_slice %294 {offsets = [0, 256], sizes = [4, 32], strides = [1, 1]} : vector<4x384xf32> to vector<4x32xf32>
    %313 = arith.mulf %302, %312 : vector<4x32xf32>
    %314 = arith.addf %311, %313 : vector<4x32xf32>
    %315 = math.tanh %314 : vector<4x32xf32>
    %cst_76 = arith.constant 1.000000e+00 : f32
    %316 = vector.broadcast %cst_76 : f32 to vector<4x32xf32>
    %317 = arith.subf %316, %310 : vector<4x32xf32>
    %318 = arith.mulf %317, %315 : vector<4x32xf32>
    %319 = arith.mulf %310, %274 : vector<4x32xf32>
    %320 = arith.addf %318, %319 : vector<4x32xf32>
    %c5_i32 = arith.constant 5 : i32
    %321 = vector.broadcast %c5_i32 : i32 to vector<4x1xi32>
    %322 = arith.cmpi eq, %0, %321 : vector<4x1xi32>
    %323 = vector.shape_cast %322 : vector<4x1xi1> to vector<4x1xi1>
    %324 = vector.broadcast %323 : vector<4x1xi1> to vector<4x32xi1>
    %325 = arith.select %324, %320, %279 : vector<4x32xi1>, vector<4x32xf32>
    %cst_77 = arith.constant dense<0.000000e+00> : vector<4x512xf32>
    %326 = tpu.matmul %320, %22, %cst_77 {dimension_numbers = #tpu.dot_dimension_numbers<[1], [0], [0], [1], [0, 0, 1, 1], [], []>} : vector<4x32xf32>, vector<32x512xf32>, vector<4x512xf32> -> vector<4x512xf32>
    %327 = vector.extract_strided_slice %326 {offsets = [0, 0], sizes = [4, 16], strides = [1, 1]} : vector<4x512xf32> to vector<4x16xf32>
    %328 = arith.addf %43, %327 : vector<4x16xf32>
    %329 = arith.negf %328 : vector<4x16xf32>
    %330 = math.exp %329 : vector<4x16xf32>
    %cst_78 = arith.constant 1.000000e+00 : f32
    %331 = vector.broadcast %cst_78 : f32 to vector<4x16xf32>
    %332 = arith.addf %331, %330 : vector<4x16xf32>
    %333 = arith.divf %331, %332 : vector<4x16xf32>
    %334 = arith.mulf %14, %333 : vector<4x16xf32>
    %cst_79 = arith.constant dense<0.000000e+00> : vector<4x384xf32>
    %335 = tpu.matmul %334, %17, %cst_79 {dimension_numbers = #tpu.dot_dimension_numbers<[1], [0], [0], [1], [0, 0, 1, 1], [], []>} : vector<4x16xf32>, vector<16x384xf32>, vector<4x384xf32> -> vector<4x384xf32>
    %336 = vector.broadcast %18 : vector<1x384xf32> to vector<4x384xf32>
    %337 = arith.addf %335, %336 : vector<4x384xf32>
    %338 = vector.extract_strided_slice %326 {offsets = [0, 128], sizes = [4, 384], strides = [1, 1]} : vector<4x512xf32> to vector<4x384xf32>
    %339 = vector.broadcast %19 : vector<1x384xf32> to vector<4x384xf32>
    %340 = arith.addf %338, %339 : vector<4x384xf32>
    %341 = vector.extract_strided_slice %337 {offsets = [0, 0], sizes = [4, 32], strides = [1, 1]} : vector<4x384xf32> to vector<4x32xf32>
    %342 = vector.extract_strided_slice %340 {offsets = [0, 0], sizes = [4, 32], strides = [1, 1]} : vector<4x384xf32> to vector<4x32xf32>
    %343 = arith.addf %341, %342 : vector<4x32xf32>
    %344 = arith.negf %343 : vector<4x32xf32>
    %345 = math.exp %344 : vector<4x32xf32>
    %cst_80 = arith.constant 1.000000e+00 : f32
    %346 = vector.broadcast %cst_80 : f32 to vector<4x32xf32>
    %347 = arith.addf %346, %345 : vector<4x32xf32>
    %348 = arith.divf %346, %347 : vector<4x32xf32>
    %349 = vector.extract_strided_slice %337 {offsets = [0, 128], sizes = [4, 32], strides = [1, 1]} : vector<4x384xf32> to vector<4x32xf32>
    %350 = vector.extract_strided_slice %340 {offsets = [0, 128], sizes = [4, 32], strides = [1, 1]} : vector<4x384xf32> to vector<4x32xf32>
    %351 = arith.addf %349, %350 : vector<4x32xf32>
    %352 = arith.negf %351 : vector<4x32xf32>
    %353 = math.exp %352 : vector<4x32xf32>
    %cst_81 = arith.constant 1.000000e+00 : f32
    %354 = vector.broadcast %cst_81 : f32 to vector<4x32xf32>
    %355 = arith.addf %354, %353 : vector<4x32xf32>
    %356 = arith.divf %354, %355 : vector<4x32xf32>
    %357 = vector.extract_strided_slice %337 {offsets = [0, 256], sizes = [4, 32], strides = [1, 1]} : vector<4x384xf32> to vector<4x32xf32>
    %358 = vector.extract_strided_slice %340 {offsets = [0, 256], sizes = [4, 32], strides = [1, 1]} : vector<4x384xf32> to vector<4x32xf32>
    %359 = arith.mulf %348, %358 : vector<4x32xf32>
    %360 = arith.addf %357, %359 : vector<4x32xf32>
    %361 = math.tanh %360 : vector<4x32xf32>
    %cst_82 = arith.constant 1.000000e+00 : f32
    %362 = vector.broadcast %cst_82 : f32 to vector<4x32xf32>
    %363 = arith.subf %362, %356 : vector<4x32xf32>
    %364 = arith.mulf %363, %361 : vector<4x32xf32>
    %365 = arith.mulf %356, %320 : vector<4x32xf32>
    %366 = arith.addf %364, %365 : vector<4x32xf32>
    %c6_i32 = arith.constant 6 : i32
    %367 = vector.broadcast %c6_i32 : i32 to vector<4x1xi32>
    %368 = arith.cmpi eq, %0, %367 : vector<4x1xi32>
    %369 = vector.shape_cast %368 : vector<4x1xi1> to vector<4x1xi1>
    %370 = vector.broadcast %369 : vector<4x1xi1> to vector<4x32xi1>
    %371 = arith.select %370, %366, %325 : vector<4x32xi1>, vector<4x32xf32>
    %cst_83 = arith.constant dense<0.000000e+00> : vector<4x512xf32>
    %372 = tpu.matmul %366, %22, %cst_83 {dimension_numbers = #tpu.dot_dimension_numbers<[1], [0], [0], [1], [0, 0, 1, 1], [], []>} : vector<4x32xf32>, vector<32x512xf32>, vector<4x512xf32> -> vector<4x512xf32>
    %373 = vector.extract_strided_slice %372 {offsets = [0, 0], sizes = [4, 16], strides = [1, 1]} : vector<4x512xf32> to vector<4x16xf32>
    %374 = arith.addf %46, %373 : vector<4x16xf32>
    %375 = arith.negf %374 : vector<4x16xf32>
    %376 = math.exp %375 : vector<4x16xf32>
    %cst_84 = arith.constant 1.000000e+00 : f32
    %377 = vector.broadcast %cst_84 : f32 to vector<4x16xf32>
    %378 = arith.addf %377, %376 : vector<4x16xf32>
    %379 = arith.divf %377, %378 : vector<4x16xf32>
    %380 = arith.mulf %16, %379 : vector<4x16xf32>
    %cst_85 = arith.constant dense<0.000000e+00> : vector<4x384xf32>
    %381 = tpu.matmul %380, %17, %cst_85 {dimension_numbers = #tpu.dot_dimension_numbers<[1], [0], [0], [1], [0, 0, 1, 1], [], []>} : vector<4x16xf32>, vector<16x384xf32>, vector<4x384xf32> -> vector<4x384xf32>
    %382 = vector.broadcast %18 : vector<1x384xf32> to vector<4x384xf32>
    %383 = arith.addf %381, %382 : vector<4x384xf32>
    %384 = vector.extract_strided_slice %372 {offsets = [0, 128], sizes = [4, 384], strides = [1, 1]} : vector<4x512xf32> to vector<4x384xf32>
    %385 = vector.broadcast %19 : vector<1x384xf32> to vector<4x384xf32>
    %386 = arith.addf %384, %385 : vector<4x384xf32>
    %387 = vector.extract_strided_slice %383 {offsets = [0, 0], sizes = [4, 32], strides = [1, 1]} : vector<4x384xf32> to vector<4x32xf32>
    %388 = vector.extract_strided_slice %386 {offsets = [0, 0], sizes = [4, 32], strides = [1, 1]} : vector<4x384xf32> to vector<4x32xf32>
    %389 = arith.addf %387, %388 : vector<4x32xf32>
    %390 = arith.negf %389 : vector<4x32xf32>
    %391 = math.exp %390 : vector<4x32xf32>
    %cst_86 = arith.constant 1.000000e+00 : f32
    %392 = vector.broadcast %cst_86 : f32 to vector<4x32xf32>
    %393 = arith.addf %392, %391 : vector<4x32xf32>
    %394 = arith.divf %392, %393 : vector<4x32xf32>
    %395 = vector.extract_strided_slice %383 {offsets = [0, 128], sizes = [4, 32], strides = [1, 1]} : vector<4x384xf32> to vector<4x32xf32>
    %396 = vector.extract_strided_slice %386 {offsets = [0, 128], sizes = [4, 32], strides = [1, 1]} : vector<4x384xf32> to vector<4x32xf32>
    %397 = arith.addf %395, %396 : vector<4x32xf32>
    %398 = arith.negf %397 : vector<4x32xf32>
    %399 = math.exp %398 : vector<4x32xf32>
    %cst_87 = arith.constant 1.000000e+00 : f32
    %400 = vector.broadcast %cst_87 : f32 to vector<4x32xf32>
    %401 = arith.addf %400, %399 : vector<4x32xf32>
    %402 = arith.divf %400, %401 : vector<4x32xf32>
    %403 = vector.extract_strided_slice %383 {offsets = [0, 256], sizes = [4, 32], strides = [1, 1]} : vector<4x384xf32> to vector<4x32xf32>
    %404 = vector.extract_strided_slice %386 {offsets = [0, 256], sizes = [4, 32], strides = [1, 1]} : vector<4x384xf32> to vector<4x32xf32>
    %405 = arith.mulf %394, %404 : vector<4x32xf32>
    %406 = arith.addf %403, %405 : vector<4x32xf32>
    %407 = math.tanh %406 : vector<4x32xf32>
    %cst_88 = arith.constant 1.000000e+00 : f32
    %408 = vector.broadcast %cst_88 : f32 to vector<4x32xf32>
    %409 = arith.subf %408, %402 : vector<4x32xf32>
    %410 = arith.mulf %409, %407 : vector<4x32xf32>
    %411 = arith.mulf %402, %366 : vector<4x32xf32>
    %412 = arith.addf %410, %411 : vector<4x32xf32>
    %c7_i32 = arith.constant 7 : i32
    %413 = vector.broadcast %c7_i32 : i32 to vector<4x1xi32>
    %414 = arith.cmpi eq, %0, %413 : vector<4x1xi32>
    %415 = vector.shape_cast %414 : vector<4x1xi1> to vector<4x1xi1>
    %416 = vector.broadcast %415 : vector<4x1xi1> to vector<4x32xi1>
    %417 = arith.select %416, %412, %371 : vector<4x32xi1>, vector<4x32xf32>
    %c0_89 = arith.constant 0 : index
    %c0_90 = arith.constant 0 : index
    %c0_91 = arith.constant 0 : index
    %418 = vector.load %arg19[%c0_89, %c0_90, %c0_91] : memref<3x4x32xf32, #tpu.memory_space<vmem>>, vector<1x4x32xf32>
    %419 = vector.shape_cast %418 : vector<1x4x32xf32> to vector<4x32xf32>
    %420 = vector.shape_cast %417 : vector<4x32xf32> to vector<1x4x32xf32>
    tpu.vector_store %arg19[%c0_89, %c0_90, %c0_91], %420 {strides = array<i32>} : memref<3x4x32xf32, #tpu.memory_space<vmem>>, vector<1x4x32xf32>,
    %c0_92 = arith.constant 0 : index
    %c0_93 = arith.constant 0 : index
    %421 = vector.load %arg9[%c0_92, %c0_93] : memref<32x384xf32, #tpu.memory_space<vmem>>, vector<32x384xf32>
    %c0_94 = arith.constant 0 : index
    %c0_95 = arith.constant 0 : index
    %422 = vector.load %arg10[%c0_94, %c0_95] : memref<1x384xf32, #tpu.memory_space<vmem>>, vector<1x384xf32>
    %c0_96 = arith.constant 0 : index
    %c0_97 = arith.constant 0 : index
    %423 = vector.load %arg12[%c0_96, %c0_97] : memref<1x384xf32, #tpu.memory_space<vmem>>, vector<1x384xf32>
    %c0_98 = arith.constant 0 : index
    %c0_99 = arith.constant 0 : index
    %424 = vector.load %arg11[%c0_98, %c0_99] : memref<32x384xf32, #tpu.memory_space<vmem>>, vector<32x384xf32>
    %cst_100 = arith.constant dense<0.000000e+00> : vector<4x384xf32>
    %425 = tpu.matmul %90, %421, %cst_100 {dimension_numbers = #tpu.dot_dimension_numbers<[1], [0], [0], [1], [0, 0, 1, 1], [], []>} : vector<4x32xf32>, vector<32x384xf32>, vector<4x384xf32> -> vector<4x384xf32>
    %426 = vector.broadcast %422 : vector<1x384xf32> to vector<4x384xf32>
    %427 = arith.addf %425, %426 : vector<4x384xf32>
    %cst_101 = arith.constant dense<0.000000e+00> : vector<4x384xf32>
    %428 = tpu.matmul %136, %421, %cst_101 {dimension_numbers = #tpu.dot_dimension_numbers<[1], [0], [0], [1], [0, 0, 1, 1], [], []>} : vector<4x32xf32>, vector<32x384xf32>, vector<4x384xf32> -> vector<4x384xf32>
    %429 = vector.broadcast %422 : vector<1x384xf32> to vector<4x384xf32>
    %430 = arith.addf %428, %429 : vector<4x384xf32>
    %cst_102 = arith.constant dense<0.000000e+00> : vector<4x384xf32>
    %431 = tpu.matmul %182, %421, %cst_102 {dimension_numbers = #tpu.dot_dimension_numbers<[1], [0], [0], [1], [0, 0, 1, 1], [], []>} : vector<4x32xf32>, vector<32x384xf32>, vector<4x384xf32> -> vector<4x384xf32>
    %432 = vector.broadcast %422 : vector<1x384xf32> to vector<4x384xf32>
    %433 = arith.addf %431, %432 : vector<4x384xf32>
    %cst_103 = arith.constant dense<0.000000e+00> : vector<4x384xf32>
    %434 = tpu.matmul %228, %421, %cst_103 {dimension_numbers = #tpu.dot_dimension_numbers<[1], [0], [0], [1], [0, 0, 1, 1], [], []>} : vector<4x32xf32>, vector<32x384xf32>, vector<4x384xf32> -> vector<4x384xf32>
    %435 = vector.broadcast %422 : vector<1x384xf32> to vector<4x384xf32>
    %436 = arith.addf %434, %435 : vector<4x384xf32>
    %cst_104 = arith.constant dense<0.000000e+00> : vector<4x384xf32>
    %437 = tpu.matmul %274, %421, %cst_104 {dimension_numbers = #tpu.dot_dimension_numbers<[1], [0], [0], [1], [0, 0, 1, 1], [], []>} : vector<4x32xf32>, vector<32x384xf32>, vector<4x384xf32> -> vector<4x384xf32>
    %438 = vector.broadcast %422 : vector<1x384xf32> to vector<4x384xf32>
    %439 = arith.addf %437, %438 : vector<4x384xf32>
    %cst_105 = arith.constant dense<0.000000e+00> : vector<4x384xf32>
    %440 = tpu.matmul %320, %421, %cst_105 {dimension_numbers = #tpu.dot_dimension_numbers<[1], [0], [0], [1], [0, 0, 1, 1], [], []>} : vector<4x32xf32>, vector<32x384xf32>, vector<4x384xf32> -> vector<4x384xf32>
    %441 = vector.broadcast %422 : vector<1x384xf32> to vector<4x384xf32>
    %442 = arith.addf %440, %441 : vector<4x384xf32>
    %cst_106 = arith.constant dense<0.000000e+00> : vector<4x384xf32>
    %443 = tpu.matmul %366, %421, %cst_106 {dimension_numbers = #tpu.dot_dimension_numbers<[1], [0], [0], [1], [0, 0, 1, 1], [], []>} : vector<4x32xf32>, vector<32x384xf32>, vector<4x384xf32> -> vector<4x384xf32>
    %444 = vector.broadcast %422 : vector<1x384xf32> to vector<4x384xf32>
    %445 = arith.addf %443, %444 : vector<4x384xf32>
    %cst_107 = arith.constant dense<0.000000e+00> : vector<4x384xf32>
    %446 = tpu.matmul %412, %421, %cst_107 {dimension_numbers = #tpu.dot_dimension_numbers<[1], [0], [0], [1], [0, 0, 1, 1], [], []>} : vector<4x32xf32>, vector<32x384xf32>, vector<4x384xf32> -> vector<4x384xf32>
    %447 = vector.broadcast %422 : vector<1x384xf32> to vector<4x384xf32>
    %448 = arith.addf %446, %447 : vector<4x384xf32>
    %c1_108 = arith.constant 1 : index
    %c0_109 = arith.constant 0 : index
    %c0_110 = arith.constant 0 : index
    %449 = vector.load %arg1[%c1_108, %c0_109, %c0_110] : memref<3x4x32xf32, #tpu.memory_space<vmem>>, vector<1x4x32xf32>
    %450 = vector.shape_cast %449 : vector<1x4x32xf32> to vector<4x32xf32>
    %cst_111 = arith.constant 0.000000e+00 : f32
    %451 = vector.broadcast %cst_111 : f32 to vector<4x32xf32>
    %cst_112 = arith.constant dense<0.000000e+00> : vector<4x384xf32>
    %452 = tpu.matmul %450, %424, %cst_112 {dimension_numbers = #tpu.dot_dimension_numbers<[1], [0], [0], [1], [0, 0, 1, 1], [], []>} : vector<4x32xf32>, vector<32x384xf32>, vector<4x384xf32> -> vector<4x384xf32>
    %453 = vector.broadcast %423 : vector<1x384xf32> to vector<4x384xf32>
    %454 = arith.addf %452, %453 : vector<4x384xf32>
    %455 = vector.extract_strided_slice %427 {offsets = [0, 0], sizes = [4, 32], strides = [1, 1]} : vector<4x384xf32> to vector<4x32xf32>
    %456 = vector.extract_strided_slice %454 {offsets = [0, 0], sizes = [4, 32], strides = [1, 1]} : vector<4x384xf32> to vector<4x32xf32>
    %457 = arith.addf %455, %456 : vector<4x32xf32>
    %458 = arith.negf %457 : vector<4x32xf32>
    %459 = math.exp %458 : vector<4x32xf32>
    %cst_113 = arith.constant 1.000000e+00 : f32
    %460 = vector.broadcast %cst_113 : f32 to vector<4x32xf32>
    %461 = arith.addf %460, %459 : vector<4x32xf32>
    %462 = arith.divf %460, %461 : vector<4x32xf32>
    %463 = vector.extract_strided_slice %427 {offsets = [0, 128], sizes = [4, 32], strides = [1, 1]} : vector<4x384xf32> to vector<4x32xf32>
    %464 = vector.extract_strided_slice %454 {offsets = [0, 128], sizes = [4, 32], strides = [1, 1]} : vector<4x384xf32> to vector<4x32xf32>
    %465 = arith.addf %463, %464 : vector<4x32xf32>
    %466 = arith.negf %465 : vector<4x32xf32>
    %467 = math.exp %466 : vector<4x32xf32>
    %cst_114 = arith.constant 1.000000e+00 : f32
    %468 = vector.broadcast %cst_114 : f32 to vector<4x32xf32>
    %469 = arith.addf %468, %467 : vector<4x32xf32>
    %470 = arith.divf %468, %469 : vector<4x32xf32>
    %471 = vector.extract_strided_slice %427 {offsets = [0, 256], sizes = [4, 32], strides = [1, 1]} : vector<4x384xf32> to vector<4x32xf32>
    %472 = vector.extract_strided_slice %454 {offsets = [0, 256], sizes = [4, 32], strides = [1, 1]} : vector<4x384xf32> to vector<4x32xf32>
    %473 = arith.mulf %462, %472 : vector<4x32xf32>
    %474 = arith.addf %471, %473 : vector<4x32xf32>
    %475 = math.tanh %474 : vector<4x32xf32>
    %cst_115 = arith.constant 1.000000e+00 : f32
    %476 = vector.broadcast %cst_115 : f32 to vector<4x32xf32>
    %477 = arith.subf %476, %470 : vector<4x32xf32>
    %478 = arith.mulf %477, %475 : vector<4x32xf32>
    %479 = arith.mulf %470, %450 : vector<4x32xf32>
    %480 = arith.addf %478, %479 : vector<4x32xf32>
    %c0_i32_116 = arith.constant 0 : i32
    %481 = vector.broadcast %c0_i32_116 : i32 to vector<4x1xi32>
    %482 = arith.cmpi eq, %0, %481 : vector<4x1xi32>
    %483 = vector.shape_cast %482 : vector<4x1xi1> to vector<4x1xi1>
    %484 = vector.broadcast %483 : vector<4x1xi1> to vector<4x32xi1>
    %485 = arith.select %484, %480, %451 : vector<4x32xi1>, vector<4x32xf32>
    %cst_117 = arith.constant dense<0.000000e+00> : vector<4x384xf32>
    %486 = tpu.matmul %480, %424, %cst_117 {dimension_numbers = #tpu.dot_dimension_numbers<[1], [0], [0], [1], [0, 0, 1, 1], [], []>} : vector<4x32xf32>, vector<32x384xf32>, vector<4x384xf32> -> vector<4x384xf32>
    %487 = vector.broadcast %423 : vector<1x384xf32> to vector<4x384xf32>
    %488 = arith.addf %486, %487 : vector<4x384xf32>
    %489 = vector.extract_strided_slice %430 {offsets = [0, 0], sizes = [4, 32], strides = [1, 1]} : vector<4x384xf32> to vector<4x32xf32>
    %490 = vector.extract_strided_slice %488 {offsets = [0, 0], sizes = [4, 32], strides = [1, 1]} : vector<4x384xf32> to vector<4x32xf32>
    %491 = arith.addf %489, %490 : vector<4x32xf32>
    %492 = arith.negf %491 : vector<4x32xf32>
    %493 = math.exp %492 : vector<4x32xf32>
    %cst_118 = arith.constant 1.000000e+00 : f32
    %494 = vector.broadcast %cst_118 : f32 to vector<4x32xf32>
    %495 = arith.addf %494, %493 : vector<4x32xf32>
    %496 = arith.divf %494, %495 : vector<4x32xf32>
    %497 = vector.extract_strided_slice %430 {offsets = [0, 128], sizes = [4, 32], strides = [1, 1]} : vector<4x384xf32> to vector<4x32xf32>
    %498 = vector.extract_strided_slice %488 {offsets = [0, 128], sizes = [4, 32], strides = [1, 1]} : vector<4x384xf32> to vector<4x32xf32>
    %499 = arith.addf %497, %498 : vector<4x32xf32>
    %500 = arith.negf %499 : vector<4x32xf32>
    %501 = math.exp %500 : vector<4x32xf32>
    %cst_119 = arith.constant 1.000000e+00 : f32
    %502 = vector.broadcast %cst_119 : f32 to vector<4x32xf32>
    %503 = arith.addf %502, %501 : vector<4x32xf32>
    %504 = arith.divf %502, %503 : vector<4x32xf32>
    %505 = vector.extract_strided_slice %430 {offsets = [0, 256], sizes = [4, 32], strides = [1, 1]} : vector<4x384xf32> to vector<4x32xf32>
    %506 = vector.extract_strided_slice %488 {offsets = [0, 256], sizes = [4, 32], strides = [1, 1]} : vector<4x384xf32> to vector<4x32xf32>
    %507 = arith.mulf %496, %506 : vector<4x32xf32>
    %508 = arith.addf %505, %507 : vector<4x32xf32>
    %509 = math.tanh %508 : vector<4x32xf32>
    %cst_120 = arith.constant 1.000000e+00 : f32
    %510 = vector.broadcast %cst_120 : f32 to vector<4x32xf32>
    %511 = arith.subf %510, %504 : vector<4x32xf32>
    %512 = arith.mulf %511, %509 : vector<4x32xf32>
    %513 = arith.mulf %504, %480 : vector<4x32xf32>
    %514 = arith.addf %512, %513 : vector<4x32xf32>
    %c1_i32_121 = arith.constant 1 : i32
    %515 = vector.broadcast %c1_i32_121 : i32 to vector<4x1xi32>
    %516 = arith.cmpi eq, %0, %515 : vector<4x1xi32>
    %517 = vector.shape_cast %516 : vector<4x1xi1> to vector<4x1xi1>
    %518 = vector.broadcast %517 : vector<4x1xi1> to vector<4x32xi1>
    %519 = arith.select %518, %514, %485 : vector<4x32xi1>, vector<4x32xf32>
    %cst_122 = arith.constant dense<0.000000e+00> : vector<4x384xf32>
    %520 = tpu.matmul %514, %424, %cst_122 {dimension_numbers = #tpu.dot_dimension_numbers<[1], [0], [0], [1], [0, 0, 1, 1], [], []>} : vector<4x32xf32>, vector<32x384xf32>, vector<4x384xf32> -> vector<4x384xf32>
    %521 = vector.broadcast %423 : vector<1x384xf32> to vector<4x384xf32>
    %522 = arith.addf %520, %521 : vector<4x384xf32>
    %523 = vector.extract_strided_slice %433 {offsets = [0, 0], sizes = [4, 32], strides = [1, 1]} : vector<4x384xf32> to vector<4x32xf32>
    %524 = vector.extract_strided_slice %522 {offsets = [0, 0], sizes = [4, 32], strides = [1, 1]} : vector<4x384xf32> to vector<4x32xf32>
    %525 = arith.addf %523, %524 : vector<4x32xf32>
    %526 = arith.negf %525 : vector<4x32xf32>
    %527 = math.exp %526 : vector<4x32xf32>
    %cst_123 = arith.constant 1.000000e+00 : f32
    %528 = vector.broadcast %cst_123 : f32 to vector<4x32xf32>
    %529 = arith.addf %528, %527 : vector<4x32xf32>
    %530 = arith.divf %528, %529 : vector<4x32xf32>
    %531 = vector.extract_strided_slice %433 {offsets = [0, 128], sizes = [4, 32], strides = [1, 1]} : vector<4x384xf32> to vector<4x32xf32>
    %532 = vector.extract_strided_slice %522 {offsets = [0, 128], sizes = [4, 32], strides = [1, 1]} : vector<4x384xf32> to vector<4x32xf32>
    %533 = arith.addf %531, %532 : vector<4x32xf32>
    %534 = arith.negf %533 : vector<4x32xf32>
    %535 = math.exp %534 : vector<4x32xf32>
    %cst_124 = arith.constant 1.000000e+00 : f32
    %536 = vector.broadcast %cst_124 : f32 to vector<4x32xf32>
    %537 = arith.addf %536, %535 : vector<4x32xf32>
    %538 = arith.divf %536, %537 : vector<4x32xf32>
    %539 = vector.extract_strided_slice %433 {offsets = [0, 256], sizes = [4, 32], strides = [1, 1]} : vector<4x384xf32> to vector<4x32xf32>
    %540 = vector.extract_strided_slice %522 {offsets = [0, 256], sizes = [4, 32], strides = [1, 1]} : vector<4x384xf32> to vector<4x32xf32>
    %541 = arith.mulf %530, %540 : vector<4x32xf32>
    %542 = arith.addf %539, %541 : vector<4x32xf32>
    %543 = math.tanh %542 : vector<4x32xf32>
    %cst_125 = arith.constant 1.000000e+00 : f32
    %544 = vector.broadcast %cst_125 : f32 to vector<4x32xf32>
    %545 = arith.subf %544, %538 : vector<4x32xf32>
    %546 = arith.mulf %545, %543 : vector<4x32xf32>
    %547 = arith.mulf %538, %514 : vector<4x32xf32>
    %548 = arith.addf %546, %547 : vector<4x32xf32>
    %c2_i32_126 = arith.constant 2 : i32
    %549 = vector.broadcast %c2_i32_126 : i32 to vector<4x1xi32>
    %550 = arith.cmpi eq, %0, %549 : vector<4x1xi32>
    %551 = vector.shape_cast %550 : vector<4x1xi1> to vector<4x1xi1>
    %552 = vector.broadcast %551 : vector<4x1xi1> to vector<4x32xi1>
    %553 = arith.select %552, %548, %519 : vector<4x32xi1>, vector<4x32xf32>
    %cst_127 = arith.constant dense<0.000000e+00> : vector<4x384xf32>
    %554 = tpu.matmul %548, %424, %cst_127 {dimension_numbers = #tpu.dot_dimension_numbers<[1], [0], [0], [1], [0, 0, 1, 1], [], []>} : vector<4x32xf32>, vector<32x384xf32>, vector<4x384xf32> -> vector<4x384xf32>
    %555 = vector.broadcast %423 : vector<1x384xf32> to vector<4x384xf32>
    %556 = arith.addf %554, %555 : vector<4x384xf32>
    %557 = vector.extract_strided_slice %436 {offsets = [0, 0], sizes = [4, 32], strides = [1, 1]} : vector<4x384xf32> to vector<4x32xf32>
    %558 = vector.extract_strided_slice %556 {offsets = [0, 0], sizes = [4, 32], strides = [1, 1]} : vector<4x384xf32> to vector<4x32xf32>
    %559 = arith.addf %557, %558 : vector<4x32xf32>
    %560 = arith.negf %559 : vector<4x32xf32>
    %561 = math.exp %560 : vector<4x32xf32>
    %cst_128 = arith.constant 1.000000e+00 : f32
    %562 = vector.broadcast %cst_128 : f32 to vector<4x32xf32>
    %563 = arith.addf %562, %561 : vector<4x32xf32>
    %564 = arith.divf %562, %563 : vector<4x32xf32>
    %565 = vector.extract_strided_slice %436 {offsets = [0, 128], sizes = [4, 32], strides = [1, 1]} : vector<4x384xf32> to vector<4x32xf32>
    %566 = vector.extract_strided_slice %556 {offsets = [0, 128], sizes = [4, 32], strides = [1, 1]} : vector<4x384xf32> to vector<4x32xf32>
    %567 = arith.addf %565, %566 : vector<4x32xf32>
    %568 = arith.negf %567 : vector<4x32xf32>
    %569 = math.exp %568 : vector<4x32xf32>
    %cst_129 = arith.constant 1.000000e+00 : f32
    %570 = vector.broadcast %cst_129 : f32 to vector<4x32xf32>
    %571 = arith.addf %570, %569 : vector<4x32xf32>
    %572 = arith.divf %570, %571 : vector<4x32xf32>
    %573 = vector.extract_strided_slice %436 {offsets = [0, 256], sizes = [4, 32], strides = [1, 1]} : vector<4x384xf32> to vector<4x32xf32>
    %574 = vector.extract_strided_slice %556 {offsets = [0, 256], sizes = [4, 32], strides = [1, 1]} : vector<4x384xf32> to vector<4x32xf32>
    %575 = arith.mulf %564, %574 : vector<4x32xf32>
    %576 = arith.addf %573, %575 : vector<4x32xf32>
    %577 = math.tanh %576 : vector<4x32xf32>
    %cst_130 = arith.constant 1.000000e+00 : f32
    %578 = vector.broadcast %cst_130 : f32 to vector<4x32xf32>
    %579 = arith.subf %578, %572 : vector<4x32xf32>
    %580 = arith.mulf %579, %577 : vector<4x32xf32>
    %581 = arith.mulf %572, %548 : vector<4x32xf32>
    %582 = arith.addf %580, %581 : vector<4x32xf32>
    %c3_i32_131 = arith.constant 3 : i32
    %583 = vector.broadcast %c3_i32_131 : i32 to vector<4x1xi32>
    %584 = arith.cmpi eq, %0, %583 : vector<4x1xi32>
    %585 = vector.shape_cast %584 : vector<4x1xi1> to vector<4x1xi1>
    %586 = vector.broadcast %585 : vector<4x1xi1> to vector<4x32xi1>
    %587 = arith.select %586, %582, %553 : vector<4x32xi1>, vector<4x32xf32>
    %cst_132 = arith.constant dense<0.000000e+00> : vector<4x384xf32>
    %588 = tpu.matmul %582, %424, %cst_132 {dimension_numbers = #tpu.dot_dimension_numbers<[1], [0], [0], [1], [0, 0, 1, 1], [], []>} : vector<4x32xf32>, vector<32x384xf32>, vector<4x384xf32> -> vector<4x384xf32>
    %589 = vector.broadcast %423 : vector<1x384xf32> to vector<4x384xf32>
    %590 = arith.addf %588, %589 : vector<4x384xf32>
    %591 = vector.extract_strided_slice %439 {offsets = [0, 0], sizes = [4, 32], strides = [1, 1]} : vector<4x384xf32> to vector<4x32xf32>
    %592 = vector.extract_strided_slice %590 {offsets = [0, 0], sizes = [4, 32], strides = [1, 1]} : vector<4x384xf32> to vector<4x32xf32>
    %593 = arith.addf %591, %592 : vector<4x32xf32>
    %594 = arith.negf %593 : vector<4x32xf32>
    %595 = math.exp %594 : vector<4x32xf32>
    %cst_133 = arith.constant 1.000000e+00 : f32
    %596 = vector.broadcast %cst_133 : f32 to vector<4x32xf32>
    %597 = arith.addf %596, %595 : vector<4x32xf32>
    %598 = arith.divf %596, %597 : vector<4x32xf32>
    %599 = vector.extract_strided_slice %439 {offsets = [0, 128], sizes = [4, 32], strides = [1, 1]} : vector<4x384xf32> to vector<4x32xf32>
    %600 = vector.extract_strided_slice %590 {offsets = [0, 128], sizes = [4, 32], strides = [1, 1]} : vector<4x384xf32> to vector<4x32xf32>
    %601 = arith.addf %599, %600 : vector<4x32xf32>
    %602 = arith.negf %601 : vector<4x32xf32>
    %603 = math.exp %602 : vector<4x32xf32>
    %cst_134 = arith.constant 1.000000e+00 : f32
    %604 = vector.broadcast %cst_134 : f32 to vector<4x32xf32>
    %605 = arith.addf %604, %603 : vector<4x32xf32>
    %606 = arith.divf %604, %605 : vector<4x32xf32>
    %607 = vector.extract_strided_slice %439 {offsets = [0, 256], sizes = [4, 32], strides = [1, 1]} : vector<4x384xf32> to vector<4x32xf32>
    %608 = vector.extract_strided_slice %590 {offsets = [0, 256], sizes = [4, 32], strides = [1, 1]} : vector<4x384xf32> to vector<4x32xf32>
    %609 = arith.mulf %598, %608 : vector<4x32xf32>
    %610 = arith.addf %607, %609 : vector<4x32xf32>
    %611 = math.tanh %610 : vector<4x32xf32>
    %cst_135 = arith.constant 1.000000e+00 : f32
    %612 = vector.broadcast %cst_135 : f32 to vector<4x32xf32>
    %613 = arith.subf %612, %606 : vector<4x32xf32>
    %614 = arith.mulf %613, %611 : vector<4x32xf32>
    %615 = arith.mulf %606, %582 : vector<4x32xf32>
    %616 = arith.addf %614, %615 : vector<4x32xf32>
    %c4_i32_136 = arith.constant 4 : i32
    %617 = vector.broadcast %c4_i32_136 : i32 to vector<4x1xi32>
    %618 = arith.cmpi eq, %0, %617 : vector<4x1xi32>
    %619 = vector.shape_cast %618 : vector<4x1xi1> to vector<4x1xi1>
    %620 = vector.broadcast %619 : vector<4x1xi1> to vector<4x32xi1>
    %621 = arith.select %620, %616, %587 : vector<4x32xi1>, vector<4x32xf32>
    %cst_137 = arith.constant dense<0.000000e+00> : vector<4x384xf32>
    %622 = tpu.matmul %616, %424, %cst_137 {dimension_numbers = #tpu.dot_dimension_numbers<[1], [0], [0], [1], [0, 0, 1, 1], [], []>} : vector<4x32xf32>, vector<32x384xf32>, vector<4x384xf32> -> vector<4x384xf32>
    %623 = vector.broadcast %423 : vector<1x384xf32> to vector<4x384xf32>
    %624 = arith.addf %622, %623 : vector<4x384xf32>
    %625 = vector.extract_strided_slice %442 {offsets = [0, 0], sizes = [4, 32], strides = [1, 1]} : vector<4x384xf32> to vector<4x32xf32>
    %626 = vector.extract_strided_slice %624 {offsets = [0, 0], sizes = [4, 32], strides = [1, 1]} : vector<4x384xf32> to vector<4x32xf32>
    %627 = arith.addf %625, %626 : vector<4x32xf32>
    %628 = arith.negf %627 : vector<4x32xf32>
    %629 = math.exp %628 : vector<4x32xf32>
    %cst_138 = arith.constant 1.000000e+00 : f32
    %630 = vector.broadcast %cst_138 : f32 to vector<4x32xf32>
    %631 = arith.addf %630, %629 : vector<4x32xf32>
    %632 = arith.divf %630, %631 : vector<4x32xf32>
    %633 = vector.extract_strided_slice %442 {offsets = [0, 128], sizes = [4, 32], strides = [1, 1]} : vector<4x384xf32> to vector<4x32xf32>
    %634 = vector.extract_strided_slice %624 {offsets = [0, 128], sizes = [4, 32], strides = [1, 1]} : vector<4x384xf32> to vector<4x32xf32>
    %635 = arith.addf %633, %634 : vector<4x32xf32>
    %636 = arith.negf %635 : vector<4x32xf32>
    %637 = math.exp %636 : vector<4x32xf32>
    %cst_139 = arith.constant 1.000000e+00 : f32
    %638 = vector.broadcast %cst_139 : f32 to vector<4x32xf32>
    %639 = arith.addf %638, %637 : vector<4x32xf32>
    %640 = arith.divf %638, %639 : vector<4x32xf32>
    %641 = vector.extract_strided_slice %442 {offsets = [0, 256], sizes = [4, 32], strides = [1, 1]} : vector<4x384xf32> to vector<4x32xf32>
    %642 = vector.extract_strided_slice %624 {offsets = [0, 256], sizes = [4, 32], strides = [1, 1]} : vector<4x384xf32> to vector<4x32xf32>
    %643 = arith.mulf %632, %642 : vector<4x32xf32>
    %644 = arith.addf %641, %643 : vector<4x32xf32>
    %645 = math.tanh %644 : vector<4x32xf32>
    %cst_140 = arith.constant 1.000000e+00 : f32
    %646 = vector.broadcast %cst_140 : f32 to vector<4x32xf32>
    %647 = arith.subf %646, %640 : vector<4x32xf32>
    %648 = arith.mulf %647, %645 : vector<4x32xf32>
    %649 = arith.mulf %640, %616 : vector<4x32xf32>
    %650 = arith.addf %648, %649 : vector<4x32xf32>
    %c5_i32_141 = arith.constant 5 : i32
    %651 = vector.broadcast %c5_i32_141 : i32 to vector<4x1xi32>
    %652 = arith.cmpi eq, %0, %651 : vector<4x1xi32>
    %653 = vector.shape_cast %652 : vector<4x1xi1> to vector<4x1xi1>
    %654 = vector.broadcast %653 : vector<4x1xi1> to vector<4x32xi1>
    %655 = arith.select %654, %650, %621 : vector<4x32xi1>, vector<4x32xf32>
    %cst_142 = arith.constant dense<0.000000e+00> : vector<4x384xf32>
    %656 = tpu.matmul %650, %424, %cst_142 {dimension_numbers = #tpu.dot_dimension_numbers<[1], [0], [0], [1], [0, 0, 1, 1], [], []>} : vector<4x32xf32>, vector<32x384xf32>, vector<4x384xf32> -> vector<4x384xf32>
    %657 = vector.broadcast %423 : vector<1x384xf32> to vector<4x384xf32>
    %658 = arith.addf %656, %657 : vector<4x384xf32>
    %659 = vector.extract_strided_slice %445 {offsets = [0, 0], sizes = [4, 32], strides = [1, 1]} : vector<4x384xf32> to vector<4x32xf32>
    %660 = vector.extract_strided_slice %658 {offsets = [0, 0], sizes = [4, 32], strides = [1, 1]} : vector<4x384xf32> to vector<4x32xf32>
    %661 = arith.addf %659, %660 : vector<4x32xf32>
    %662 = arith.negf %661 : vector<4x32xf32>
    %663 = math.exp %662 : vector<4x32xf32>
    %cst_143 = arith.constant 1.000000e+00 : f32
    %664 = vector.broadcast %cst_143 : f32 to vector<4x32xf32>
    %665 = arith.addf %664, %663 : vector<4x32xf32>
    %666 = arith.divf %664, %665 : vector<4x32xf32>
    %667 = vector.extract_strided_slice %445 {offsets = [0, 128], sizes = [4, 32], strides = [1, 1]} : vector<4x384xf32> to vector<4x32xf32>
    %668 = vector.extract_strided_slice %658 {offsets = [0, 128], sizes = [4, 32], strides = [1, 1]} : vector<4x384xf32> to vector<4x32xf32>
    %669 = arith.addf %667, %668 : vector<4x32xf32>
    %670 = arith.negf %669 : vector<4x32xf32>
    %671 = math.exp %670 : vector<4x32xf32>
    %cst_144 = arith.constant 1.000000e+00 : f32
    %672 = vector.broadcast %cst_144 : f32 to vector<4x32xf32>
    %673 = arith.addf %672, %671 : vector<4x32xf32>
    %674 = arith.divf %672, %673 : vector<4x32xf32>
    %675 = vector.extract_strided_slice %445 {offsets = [0, 256], sizes = [4, 32], strides = [1, 1]} : vector<4x384xf32> to vector<4x32xf32>
    %676 = vector.extract_strided_slice %658 {offsets = [0, 256], sizes = [4, 32], strides = [1, 1]} : vector<4x384xf32> to vector<4x32xf32>
    %677 = arith.mulf %666, %676 : vector<4x32xf32>
    %678 = arith.addf %675, %677 : vector<4x32xf32>
    %679 = math.tanh %678 : vector<4x32xf32>
    %cst_145 = arith.constant 1.000000e+00 : f32
    %680 = vector.broadcast %cst_145 : f32 to vector<4x32xf32>
    %681 = arith.subf %680, %674 : vector<4x32xf32>
    %682 = arith.mulf %681, %679 : vector<4x32xf32>
    %683 = arith.mulf %674, %650 : vector<4x32xf32>
    %684 = arith.addf %682, %683 : vector<4x32xf32>
    %c6_i32_146 = arith.constant 6 : i32
    %685 = vector.broadcast %c6_i32_146 : i32 to vector<4x1xi32>
    %686 = arith.cmpi eq, %0, %685 : vector<4x1xi32>
    %687 = vector.shape_cast %686 : vector<4x1xi1> to vector<4x1xi1>
    %688 = vector.broadcast %687 : vector<4x1xi1> to vector<4x32xi1>
    %689 = arith.select %688, %684, %655 : vector<4x32xi1>, vector<4x32xf32>
    %cst_147 = arith.constant dense<0.000000e+00> : vector<4x384xf32>
    %690 = tpu.matmul %684, %424, %cst_147 {dimension_numbers = #tpu.dot_dimension_numbers<[1], [0], [0], [1], [0, 0, 1, 1], [], []>} : vector<4x32xf32>, vector<32x384xf32>, vector<4x384xf32> -> vector<4x384xf32>
    %691 = vector.broadcast %423 : vector<1x384xf32> to vector<4x384xf32>
    %692 = arith.addf %690, %691 : vector<4x384xf32>
    %693 = vector.extract_strided_slice %448 {offsets = [0, 0], sizes = [4, 32], strides = [1, 1]} : vector<4x384xf32> to vector<4x32xf32>
    %694 = vector.extract_strided_slice %692 {offsets = [0, 0], sizes = [4, 32], strides = [1, 1]} : vector<4x384xf32> to vector<4x32xf32>
    %695 = arith.addf %693, %694 : vector<4x32xf32>
    %696 = arith.negf %695 : vector<4x32xf32>
    %697 = math.exp %696 : vector<4x32xf32>
    %cst_148 = arith.constant 1.000000e+00 : f32
    %698 = vector.broadcast %cst_148 : f32 to vector<4x32xf32>
    %699 = arith.addf %698, %697 : vector<4x32xf32>
    %700 = arith.divf %698, %699 : vector<4x32xf32>
    %701 = vector.extract_strided_slice %448 {offsets = [0, 128], sizes = [4, 32], strides = [1, 1]} : vector<4x384xf32> to vector<4x32xf32>
    %702 = vector.extract_strided_slice %692 {offsets = [0, 128], sizes = [4, 32], strides = [1, 1]} : vector<4x384xf32> to vector<4x32xf32>
    %703 = arith.addf %701, %702 : vector<4x32xf32>
    %704 = arith.negf %703 : vector<4x32xf32>
    %705 = math.exp %704 : vector<4x32xf32>
    %cst_149 = arith.constant 1.000000e+00 : f32
    %706 = vector.broadcast %cst_149 : f32 to vector<4x32xf32>
    %707 = arith.addf %706, %705 : vector<4x32xf32>
    %708 = arith.divf %706, %707 : vector<4x32xf32>
    %709 = vector.extract_strided_slice %448 {offsets = [0, 256], sizes = [4, 32], strides = [1, 1]} : vector<4x384xf32> to vector<4x32xf32>
    %710 = vector.extract_strided_slice %692 {offsets = [0, 256], sizes = [4, 32], strides = [1, 1]} : vector<4x384xf32> to vector<4x32xf32>
    %711 = arith.mulf %700, %710 : vector<4x32xf32>
    %712 = arith.addf %709, %711 : vector<4x32xf32>
    %713 = math.tanh %712 : vector<4x32xf32>
    %cst_150 = arith.constant 1.000000e+00 : f32
    %714 = vector.broadcast %cst_150 : f32 to vector<4x32xf32>
    %715 = arith.subf %714, %708 : vector<4x32xf32>
    %716 = arith.mulf %715, %713 : vector<4x32xf32>
    %717 = arith.mulf %708, %684 : vector<4x32xf32>
    %718 = arith.addf %716, %717 : vector<4x32xf32>
    %c7_i32_151 = arith.constant 7 : i32
    %719 = vector.broadcast %c7_i32_151 : i32 to vector<4x1xi32>
    %720 = arith.cmpi eq, %0, %719 : vector<4x1xi32>
    %721 = vector.shape_cast %720 : vector<4x1xi1> to vector<4x1xi1>
    %722 = vector.broadcast %721 : vector<4x1xi1> to vector<4x32xi1>
    %723 = arith.select %722, %718, %689 : vector<4x32xi1>, vector<4x32xf32>
    %c1_152 = arith.constant 1 : index
    %c0_153 = arith.constant 0 : index
    %c0_154 = arith.constant 0 : index
    %724 = vector.load %arg19[%c1_152, %c0_153, %c0_154] : memref<3x4x32xf32, #tpu.memory_space<vmem>>, vector<1x4x32xf32>
    %725 = vector.shape_cast %724 : vector<1x4x32xf32> to vector<4x32xf32>
    %726 = vector.shape_cast %723 : vector<4x32xf32> to vector<1x4x32xf32>
    tpu.vector_store %arg19[%c1_152, %c0_153, %c0_154], %726 {strides = array<i32>} : memref<3x4x32xf32, #tpu.memory_space<vmem>>, vector<1x4x32xf32>,
    %c0_155 = arith.constant 0 : index
    %c0_156 = arith.constant 0 : index
    %727 = vector.load %arg16[%c0_155, %c0_156] : memref<32x384xf32, #tpu.memory_space<vmem>>, vector<32x384xf32>
    %c0_157 = arith.constant 0 : index
    %c0_158 = arith.constant 0 : index
    %728 = vector.load %arg17[%c0_157, %c0_158] : memref<1x384xf32, #tpu.memory_space<vmem>>, vector<1x384xf32>
    %c0_159 = arith.constant 0 : index
    %c0_160 = arith.constant 0 : index
    %729 = vector.load %arg18[%c0_159, %c0_160] : memref<1x384xf32, #tpu.memory_space<vmem>>, vector<1x384xf32>
    %c0_161 = arith.constant 0 : index
    %c0_162 = arith.constant 0 : index
    %730 = vector.load %arg13[%c0_161, %c0_162] : memref<32x32xf32, #tpu.memory_space<vmem>>, vector<32x32xf32>
    %c0_163 = arith.constant 0 : index
    %c0_164 = arith.constant 0 : index
    %731 = vector.load %arg14[%c0_163, %c0_164] : memref<1x32xf32, #tpu.memory_space<vmem>>, vector<1x32xf32>
    %c0_165 = arith.constant 0 : index
    %c0_166 = arith.constant 0 : index
    %732 = vector.load %arg15[%c0_165, %c0_166] : memref<32x512xf32, #tpu.memory_space<vmem>>, vector<32x512xf32>
    %cst_167 = arith.constant dense<0.000000e+00> : vector<4x32xf32>
    %733 = tpu.matmul %480, %730, %cst_167 {dimension_numbers = #tpu.dot_dimension_numbers<[1], [0], [0], [1], [0, 0, 1, 1], [], []>} : vector<4x32xf32>, vector<32x32xf32>, vector<4x32xf32> -> vector<4x32xf32>
    %734 = vector.broadcast %731 : vector<1x32xf32> to vector<4x32xf32>
    %735 = arith.addf %733, %734 : vector<4x32xf32>
    %cst_168 = arith.constant dense<0.000000e+00> : vector<4x32xf32>
    %736 = tpu.matmul %514, %730, %cst_168 {dimension_numbers = #tpu.dot_dimension_numbers<[1], [0], [0], [1], [0, 0, 1, 1], [], []>} : vector<4x32xf32>, vector<32x32xf32>, vector<4x32xf32> -> vector<4x32xf32>
    %737 = vector.broadcast %731 : vector<1x32xf32> to vector<4x32xf32>
    %738 = arith.addf %736, %737 : vector<4x32xf32>
    %cst_169 = arith.constant dense<0.000000e+00> : vector<4x32xf32>
    %739 = tpu.matmul %548, %730, %cst_169 {dimension_numbers = #tpu.dot_dimension_numbers<[1], [0], [0], [1], [0, 0, 1, 1], [], []>} : vector<4x32xf32>, vector<32x32xf32>, vector<4x32xf32> -> vector<4x32xf32>
    %740 = vector.broadcast %731 : vector<1x32xf32> to vector<4x32xf32>
    %741 = arith.addf %739, %740 : vector<4x32xf32>
    %cst_170 = arith.constant dense<0.000000e+00> : vector<4x32xf32>
    %742 = tpu.matmul %582, %730, %cst_170 {dimension_numbers = #tpu.dot_dimension_numbers<[1], [0], [0], [1], [0, 0, 1, 1], [], []>} : vector<4x32xf32>, vector<32x32xf32>, vector<4x32xf32> -> vector<4x32xf32>
    %743 = vector.broadcast %731 : vector<1x32xf32> to vector<4x32xf32>
    %744 = arith.addf %742, %743 : vector<4x32xf32>
    %cst_171 = arith.constant dense<0.000000e+00> : vector<4x32xf32>
    %745 = tpu.matmul %616, %730, %cst_171 {dimension_numbers = #tpu.dot_dimension_numbers<[1], [0], [0], [1], [0, 0, 1, 1], [], []>} : vector<4x32xf32>, vector<32x32xf32>, vector<4x32xf32> -> vector<4x32xf32>
    %746 = vector.broadcast %731 : vector<1x32xf32> to vector<4x32xf32>
    %747 = arith.addf %745, %746 : vector<4x32xf32>
    %cst_172 = arith.constant dense<0.000000e+00> : vector<4x32xf32>
    %748 = tpu.matmul %650, %730, %cst_172 {dimension_numbers = #tpu.dot_dimension_numbers<[1], [0], [0], [1], [0, 0, 1, 1], [], []>} : vector<4x32xf32>, vector<32x32xf32>, vector<4x32xf32> -> vector<4x32xf32>
    %749 = vector.broadcast %731 : vector<1x32xf32> to vector<4x32xf32>
    %750 = arith.addf %748, %749 : vector<4x32xf32>
    %cst_173 = arith.constant dense<0.000000e+00> : vector<4x32xf32>
    %751 = tpu.matmul %684, %730, %cst_173 {dimension_numbers = #tpu.dot_dimension_numbers<[1], [0], [0], [1], [0, 0, 1, 1], [], []>} : vector<4x32xf32>, vector<32x32xf32>, vector<4x32xf32> -> vector<4x32xf32>
    %752 = vector.broadcast %731 : vector<1x32xf32> to vector<4x32xf32>
    %753 = arith.addf %751, %752 : vector<4x32xf32>
    %cst_174 = arith.constant dense<0.000000e+00> : vector<4x32xf32>
    %754 = tpu.matmul %718, %730, %cst_174 {dimension_numbers = #tpu.dot_dimension_numbers<[1], [0], [0], [1], [0, 0, 1, 1], [], []>} : vector<4x32xf32>, vector<32x32xf32>, vector<4x32xf32> -> vector<4x32xf32>
    %755 = vector.broadcast %731 : vector<1x32xf32> to vector<4x32xf32>
    %756 = arith.addf %754, %755 : vector<4x32xf32>
    %c2_175 = arith.constant 2 : index
    %c0_176 = arith.constant 0 : index
    %c0_177 = arith.constant 0 : index
    %757 = vector.load %arg1[%c2_175, %c0_176, %c0_177] : memref<3x4x32xf32, #tpu.memory_space<vmem>>, vector<1x4x32xf32>
    %758 = vector.shape_cast %757 : vector<1x4x32xf32> to vector<4x32xf32>
    %cst_178 = arith.constant 0.000000e+00 : f32
    %759 = vector.broadcast %cst_178 : f32 to vector<4x32xf32>
    %cst_179 = arith.constant dense<0.000000e+00> : vector<4x512xf32>
    %760 = tpu.matmul %758, %732, %cst_179 {dimension_numbers = #tpu.dot_dimension_numbers<[1], [0], [0], [1], [0, 0, 1, 1], [], []>} : vector<4x32xf32>, vector<32x512xf32>, vector<4x512xf32> -> vector<4x512xf32>
    %761 = vector.extract_strided_slice %760 {offsets = [0, 0], sizes = [4, 32], strides = [1, 1]} : vector<4x512xf32> to vector<4x32xf32>
    %762 = arith.addf %735, %761 : vector<4x32xf32>
    %763 = arith.negf %762 : vector<4x32xf32>
    %764 = math.exp %763 : vector<4x32xf32>
    %cst_180 = arith.constant 1.000000e+00 : f32
    %765 = vector.broadcast %cst_180 : f32 to vector<4x32xf32>
    %766 = arith.addf %765, %764 : vector<4x32xf32>
    %767 = arith.divf %765, %766 : vector<4x32xf32>
    %768 = arith.mulf %480, %767 : vector<4x32xf32>
    %cst_181 = arith.constant dense<0.000000e+00> : vector<4x384xf32>
    %769 = tpu.matmul %768, %727, %cst_181 {dimension_numbers = #tpu.dot_dimension_numbers<[1], [0], [0], [1], [0, 0, 1, 1], [], []>} : vector<4x32xf32>, vector<32x384xf32>, vector<4x384xf32> -> vector<4x384xf32>
    %770 = vector.broadcast %728 : vector<1x384xf32> to vector<4x384xf32>
    %771 = arith.addf %769, %770 : vector<4x384xf32>
    %772 = vector.extract_strided_slice %760 {offsets = [0, 128], sizes = [4, 384], strides = [1, 1]} : vector<4x512xf32> to vector<4x384xf32>
    %773 = vector.broadcast %729 : vector<1x384xf32> to vector<4x384xf32>
    %774 = arith.addf %772, %773 : vector<4x384xf32>
    %775 = vector.extract_strided_slice %771 {offsets = [0, 0], sizes = [4, 32], strides = [1, 1]} : vector<4x384xf32> to vector<4x32xf32>
    %776 = vector.extract_strided_slice %774 {offsets = [0, 0], sizes = [4, 32], strides = [1, 1]} : vector<4x384xf32> to vector<4x32xf32>
    %777 = arith.addf %775, %776 : vector<4x32xf32>
    %778 = arith.negf %777 : vector<4x32xf32>
    %779 = math.exp %778 : vector<4x32xf32>
    %cst_182 = arith.constant 1.000000e+00 : f32
    %780 = vector.broadcast %cst_182 : f32 to vector<4x32xf32>
    %781 = arith.addf %780, %779 : vector<4x32xf32>
    %782 = arith.divf %780, %781 : vector<4x32xf32>
    %783 = vector.extract_strided_slice %771 {offsets = [0, 128], sizes = [4, 32], strides = [1, 1]} : vector<4x384xf32> to vector<4x32xf32>
    %784 = vector.extract_strided_slice %774 {offsets = [0, 128], sizes = [4, 32], strides = [1, 1]} : vector<4x384xf32> to vector<4x32xf32>
    %785 = arith.addf %783, %784 : vector<4x32xf32>
    %786 = arith.negf %785 : vector<4x32xf32>
    %787 = math.exp %786 : vector<4x32xf32>
    %cst_183 = arith.constant 1.000000e+00 : f32
    %788 = vector.broadcast %cst_183 : f32 to vector<4x32xf32>
    %789 = arith.addf %788, %787 : vector<4x32xf32>
    %790 = arith.divf %788, %789 : vector<4x32xf32>
    %791 = vector.extract_strided_slice %771 {offsets = [0, 256], sizes = [4, 32], strides = [1, 1]} : vector<4x384xf32> to vector<4x32xf32>
    %792 = vector.extract_strided_slice %774 {offsets = [0, 256], sizes = [4, 32], strides = [1, 1]} : vector<4x384xf32> to vector<4x32xf32>
    %793 = arith.mulf %782, %792 : vector<4x32xf32>
    %794 = arith.addf %791, %793 : vector<4x32xf32>
    %795 = math.tanh %794 : vector<4x32xf32>
    %cst_184 = arith.constant 1.000000e+00 : f32
    %796 = vector.broadcast %cst_184 : f32 to vector<4x32xf32>
    %797 = arith.subf %796, %790 : vector<4x32xf32>
    %798 = arith.mulf %797, %795 : vector<4x32xf32>
    %799 = arith.mulf %790, %758 : vector<4x32xf32>
    %800 = arith.addf %798, %799 : vector<4x32xf32>
    %c0_i32_185 = arith.constant 0 : i32
    %801 = vector.broadcast %c0_i32_185 : i32 to vector<4x1xi32>
    %802 = arith.cmpi eq, %0, %801 : vector<4x1xi32>
    %803 = vector.shape_cast %802 : vector<4x1xi1> to vector<4x1xi1>
    %804 = vector.broadcast %803 : vector<4x1xi1> to vector<4x32xi1>
    %805 = arith.select %804, %800, %759 : vector<4x32xi1>, vector<4x32xf32>
    %cst_186 = arith.constant dense<0.000000e+00> : vector<4x512xf32>
    %806 = tpu.matmul %800, %732, %cst_186 {dimension_numbers = #tpu.dot_dimension_numbers<[1], [0], [0], [1], [0, 0, 1, 1], [], []>} : vector<4x32xf32>, vector<32x512xf32>, vector<4x512xf32> -> vector<4x512xf32>
    %807 = vector.extract_strided_slice %806 {offsets = [0, 0], sizes = [4, 32], strides = [1, 1]} : vector<4x512xf32> to vector<4x32xf32>
    %808 = arith.addf %738, %807 : vector<4x32xf32>
    %809 = arith.negf %808 : vector<4x32xf32>
    %810 = math.exp %809 : vector<4x32xf32>
    %cst_187 = arith.constant 1.000000e+00 : f32
    %811 = vector.broadcast %cst_187 : f32 to vector<4x32xf32>
    %812 = arith.addf %811, %810 : vector<4x32xf32>
    %813 = arith.divf %811, %812 : vector<4x32xf32>
    %814 = arith.mulf %514, %813 : vector<4x32xf32>
    %cst_188 = arith.constant dense<0.000000e+00> : vector<4x384xf32>
    %815 = tpu.matmul %814, %727, %cst_188 {dimension_numbers = #tpu.dot_dimension_numbers<[1], [0], [0], [1], [0, 0, 1, 1], [], []>} : vector<4x32xf32>, vector<32x384xf32>, vector<4x384xf32> -> vector<4x384xf32>
    %816 = vector.broadcast %728 : vector<1x384xf32> to vector<4x384xf32>
    %817 = arith.addf %815, %816 : vector<4x384xf32>
    %818 = vector.extract_strided_slice %806 {offsets = [0, 128], sizes = [4, 384], strides = [1, 1]} : vector<4x512xf32> to vector<4x384xf32>
    %819 = vector.broadcast %729 : vector<1x384xf32> to vector<4x384xf32>
    %820 = arith.addf %818, %819 : vector<4x384xf32>
    %821 = vector.extract_strided_slice %817 {offsets = [0, 0], sizes = [4, 32], strides = [1, 1]} : vector<4x384xf32> to vector<4x32xf32>
    %822 = vector.extract_strided_slice %820 {offsets = [0, 0], sizes = [4, 32], strides = [1, 1]} : vector<4x384xf32> to vector<4x32xf32>
    %823 = arith.addf %821, %822 : vector<4x32xf32>
    %824 = arith.negf %823 : vector<4x32xf32>
    %825 = math.exp %824 : vector<4x32xf32>
    %cst_189 = arith.constant 1.000000e+00 : f32
    %826 = vector.broadcast %cst_189 : f32 to vector<4x32xf32>
    %827 = arith.addf %826, %825 : vector<4x32xf32>
    %828 = arith.divf %826, %827 : vector<4x32xf32>
    %829 = vector.extract_strided_slice %817 {offsets = [0, 128], sizes = [4, 32], strides = [1, 1]} : vector<4x384xf32> to vector<4x32xf32>
    %830 = vector.extract_strided_slice %820 {offsets = [0, 128], sizes = [4, 32], strides = [1, 1]} : vector<4x384xf32> to vector<4x32xf32>
    %831 = arith.addf %829, %830 : vector<4x32xf32>
    %832 = arith.negf %831 : vector<4x32xf32>
    %833 = math.exp %832 : vector<4x32xf32>
    %cst_190 = arith.constant 1.000000e+00 : f32
    %834 = vector.broadcast %cst_190 : f32 to vector<4x32xf32>
    %835 = arith.addf %834, %833 : vector<4x32xf32>
    %836 = arith.divf %834, %835 : vector<4x32xf32>
    %837 = vector.extract_strided_slice %817 {offsets = [0, 256], sizes = [4, 32], strides = [1, 1]} : vector<4x384xf32> to vector<4x32xf32>
    %838 = vector.extract_strided_slice %820 {offsets = [0, 256], sizes = [4, 32], strides = [1, 1]} : vector<4x384xf32> to vector<4x32xf32>
    %839 = arith.mulf %828, %838 : vector<4x32xf32>
    %840 = arith.addf %837, %839 : vector<4x32xf32>
    %841 = math.tanh %840 : vector<4x32xf32>
    %cst_191 = arith.constant 1.000000e+00 : f32
    %842 = vector.broadcast %cst_191 : f32 to vector<4x32xf32>
    %843 = arith.subf %842, %836 : vector<4x32xf32>
    %844 = arith.mulf %843, %841 : vector<4x32xf32>
    %845 = arith.mulf %836, %800 : vector<4x32xf32>
    %846 = arith.addf %844, %845 : vector<4x32xf32>
    %c1_i32_192 = arith.constant 1 : i32
    %847 = vector.broadcast %c1_i32_192 : i32 to vector<4x1xi32>
    %848 = arith.cmpi eq, %0, %847 : vector<4x1xi32>
    %849 = vector.shape_cast %848 : vector<4x1xi1> to vector<4x1xi1>
    %850 = vector.broadcast %849 : vector<4x1xi1> to vector<4x32xi1>
    %851 = arith.select %850, %846, %805 : vector<4x32xi1>, vector<4x32xf32>
    %cst_193 = arith.constant dense<0.000000e+00> : vector<4x512xf32>
    %852 = tpu.matmul %846, %732, %cst_193 {dimension_numbers = #tpu.dot_dimension_numbers<[1], [0], [0], [1], [0, 0, 1, 1], [], []>} : vector<4x32xf32>, vector<32x512xf32>, vector<4x512xf32> -> vector<4x512xf32>
    %853 = vector.extract_strided_slice %852 {offsets = [0, 0], sizes = [4, 32], strides = [1, 1]} : vector<4x512xf32> to vector<4x32xf32>
    %854 = arith.addf %741, %853 : vector<4x32xf32>
    %855 = arith.negf %854 : vector<4x32xf32>
    %856 = math.exp %855 : vector<4x32xf32>
    %cst_194 = arith.constant 1.000000e+00 : f32
    %857 = vector.broadcast %cst_194 : f32 to vector<4x32xf32>
    %858 = arith.addf %857, %856 : vector<4x32xf32>
    %859 = arith.divf %857, %858 : vector<4x32xf32>
    %860 = arith.mulf %548, %859 : vector<4x32xf32>
    %cst_195 = arith.constant dense<0.000000e+00> : vector<4x384xf32>
    %861 = tpu.matmul %860, %727, %cst_195 {dimension_numbers = #tpu.dot_dimension_numbers<[1], [0], [0], [1], [0, 0, 1, 1], [], []>} : vector<4x32xf32>, vector<32x384xf32>, vector<4x384xf32> -> vector<4x384xf32>
    %862 = vector.broadcast %728 : vector<1x384xf32> to vector<4x384xf32>
    %863 = arith.addf %861, %862 : vector<4x384xf32>
    %864 = vector.extract_strided_slice %852 {offsets = [0, 128], sizes = [4, 384], strides = [1, 1]} : vector<4x512xf32> to vector<4x384xf32>
    %865 = vector.broadcast %729 : vector<1x384xf32> to vector<4x384xf32>
    %866 = arith.addf %864, %865 : vector<4x384xf32>
    %867 = vector.extract_strided_slice %863 {offsets = [0, 0], sizes = [4, 32], strides = [1, 1]} : vector<4x384xf32> to vector<4x32xf32>
    %868 = vector.extract_strided_slice %866 {offsets = [0, 0], sizes = [4, 32], strides = [1, 1]} : vector<4x384xf32> to vector<4x32xf32>
    %869 = arith.addf %867, %868 : vector<4x32xf32>
    %870 = arith.negf %869 : vector<4x32xf32>
    %871 = math.exp %870 : vector<4x32xf32>
    %cst_196 = arith.constant 1.000000e+00 : f32
    %872 = vector.broadcast %cst_196 : f32 to vector<4x32xf32>
    %873 = arith.addf %872, %871 : vector<4x32xf32>
    %874 = arith.divf %872, %873 : vector<4x32xf32>
    %875 = vector.extract_strided_slice %863 {offsets = [0, 128], sizes = [4, 32], strides = [1, 1]} : vector<4x384xf32> to vector<4x32xf32>
    %876 = vector.extract_strided_slice %866 {offsets = [0, 128], sizes = [4, 32], strides = [1, 1]} : vector<4x384xf32> to vector<4x32xf32>
    %877 = arith.addf %875, %876 : vector<4x32xf32>
    %878 = arith.negf %877 : vector<4x32xf32>
    %879 = math.exp %878 : vector<4x32xf32>
    %cst_197 = arith.constant 1.000000e+00 : f32
    %880 = vector.broadcast %cst_197 : f32 to vector<4x32xf32>
    %881 = arith.addf %880, %879 : vector<4x32xf32>
    %882 = arith.divf %880, %881 : vector<4x32xf32>
    %883 = vector.extract_strided_slice %863 {offsets = [0, 256], sizes = [4, 32], strides = [1, 1]} : vector<4x384xf32> to vector<4x32xf32>
    %884 = vector.extract_strided_slice %866 {offsets = [0, 256], sizes = [4, 32], strides = [1, 1]} : vector<4x384xf32> to vector<4x32xf32>
    %885 = arith.mulf %874, %884 : vector<4x32xf32>
    %886 = arith.addf %883, %885 : vector<4x32xf32>
    %887 = math.tanh %886 : vector<4x32xf32>
    %cst_198 = arith.constant 1.000000e+00 : f32
    %888 = vector.broadcast %cst_198 : f32 to vector<4x32xf32>
    %889 = arith.subf %888, %882 : vector<4x32xf32>
    %890 = arith.mulf %889, %887 : vector<4x32xf32>
    %891 = arith.mulf %882, %846 : vector<4x32xf32>
    %892 = arith.addf %890, %891 : vector<4x32xf32>
    %c2_i32_199 = arith.constant 2 : i32
    %893 = vector.broadcast %c2_i32_199 : i32 to vector<4x1xi32>
    %894 = arith.cmpi eq, %0, %893 : vector<4x1xi32>
    %895 = vector.shape_cast %894 : vector<4x1xi1> to vector<4x1xi1>
    %896 = vector.broadcast %895 : vector<4x1xi1> to vector<4x32xi1>
    %897 = arith.select %896, %892, %851 : vector<4x32xi1>, vector<4x32xf32>
    %cst_200 = arith.constant dense<0.000000e+00> : vector<4x512xf32>
    %898 = tpu.matmul %892, %732, %cst_200 {dimension_numbers = #tpu.dot_dimension_numbers<[1], [0], [0], [1], [0, 0, 1, 1], [], []>} : vector<4x32xf32>, vector<32x512xf32>, vector<4x512xf32> -> vector<4x512xf32>
    %899 = vector.extract_strided_slice %898 {offsets = [0, 0], sizes = [4, 32], strides = [1, 1]} : vector<4x512xf32> to vector<4x32xf32>
    %900 = arith.addf %744, %899 : vector<4x32xf32>
    %901 = arith.negf %900 : vector<4x32xf32>
    %902 = math.exp %901 : vector<4x32xf32>
    %cst_201 = arith.constant 1.000000e+00 : f32
    %903 = vector.broadcast %cst_201 : f32 to vector<4x32xf32>
    %904 = arith.addf %903, %902 : vector<4x32xf32>
    %905 = arith.divf %903, %904 : vector<4x32xf32>
    %906 = arith.mulf %582, %905 : vector<4x32xf32>
    %cst_202 = arith.constant dense<0.000000e+00> : vector<4x384xf32>
    %907 = tpu.matmul %906, %727, %cst_202 {dimension_numbers = #tpu.dot_dimension_numbers<[1], [0], [0], [1], [0, 0, 1, 1], [], []>} : vector<4x32xf32>, vector<32x384xf32>, vector<4x384xf32> -> vector<4x384xf32>
    %908 = vector.broadcast %728 : vector<1x384xf32> to vector<4x384xf32>
    %909 = arith.addf %907, %908 : vector<4x384xf32>
    %910 = vector.extract_strided_slice %898 {offsets = [0, 128], sizes = [4, 384], strides = [1, 1]} : vector<4x512xf32> to vector<4x384xf32>
    %911 = vector.broadcast %729 : vector<1x384xf32> to vector<4x384xf32>
    %912 = arith.addf %910, %911 : vector<4x384xf32>
    %913 = vector.extract_strided_slice %909 {offsets = [0, 0], sizes = [4, 32], strides = [1, 1]} : vector<4x384xf32> to vector<4x32xf32>
    %914 = vector.extract_strided_slice %912 {offsets = [0, 0], sizes = [4, 32], strides = [1, 1]} : vector<4x384xf32> to vector<4x32xf32>
    %915 = arith.addf %913, %914 : vector<4x32xf32>
    %916 = arith.negf %915 : vector<4x32xf32>
    %917 = math.exp %916 : vector<4x32xf32>
    %cst_203 = arith.constant 1.000000e+00 : f32
    %918 = vector.broadcast %cst_203 : f32 to vector<4x32xf32>
    %919 = arith.addf %918, %917 : vector<4x32xf32>
    %920 = arith.divf %918, %919 : vector<4x32xf32>
    %921 = vector.extract_strided_slice %909 {offsets = [0, 128], sizes = [4, 32], strides = [1, 1]} : vector<4x384xf32> to vector<4x32xf32>
    %922 = vector.extract_strided_slice %912 {offsets = [0, 128], sizes = [4, 32], strides = [1, 1]} : vector<4x384xf32> to vector<4x32xf32>
    %923 = arith.addf %921, %922 : vector<4x32xf32>
    %924 = arith.negf %923 : vector<4x32xf32>
    %925 = math.exp %924 : vector<4x32xf32>
    %cst_204 = arith.constant 1.000000e+00 : f32
    %926 = vector.broadcast %cst_204 : f32 to vector<4x32xf32>
    %927 = arith.addf %926, %925 : vector<4x32xf32>
    %928 = arith.divf %926, %927 : vector<4x32xf32>
    %929 = vector.extract_strided_slice %909 {offsets = [0, 256], sizes = [4, 32], strides = [1, 1]} : vector<4x384xf32> to vector<4x32xf32>
    %930 = vector.extract_strided_slice %912 {offsets = [0, 256], sizes = [4, 32], strides = [1, 1]} : vector<4x384xf32> to vector<4x32xf32>
    %931 = arith.mulf %920, %930 : vector<4x32xf32>
    %932 = arith.addf %929, %931 : vector<4x32xf32>
    %933 = math.tanh %932 : vector<4x32xf32>
    %cst_205 = arith.constant 1.000000e+00 : f32
    %934 = vector.broadcast %cst_205 : f32 to vector<4x32xf32>
    %935 = arith.subf %934, %928 : vector<4x32xf32>
    %936 = arith.mulf %935, %933 : vector<4x32xf32>
    %937 = arith.mulf %928, %892 : vector<4x32xf32>
    %938 = arith.addf %936, %937 : vector<4x32xf32>
    %c3_i32_206 = arith.constant 3 : i32
    %939 = vector.broadcast %c3_i32_206 : i32 to vector<4x1xi32>
    %940 = arith.cmpi eq, %0, %939 : vector<4x1xi32>
    %941 = vector.shape_cast %940 : vector<4x1xi1> to vector<4x1xi1>
    %942 = vector.broadcast %941 : vector<4x1xi1> to vector<4x32xi1>
    %943 = arith.select %942, %938, %897 : vector<4x32xi1>, vector<4x32xf32>
    %cst_207 = arith.constant dense<0.000000e+00> : vector<4x512xf32>
    %944 = tpu.matmul %938, %732, %cst_207 {dimension_numbers = #tpu.dot_dimension_numbers<[1], [0], [0], [1], [0, 0, 1, 1], [], []>} : vector<4x32xf32>, vector<32x512xf32>, vector<4x512xf32> -> vector<4x512xf32>
    %945 = vector.extract_strided_slice %944 {offsets = [0, 0], sizes = [4, 32], strides = [1, 1]} : vector<4x512xf32> to vector<4x32xf32>
    %946 = arith.addf %747, %945 : vector<4x32xf32>
    %947 = arith.negf %946 : vector<4x32xf32>
    %948 = math.exp %947 : vector<4x32xf32>
    %cst_208 = arith.constant 1.000000e+00 : f32
    %949 = vector.broadcast %cst_208 : f32 to vector<4x32xf32>
    %950 = arith.addf %949, %948 : vector<4x32xf32>
    %951 = arith.divf %949, %950 : vector<4x32xf32>
    %952 = arith.mulf %616, %951 : vector<4x32xf32>
    %cst_209 = arith.constant dense<0.000000e+00> : vector<4x384xf32>
    %953 = tpu.matmul %952, %727, %cst_209 {dimension_numbers = #tpu.dot_dimension_numbers<[1], [0], [0], [1], [0, 0, 1, 1], [], []>} : vector<4x32xf32>, vector<32x384xf32>, vector<4x384xf32> -> vector<4x384xf32>
    %954 = vector.broadcast %728 : vector<1x384xf32> to vector<4x384xf32>
    %955 = arith.addf %953, %954 : vector<4x384xf32>
    %956 = vector.extract_strided_slice %944 {offsets = [0, 128], sizes = [4, 384], strides = [1, 1]} : vector<4x512xf32> to vector<4x384xf32>
    %957 = vector.broadcast %729 : vector<1x384xf32> to vector<4x384xf32>
    %958 = arith.addf %956, %957 : vector<4x384xf32>
    %959 = vector.extract_strided_slice %955 {offsets = [0, 0], sizes = [4, 32], strides = [1, 1]} : vector<4x384xf32> to vector<4x32xf32>
    %960 = vector.extract_strided_slice %958 {offsets = [0, 0], sizes = [4, 32], strides = [1, 1]} : vector<4x384xf32> to vector<4x32xf32>
    %961 = arith.addf %959, %960 : vector<4x32xf32>
    %962 = arith.negf %961 : vector<4x32xf32>
    %963 = math.exp %962 : vector<4x32xf32>
    %cst_210 = arith.constant 1.000000e+00 : f32
    %964 = vector.broadcast %cst_210 : f32 to vector<4x32xf32>
    %965 = arith.addf %964, %963 : vector<4x32xf32>
    %966 = arith.divf %964, %965 : vector<4x32xf32>
    %967 = vector.extract_strided_slice %955 {offsets = [0, 128], sizes = [4, 32], strides = [1, 1]} : vector<4x384xf32> to vector<4x32xf32>
    %968 = vector.extract_strided_slice %958 {offsets = [0, 128], sizes = [4, 32], strides = [1, 1]} : vector<4x384xf32> to vector<4x32xf32>
    %969 = arith.addf %967, %968 : vector<4x32xf32>
    %970 = arith.negf %969 : vector<4x32xf32>
    %971 = math.exp %970 : vector<4x32xf32>
    %cst_211 = arith.constant 1.000000e+00 : f32
    %972 = vector.broadcast %cst_211 : f32 to vector<4x32xf32>
    %973 = arith.addf %972, %971 : vector<4x32xf32>
    %974 = arith.divf %972, %973 : vector<4x32xf32>
    %975 = vector.extract_strided_slice %955 {offsets = [0, 256], sizes = [4, 32], strides = [1, 1]} : vector<4x384xf32> to vector<4x32xf32>
    %976 = vector.extract_strided_slice %958 {offsets = [0, 256], sizes = [4, 32], strides = [1, 1]} : vector<4x384xf32> to vector<4x32xf32>
    %977 = arith.mulf %966, %976 : vector<4x32xf32>
    %978 = arith.addf %975, %977 : vector<4x32xf32>
    %979 = math.tanh %978 : vector<4x32xf32>
    %cst_212 = arith.constant 1.000000e+00 : f32
    %980 = vector.broadcast %cst_212 : f32 to vector<4x32xf32>
    %981 = arith.subf %980, %974 : vector<4x32xf32>
    %982 = arith.mulf %981, %979 : vector<4x32xf32>
    %983 = arith.mulf %974, %938 : vector<4x32xf32>
    %984 = arith.addf %982, %983 : vector<4x32xf32>
    %c4_i32_213 = arith.constant 4 : i32
    %985 = vector.broadcast %c4_i32_213 : i32 to vector<4x1xi32>
    %986 = arith.cmpi eq, %0, %985 : vector<4x1xi32>
    %987 = vector.shape_cast %986 : vector<4x1xi1> to vector<4x1xi1>
    %988 = vector.broadcast %987 : vector<4x1xi1> to vector<4x32xi1>
    %989 = arith.select %988, %984, %943 : vector<4x32xi1>, vector<4x32xf32>
    %cst_214 = arith.constant dense<0.000000e+00> : vector<4x512xf32>
    %990 = tpu.matmul %984, %732, %cst_214 {dimension_numbers = #tpu.dot_dimension_numbers<[1], [0], [0], [1], [0, 0, 1, 1], [], []>} : vector<4x32xf32>, vector<32x512xf32>, vector<4x512xf32> -> vector<4x512xf32>
    %991 = vector.extract_strided_slice %990 {offsets = [0, 0], sizes = [4, 32], strides = [1, 1]} : vector<4x512xf32> to vector<4x32xf32>
    %992 = arith.addf %750, %991 : vector<4x32xf32>
    %993 = arith.negf %992 : vector<4x32xf32>
    %994 = math.exp %993 : vector<4x32xf32>
    %cst_215 = arith.constant 1.000000e+00 : f32
    %995 = vector.broadcast %cst_215 : f32 to vector<4x32xf32>
    %996 = arith.addf %995, %994 : vector<4x32xf32>
    %997 = arith.divf %995, %996 : vector<4x32xf32>
    %998 = arith.mulf %650, %997 : vector<4x32xf32>
    %cst_216 = arith.constant dense<0.000000e+00> : vector<4x384xf32>
    %999 = tpu.matmul %998, %727, %cst_216 {dimension_numbers = #tpu.dot_dimension_numbers<[1], [0], [0], [1], [0, 0, 1, 1], [], []>} : vector<4x32xf32>, vector<32x384xf32>, vector<4x384xf32> -> vector<4x384xf32>
    %1000 = vector.broadcast %728 : vector<1x384xf32> to vector<4x384xf32>
    %1001 = arith.addf %999, %1000 : vector<4x384xf32>
    %1002 = vector.extract_strided_slice %990 {offsets = [0, 128], sizes = [4, 384], strides = [1, 1]} : vector<4x512xf32> to vector<4x384xf32>
    %1003 = vector.broadcast %729 : vector<1x384xf32> to vector<4x384xf32>
    %1004 = arith.addf %1002, %1003 : vector<4x384xf32>
    %1005 = vector.extract_strided_slice %1001 {offsets = [0, 0], sizes = [4, 32], strides = [1, 1]} : vector<4x384xf32> to vector<4x32xf32>
    %1006 = vector.extract_strided_slice %1004 {offsets = [0, 0], sizes = [4, 32], strides = [1, 1]} : vector<4x384xf32> to vector<4x32xf32>
    %1007 = arith.addf %1005, %1006 : vector<4x32xf32>
    %1008 = arith.negf %1007 : vector<4x32xf32>
    %1009 = math.exp %1008 : vector<4x32xf32>
    %cst_217 = arith.constant 1.000000e+00 : f32
    %1010 = vector.broadcast %cst_217 : f32 to vector<4x32xf32>
    %1011 = arith.addf %1010, %1009 : vector<4x32xf32>
    %1012 = arith.divf %1010, %1011 : vector<4x32xf32>
    %1013 = vector.extract_strided_slice %1001 {offsets = [0, 128], sizes = [4, 32], strides = [1, 1]} : vector<4x384xf32> to vector<4x32xf32>
    %1014 = vector.extract_strided_slice %1004 {offsets = [0, 128], sizes = [4, 32], strides = [1, 1]} : vector<4x384xf32> to vector<4x32xf32>
    %1015 = arith.addf %1013, %1014 : vector<4x32xf32>
    %1016 = arith.negf %1015 : vector<4x32xf32>
    %1017 = math.exp %1016 : vector<4x32xf32>
    %cst_218 = arith.constant 1.000000e+00 : f32
    %1018 = vector.broadcast %cst_218 : f32 to vector<4x32xf32>
    %1019 = arith.addf %1018, %1017 : vector<4x32xf32>
    %1020 = arith.divf %1018, %1019 : vector<4x32xf32>
    %1021 = vector.extract_strided_slice %1001 {offsets = [0, 256], sizes = [4, 32], strides = [1, 1]} : vector<4x384xf32> to vector<4x32xf32>
    %1022 = vector.extract_strided_slice %1004 {offsets = [0, 256], sizes = [4, 32], strides = [1, 1]} : vector<4x384xf32> to vector<4x32xf32>
    %1023 = arith.mulf %1012, %1022 : vector<4x32xf32>
    %1024 = arith.addf %1021, %1023 : vector<4x32xf32>
    %1025 = math.tanh %1024 : vector<4x32xf32>
    %cst_219 = arith.constant 1.000000e+00 : f32
    %1026 = vector.broadcast %cst_219 : f32 to vector<4x32xf32>
    %1027 = arith.subf %1026, %1020 : vector<4x32xf32>
    %1028 = arith.mulf %1027, %1025 : vector<4x32xf32>
    %1029 = arith.mulf %1020, %984 : vector<4x32xf32>
    %1030 = arith.addf %1028, %1029 : vector<4x32xf32>
    %c5_i32_220 = arith.constant 5 : i32
    %1031 = vector.broadcast %c5_i32_220 : i32 to vector<4x1xi32>
    %1032 = arith.cmpi eq, %0, %1031 : vector<4x1xi32>
    %1033 = vector.shape_cast %1032 : vector<4x1xi1> to vector<4x1xi1>
    %1034 = vector.broadcast %1033 : vector<4x1xi1> to vector<4x32xi1>
    %1035 = arith.select %1034, %1030, %989 : vector<4x32xi1>, vector<4x32xf32>
    %cst_221 = arith.constant dense<0.000000e+00> : vector<4x512xf32>
    %1036 = tpu.matmul %1030, %732, %cst_221 {dimension_numbers = #tpu.dot_dimension_numbers<[1], [0], [0], [1], [0, 0, 1, 1], [], []>} : vector<4x32xf32>, vector<32x512xf32>, vector<4x512xf32> -> vector<4x512xf32>
    %1037 = vector.extract_strided_slice %1036 {offsets = [0, 0], sizes = [4, 32], strides = [1, 1]} : vector<4x512xf32> to vector<4x32xf32>
    %1038 = arith.addf %753, %1037 : vector<4x32xf32>
    %1039 = arith.negf %1038 : vector<4x32xf32>
    %1040 = math.exp %1039 : vector<4x32xf32>
    %cst_222 = arith.constant 1.000000e+00 : f32
    %1041 = vector.broadcast %cst_222 : f32 to vector<4x32xf32>
    %1042 = arith.addf %1041, %1040 : vector<4x32xf32>
    %1043 = arith.divf %1041, %1042 : vector<4x32xf32>
    %1044 = arith.mulf %684, %1043 : vector<4x32xf32>
    %cst_223 = arith.constant dense<0.000000e+00> : vector<4x384xf32>
    %1045 = tpu.matmul %1044, %727, %cst_223 {dimension_numbers = #tpu.dot_dimension_numbers<[1], [0], [0], [1], [0, 0, 1, 1], [], []>} : vector<4x32xf32>, vector<32x384xf32>, vector<4x384xf32> -> vector<4x384xf32>
    %1046 = vector.broadcast %728 : vector<1x384xf32> to vector<4x384xf32>
    %1047 = arith.addf %1045, %1046 : vector<4x384xf32>
    %1048 = vector.extract_strided_slice %1036 {offsets = [0, 128], sizes = [4, 384], strides = [1, 1]} : vector<4x512xf32> to vector<4x384xf32>
    %1049 = vector.broadcast %729 : vector<1x384xf32> to vector<4x384xf32>
    %1050 = arith.addf %1048, %1049 : vector<4x384xf32>
    %1051 = vector.extract_strided_slice %1047 {offsets = [0, 0], sizes = [4, 32], strides = [1, 1]} : vector<4x384xf32> to vector<4x32xf32>
    %1052 = vector.extract_strided_slice %1050 {offsets = [0, 0], sizes = [4, 32], strides = [1, 1]} : vector<4x384xf32> to vector<4x32xf32>
    %1053 = arith.addf %1051, %1052 : vector<4x32xf32>
    %1054 = arith.negf %1053 : vector<4x32xf32>
    %1055 = math.exp %1054 : vector<4x32xf32>
    %cst_224 = arith.constant 1.000000e+00 : f32
    %1056 = vector.broadcast %cst_224 : f32 to vector<4x32xf32>
    %1057 = arith.addf %1056, %1055 : vector<4x32xf32>
    %1058 = arith.divf %1056, %1057 : vector<4x32xf32>
    %1059 = vector.extract_strided_slice %1047 {offsets = [0, 128], sizes = [4, 32], strides = [1, 1]} : vector<4x384xf32> to vector<4x32xf32>
    %1060 = vector.extract_strided_slice %1050 {offsets = [0, 128], sizes = [4, 32], strides = [1, 1]} : vector<4x384xf32> to vector<4x32xf32>
    %1061 = arith.addf %1059, %1060 : vector<4x32xf32>
    %1062 = arith.negf %1061 : vector<4x32xf32>
    %1063 = math.exp %1062 : vector<4x32xf32>
    %cst_225 = arith.constant 1.000000e+00 : f32
    %1064 = vector.broadcast %cst_225 : f32 to vector<4x32xf32>
    %1065 = arith.addf %1064, %1063 : vector<4x32xf32>
    %1066 = arith.divf %1064, %1065 : vector<4x32xf32>
    %1067 = vector.extract_strided_slice %1047 {offsets = [0, 256], sizes = [4, 32], strides = [1, 1]} : vector<4x384xf32> to vector<4x32xf32>
    %1068 = vector.extract_strided_slice %1050 {offsets = [0, 256], sizes = [4, 32], strides = [1, 1]} : vector<4x384xf32> to vector<4x32xf32>
    %1069 = arith.mulf %1058, %1068 : vector<4x32xf32>
    %1070 = arith.addf %1067, %1069 : vector<4x32xf32>
    %1071 = math.tanh %1070 : vector<4x32xf32>
    %cst_226 = arith.constant 1.000000e+00 : f32
    %1072 = vector.broadcast %cst_226 : f32 to vector<4x32xf32>
    %1073 = arith.subf %1072, %1066 : vector<4x32xf32>
    %1074 = arith.mulf %1073, %1071 : vector<4x32xf32>
    %1075 = arith.mulf %1066, %1030 : vector<4x32xf32>
    %1076 = arith.addf %1074, %1075 : vector<4x32xf32>
    %c6_i32_227 = arith.constant 6 : i32
    %1077 = vector.broadcast %c6_i32_227 : i32 to vector<4x1xi32>
    %1078 = arith.cmpi eq, %0, %1077 : vector<4x1xi32>
    %1079 = vector.shape_cast %1078 : vector<4x1xi1> to vector<4x1xi1>
    %1080 = vector.broadcast %1079 : vector<4x1xi1> to vector<4x32xi1>
    %1081 = arith.select %1080, %1076, %1035 : vector<4x32xi1>, vector<4x32xf32>
    %cst_228 = arith.constant dense<0.000000e+00> : vector<4x512xf32>
    %1082 = tpu.matmul %1076, %732, %cst_228 {dimension_numbers = #tpu.dot_dimension_numbers<[1], [0], [0], [1], [0, 0, 1, 1], [], []>} : vector<4x32xf32>, vector<32x512xf32>, vector<4x512xf32> -> vector<4x512xf32>
    %1083 = vector.extract_strided_slice %1082 {offsets = [0, 0], sizes = [4, 32], strides = [1, 1]} : vector<4x512xf32> to vector<4x32xf32>
    %1084 = arith.addf %756, %1083 : vector<4x32xf32>
    %1085 = arith.negf %1084 : vector<4x32xf32>
    %1086 = math.exp %1085 : vector<4x32xf32>
    %cst_229 = arith.constant 1.000000e+00 : f32
    %1087 = vector.broadcast %cst_229 : f32 to vector<4x32xf32>
    %1088 = arith.addf %1087, %1086 : vector<4x32xf32>
    %1089 = arith.divf %1087, %1088 : vector<4x32xf32>
    %1090 = arith.mulf %718, %1089 : vector<4x32xf32>
    %cst_230 = arith.constant dense<0.000000e+00> : vector<4x384xf32>
    %1091 = tpu.matmul %1090, %727, %cst_230 {dimension_numbers = #tpu.dot_dimension_numbers<[1], [0], [0], [1], [0, 0, 1, 1], [], []>} : vector<4x32xf32>, vector<32x384xf32>, vector<4x384xf32> -> vector<4x384xf32>
    %1092 = vector.broadcast %728 : vector<1x384xf32> to vector<4x384xf32>
    %1093 = arith.addf %1091, %1092 : vector<4x384xf32>
    %1094 = vector.extract_strided_slice %1082 {offsets = [0, 128], sizes = [4, 384], strides = [1, 1]} : vector<4x512xf32> to vector<4x384xf32>
    %1095 = vector.broadcast %729 : vector<1x384xf32> to vector<4x384xf32>
    %1096 = arith.addf %1094, %1095 : vector<4x384xf32>
    %1097 = vector.extract_strided_slice %1093 {offsets = [0, 0], sizes = [4, 32], strides = [1, 1]} : vector<4x384xf32> to vector<4x32xf32>
    %1098 = vector.extract_strided_slice %1096 {offsets = [0, 0], sizes = [4, 32], strides = [1, 1]} : vector<4x384xf32> to vector<4x32xf32>
    %1099 = arith.addf %1097, %1098 : vector<4x32xf32>
    %1100 = arith.negf %1099 : vector<4x32xf32>
    %1101 = math.exp %1100 : vector<4x32xf32>
    %cst_231 = arith.constant 1.000000e+00 : f32
    %1102 = vector.broadcast %cst_231 : f32 to vector<4x32xf32>
    %1103 = arith.addf %1102, %1101 : vector<4x32xf32>
    %1104 = arith.divf %1102, %1103 : vector<4x32xf32>
    %1105 = vector.extract_strided_slice %1093 {offsets = [0, 128], sizes = [4, 32], strides = [1, 1]} : vector<4x384xf32> to vector<4x32xf32>
    %1106 = vector.extract_strided_slice %1096 {offsets = [0, 128], sizes = [4, 32], strides = [1, 1]} : vector<4x384xf32> to vector<4x32xf32>
    %1107 = arith.addf %1105, %1106 : vector<4x32xf32>
    %1108 = arith.negf %1107 : vector<4x32xf32>
    %1109 = math.exp %1108 : vector<4x32xf32>
    %cst_232 = arith.constant 1.000000e+00 : f32
    %1110 = vector.broadcast %cst_232 : f32 to vector<4x32xf32>
    %1111 = arith.addf %1110, %1109 : vector<4x32xf32>
    %1112 = arith.divf %1110, %1111 : vector<4x32xf32>
    %1113 = vector.extract_strided_slice %1093 {offsets = [0, 256], sizes = [4, 32], strides = [1, 1]} : vector<4x384xf32> to vector<4x32xf32>
    %1114 = vector.extract_strided_slice %1096 {offsets = [0, 256], sizes = [4, 32], strides = [1, 1]} : vector<4x384xf32> to vector<4x32xf32>
    %1115 = arith.mulf %1104, %1114 : vector<4x32xf32>
    %1116 = arith.addf %1113, %1115 : vector<4x32xf32>
    %1117 = math.tanh %1116 : vector<4x32xf32>
    %cst_233 = arith.constant 1.000000e+00 : f32
    %1118 = vector.broadcast %cst_233 : f32 to vector<4x32xf32>
    %1119 = arith.subf %1118, %1112 : vector<4x32xf32>
    %1120 = arith.mulf %1119, %1117 : vector<4x32xf32>
    %1121 = arith.mulf %1112, %1076 : vector<4x32xf32>
    %1122 = arith.addf %1120, %1121 : vector<4x32xf32>
    %c7_i32_234 = arith.constant 7 : i32
    %1123 = vector.broadcast %c7_i32_234 : i32 to vector<4x1xi32>
    %1124 = arith.cmpi eq, %0, %1123 : vector<4x1xi32>
    %1125 = vector.shape_cast %1124 : vector<4x1xi1> to vector<4x1xi1>
    %1126 = vector.broadcast %1125 : vector<4x1xi1> to vector<4x32xi1>
    %1127 = arith.select %1126, %1122, %1081 : vector<4x32xi1>, vector<4x32xf32>
    %c2_235 = arith.constant 2 : index
    %c0_236 = arith.constant 0 : index
    %c0_237 = arith.constant 0 : index
    %1128 = vector.load %arg19[%c2_235, %c0_236, %c0_237] : memref<3x4x32xf32, #tpu.memory_space<vmem>>, vector<1x4x32xf32>
    %1129 = vector.shape_cast %1128 : vector<1x4x32xf32> to vector<4x32xf32>
    %1130 = vector.shape_cast %1127 : vector<4x32xf32> to vector<1x4x32xf32>
    tpu.vector_store %arg19[%c2_235, %c0_236, %c0_237], %1130 {strides = array<i32>} : memref<3x4x32xf32, #tpu.memory_space<vmem>>, vector<1x4x32xf32>,
    return
  }
}

</mosaic_0001>

<bundles_post_ra>
// kernel: gru_att_layers_forward.1
= control target key start
LH: loop header
LB: loop body
LE: loop exit
PB: predicated region body
PF: predicated region fallthrough
CT: control target
= control target key end

     0   :  { %s8614_s0 = inlined_call_operand.vmem [shape: f32[8,4,16], index: 0, kind: input, shape index: {}]   ;;  %s8615_s1 = inlined_call_operand.hbm [shape: f32[3,4,32], index: 1, kind: input, shape index: {}]   ;;  %s8616_s2 = inlined_call_operand.vmem [shape: s32[4,1], index: 2, kind: input, shape index: {}]   ;;  %s8617_s3 = inlined_call_operand.hbm [shape: f32[16,16], index: 3, kind: input, shape index: {}]   ;;  %s8618_s4 = inlined_call_operand.hbm [shape: f32[1,16], index: 4, kind: input, shape index: {}]   ;;  %s8619_s5 = inlined_call_operand.hbm [shape: f32[32,512], index: 5, kind: input, shape index: {}]   ;;  %s8620_s6 = inlined_call_operand.vmem [shape: f32[16,384], index: 6, kind: input, shape index: {}]   ;;  %s8621_s7 = inlined_call_operand.hbm [shape: f32[1,384], index: 7, kind: input, shape index: {}]   ;;  %s8622_s8 = inlined_call_operand.hbm [shape: f32[1,384], index: 8, kind: input, shape index: {}]   ;;  %s8623_s9 = inlined_call_operand.hbm [shape: f32[32,384], index: 9, kind: input, shape index: {}]   ;;  %s8624_s10 = inlined_call_operand.hbm [shape: f32[1,384], index: 10, kind: input, shape index: {}]   ;;  %s8625_s11 = inlined_call_operand.hbm [shape: f32[32,384], index: 11, kind: input, shape index: {}]   ;;  %s8626_s12 = inlined_call_operand.hbm [shape: f32[1,384], index: 12, kind: input, shape index: {}]   ;;  %s8627_s13 = inlined_call_operand.vmem [shape: f32[32,32], index: 13, kind: input, shape index: {}]   ;;  %s8628_s14 = inlined_call_operand.hbm [shape: f32[1,32], index: 14, kind: input, shape index: {}]   ;;  %s8629_s15 = inlined_call_operand.hbm [shape: f32[32,512], index: 15, kind: input, shape index: {}]   ;;  %s8630_s16 = inlined_call_operand.hbm [shape: f32[32,384], index: 16, kind: input, shape index: {}]   ;;  %s8631_s17 = inlined_call_operand.vmem [shape: f32[1,384], index: 17, kind: input, shape index: {}]   ;;  %s8632_s18 = inlined_call_operand.vmem [shape: f32[1,384], index: 18, kind: input, shape index: {}]   ;;  %s8633_s19 = inlined_call_operand.vmem [shape: f32[3,4,32], index: 19, kind: output, shape index: {}]  }
   0x1   :  { %8654 = sst [smem:[#allocation45_spill]] %s8614_s0 }
   0x2   :  { %8655 = sst [smem:[#allocation46_spill]] %s8615_s1 }
   0x3   :  { %8656 = sst [smem:[#allocation47_spill]] %s8616_s2 }
   0x4   :  { %8657 = sst [smem:[#allocation48_spill]] %s8617_s3 }
   0x5   :  { %24 = vsyncpa [#allocation3], 0 }
   0x6   :  { %25 = vsyncpa [#allocation5], 0 }
   0x7   :  { %26 = vsyncpa [#allocation8], 0 }
   0x8   :  { %27 = vsyncpa [#allocation11], 0 }
   0x9   :  { %28 = vsyncpa [#allocation14], 0 }
   0xa   :  { %29 = vsyncpa [#allocation17], 0  ;;  %s8658_s20 = sld [smem:[#allocation48_spill]] }
  0x10   :  { %s52_s21 = sshll.u32 %s8658_s20, 4  ;;  %s53_s21 = int_to_ptr.hbm [resolvable:$true] %s52_s21 }
  0x11   :  { %30 = vsyncpa [#allocation20], 0  ;;  %s6649_s1 = smov [#allocation4]   ;;  %s76_s24 = sshll.u32 %s8619_s5, 4  ;;  %s77_s24 = int_to_ptr.hbm [resolvable:$true] %s76_s24 }
  0x12   :  { %s54_s22 = sshll.u32 %s6649_s1, 4  ;;  %s6650_s25 = smov 128   ;;  %s55_s22 = int_to_ptr.vmem [resolvable:$true] %s54_s22 }
  0x13   :  { %s6651_s3 = smov 8   ;;  %s6652_s26 = smov [#allocation7]  }
  0x14   :  { %60 = dma.hbm_to_vmem [thread:$0]  %s53_s21, 256, %s55_s22, [#allocation5], %s6650_s25, %s6650_s25, %s6651_s3  }
  0x15   :  { %s78_s27 = sshll.u32 %s6652_s26, 4  ;;  %s6653_s28 = smov 512   ;;  %s79_s27 = int_to_ptr.vmem [resolvable:$true] %s78_s27 }
  0x16   :  { %s6654_s29 = smov 32   ;;  %s103_s20 = sshll.u32 %s8622_s8, 4  ;;  %s104_s20 = int_to_ptr.hbm [resolvable:$true] %s103_s20 }
  0x17   :  { %84 = dma.hbm_to_vmem [thread:$0]  %s77_s24, 2048, %s79_s27, [#allocation8], %s6653_s28, %s6653_s28, %s6654_s29  }
  0x18   :  { %s6655_s1 = smov [#allocation10]   ;;  %s127_s22 = sshll.u32 %s8624_s10, 4  ;;  %s128_s22 = int_to_ptr.hbm [resolvable:$true] %s127_s22 }
  0x19   :  { %s105_s5 = sshll.u32 %s6655_s1, 4  ;;  %s6656_s23 = smov [#allocation13]   ;;  %s106_s5 = int_to_ptr.vmem [resolvable:$true] %s105_s5 }
  0x1a   :  { %108 = dma.hbm_to_vmem [thread:$0]  %s104_s20, 48, %s106_s5, [#allocation11]  }
  0x1b   :  { %s129_s25 = sshll.u32 %s6656_s23, 4  ;;  %s151_s24 = sshll.u32 %s8626_s12, 4  ;;  %s130_s25 = int_to_ptr.vmem [resolvable:$true] %s129_s25  ;;  %s152_s24 = int_to_ptr.hbm [resolvable:$true] %s151_s24 }
  0x1c   :  { %132 = dma.hbm_to_vmem [thread:$0]  %s128_s22, 48, %s130_s25, [#allocation14]  }
  0x1d   :  { %s174_s0 = sshll.u32 %s8629_s15, 4  ;;  %s6657_s30 = smov [#allocation16]   ;;  %s175_s0 = int_to_ptr.hbm [resolvable:$true] %s174_s0 }
  0x1e   :  { %s153_s1 = sshll.u32 %s6657_s30, 4  ;;  %s6658_s10 = smov [#allocation19]   ;;  %s154_s1 = int_to_ptr.vmem [resolvable:$true] %s153_s1 }
  0x1f   :  { %156 = dma.hbm_to_vmem [thread:$0]  %s152_s24, 48, %s154_s1, [#allocation17]  }
  0x20   :  { %s176_s20 = sshll.u32 %s6658_s10, 4  ;;  %s8659_s21 = sld [smem:[#allocation46_spill]]  ;;  %s177_s20 = int_to_ptr.vmem [resolvable:$true] %s176_s20 }
  0x21   :  { %182 = dma.hbm_to_vmem [thread:$0]  %s175_s0, 2048, %s177_s20, [#allocation20], %s6653_s28, %s6653_s28, %s6654_s29  }
  0x22   :  { %s6659_s12 = smov [#allocation2]   ;;  %s66_s3 = sshll.u32 %s8618_s4, 4  ;;  %s67_s3 = int_to_ptr.hbm [resolvable:$true] %s66_s3 }
  0x23   :  { %s39_s22 = sshll.u32 %s6659_s12, 4  ;;  %s6660_s26 = smov 64   ;;  %s40_s22 = int_to_ptr.vmem [resolvable:$true] %s39_s22 }
  0x24   :  { %s6661_s24 = smov 4   ;;  %s6662_s8 = smov [#allocation6]  }
  0x25   :  { %s68_s27 = sshll.u32 %s6662_s8, 4  ;;  %s92_s10 = sshll.u32 %s8621_s7, 4  ;;  %s69_s27 = int_to_ptr.vmem [resolvable:$true] %s68_s27  ;;  %s93_s10 = int_to_ptr.hbm [resolvable:$true] %s92_s10 }
  0x26   :  { %s37_s23 = sshll.u32 %s8659_s21, 4  ;;  %s113_s0 = sshll.u32 %s8623_s9, 4  ;;  %s38_s23 = int_to_ptr.hbm [resolvable:$true] %s37_s23  ;;  %s114_s0 = int_to_ptr.hbm [resolvable:$true] %s113_s0 }
  0x27   :  { %45 = dma.hbm_to_vmem [thread:$0]  %s38_s23, 192, %s40_s22, [#allocation3], %s6660_s26, %s6660_s26, %s6661_s24  }
  0x28   :  { %71 = dma.hbm_to_vmem [thread:$0]  %s67_s3, 16, %s69_s27, [#allocation5]  }
  0x29   :  { %s6663_s20 = smov [#allocation9]   ;;  %s6664_s4 = smov [#allocation12]  }
  0x2a   :  { %s94_s5 = sshll.u32 %s6663_s20, 4  ;;  %s115_s2 = sshll.u32 %s6664_s4, 4  ;;  %s95_s5 = int_to_ptr.vmem [resolvable:$true] %s94_s5  ;;  %s116_s2 = int_to_ptr.vmem [resolvable:$true] %s115_s2 }
  0x2b   :  { %97 = dma.hbm_to_vmem [thread:$0]  %s93_s10, 48, %s95_s5, [#allocation8]  }
  0x2c   :  { %s6665_s21 = smov 384   ;;  %s6666_s23 = smov 24  }
  0x2d   :  { %121 = dma.hbm_to_vmem [thread:$0]  %s114_s0, 1536, %s116_s2, [#allocation11], %s6665_s21, %s6665_s21, %s6666_s23  }
  0x2e   :  { %s137_s22 = sshll.u32 %s8625_s11, 4  ;;  %s6667_s15 = smov [#allocation15]   ;;  %s138_s22 = int_to_ptr.hbm [resolvable:$true] %s137_s22 }
  0x2f   :  { %s139_s25 = sshll.u32 %s6667_s15, 4  ;;  %s164_s26 = sshll.u32 %s8628_s14, 4  ;;  %s140_s25 = int_to_ptr.vmem [resolvable:$true] %s139_s25  ;;  %s165_s26 = int_to_ptr.hbm [resolvable:$true] %s164_s26 }
  0x30   :  { %145 = dma.hbm_to_vmem [thread:$0]  %s138_s22, 1536, %s140_s25, [#allocation14], %s6665_s21, %s6665_s21, %s6666_s23  }
  0x31   :  { %s6668_s24 = smov [#allocation18]   ;;  %s187_s1 = sshll.u32 %s8630_s16, 4  ;;  %s188_s1 = int_to_ptr.hbm [resolvable:$true] %s187_s1 }
  0x32   :  { %s166_s8 = sshll.u32 %s6668_s24, 4  ;;  %s6669_s11 = smov [#allocation21]   ;;  %s167_s8 = int_to_ptr.vmem [resolvable:$true] %s166_s8 }
  0x33   :  { %169 = dma.hbm_to_vmem [thread:$0]  %s165_s26, 16, %s167_s8, [#allocation17]  }
  0x34   :  { %s189_s10 = sshll.u32 %s6669_s11, 4  ;;  %s190_s10 = int_to_ptr.vmem [resolvable:$true] %s189_s10 }
  0x35   :  { %195 = dma.hbm_to_vmem [thread:$0]  %s188_s1, 1536, %s190_s10, [#allocation20], %s6665_s21, %s6665_s21, %s6666_s23  }
  0x36   :  { %6635 = dma.done.wait [#allocation3], 192  }
  0x37   :  { %6636 = vsyncadd [#allocation3], 4294967104 }
  0x38   :  { %6637 = dma.done.wait [#allocation5], 272  }
  0x39   :  { %6638 = vsyncadd [#allocation5], 4294967024 }
  0x3a   :  { %6639 = dma.done.wait [#allocation8], 2096  }
  0x3b   :  { %6640 = vsyncadd [#allocation8], 4294965200 }
  0x3c   :  { %6641 = dma.done.wait [#allocation11], 1584  }
  0x3d   :  { %6642 = vsyncadd [#allocation11], 4294965712 }
  0x3e   :  { %6643 = dma.done.wait [#allocation14], 1584  }
  0x3f   :  { %6644 = vsyncadd [#allocation14], 4294965712 }
  0x40   :  { %6645 = dma.done.wait [#allocation17], 64  }
  0x41   :  { %6646 = vsyncadd [#allocation17], 4294967232 }
  0x42   :  { %6647 = dma.done.wait [#allocation20], 3584  }
  0x43   :  { %6648 = vsyncadd [#allocation20], 4294963712  ;;  %v277_v0 = vld [vmem:[#allocation4 + $0x8] sm:$0xff]  ;;  %v276_v1 = vld [vmem:[#allocation4] sm:$0xff]  ;;  %s8660_s28 = sld [smem:[#allocation45_spill]]  ;;  %vm298_vm0 = vcmask 130048  }
  0x44   :  { %316 = vmatpush.msra.mxu0 %v277_v0  ;;  %339 = vmatpush.msra.mxu1 %v277_v0  ;;  %v6823_v3 = vld [vmem:[#allocation7 + $0x60] sm:$0xff]  ;;  %vm484_vm1 = vcmask 261120   ;;  %v6865_v14 = vld [vmem:[#allocation7 + $0x68] sm:$0xff]  ;;  %v6867_v15 = vld [vmem:[#allocation7 + $0x70] sm:$0xff]  ;;  %v6670_v37 = vmov 0   ;;  %s8661_s0 = sld [smem:[#allocation47_spill]] }
  0x45   :  { %362 = vmatpush.msra.mxu2 %v277_v0  ;;  %385 = vmatpush.msra.mxu3 %v277_v0  ;;  %v6825_v4 = vld [vmem:[#allocation7 + $0x40] sm:$0xff]  ;;  %v6871_v16 = vld [vmem:[#allocation7 + $0x48] sm:$0xff]  ;;  %v6873_v17 = vld [vmem:[#allocation7 + $0x50] sm:$0xff] }
  0x46   :  { %317 = vmatpush.msra.mxu0 %v276_v1  ;;  %340 = vmatpush.msra.mxu1 %v276_v1  ;;  %v6832_v6 = vld [vmem:[#allocation7 + $0x20] sm:$0xff]  ;;  %v6877_v18 = vld [vmem:[#allocation7 + $0x28] sm:$0xff]  ;;  %v6879_v19 = vld [vmem:[#allocation7 + $0x30] sm:$0xff] }
  0x47   :  { %363 = vmatpush.msra.mxu2 %v276_v1  ;;  %386 = vmatpush.msra.mxu3 %v276_v1  ;;  %v6835_v7 = vld [vmem:[#allocation7] sm:$0xff]  ;;  %v6883_v20 = vld [vmem:[#allocation7 + $0x8] sm:$0xff]  ;;  %v6885_v21 = vld [vmem:[#allocation7 + $0x10] sm:$0xff] }
  0x48   :  { %408 = vmatpush.msrb.mxu0 %v277_v0  ;;  %431 = vmatpush.msrb.mxu1 %v277_v0  ;;  %v6839_v8 = vld [vmem:[#allocation2] sm:$0xf]  ;;  %v6898_v23 = vld [vmem:[%s8620_s6 + $0x18] sm:$0xff]  ;;  %v6915_v26 = vld [vmem:[%s8620_s6 + $0x28] sm:$0xff] }
  0x49   :  { %v6819_v2 = vld [vmem:[%s8660_s28] sm:$0xf]  ;;  %454 = vmatpush.msrb.mxu2 %v277_v0  ;;  %v5685_v5 = vld [vmem:[%s8660_s28 + $0x10] sm:$0xf]  ;;  %477 = vmatpush.msrb.mxu3 %v277_v0  ;;  %v6846_v9 = vld [vmem:[%s8660_s28 + $0x4] sm:$0xf] }
  0x4a   :  { %5689 = vmatmul.msk.f32.vlgmr.msra.gmra.mxu0 %vm298_vm0, %v6819_v2  ;;  %432 = vmatpush.msrb.mxu1 %v276_v1  ;;  %v6851_v10 = vld [vmem:[%s8660_s28 + $0x8] sm:$0xf]  ;;  %v5686_v12 = vld [vmem:[%s8660_s28 + $0x14] sm:$0xf]  ;;  %v5687_v13 = vld [vmem:[%s8660_s28 + $0x18] sm:$0xf] }
  0x4b   :  { %409 = vmatpush.msrb.mxu0 %v276_v1  ;;  %455 = vmatpush.msrb.mxu2 %v276_v1  ;;  %v6903_v24 = vld [vmem:[%s8620_s6] sm:$0xff]  ;;  %v6920_v27 = vld [vmem:[%s8620_s6 + $0x8] sm:$0xff]  ;;  %v6925_v28 = vld [vmem:[%s8620_s6 + $0x10] sm:$0xff] }
  0x4c   :  { %478 = vmatpush.msrb.mxu3 %v276_v1  ;;  %5690 = vmatmul.msk.f32.vlgmr.msra.gmra.mxu1 %vm298_vm0, %v6846_v9  ;;  %v6908_v25 = vld [vmem:[%s8620_s6 + $0x20] sm:$0xff]  ;;  %v6927_v29 = vld [vmem:[#allocation6] ss:$0 sm:$0xff]  ;;  %v6942_v33 = vld [vmem:[%s8660_s28 + $0xc] sm:$0xf] }
  0x4d   :  { %500 = vmatpush.msra.mxu0 %v6823_v3  ;;  %5691 = vmatmul.msk.f32.vlgmr.msra.gmra.mxu2 %vm298_vm0, %v6851_v10  ;;  %v6944_v34 = vld [vmem:[#allocation7 + $0x78] sm:$0xff]  ;;  %v6956_v38 = vld [vmem:[%s8661_s0] sm:$0xf] }
  0x4e   :  { %520 = vmatpush.msra.mxu1 %v6865_v14  ;;  %540 = vmatpush.msra.mxu2 %v6867_v15  ;;  %v6949_v36 = vld [vmem:[#allocation7 + $0x58] sm:$0xff]  ;;  %vm716_vm2 = vcmp.eq.s32.totalorder %v6956_v38, 0  ;;  %v275_v61 = vld [vmem:[#allocation10] sm:$0x7]  ;;  %v274_v62 = vld [vmem:[#allocation9] sm:$0x7] }
  0x4f   :  { %501 = vmatpush.msra.mxu0 %v6825_v4  ;;  %5692 = vmatmul.msk.f32.vlgmr.msra.gmra.mxu3 %vm298_vm0, %v6942_v33  ;;  %v6959_v39 = vld [vmem:[#allocation7 + $0x38] sm:$0xff]  ;;  %v717_v40 = vsel %vm716_vm2, 1, %v6670_v37  ;;  %v7007_v63 = vperm.slane %v275_v61, 0  ;;  %v7009_v0 = vperm.slane %v275_v61, 1  ;;  %v7011_v1 = vperm.slane %v274_v62, 0 }
  0x50   :  { %521 = vmatpush.msra.mxu1 %v6871_v16  ;;  %541 = vmatpush.msra.mxu2 %v6873_v17  ;;  %v6967_v41 = vld [vmem:[#allocation7 + $0x18] sm:$0xff]  ;;  %vm940_vm15 = vcmp.eq.s32.totalorder %v6956_v38, 1 }
  0x51   :  { %502 = vmatpush.msra.mxu0 %v6832_v6  ;;  %5953 = vset.pattern.permute.xlu0 %v6670_v37  ;;  %v5688_v42 = vld [vmem:[%s8660_s28 + $0x1c] sm:$0xf] }
  0x52   :  { %5693 = vmatmul.msk.f32.vlgmr.msrb.gmra.mxu0 %vm298_vm0, %v5685_v5  ;;  %522 = vmatpush.msra.mxu1 %v6877_v18 }
  0x53   :  { %503 = vmatpush.msra.mxu0 %v6835_v7  ;;  %542 = vmatpush.msra.mxu2 %v6879_v19 }
  0x54   :  { %5694 = vmatmul.msk.f32.vlgmr.msrb.gmra.mxu1 %vm298_vm0, %v5686_v12  ;;  %560 = vmatpush.msra.mxu3 %v6944_v34 }
  0x55   :  { %5695 = vmatmul.msk.f32.vlgmr.msrb.gmra.mxu2 %vm298_vm0, %v5687_v13  ;;  %523 = vmatpush.msra.mxu1 %v6883_v20 }
  0x56   :  { %543 = vmatpush.msra.mxu2 %v6885_v21  ;;  %613 = vmatpush.msrb.mxu0 %v6898_v23 }
  0x57   :  { %633 = vmatpush.msrb.mxu1 %v6908_v25  ;;  %561 = vmatpush.msra.mxu3 %v6949_v36 }
  0x58   :  { %653 = vmatpush.msrb.mxu2 %v6915_v26  ;;  %614 = vmatpush.msrb.mxu0 %v6903_v24 }
  0x59   :  { %634 = vmatpush.msrb.mxu1 %v6920_v27  ;;  %719 = vperm.xlu0 %5953, %v717_v40  }
  0x5a   :  { %5697 = vmatmul.msk.f32.vlgmr.msra.gmra.mxu0 %vm484_vm1, %v6839_v8  ;;  %654 = vmatpush.msrb.mxu2 %v6925_v28 }
  0x5b   :  { %758 = vmatpush.msra.mxu0 %v6865_v14  ;;  %5954 = vset.pattern.permute.xlu1 %v6670_v37 }
  0x5c   :  { %5698 = vmatmul.msk.f32.vlgmr.msra.gmra.mxu1 %vm484_vm1, %v6839_v8  ;;  %562 = vmatpush.msra.mxu3 %v6959_v39 }
  0x5d   :  { %5699 = vmatmul.msk.f32.vlgmr.msra.gmra.mxu2 %vm484_vm1, %v6839_v8  ;;  %778 = vmatpush.msra.mxu1 %v6867_v15 }
  0x5e   :  { %759 = vmatpush.msra.mxu0 %v6871_v16  ;;  %798 = vmatpush.msra.mxu2 %v6944_v34 }
  0x5f   :  { %779 = vmatpush.msra.mxu1 %v6873_v17  ;;  %5955 = vset.pattern.permute.xlu2 %v6670_v37 }
  0x60   :  { %760 = vmatpush.msra.mxu0 %v6877_v18  ;;  %799 = vmatpush.msra.mxu2 %v6949_v36 }
  0x61   :  { %780 = vmatpush.msra.mxu1 %v6879_v19  ;;  %563 = vmatpush.msra.mxu3 %v6967_v41 }
  0x62   :  { %761 = vmatpush.msra.mxu0 %v6883_v20  ;;  %800 = vmatpush.msra.mxu2 %v6959_v39 }
  0x63   :  { %781 = vmatpush.msra.mxu1 %v6885_v21  ;;  %5696 = vmatmul.msk.f32.vlgmr.msrb.gmra.mxu3 %vm298_vm0, %v5688_v42 }
  0x64   :  { %801 = vmatpush.msra.mxu2 %v6967_v41  ;;  %738 = vmatpush.msrb.mxu3 %v6823_v3 }
  0x66   :  { %739 = vmatpush.msrb.mxu3 %v6825_v4 }
  0x68   :  { %740 = vmatpush.msrb.mxu3 %v6832_v6 }
  0x6a   :  { %741 = vmatpush.msrb.mxu3 %v6835_v7 }
  0x6b   :  { %5700 = vmatmul.msk.f32.vlgmr.msra.gmra.mxu3 %vm484_vm1, %v6839_v8 }
  0x6c   :  { %844 = vmatpush.msra.mxu3 %v6898_v23 }
  0x6e   :  { %845 = vmatpush.msra.mxu3 %v6903_v24 }
  0xc7   :  { %v319_v11 = vpop.f32.mrf.mxu0 }
  0xc8   :  { %v320_v30 = vadd.f32 %v6927_v29, %v319_v11 }
  0xc9   :  { %v6999_v56 = vpop.f32.mrf.mxu1 }
  0xcf   :  { %v6887_v22 = vpop.f32.mrf.mxu0 }
  0xd0   :  { %v7001_v57 = vpop.f32.mrf.mxu2 }
  0xd1   :  { %v7003_v58 = vpop.f32.mrf.mxu1 }
  0xd7   :  { %v505_v31 = vpop.f32.mrf.mxu0 }
  0xd8   :  { %v568_v32 = vadd.f32 %v505_v31, %v320_v30  ;;  %v7005_v59 = vpop.f32.mrf.mxu2 }
  0xd9   :  { %v525_v60 = vpop.f32.mrf.mxu1 }
  0xda   :  { %v5701_v35 = vmul.f32 -1.442695, %v568_v32  ;;  %v666_v11 = vadd.f32 %v7007_v63, %v525_v60 }
  0xdc   :  { %5958 = vpow2.f32 %v5701_v35 }
  0xe0   :  { %v545_v5 = vpop.f32.mrf.mxu2 }
  0xe1   :  { %v667_v12 = vadd.f32 %v7009_v0, %v545_v5 }
  0xe2   :  { %v5959_v43 = vpop.eup %5958 }
  0xe3   :  { %v572_v44 = vadd.f32 1.0, %v5959_v43 }
  0xe5   :  { %5960 = vrcp.f32 %v572_v44  ;;  %v584_v48 = vand.u32 2147483648, %v572_v44  ;;  %v582_v50 = vand.u32 2147483647, %v572_v44  ;;  %vm578_vm4 = vweird.f32 %v572_v44 }
  0xe7   :  { %v585_v52 = vor.u32 1.1754944e-38, %v584_v48  ;;  %vm583_vm6 = vcmp.eq.f32.partialorder %v582_v50, 8.507059e+37 }
  0xeb   :  { %v5961_v45 = vpop.eup %5960 }
  0xec   :  { %v574_v46 = vmul.f32 %v5961_v45, %v572_v44  ;;  %vm579_vm3 = vweird.f32 %v5961_v45  ;;  %v7019_v44 = vpop.f32.mrf.mxu3 }
  0xed   :  { %vm580_vm5 = vmor %vm578_vm4, %vm579_vm3 }
  0xee   :  { %v575_v47 = vsub.f32 1.0, %v574_v46 }
  0xf0   :  { %v576_v49 = vmul.f32 %v5961_v45, %v575_v47 }
  0xf2   :  { %v577_v51 = vadd.f32 %v5961_v45, %v576_v49 }
  0xf4   :  { %v581_v53 = vsel %vm580_vm5, %v5961_v45, %v577_v51  ;;  %v7021_v49 = vpop.f32.mrf.mxu3 }
  0xf5   :  { %v586_v54 = vsel %vm583_vm6, %v585_v52, %v581_v53 }
  0xf6   :  { %v588_v55 = vmul.f32 %v586_v54, %v6819_v2  ;;  %v7013_v2 = vperm.slane %v274_v62, 1  ;;  %v7023_v54 = vperm.slane %v275_v61, 2 }
  0xf8   :  { %5702 = vmatmul.msk.f32.vlgmr.msrb.gmra.mxu0 %vm298_vm0, %v588_v55  ;;  %5703 = vmatmul.msk.f32.vlgmr.msrb.gmra.mxu1 %vm298_vm0, %v588_v55 }
  0xf9   :  { %5704 = vmatmul.msk.f32.vlgmr.msrb.gmra.mxu2 %vm298_vm0, %v588_v55  ;;  %864 = vmatpush.msrb.mxu0 %v6908_v25 }
  0xfa   :  { %884 = vmatpush.msrb.mxu1 %v6915_v26  ;;  %962 = vmatpush.msrb.mxu2 %v6823_v3 }
  0xfb   :  { %865 = vmatpush.msrb.mxu0 %v6920_v27 }
  0xfc   :  { %885 = vmatpush.msrb.mxu1 %v6925_v28  ;;  %963 = vmatpush.msrb.mxu2 %v6825_v4  ;;  %v565_v5 = vpop.f32.mrf.mxu3 }
  0xfe   :  { %964 = vmatpush.msrb.mxu2 %v6832_v6 }
 0x100   :  { %965 = vmatpush.msrb.mxu2 %v6835_v7 }
 0x175   :  { %v616_v13 = vpop.f32.mrf.mxu0  ;;  %v636_v30 = vpop.f32.mrf.mxu1 }
 0x176   :  { %v617_v31 = vadd.f32 %v616_v13, %v7011_v1  ;;  %v637_v32 = vadd.f32 %v636_v30, %v7013_v2 }
 0x178   :  { %v669_v35 = vadd.f32 %v666_v11, %v617_v31  ;;  %v689_v40 = vadd.f32 %v667_v12, %v637_v32  ;;  %v7025_v31 = vperm.slane %v274_v62, 2  ;;  %v668_v32 = vadd.f32 %v7023_v54, %v565_v5 }
 0x17a   :  { %v5705_v42 = vmul.f32 -1.442695, %v669_v35  ;;  %v5706_v43 = vmul.f32 -1.442695, %v689_v40 }
 0x17c   :  { %5962 = vpow2.f32 %v5705_v42  ;;  %v656_v40 = vpop.f32.mrf.mxu2 }
 0x17d   :  { %5964 = vpow2.f32 %v5706_v43 }
 0x182   :  { %v5963_v45 = vpop.eup %5962 }
 0x183   :  { %v5965_v46 = vpop.eup %5964  ;;  %v673_v47 = vadd.f32 1.0, %v5963_v45 }
 0x184   :  { %v693_v48 = vadd.f32 1.0, %v5965_v46 }
 0x185   :  { %5966 = vrcp.f32 %v673_v47  ;;  %v685_v11 = vand.u32 2147483648, %v673_v47  ;;  %v683_v13 = vand.u32 2147483647, %v673_v47  ;;  %vm679_vm8 = vweird.f32 %v673_v47 }
 0x186   :  { %5968 = vrcp.f32 %v693_v48  ;;  %v705_v46 = vand.u32 2147483648, %v693_v48  ;;  %vm699_vm12 = vweird.f32 %v693_v48 }
 0x187   :  { %v686_v42 = vor.u32 1.1754944e-38, %v685_v11  ;;  %vm684_vm10 = vcmp.eq.f32.partialorder %v683_v13, 8.507059e+37 }
 0x188   :  { %v706_v5 = vor.u32 1.1754944e-38, %v705_v46 }
 0x18b   :  { %v5967_v50 = vpop.eup %5966 }
 0x18c   :  { %v5969_v51 = vpop.eup %5968  ;;  %v675_v52 = vmul.f32 %v5967_v50, %v673_v47  ;;  %vm680_vm7 = vweird.f32 %v5967_v50 }
 0x18d   :  { %v695_v53 = vmul.f32 %v5969_v51, %v693_v48  ;;  %vm681_vm9 = vmor %vm679_vm8, %vm680_vm7  ;;  %vm700_vm11 = vweird.f32 %v5969_v51 }
 0x18e   :  { %v676_v55 = vsub.f32 1.0, %v675_v52  ;;  %v657_v52 = vadd.f32 %v656_v40, %v7025_v31  ;;  %vm701_vm13 = vmor %vm699_vm12, %vm700_vm11 }
 0x18f   :  { %v696_v60 = vsub.f32 1.0, %v695_v53 }
 0x190   :  { %v677_v12 = vmul.f32 %v5967_v50, %v676_v55  ;;  %v703_v55 = vand.u32 2147483647, %v693_v48 }
 0x191   :  { %v697_v30 = vmul.f32 %v5969_v51, %v696_v60 }
 0x192   :  { %v678_v35 = vadd.f32 %v5967_v50, %v677_v12  ;;  %vm704_vm14 = vcmp.eq.f32.partialorder %v703_v55, 8.507059e+37 }
 0x193   :  { %v698_v45 = vadd.f32 %v5969_v51, %v697_v30 }
 0x194   :  { %v682_v43 = vsel %vm681_vm9, %v5967_v50, %v678_v35 }
 0x195   :  { %v687_v61 = vsel %vm684_vm10, %v686_v42, %v682_v43  ;;  %v702_v60 = vsel %vm701_vm13, %v5969_v51, %v698_v45 }
 0x196   :  { %v709_v53 = vmul.f32 %v687_v61, %v668_v32  ;;  %v707_v47 = vsel %vm704_vm14, %v706_v5, %v702_v60  ;;  %v941_v32 = vsel %vm940_vm15, 1, %v6670_v37  ;;  %vm1164_vm14 = vcmp.eq.s32.totalorder %v6956_v38, 2 }
 0x197   :  { %v712_v12 = vsub.f32 1.0, %v707_v47  ;;  %v714_v13 = vmul.f32 %v707_v47, %v6839_v8  ;;  %v343_v8 = vadd.f32 %v6927_v29, %v6999_v56  ;;  %943 = vperm.xlu0 %5953, %v941_v32  }
 0x198   :  { %v710_v62 = vadd.f32 %v709_v53, %v657_v52 }
 0x19a   :  { %5970 = vtanh.f32 %v710_v62 }
 0x1a0   :  { %v5971_v11 = vpop.eup %5970 }
 0x1a1   :  { %v713_v50 = vmul.f32 %v5971_v11, %v712_v12 }
 0x1a3   :  { %v7030_v35 = vadd.f32 %v714_v13, %v713_v50 }
 0x1a5   :  { %5707 = vmatmul.msk.f32.vlgmr.msrb.gmra.mxu3 %vm484_vm1, %v7030_v35  ;;  %5708 = vmatmul.msk.f32.vlgmr.msra.gmra.mxu0 %vm484_vm1, %v7030_v35 }
 0x1a6   :  { %5709 = vmatmul.msk.f32.vlgmr.msra.gmra.mxu1 %vm484_vm1, %v7030_v35  ;;  %5710 = vmatmul.msk.f32.vlgmr.msra.gmra.mxu2 %vm484_vm1, %v7030_v35 }
 0x1a7   :  { %982 = vmatpush.msrb.mxu3 %v6865_v14  ;;  %1002 = vmatpush.msra.mxu0 %v6867_v15 }
 0x1a8   :  { %1022 = vmatpush.msra.mxu1 %v6944_v34  ;;  %1068 = vmatpush.msra.mxu2 %v6898_v23 }
 0x1a9   :  { %983 = vmatpush.msrb.mxu3 %v6871_v16  ;;  %1003 = vmatpush.msra.mxu0 %v6873_v17 }
 0x1aa   :  { %1023 = vmatpush.msra.mxu1 %v6949_v36  ;;  %1069 = vmatpush.msra.mxu2 %v6903_v24 }
 0x1ab   :  { %984 = vmatpush.msrb.mxu3 %v6877_v18  ;;  %1004 = vmatpush.msra.mxu0 %v6879_v19 }
 0x1ac   :  { %1024 = vmatpush.msra.mxu1 %v6959_v39 }
 0x1ad   :  { %985 = vmatpush.msrb.mxu3 %v6883_v20  ;;  %1005 = vmatpush.msra.mxu0 %v6885_v21 }
 0x1ae   :  { %1025 = vmatpush.msra.mxu1 %v6967_v41 }
 0x223   :  { %v783_v47 = vpop.f32.mrf.mxu1 }
 0x224   :  { %v891_v11 = vadd.f32 %v783_v47, %v7009_v0 }
 0x228   :  { %v743_v48 = vpop.f32.mrf.mxu3 }
 0x229   :  { %v806_v51 = vadd.f32 %v743_v48, %v343_v8  ;;  %v803_v47 = vpop.f32.mrf.mxu2 }
 0x22b   :  { %v5711_v30 = vmul.f32 -1.442695, %v806_v51 }
 0x22d   :  { %5972 = vpow2.f32 %v5711_v30 }
 0x233   :  { %v5973_v40 = vpop.eup %5972 }
 0x234   :  { %v810_v42 = vadd.f32 1.0, %v5973_v40 }
 0x236   :  { %5974 = vrcp.f32 %v810_v42  ;;  %v822_v46 = vand.u32 2147483648, %v810_v42  ;;  %v820_v53 = vand.u32 2147483647, %v810_v42  ;;  %vm816_vm3 = vweird.f32 %v810_v42 }
 0x238   :  { %v823_v55 = vor.u32 1.1754944e-38, %v822_v46  ;;  %vm821_vm5 = vcmp.eq.f32.partialorder %v820_v53, 8.507059e+37 }
 0x23c   :  { %v5975_v43 = vpop.eup %5974 }
 0x23d   :  { %v812_v61 = vmul.f32 %v5975_v43, %v810_v42  ;;  %vm817_vm2 = vweird.f32 %v5975_v43 }
 0x23e   :  { %vm818_vm4 = vmor %vm816_vm3, %vm817_vm2 }
 0x23f   :  { %v813_v45 = vsub.f32 1.0, %v812_v61 }
 0x241   :  { %v814_v52 = vmul.f32 %v5975_v43, %v813_v45 }
 0x243   :  { %v815_v56 = vadd.f32 %v5975_v43, %v814_v52 }
 0x245   :  { %v819_v62 = vsel %vm818_vm4, %v5975_v43, %v815_v56 }
 0x246   :  { %v824_v60 = vsel %vm821_vm5, %v823_v55, %v819_v62 }
 0x247   :  { %v826_v5 = vmul.f32 %v6846_v9, %v824_v60  ;;  %v763_v9 = vpop.f32.mrf.mxu0 }
 0x248   :  { %v890_v51 = vadd.f32 %v763_v9, %v7007_v63 }
 0x249   :  { %5712 = vmatmul.msk.f32.vlgmr.msra.gmra.mxu3 %vm298_vm0, %v826_v5  ;;  %5713 = vmatmul.msk.f32.vlgmr.msrb.gmra.mxu0 %vm298_vm0, %v826_v5 }
 0x24a   :  { %5714 = vmatmul.msk.f32.vlgmr.msrb.gmra.mxu1 %vm298_vm0, %v826_v5  ;;  %1088 = vmatpush.msra.mxu3 %v6908_v25 }
 0x24b   :  { %1108 = vmatpush.msrb.mxu0 %v6915_v26  ;;  %1186 = vmatpush.msrb.mxu1 %v6823_v3 }
 0x24c   :  { %1089 = vmatpush.msra.mxu3 %v6920_v27 }
 0x24d   :  { %1109 = vmatpush.msrb.mxu0 %v6925_v28  ;;  %1187 = vmatpush.msrb.mxu1 %v6825_v4 }
 0x24f   :  { %1188 = vmatpush.msrb.mxu1 %v6832_v6 }
 0x251   :  { %1189 = vmatpush.msrb.mxu1 %v6835_v7 }
 0x2c6   :  { %v867_v12 = vpop.f32.mrf.mxu0 }
 0x2c7   :  { %v868_v50 = vadd.f32 %v867_v12, %v7013_v2 }
 0x2c9   :  { %v913_v13 = vadd.f32 %v891_v11, %v868_v50  ;;  %v887_v50 = vpop.f32.mrf.mxu1 }
 0x2cb   :  { %v5716_v8 = vmul.f32 -1.442695, %v913_v13 }
 0x2cc   :  { %v847_v48 = vpop.f32.mrf.mxu3 }
 0x2cd   :  { %5976 = vpow2.f32 %v5716_v8  ;;  %v848_v30 = vadd.f32 %v847_v48, %v7011_v1  ;;  %v892_v8 = vadd.f32 %v803_v47, %v7023_v54 }
 0x2cf   :  { %v893_v32 = vadd.f32 %v890_v51, %v848_v30 }
 0x2d1   :  { %v5715_v40 = vmul.f32 -1.442695, %v893_v32 }
 0x2d3   :  { %v5977_v42 = vpop.eup %5976  ;;  %5978 = vpow2.f32 %v5715_v40  ;;  %v888_v40 = vadd.f32 %v887_v50, %v7025_v31 }
 0x2d4   :  { %v917_v43 = vadd.f32 1.0, %v5977_v42 }
 0x2d6   :  { %5980 = vrcp.f32 %v917_v43  ;;  %v929_v32 = vand.u32 2147483648, %v917_v43  ;;  %vm923_vm11 = vweird.f32 %v917_v43 }
 0x2d9   :  { %v5979_v61 = vpop.eup %5978 }
 0x2da   :  { %v897_v45 = vadd.f32 1.0, %v5979_v61  ;;  %v927_v61 = vand.u32 2147483647, %v917_v43 }
 0x2dc   :  { %5982 = vrcp.f32 %v897_v45  ;;  %v5981_v46 = vpop.eup %5980  ;;  %v909_v60 = vand.u32 2147483648, %v897_v45  ;;  %v907_v9 = vand.u32 2147483647, %v897_v45  ;;  %vm903_vm7 = vweird.f32 %v897_v45 }
 0x2dd   :  { %v919_v52 = vmul.f32 %v5981_v46, %v917_v43  ;;  %vm924_vm10 = vweird.f32 %v5981_v46  ;;  %vm928_vm13 = vcmp.eq.f32.partialorder %v927_v61, 8.507059e+37  ;;  %v366_v43 = vadd.f32 %v6927_v29, %v7001_v57 }
 0x2de   :  { %v910_v13 = vor.u32 1.1754944e-38, %v909_v60  ;;  %vm908_vm9 = vcmp.eq.f32.partialorder %v907_v9, 8.507059e+37  ;;  %vm925_vm12 = vmor %vm923_vm11, %vm924_vm10 }
 0x2df   :  { %v920_v55 = vsub.f32 1.0, %v919_v52 }
 0x2e1   :  { %v921_v12 = vmul.f32 %v5981_v46, %v920_v55 }
 0x2e2   :  { %v5983_v53 = vpop.eup %5982 }
 0x2e3   :  { %v899_v56 = vmul.f32 %v5983_v53, %v897_v45  ;;  %vm904_vm6 = vweird.f32 %v5983_v53  ;;  %v922_v51 = vadd.f32 %v5981_v46, %v921_v12  ;;  %v930_v45 = vor.u32 1.1754944e-38, %v929_v32 }
 0x2e4   :  { %vm905_vm8 = vmor %vm903_vm7, %vm904_vm6 }
 0x2e5   :  { %v900_v62 = vsub.f32 1.0, %v899_v56  ;;  %v926_v56 = vsel %vm925_vm12, %v5981_v46, %v922_v51 }
 0x2e6   :  { %v931_v55 = vsel %vm928_vm13, %v930_v45, %v926_v56  ;;  %vm1388_vm13 = vcmp.eq.s32.totalorder %v6956_v38, 3 }
 0x2e7   :  { %v901_v5 = vmul.f32 %v5983_v53, %v900_v62  ;;  %v936_v62 = vsub.f32 1.0, %v931_v55 }
 0x2e9   :  { %v902_v11 = vadd.f32 %v5983_v53, %v901_v5 }
 0x2eb   :  { %v906_v48 = vsel %vm905_vm8, %v5983_v53, %v902_v11  ;;  %v938_v53 = vmul.f32 %v931_v55, %v7030_v35  ;;  %v1165_v11 = vsel %vm1164_vm14, 1, %v6670_v37 }
 0x2ec   :  { %v911_v30 = vsel %vm908_vm9, %v910_v13, %v906_v48  ;;  %1167 = vperm.xlu1 %5954, %v1165_v11  }
 0x2ed   :  { %v933_v42 = vmul.f32 %v911_v30, %v892_v8 }
 0x2ef   :  { %v934_v52 = vadd.f32 %v933_v42, %v888_v40 }
 0x2f1   :  { %5984 = vtanh.f32 %v934_v52 }
 0x2f7   :  { %v5985_v60 = vpop.eup %5984 }
 0x2f8   :  { %v937_v5 = vmul.f32 %v5985_v60, %v936_v62 }
 0x2fa   :  { %v7077_v9 = vadd.f32 %v938_v53, %v937_v5 }
 0x2fc   :  { %5717 = vmatmul.msk.f32.vlgmr.msrb.gmra.mxu2 %vm484_vm1, %v7077_v9  ;;  %5718 = vmatmul.msk.f32.vlgmr.msrb.gmra.mxu3 %vm484_vm1, %v7077_v9 }
 0x2fd   :  { %5719 = vmatmul.msk.f32.vlgmr.msra.gmra.mxu0 %vm484_vm1, %v7077_v9  ;;  %5720 = vmatmul.msk.f32.vlgmr.msra.gmra.mxu1 %vm484_vm1, %v7077_v9 }
 0x2fe   :  { %1206 = vmatpush.msrb.mxu2 %v6865_v14  ;;  %1226 = vmatpush.msrb.mxu3 %v6867_v15 }
 0x2ff   :  { %1246 = vmatpush.msra.mxu0 %v6944_v34  ;;  %1292 = vmatpush.msra.mxu1 %v6898_v23 }
 0x300   :  { %1207 = vmatpush.msrb.mxu2 %v6871_v16  ;;  %1227 = vmatpush.msrb.mxu3 %v6873_v17 }
 0x301   :  { %1247 = vmatpush.msra.mxu0 %v6949_v36  ;;  %1293 = vmatpush.msra.mxu1 %v6903_v24 }
 0x302   :  { %1208 = vmatpush.msrb.mxu2 %v6877_v18  ;;  %1228 = vmatpush.msrb.mxu3 %v6879_v19 }
 0x303   :  { %1248 = vmatpush.msra.mxu0 %v6959_v39 }
 0x304   :  { %1209 = vmatpush.msrb.mxu2 %v6883_v20  ;;  %1229 = vmatpush.msrb.mxu3 %v6885_v21 }
 0x305   :  { %1249 = vmatpush.msra.mxu0 %v6967_v41 }
 0x37a   :  { %v1007_v45 = vpop.f32.mrf.mxu0 }
 0x37b   :  { %v1115_v60 = vadd.f32 %v1007_v45, %v7009_v0 }
 0x37f   :  { %v967_v46 = vpop.f32.mrf.mxu2 }
 0x380   :  { %v1030_v47 = vadd.f32 %v967_v46, %v366_v43 }
 0x382   :  { %v5721_v12 = vmul.f32 -1.442695, %v1030_v47 }
 0x384   :  { %5986 = vpow2.f32 %v5721_v12 }
 0x38a   :  { %v5987_v50 = vpop.eup %5986 }
 0x38b   :  { %v1034_v13 = vadd.f32 1.0, %v5987_v50 }
 0x38d   :  { %5988 = vrcp.f32 %v1034_v13  ;;  %v1046_v30 = vand.u32 2147483648, %v1034_v13  ;;  %v1044_v40 = vand.u32 2147483647, %v1034_v13  ;;  %vm1040_vm2 = vweird.f32 %v1034_v13 }
 0x38f   :  { %v1047_v42 = vor.u32 1.1754944e-38, %v1046_v30  ;;  %vm1045_vm4 = vcmp.eq.f32.partialorder %v1044_v40, 8.507059e+37 }
 0x393   :  { %v5989_v8 = vpop.eup %5988 }
 0x394   :  { %v1036_v48 = vmul.f32 %v5989_v8, %v1034_v13  ;;  %vm1041_vm15 = vweird.f32 %v5989_v8 }
 0x395   :  { %vm1042_vm3 = vmor %vm1040_vm2, %vm1041_vm15 }
 0x396   :  { %v1037_v51 = vsub.f32 1.0, %v1036_v48 }
 0x398   :  { %v1038_v32 = vmul.f32 %v5989_v8, %v1037_v51 }
 0x39a   :  { %v1039_v57 = vadd.f32 %v5989_v8, %v1038_v32 }
 0x39c   :  { %v1043_v61 = vsel %vm1042_vm3, %v5989_v8, %v1039_v57 }
 0x39d   :  { %v1048_v52 = vsel %vm1045_vm4, %v1047_v42, %v1043_v61 }
 0x39e   :  { %v1050_v56 = vmul.f32 %v6851_v10, %v1048_v52  ;;  %v987_v10 = vpop.f32.mrf.mxu3 }
 0x39f   :  { %v1114_v53 = vadd.f32 %v987_v10, %v7007_v63  ;;  %v1027_v10 = vpop.f32.mrf.mxu1 }
 0x3a0   :  { %5722 = vmatmul.msk.f32.vlgmr.msra.gmra.mxu2 %vm298_vm0, %v1050_v56  ;;  %5723 = vmatmul.msk.f32.vlgmr.msra.gmra.mxu3 %vm298_vm0, %v1050_v56 }
 0x3a1   :  { %5724 = vmatmul.msk.f32.vlgmr.msrb.gmra.mxu0 %vm298_vm0, %v1050_v56  ;;  %1312 = vmatpush.msra.mxu2 %v6908_v25 }
 0x3a2   :  { %1332 = vmatpush.msra.mxu3 %v6915_v26  ;;  %1410 = vmatpush.msrb.mxu0 %v6823_v3 }
 0x3a3   :  { %1313 = vmatpush.msra.mxu2 %v6920_v27 }
 0x3a4   :  { %1333 = vmatpush.msra.mxu3 %v6925_v28  ;;  %1411 = vmatpush.msrb.mxu0 %v6825_v4 }
 0x3a6   :  { %1412 = vmatpush.msrb.mxu0 %v6832_v6 }
 0x3a8   :  { %1413 = vmatpush.msrb.mxu0 %v6835_v7 }
 0x423   :  { %v1071_v55 = vpop.f32.mrf.mxu2  ;;  %v1091_v62 = vpop.f32.mrf.mxu3 }
 0x424   :  { %v1072_v5 = vadd.f32 %v1071_v55, %v7011_v1  ;;  %v1092_v43 = vadd.f32 %v1091_v62, %v7013_v2  ;;  %v1111_v62 = vpop.f32.mrf.mxu0 }
 0x426   :  { %v1117_v46 = vadd.f32 %v1114_v53, %v1072_v5  ;;  %v1137_v47 = vadd.f32 %v1115_v60, %v1092_v43  ;;  %v1116_v53 = vadd.f32 %v1027_v10, %v7023_v54 }
 0x428   :  { %v5725_v12 = vmul.f32 -1.442695, %v1117_v46  ;;  %v5726_v11 = vmul.f32 -1.442695, %v1137_v47  ;;  %v1112_v47 = vadd.f32 %v1111_v62, %v7025_v31 }
 0x42a   :  { %5990 = vpow2.f32 %v5725_v12 }
 0x42b   :  { %5992 = vpow2.f32 %v5726_v11 }
 0x430   :  { %v5991_v50 = vpop.eup %5990 }
 0x431   :  { %v5993_v13 = vpop.eup %5992  ;;  %v1121_v8 = vadd.f32 1.0, %v5991_v50 }
 0x432   :  { %v1141_v48 = vadd.f32 1.0, %v5993_v13 }
 0x433   :  { %5994 = vrcp.f32 %v1121_v8  ;;  %v1133_v42 = vand.u32 2147483648, %v1121_v8  ;;  %v1131_v56 = vand.u32 2147483647, %v1121_v8  ;;  %vm1127_vm6 = vweird.f32 %v1121_v8 }
 0x434   :  { %5996 = vrcp.f32 %v1141_v48  ;;  %v1153_v11 = vand.u32 2147483648, %v1141_v48  ;;  %vm1147_vm10 = vweird.f32 %v1141_v48  ;;  %v1151_v50 = vand.u32 2147483647, %v1141_v48 }
 0x435   :  { %v1134_v60 = vor.u32 1.1754944e-38, %v1133_v42  ;;  %vm1132_vm8 = vcmp.eq.f32.partialorder %v1131_v56, 8.507059e+37 }
 0x436   :  { %vm1152_vm12 = vcmp.eq.f32.partialorder %v1151_v50, 8.507059e+37 }
 0x439   :  { %v5995_v51 = vpop.eup %5994 }
 0x43a   :  { %v5997_v30 = vpop.eup %5996  ;;  %v1123_v32 = vmul.f32 %v5995_v51, %v1121_v8  ;;  %vm1128_vm5 = vweird.f32 %v5995_v51  ;;  %v1154_v8 = vor.u32 1.1754944e-38, %v1153_v11 }
 0x43b   :  { %v1143_v40 = vmul.f32 %v5997_v30, %v1141_v48  ;;  %vm1129_vm7 = vmor %vm1127_vm6, %vm1128_vm5  ;;  %vm1148_vm9 = vweird.f32 %v5997_v30 }
 0x43c   :  { %v1124_v57 = vsub.f32 1.0, %v1123_v32  ;;  %vm1149_vm11 = vmor %vm1147_vm10, %vm1148_vm9 }
 0x43d   :  { %v1144_v61 = vsub.f32 1.0, %v1143_v40 }
 0x43e   :  { %v1125_v52 = vmul.f32 %v5995_v51, %v1124_v57 }
 0x43f   :  { %v1145_v45 = vmul.f32 %v5997_v30, %v1144_v61 }
 0x440   :  { %v1126_v55 = vadd.f32 %v5995_v51, %v1125_v52 }
 0x441   :  { %v1146_v46 = vadd.f32 %v5997_v30, %v1145_v45 }
 0x442   :  { %v1130_v5 = vsel %vm1129_vm7, %v5995_v51, %v1126_v55 }
 0x443   :  { %v1135_v43 = vsel %vm1132_vm8, %v1134_v60, %v1130_v5  ;;  %v1150_v32 = vsel %vm1149_vm11, %v5997_v30, %v1146_v46 }
 0x444   :  { %v1157_v12 = vmul.f32 %v1135_v43, %v1116_v53  ;;  %v1155_v40 = vsel %vm1152_vm12, %v1154_v8, %v1150_v32  ;;  %vm1612_vm12 = vcmp.eq.s32.totalorder %v6956_v38, 4 }
 0x445   :  { %v1160_v57 = vsub.f32 1.0, %v1155_v40  ;;  %v1162_v61 = vmul.f32 %v1155_v40, %v7077_v9 }
 0x446   :  { %v1158_v13 = vadd.f32 %v1157_v12, %v1112_v47 }
 0x448   :  { %5998 = vtanh.f32 %v1158_v13 }
 0x44e   :  { %v5999_v42 = vpop.eup %5998 }
 0x44f   :  { %v1161_v51 = vmul.f32 %v5999_v42, %v1160_v57 }
 0x451   :  { %v7124_v52 = vadd.f32 %v1162_v61, %v1161_v51 }
 0x453   :  { %5727 = vmatmul.msk.f32.vlgmr.msrb.gmra.mxu1 %vm484_vm1, %v7124_v52  ;;  %5728 = vmatmul.msk.f32.vlgmr.msrb.gmra.mxu2 %vm484_vm1, %v7124_v52 }
 0x454   :  { %5729 = vmatmul.msk.f32.vlgmr.msrb.gmra.mxu3 %vm484_vm1, %v7124_v52  ;;  %5730 = vmatmul.msk.f32.vlgmr.msra.gmra.mxu0 %vm484_vm1, %v7124_v52 }
 0x455   :  { %1430 = vmatpush.msrb.mxu1 %v6865_v14  ;;  %1450 = vmatpush.msrb.mxu2 %v6867_v15  ;;  %v389_v14 = vadd.f32 %v6927_v29, %v7019_v44 }
 0x456   :  { %1470 = vmatpush.msrb.mxu3 %v6944_v34  ;;  %1516 = vmatpush.msra.mxu0 %v6898_v23 }
 0x457   :  { %1431 = vmatpush.msrb.mxu1 %v6871_v16  ;;  %1451 = vmatpush.msrb.mxu2 %v6873_v17 }
 0x458   :  { %1471 = vmatpush.msrb.mxu3 %v6949_v36  ;;  %1517 = vmatpush.msra.mxu0 %v6903_v24 }
 0x459   :  { %1432 = vmatpush.msrb.mxu1 %v6877_v18  ;;  %1452 = vmatpush.msrb.mxu2 %v6879_v19  ;;  %v1389_v18 = vsel %vm1388_vm13, 1, %v6670_v37 }
 0x45a   :  { %1472 = vmatpush.msrb.mxu3 %v6959_v39  ;;  %1391 = vperm.xlu1 %5954, %v1389_v18  }
 0x45b   :  { %1433 = vmatpush.msrb.mxu1 %v6883_v20  ;;  %1453 = vmatpush.msrb.mxu2 %v6885_v21 }
 0x45c   :  { %1473 = vmatpush.msrb.mxu3 %v6967_v41 }
 0x4d0   :  { %v1191_v15 = vpop.f32.mrf.mxu1 }
 0x4d1   :  { %v1254_v16 = vadd.f32 %v1191_v15, %v389_v14  ;;  %v1251_v57 = vpop.f32.mrf.mxu0 }
 0x4d2   :  { %v1340_v15 = vadd.f32 %v1251_v57, %v7023_v54 }
 0x4d3   :  { %v5731_v17 = vmul.f32 -1.442695, %v1254_v16 }
 0x4d5   :  { %6000 = vpow2.f32 %v5731_v17 }
 0x4db   :  { %v6001_v19 = vpop.eup %6000 }
 0x4dc   :  { %v1258_v23 = vadd.f32 1.0, %v6001_v19 }
 0x4de   :  { %6002 = vrcp.f32 %v1258_v23  ;;  %v1270_v48 = vand.u32 2147483648, %v1258_v23  ;;  %v1268_v56 = vand.u32 2147483647, %v1258_v23  ;;  %vm1264_vm15 = vweird.f32 %v1258_v23 }
 0x4e0   :  { %v1271_v44 = vor.u32 1.1754944e-38, %v1270_v48  ;;  %vm1269_vm3 = vcmp.eq.f32.partialorder %v1268_v56, 8.507059e+37 }
 0x4e4   :  { %v6003_v20 = vpop.eup %6002 }
 0x4e5   :  { %v1260_v24 = vmul.f32 %v6003_v20, %v1258_v23  ;;  %vm1265_vm14 = vweird.f32 %v6003_v20 }
 0x4e6   :  { %vm1266_vm2 = vmor %vm1264_vm15, %vm1265_vm14 }
 0x4e7   :  { %v1261_v21 = vsub.f32 1.0, %v1260_v24 }
 0x4e9   :  { %v1262_v30 = vmul.f32 %v6003_v20, %v1261_v21 }
 0x4eb   :  { %v1263_v29 = vadd.f32 %v6003_v20, %v1262_v30 }
 0x4ed   :  { %v1267_v10 = vsel %vm1266_vm2, %v6003_v20, %v1263_v29 }
 0x4ee   :  { %v1272_v45 = vsel %vm1269_vm3, %v1271_v44, %v1267_v10 }
 0x4ef   :  { %v1274_v55 = vmul.f32 %v6942_v33, %v1272_v45  ;;  %v1211_v33 = vpop.f32.mrf.mxu2 }
 0x4f0   :  { %v1338_v60 = vadd.f32 %v1211_v33, %v7007_v63 }
 0x4f1   :  { %5732 = vmatmul.msk.f32.vlgmr.msra.gmra.mxu1 %vm298_vm0, %v1274_v55  ;;  %5733 = vmatmul.msk.f32.vlgmr.msra.gmra.mxu2 %vm298_vm0, %v1274_v55 }
 0x4f2   :  { %5734 = vmatmul.msk.f32.vlgmr.msra.gmra.mxu3 %vm298_vm0, %v1274_v55  ;;  %1536 = vmatpush.msra.mxu1 %v6908_v25 }
 0x4f3   :  { %1556 = vmatpush.msra.mxu2 %v6915_v26  ;;  %1634 = vmatpush.msra.mxu3 %v6823_v3  ;;  %v1231_v26 = vpop.f32.mrf.mxu3 }
 0x4f4   :  { %1537 = vmatpush.msra.mxu1 %v6920_v27  ;;  %v1339_v27 = vadd.f32 %v1231_v26, %v7009_v0  ;;  %v7194_v26 = vld [vmem:[#allocation7 + $0x48] sm:$0xff] }
 0x4f5   :  { %1557 = vmatpush.msra.mxu2 %v6925_v28  ;;  %1635 = vmatpush.msra.mxu3 %v6825_v4 }
 0x4f7   :  { %1636 = vmatpush.msra.mxu3 %v6832_v6 }
 0x4f9   :  { %1637 = vmatpush.msra.mxu3 %v6835_v7 }
 0x56e   :  { %v1295_v62 = vpop.f32.mrf.mxu1 }
 0x56f   :  { %v1296_v25 = vadd.f32 %v1295_v62, %v7011_v1 }
 0x571   :  { %v1341_v53 = vadd.f32 %v1338_v60, %v1296_v25  ;;  %v7181_v60 = vld [vmem:[#allocation7 + $0x68] sm:$0xff]  ;;  %v7184_v25 = vld [vmem:[#allocation7 + $0x70] sm:$0xff] }
 0x573   :  { %v5735_v5 = vmul.f32 -1.442695, %v1341_v53  ;;  %v7191_v53 = vld [vmem:[%s8620_s6 + $0x18] sm:$0xff] }
 0x574   :  { %v1315_v3 = vpop.f32.mrf.mxu2 }
 0x575   :  { %6004 = vpow2.f32 %v5735_v5  ;;  %v1316_v28 = vadd.f32 %v1315_v3, %v7013_v2  ;;  %v1335_v51 = vpop.f32.mrf.mxu3  ;;  %v7197_v5 = vld [vmem:[#allocation7 + $0x50] sm:$0xff]  ;;  %v7207_v3 = vld [vmem:[#allocation7 + $0x28] sm:$0xff] }
 0x576   :  { %v1336_v18 = vadd.f32 %v1335_v51, %v7025_v31 }
 0x577   :  { %v1361_v4 = vadd.f32 %v1339_v27, %v1316_v28  ;;  %v7210_v27 = vld [vmem:[#allocation7 + $0x30] sm:$0xff]  ;;  %v7214_v28 = vld [vmem:[#allocation7 + $0x8] sm:$0xff] }
 0x579   :  { %v5736_v43 = vmul.f32 -1.442695, %v1361_v4  ;;  %v7221_v4 = vld [vmem:[#allocation6] ss:$0 sm:$0xff] }
 0x57b   :  { %v6005_v6 = vpop.eup %6004  ;;  %6006 = vpow2.f32 %v5736_v43  ;;  %v412_v43 = vadd.f32 %v7221_v4, %v6887_v22 }
 0x57c   :  { %v1345_v7 = vadd.f32 1.0, %v6005_v6 }
 0x57e   :  { %6008 = vrcp.f32 %v1345_v7  ;;  %v1357_v13 = vand.u32 2147483648, %v1345_v7  ;;  %v1355_v8 = vand.u32 2147483647, %v1345_v7  ;;  %vm1351_vm5 = vweird.f32 %v1345_v7 }
 0x580   :  { %v1358_v14 = vor.u32 1.1754944e-38, %v1357_v13  ;;  %vm1356_vm7 = vcmp.eq.f32.partialorder %v1355_v8, 8.507059e+37 }
 0x581   :  { %v6007_v46 = vpop.eup %6006 }
 0x582   :  { %v1365_v47 = vadd.f32 1.0, %v6007_v46  ;;  %v1613_v46 = vsel %vm1612_vm12, 1, %v6670_v37 }
 0x583   :  { %1615 = vperm.xlu2 %5955, %v1613_v46  }
 0x584   :  { %v6009_v12 = vpop.eup %6008  ;;  %6010 = vrcp.f32 %v1365_v47  ;;  %v1377_v20 = vand.u32 2147483648, %v1365_v47  ;;  %v1375_v21 = vand.u32 2147483647, %v1365_v47  ;;  %vm1371_vm9 = vweird.f32 %v1365_v47 }
 0x585   :  { %v1347_v11 = vmul.f32 %v6009_v12, %v1345_v7  ;;  %vm1352_vm4 = vweird.f32 %v6009_v12 }
 0x586   :  { %vm1353_vm6 = vmor %vm1351_vm5, %vm1352_vm4  ;;  %v1378_v29 = vor.u32 1.1754944e-38, %v1377_v20  ;;  %vm1376_vm11 = vcmp.eq.f32.partialorder %v1375_v21, 8.507059e+37 }
 0x587   :  { %v1348_v50 = vsub.f32 1.0, %v1347_v11 }
 0x589   :  { %v1349_v32 = vmul.f32 %v6009_v12, %v1348_v50 }
 0x58a   :  { %v6011_v40 = vpop.eup %6010 }
 0x58b   :  { %v1367_v42 = vmul.f32 %v6011_v40, %v1365_v47  ;;  %v1350_v61 = vadd.f32 %v6009_v12, %v1349_v32  ;;  %vm1372_vm8 = vweird.f32 %v6011_v40 }
 0x58c   :  { %vm1373_vm10 = vmor %vm1371_vm9, %vm1372_vm8 }
 0x58d   :  { %v1368_v16 = vsub.f32 1.0, %v1367_v42  ;;  %v1354_v17 = vsel %vm1353_vm6, %v6009_v12, %v1350_v61  ;;  %v6273_v42 = vld [vmem:[%s8660_s28 + $0x10] sm:$0xf]  ;;  %v7236_v61 = vld [vmem:[%s8620_s6 + $0x20] sm:$0xff] }
 0x58e   :  { %v1359_v19 = vsel %vm1356_vm7, %v1358_v14, %v1354_v17  ;;  %v7242_v14 = vld [vmem:[%s8620_s6 + $0x28] sm:$0xff]  ;;  %v7257_v17 = vld [vmem:[%s8620_s6 + $0x10] sm:$0xff] }
 0x58f   :  { %v1369_v23 = vmul.f32 %v6011_v40, %v1368_v16  ;;  %v1381_v24 = vmul.f32 %v1359_v19, %v1340_v15  ;;  %v7245_v15 = vld [vmem:[#allocation7 + $0x60] sm:$0xff]  ;;  %v7251_v16 = vld [vmem:[%s8620_s6 + $0x8] sm:$0xff] }
 0x590   :  { %v7263_v19 = vld [vmem:[#allocation7 + $0x20] sm:$0xff] }
 0x591   :  { %v1370_v48 = vadd.f32 %v6011_v40, %v1369_v23  ;;  %v1382_v30 = vadd.f32 %v1381_v24, %v1336_v18  ;;  %v7260_v18 = vld [vmem:[#allocation7 + $0x40] sm:$0xff] }
 0x592   :  { %v7266_v23 = vld [vmem:[#allocation7] sm:$0xff] }
 0x593   :  { %v1374_v56 = vsel %vm1373_vm10, %v6011_v40, %v1370_v48  ;;  %6012 = vtanh.f32 %v1382_v30 }
 0x594   :  { %v1379_v44 = vsel %vm1376_vm11, %v1378_v29, %v1374_v56 }
 0x595   :  { %v1384_v10 = vsub.f32 1.0, %v1379_v44  ;;  %v1386_v33 = vmul.f32 %v1379_v44, %v7124_v52 }
 0x599   :  { %v6013_v45 = vpop.eup %6012 }
 0x59a   :  { %v1385_v55 = vmul.f32 %v6013_v45, %v1384_v10 }
 0x59c   :  { %v7171_v62 = vadd.f32 %v1386_v33, %v1385_v55 }
 0x59e   :  { %5737 = vmatmul.msk.f32.vlgmr.msrb.gmra.mxu0 %vm484_vm1, %v7171_v62  ;;  %5738 = vmatmul.msk.f32.vlgmr.msrb.gmra.mxu1 %vm484_vm1, %v7171_v62 }
 0x59f   :  { %5739 = vmatmul.msk.f32.vlgmr.msrb.gmra.mxu2 %vm484_vm1, %v7171_v62  ;;  %5740 = vmatmul.msk.f32.vlgmr.msrb.gmra.mxu3 %vm484_vm1, %v7171_v62 }
 0x5a0   :  { %1654 = vmatpush.msrb.mxu0 %v7181_v60  ;;  %1674 = vmatpush.msrb.mxu1 %v7184_v25 }
 0x5a1   :  { %1694 = vmatpush.msrb.mxu2 %v6944_v34  ;;  %1740 = vmatpush.msrb.mxu3 %v7191_v53  ;;  %v7204_v34 = vld [vmem:[%s8620_s6] sm:$0xff] }
 0x5a2   :  { %1655 = vmatpush.msrb.mxu0 %v7194_v26  ;;  %1675 = vmatpush.msrb.mxu1 %v7197_v5 }
 0x5a3   :  { %1695 = vmatpush.msrb.mxu2 %v6949_v36  ;;  %1741 = vmatpush.msrb.mxu3 %v7204_v34  ;;  %v7217_v36 = vld [vmem:[#allocation7 + $0x10] sm:$0xff] }
 0x5a4   :  { %1656 = vmatpush.msrb.mxu0 %v7207_v3  ;;  %1676 = vmatpush.msrb.mxu1 %v7210_v27 }
 0x5a5   :  { %1696 = vmatpush.msrb.mxu2 %v6959_v39 }
 0x5a6   :  { %1657 = vmatpush.msrb.mxu0 %v7214_v28  ;;  %1677 = vmatpush.msrb.mxu1 %v7217_v36 }
 0x5a7   :  { %1697 = vmatpush.msrb.mxu2 %v6967_v41 }
 0x61b   :  { %v1415_v6 = vpop.f32.mrf.mxu0  ;;  %v1435_v20 = vpop.f32.mrf.mxu1 }
 0x61c   :  { %v1478_v7 = vadd.f32 %v1415_v6, %v412_v43  ;;  %v1562_v30 = vadd.f32 %v1435_v20, %v7007_v63 }
 0x61e   :  { %v5741_v39 = vmul.f32 -1.442695, %v1478_v7 }
 0x620   :  { %6014 = vpow2.f32 %v5741_v39 }
 0x622   :  { %v1455_v24 = vpop.f32.mrf.mxu2 }
 0x623   :  { %v1563_v56 = vadd.f32 %v1455_v24, %v7009_v0 }
 0x626   :  { %v6015_v47 = vpop.eup %6014 }
 0x627   :  { %v1482_v12 = vadd.f32 1.0, %v6015_v47 }
 0x629   :  { %6016 = vrcp.f32 %v1482_v12  ;;  %v1494_v13 = vand.u32 2147483648, %v1482_v12  ;;  %v1492_v8 = vand.u32 2147483647, %v1482_v12  ;;  %vm1488_vm14 = vweird.f32 %v1482_v12 }
 0x62b   :  { %v1495_v40 = vor.u32 1.1754944e-38, %v1494_v13  ;;  %vm1493_vm2 = vcmp.eq.f32.partialorder %v1492_v8, 8.507059e+37 }
 0x62f   :  { %v6017_v11 = vpop.eup %6016 }
 0x630   :  { %v1484_v50 = vmul.f32 %v6017_v11, %v1482_v12  ;;  %vm1489_vm13 = vweird.f32 %v6017_v11 }
 0x631   :  { %vm1490_vm15 = vmor %vm1488_vm14, %vm1489_vm13 }
 0x632   :  { %v1485_v41 = vsub.f32 1.0, %v1484_v50 }
 0x634   :  { %v1486_v32 = vmul.f32 %v6017_v11, %v1485_v41 }
 0x636   :  { %v1487_v22 = vadd.f32 %v6017_v11, %v1486_v32 }
 0x638   :  { %v1491_v38 = vsel %vm1490_vm15, %v6017_v11, %v1487_v22  ;;  %v1475_v22 = vpop.f32.mrf.mxu3 }
 0x639   :  { %v1496_v57 = vsel %vm1493_vm2, %v1495_v40, %v1491_v38 }
 0x63a   :  { %v1498_v51 = vmul.f32 %v6273_v42, %v1496_v57 }
 0x63c   :  { %5742 = vmatmul.msk.f32.vlgmr.msra.gmra.mxu0 %vm298_vm0, %v1498_v51  ;;  %5743 = vmatmul.msk.f32.vlgmr.msra.gmra.mxu1 %vm298_vm0, %v1498_v51 }
 0x63d   :  { %5744 = vmatmul.msk.f32.vlgmr.msra.gmra.mxu2 %vm298_vm0, %v1498_v51  ;;  %1760 = vmatpush.msra.mxu0 %v7236_v61  ;;  %v1564_v51 = vadd.f32 %v1475_v22, %v7023_v54 }
 0x63e   :  { %1780 = vmatpush.msra.mxu1 %v7242_v14  ;;  %1858 = vmatpush.msra.mxu2 %v7245_v15 }
 0x63f   :  { %1761 = vmatpush.msra.mxu0 %v7251_v16 }
 0x640   :  { %1781 = vmatpush.msra.mxu1 %v7257_v17  ;;  %1859 = vmatpush.msra.mxu2 %v7260_v18 }
 0x642   :  { %1860 = vmatpush.msra.mxu2 %v7263_v19 }
 0x644   :  { %1861 = vmatpush.msra.mxu2 %v7266_v23 }
 0x6b9   :  { %v1519_v21 = vpop.f32.mrf.mxu0  ;;  %v1539_v48 = vpop.f32.mrf.mxu1 }
 0x6ba   :  { %v1520_v29 = vadd.f32 %v1519_v21, %v7011_v1  ;;  %v1540_v44 = vadd.f32 %v1539_v48, %v7013_v2 }
 0x6bc   :  { %v1565_v10 = vadd.f32 %v1562_v30, %v1520_v29  ;;  %v1585_v45 = vadd.f32 %v1563_v56, %v1540_v44 }
 0x6be   :  { %v5745_v55 = vmul.f32 -1.442695, %v1565_v10  ;;  %v5746_v33 = vmul.f32 -1.442695, %v1585_v45 }
 0x6c0   :  { %6018 = vpow2.f32 %v5745_v55  ;;  %v1559_v57 = vpop.f32.mrf.mxu2 }
 0x6c1   :  { %6020 = vpow2.f32 %v5746_v33  ;;  %v1560_v30 = vadd.f32 %v1559_v57, %v7025_v31 }
 0x6c6   :  { %v6019_v43 = vpop.eup %6018 }
 0x6c7   :  { %v6021_v6 = vpop.eup %6020  ;;  %v1569_v7 = vadd.f32 1.0, %v6019_v43 }
 0x6c8   :  { %v1589_v39 = vadd.f32 1.0, %v6021_v6 }
 0x6c9   :  { %6022 = vrcp.f32 %v1569_v7  ;;  %v1581_v13 = vand.u32 2147483648, %v1569_v7  ;;  %v1579_v8 = vand.u32 2147483647, %v1569_v7  ;;  %vm1575_vm4 = vweird.f32 %v1569_v7 }
 0x6ca   :  { %6024 = vrcp.f32 %v1589_v39  ;;  %v1601_v48 = vand.u32 2147483648, %v1589_v39  ;;  %vm1595_vm8 = vweird.f32 %v1589_v39  ;;  %v1599_v29 = vand.u32 2147483647, %v1589_v39 }
 0x6cb   :  { %v1582_v42 = vor.u32 1.1754944e-38, %v1581_v13  ;;  %vm1580_vm6 = vcmp.eq.f32.partialorder %v1579_v8, 8.507059e+37 }
 0x6cc   :  { %v1602_v45 = vor.u32 1.1754944e-38, %v1601_v48  ;;  %vm1600_vm10 = vcmp.eq.f32.partialorder %v1599_v29, 8.507059e+37  ;;  %v6287_v29 = vld [vmem:[%s8660_s28 + $0x14] sm:$0xf] }
 0x6cf   :  { %v6023_v46 = vpop.eup %6022 }
 0x6d0   :  { %v6025_v47 = vpop.eup %6024  ;;  %v1571_v12 = vmul.f32 %v6023_v46, %v1569_v7  ;;  %vm1576_vm3 = vweird.f32 %v6023_v46 }
 0x6d1   :  { %v1591_v11 = vmul.f32 %v6025_v47, %v1589_v39  ;;  %vm1577_vm5 = vmor %vm1575_vm4, %vm1576_vm3  ;;  %vm1596_vm7 = vweird.f32 %v6025_v47  ;;  %v7288_v39 = vld [vmem:[#allocation7 + $0x78] sm:$0xff] }
 0x6d2   :  { %v1572_v50 = vsub.f32 1.0, %v1571_v12  ;;  %vm1597_vm9 = vmor %vm1595_vm8, %vm1596_vm7  ;;  %v7300_v12 = vld [vmem:[#allocation7 + $0x38] sm:$0xff] }
 0x6d3   :  { %v1592_v41 = vsub.f32 1.0, %v1591_v11  ;;  %v7305_v11 = vld [vmem:[#allocation7 + $0x18] sm:$0xff] }
 0x6d4   :  { %v1573_v32 = vmul.f32 %v6023_v46, %v1572_v50  ;;  %v435_v50 = vadd.f32 %v7221_v4, %v7003_v58 }
 0x6d5   :  { %v1593_v40 = vmul.f32 %v6025_v47, %v1592_v41 }
 0x6d6   :  { %v1574_v38 = vadd.f32 %v6023_v46, %v1573_v32  ;;  %v7313_v32 = vld [vmem:[%s8661_s0] sm:$0xf] }
 0x6d7   :  { %v1594_v21 = vadd.f32 %v6025_v47, %v1593_v40  ;;  %vm1836_vm11 = vcmp.eq.s32.totalorder %v7313_v32, 5 }
 0x6d8   :  { %v1578_v20 = vsel %vm1577_vm5, %v6023_v46, %v1574_v38  ;;  %v1837_v22 = vsel %vm1836_vm11, 1, %v6670_v37 }
 0x6d9   :  { %v1583_v24 = vsel %vm1580_vm6, %v1582_v42, %v1578_v20  ;;  %v1598_v10 = vsel %vm1597_vm9, %v6025_v47, %v1594_v21  ;;  %v7294_v47 = vld [vmem:[#allocation7 + $0x58] sm:$0xff]  ;;  %1839 = vperm.xlu2 %5955, %v1837_v22  }
 0x6da   :  { %v1605_v56 = vmul.f32 %v1583_v24, %v1564_v51  ;;  %v1603_v55 = vsel %vm1600_vm10, %v1602_v45, %v1598_v10  ;;  %vm2060_vm10 = vcmp.eq.s32.totalorder %v7313_v32, 6 }
 0x6db   :  { %v1608_v33 = vsub.f32 1.0, %v1603_v55  ;;  %v1610_v7 = vmul.f32 %v1603_v55, %v7171_v62 }
 0x6dc   :  { %v1606_v44 = vadd.f32 %v1605_v56, %v1560_v30 }
 0x6de   :  { %6026 = vtanh.f32 %v1606_v44 }
 0x6e4   :  { %v6027_v43 = vpop.eup %6026 }
 0x6e5   :  { %v1609_v6 = vmul.f32 %v6027_v43, %v1608_v33 }
 0x6e7   :  { %v7276_v46 = vadd.f32 %v1610_v7, %v1609_v6 }
 0x6e9   :  { %5747 = vmatmul.msk.f32.vlgmr.msra.gmra.mxu3 %vm484_vm1, %v7276_v46  ;;  %5748 = vmatmul.msk.f32.vlgmr.msrb.gmra.mxu0 %vm484_vm1, %v7276_v46 }
 0x6ea   :  { %5749 = vmatmul.msk.f32.vlgmr.msrb.gmra.mxu1 %vm484_vm1, %v7276_v46  ;;  %5750 = vmatmul.msk.f32.vlgmr.msrb.gmra.mxu2 %vm484_vm1, %v7276_v46 }
 0x6eb   :  { %1878 = vmatpush.msra.mxu3 %v7181_v60  ;;  %1898 = vmatpush.msrb.mxu0 %v7184_v25 }
 0x6ec   :  { %1918 = vmatpush.msrb.mxu1 %v7288_v39  ;;  %1964 = vmatpush.msrb.mxu2 %v7191_v53 }
 0x6ed   :  { %1879 = vmatpush.msra.mxu3 %v7194_v26  ;;  %1899 = vmatpush.msrb.mxu0 %v7197_v5 }
 0x6ee   :  { %1919 = vmatpush.msrb.mxu1 %v7294_v47  ;;  %1965 = vmatpush.msrb.mxu2 %v7204_v34 }
 0x6ef   :  { %1880 = vmatpush.msra.mxu3 %v7207_v3  ;;  %1900 = vmatpush.msrb.mxu0 %v7210_v27 }
 0x6f0   :  { %1920 = vmatpush.msrb.mxu1 %v7300_v12 }
 0x6f1   :  { %1881 = vmatpush.msra.mxu3 %v7214_v28  ;;  %1901 = vmatpush.msrb.mxu0 %v7217_v36 }
 0x6f2   :  { %1921 = vmatpush.msrb.mxu1 %v7305_v11 }
 0x766   :  { %v1659_v10 = vpop.f32.mrf.mxu0 }
 0x767   :  { %v1679_v45 = vpop.f32.mrf.mxu1 }
 0x768   :  { %v1787_v33 = vadd.f32 %v1679_v45, %v7009_v0 }
 0x76c   :  { %v1639_v41 = vpop.f32.mrf.mxu3 }
 0x76d   :  { %v1702_v13 = vadd.f32 %v1639_v41, %v435_v50  ;;  %v1786_v50 = vadd.f32 %v1659_v10, %v7007_v63 }
 0x76f   :  { %v5751_v8 = vmul.f32 -1.442695, %v1702_v13 }
 0x771   :  { %6028 = vpow2.f32 %v5751_v8 }
 0x777   :  { %v6029_v40 = vpop.eup %6028 }
 0x778   :  { %v1706_v38 = vadd.f32 1.0, %v6029_v40 }
 0x77a   :  { %6030 = vrcp.f32 %v1706_v38  ;;  %v1718_v51 = vand.u32 2147483648, %v1706_v38  ;;  %v1716_v24 = vand.u32 2147483647, %v1706_v38  ;;  %vm1712_vm13 = vweird.f32 %v1706_v38 }
 0x77c   :  { %v1719_v48 = vor.u32 1.1754944e-38, %v1718_v51  ;;  %vm1717_vm15 = vcmp.eq.f32.partialorder %v1716_v24, 8.507059e+37 }
 0x780   :  { %v6031_v57 = vpop.eup %6030 }
 0x781   :  { %v1708_v42 = vmul.f32 %v6031_v57, %v1706_v38  ;;  %vm1713_vm12 = vweird.f32 %v6031_v57 }
 0x782   :  { %vm1714_vm14 = vmor %vm1712_vm13, %vm1713_vm12 }
 0x783   :  { %v1709_v58 = vsub.f32 1.0, %v1708_v42 }
 0x785   :  { %v1710_v20 = vmul.f32 %v6031_v57, %v1709_v58 }
 0x787   :  { %v1711_v21 = vadd.f32 %v6031_v57, %v1710_v20 }
 0x789   :  { %v1715_v30 = vsel %vm1714_vm14, %v6031_v57, %v1711_v21 }
 0x78a   :  { %v1720_v56 = vsel %vm1717_vm15, %v1719_v48, %v1715_v30  ;;  %v1699_v48 = vpop.f32.mrf.mxu2 }
 0x78b   :  { %v1722_v44 = vmul.f32 %v6287_v29, %v1720_v56  ;;  %v1788_v10 = vadd.f32 %v1699_v48, %v7023_v54 }
 0x78d   :  { %5752 = vmatmul.msk.f32.vlgmr.msrb.gmra.mxu3 %vm298_vm0, %v1722_v44  ;;  %5753 = vmatmul.msk.f32.vlgmr.msra.gmra.mxu0 %vm298_vm0, %v1722_v44 }
 0x78e   :  { %5754 = vmatmul.msk.f32.vlgmr.msra.gmra.mxu1 %vm298_vm0, %v1722_v44  ;;  %1984 = vmatpush.msrb.mxu3 %v7236_v61 }
 0x78f   :  { %2004 = vmatpush.msra.mxu0 %v7242_v14  ;;  %2082 = vmatpush.msra.mxu1 %v7245_v15 }
 0x790   :  { %1985 = vmatpush.msrb.mxu3 %v7251_v16 }
 0x791   :  { %2005 = vmatpush.msra.mxu0 %v7257_v17  ;;  %2083 = vmatpush.msra.mxu1 %v7260_v18 }
 0x793   :  { %2084 = vmatpush.msra.mxu1 %v7263_v19 }
 0x795   :  { %2085 = vmatpush.msra.mxu1 %v7266_v23 }
 0x80a   :  { %v1763_v55 = vpop.f32.mrf.mxu0 }
 0x80b   :  { %v1764_v43 = vadd.f32 %v1763_v55, %v7013_v2  ;;  %v1783_v29 = vpop.f32.mrf.mxu1 }
 0x80d   :  { %v1809_v6 = vadd.f32 %v1787_v33, %v1764_v43 }
 0x80f   :  { %v5756_v7 = vmul.f32 -1.442695, %v1809_v6  ;;  %v1784_v6 = vadd.f32 %v1783_v29, %v7025_v31 }
 0x810   :  { %v1743_v15 = vpop.f32.mrf.mxu3 }
 0x811   :  { %6032 = vpow2.f32 %v5756_v7  ;;  %v1744_v41 = vadd.f32 %v1743_v15, %v7011_v1 }
 0x813   :  { %v1789_v18 = vadd.f32 %v1786_v50, %v1744_v41 }
 0x815   :  { %v5755_v13 = vmul.f32 -1.442695, %v1789_v18 }
 0x817   :  { %v6033_v19 = vpop.eup %6032  ;;  %6034 = vpow2.f32 %v5755_v13 }
 0x818   :  { %v1813_v23 = vadd.f32 1.0, %v6033_v19 }
 0x81a   :  { %6036 = vrcp.f32 %v1813_v23  ;;  %v1825_v43 = vand.u32 2147483648, %v1813_v23  ;;  %vm1819_vm7 = vweird.f32 %v1813_v23  ;;  %v1823_v15 = vand.u32 2147483647, %v1813_v23 }
 0x81c   :  { %v1826_v18 = vor.u32 1.1754944e-38, %v1825_v43  ;;  %vm1824_vm9 = vcmp.eq.f32.partialorder %v1823_v15, 8.507059e+37  ;;  %v7382_v43 = vld [vmem:[#allocation12 + $0x30] sm:$0xff] }
 0x81d   :  { %v6035_v8 = vpop.eup %6034 }
 0x81e   :  { %v1793_v22 = vadd.f32 1.0, %v6035_v8 }
 0x820   :  { %6038 = vrcp.f32 %v1793_v22  ;;  %v6037_v40 = vpop.eup %6036  ;;  %v1805_v20 = vand.u32 2147483648, %v1793_v22  ;;  %v1803_v21 = vand.u32 2147483647, %v1793_v22  ;;  %vm1799_vm3 = vweird.f32 %v1793_v22 }
 0x821   :  { %v1815_v38 = vmul.f32 %v6037_v40, %v1813_v23  ;;  %vm1820_vm6 = vweird.f32 %v6037_v40 }
 0x822   :  { %v1806_v44 = vor.u32 1.1754944e-38, %v1805_v20  ;;  %vm1804_vm5 = vcmp.eq.f32.partialorder %v1803_v21, 8.507059e+37  ;;  %vm1821_vm8 = vmor %vm1819_vm7, %vm1820_vm6 }
 0x823   :  { %v1816_v58 = vsub.f32 1.0, %v1815_v38 }
 0x825   :  { %v1817_v30 = vmul.f32 %v6037_v40, %v1816_v58 }
 0x826   :  { %v6039_v57 = vpop.eup %6038 }
 0x827   :  { %v1795_v42 = vmul.f32 %v6039_v57, %v1793_v22  ;;  %vm1800_vm2 = vweird.f32 %v6039_v57  ;;  %v1818_v55 = vadd.f32 %v6037_v40, %v1817_v30 }
 0x828   :  { %vm1801_vm4 = vmor %vm1799_vm3, %vm1800_vm2 }
 0x829   :  { %v1796_v51 = vsub.f32 1.0, %v1795_v42  ;;  %v1822_v41 = vsel %vm1821_vm8, %v6037_v40, %v1818_v55  ;;  %v6288_v42 = vld [vmem:[%s8660_s28 + $0x18] sm:$0xf] }
 0x82a   :  { %v1827_v13 = vsel %vm1824_vm9, %v1826_v18, %v1822_v41 }
 0x82b   :  { %v1797_v24 = vmul.f32 %v6039_v57, %v1796_v51  ;;  %v1832_v19 = vsub.f32 1.0, %v1827_v13  ;;  %v1834_v22 = vmul.f32 %v1827_v13, %v7276_v46 }
 0x82d   :  { %v1798_v56 = vadd.f32 %v6039_v57, %v1797_v24 }
 0x82f   :  { %v1802_v45 = vsel %vm1801_vm4, %v6039_v57, %v1798_v56 }
 0x830   :  { %v1807_v33 = vsel %vm1804_vm5, %v1806_v44, %v1802_v45 }
 0x831   :  { %v1829_v7 = vmul.f32 %v1807_v33, %v1788_v10  ;;  %v7380_v33 = vld [vmem:[#allocation12 + $0x48] sm:$0xff] }
 0x833   :  { %v1830_v50 = vadd.f32 %v1829_v7, %v1784_v6  ;;  %v7385_v6 = vld [vmem:[#allocation12 + $0x18] sm:$0xff]  ;;  %v7388_v7 = vld [vmem:[#allocation12] sm:$0xff] }
 0x835   :  { %6040 = vtanh.f32 %v1830_v50 }
 0x83b   :  { %v6041_v8 = vpop.eup %6040 }
 0x83c   :  { %v1833_v38 = vmul.f32 %v6041_v8, %v1832_v19 }
 0x83e   :  { %v7338_v57 = vadd.f32 %v1834_v22, %v1833_v38 }
 0x840   :  { %5757 = vmatmul.msk.f32.vlgmr.msra.gmra.mxu2 %vm484_vm1, %v7338_v57  ;;  %5758 = vmatmul.msk.f32.vlgmr.msra.gmra.mxu3 %vm484_vm1, %v7338_v57 }
 0x841   :  { %5759 = vmatmul.msk.f32.vlgmr.msrb.gmra.mxu0 %vm484_vm1, %v7338_v57  ;;  %5760 = vmatmul.msk.f32.vlgmr.msrb.gmra.mxu1 %vm484_vm1, %v7338_v57 }
 0x842   :  { %2102 = vmatpush.msra.mxu2 %v7181_v60  ;;  %2122 = vmatpush.msra.mxu3 %v7184_v25  ;;  %v458_v60 = vadd.f32 %v7221_v4, %v7005_v59 }
 0x843   :  { %2142 = vmatpush.msrb.mxu0 %v7288_v39  ;;  %2188 = vmatpush.msrb.mxu1 %v7191_v53 }
 0x844   :  { %2103 = vmatpush.msra.mxu2 %v7194_v26  ;;  %2123 = vmatpush.msra.mxu3 %v7197_v5  ;;  %v2061_v5 = vsel %vm2060_vm10, 1, %v6670_v37 }
 0x845   :  { %2143 = vmatpush.msrb.mxu0 %v7294_v47  ;;  %2189 = vmatpush.msrb.mxu1 %v7204_v34 }
 0x846   :  { %2104 = vmatpush.msra.mxu2 %v7207_v3  ;;  %2124 = vmatpush.msra.mxu3 %v7210_v27 }
 0x847   :  { %2144 = vmatpush.msrb.mxu0 %v7300_v12  ;;  %2063 = vperm.xlu0 %5953, %v2061_v5  }
 0x848   :  { %2105 = vmatpush.msra.mxu2 %v7214_v28  ;;  %2125 = vmatpush.msra.mxu3 %v7217_v36 }
 0x849   :  { %2145 = vmatpush.msrb.mxu0 %v7305_v11 }
 0x8be   :  { %v1903_v20 = vpop.f32.mrf.mxu0 }
 0x8bf   :  { %v2011_v48 = vadd.f32 %v1903_v20, %v7009_v0 }
 0x8c3   :  { %v1863_v25 = vpop.f32.mrf.mxu2  ;;  %v1883_v51 = vpop.f32.mrf.mxu3 }
 0x8c4   :  { %v1926_v53 = vadd.f32 %v1863_v25, %v458_v60  ;;  %v2010_v30 = vadd.f32 %v1883_v51, %v7007_v63  ;;  %v1923_v60 = vpop.f32.mrf.mxu1 }
 0x8c6   :  { %v5761_v26 = vmul.f32 -1.442695, %v1926_v53 }
 0x8c8   :  { %6042 = vpow2.f32 %v5761_v26 }
 0x8ce   :  { %v6043_v34 = vpop.eup %6042 }
 0x8cf   :  { %v1930_v3 = vadd.f32 1.0, %v6043_v34  ;;  %v2012_v34 = vadd.f32 %v1923_v60, %v7023_v54 }
 0x8d1   :  { %6044 = vrcp.f32 %v1930_v3  ;;  %v1942_v39 = vand.u32 2147483648, %v1930_v3  ;;  %v1940_v12 = vand.u32 2147483647, %v1930_v3  ;;  %vm1936_vm12 = vweird.f32 %v1930_v3 }
 0x8d3   :  { %v1943_v11 = vor.u32 1.1754944e-38, %v1942_v39  ;;  %vm1941_vm14 = vcmp.eq.f32.partialorder %v1940_v12, 8.507059e+37 }
 0x8d7   :  { %v6045_v27 = vpop.eup %6044 }
 0x8d8   :  { %v1932_v28 = vmul.f32 %v6045_v27, %v1930_v3  ;;  %vm1937_vm11 = vweird.f32 %v6045_v27 }
 0x8d9   :  { %vm1938_vm13 = vmor %vm1936_vm12, %vm1937_vm11 }
 0x8da   :  { %v1933_v36 = vsub.f32 1.0, %v1932_v28 }
 0x8dc   :  { %v1934_v47 = vmul.f32 %v6045_v27, %v1933_v36 }
 0x8de   :  { %v1935_v59 = vadd.f32 %v6045_v27, %v1934_v47 }
 0x8e0   :  { %v1939_v23 = vsel %vm1938_vm13, %v6045_v27, %v1935_v59 }
 0x8e1   :  { %v1944_v40 = vsel %vm1941_vm14, %v1943_v11, %v1939_v23 }
 0x8e2   :  { %v1946_v58 = vmul.f32 %v6288_v42, %v1944_v40 }
 0x8e4   :  { %5762 = vmatmul.msk.f32.vlgmr.msrb.gmra.mxu2 %vm298_vm0, %v1946_v58  ;;  %5763 = vmatmul.msk.f32.vlgmr.msrb.gmra.mxu3 %vm298_vm0, %v1946_v58 }
 0x8e5   :  { %5764 = vmatmul.msk.f32.vlgmr.msra.gmra.mxu0 %vm298_vm0, %v1946_v58  ;;  %2208 = vmatpush.msrb.mxu2 %v7236_v61 }
 0x8e6   :  { %2228 = vmatpush.msrb.mxu3 %v7242_v14  ;;  %2338 = vmatpush.msra.mxu0 %v7380_v33 }
 0x8e7   :  { %2209 = vmatpush.msrb.mxu2 %v7251_v16 }
 0x8e8   :  { %2229 = vmatpush.msrb.mxu3 %v7257_v17  ;;  %2339 = vmatpush.msra.mxu0 %v7382_v43 }
 0x8ea   :  { %2340 = vmatpush.msra.mxu0 %v7385_v6 }
 0x8ec   :  { %2341 = vmatpush.msra.mxu0 %v7388_v7 }
 0x962   :  { %v2007_v26 = vpop.f32.mrf.mxu0 }
 0x963   :  { %v2008_v36 = vadd.f32 %v2007_v26, %v7025_v31 }
 0x967   :  { %v1967_v24 = vpop.f32.mrf.mxu2  ;;  %v1987_v21 = vpop.f32.mrf.mxu3 }
 0x968   :  { %v1968_v56 = vadd.f32 %v1967_v24, %v7011_v1  ;;  %v1988_v29 = vadd.f32 %v1987_v21, %v7013_v2  ;;  %v7397_v21 = vld [vmem:[#allocation12 + $0x50] sm:$0xff] }
 0x96a   :  { %v2013_v44 = vadd.f32 %v2010_v30, %v1968_v56  ;;  %v2033_v61 = vadd.f32 %v2011_v48, %v1988_v29  ;;  %v7407_v48 = vld [vmem:[#allocation12 + $0x38] sm:$0xff]  ;;  %v7413_v56 = vld [vmem:[#allocation12 + $0x20] sm:$0xff] }
 0x96b   :  { %v7410_v30 = vld [vmem:[#allocation12 + $0x58] sm:$0xff]  ;;  %v7418_v29 = vld [vmem:[#allocation12 + $0x40] sm:$0xff] }
 0x96c   :  { %v5765_v10 = vmul.f32 -1.442695, %v2013_v44  ;;  %v5766_v14 = vmul.f32 -1.442695, %v2033_v61  ;;  %v7421_v44 = vld [vmem:[#allocation12 + $0x8] sm:$0xff] }
 0x96d   :  { %v7426_v61 = vld [vmem:[#allocation12 + $0x28] sm:$0xff] }
 0x96e   :  { %6046 = vpow2.f32 %v5765_v10  ;;  %v7432_v10 = vld [vmem:[#allocation12 + $0x10] sm:$0xff] }
 0x96f   :  { %6048 = vpow2.f32 %v5766_v14  ;;  %v7460_v14 = vld [vmem:[#allocation15 + $0x48] sm:$0xff] }
 0x974   :  { %v6047_v16 = vpop.eup %6046 }
 0x975   :  { %v6049_v17 = vpop.eup %6048  ;;  %v2017_v45 = vadd.f32 1.0, %v6047_v16  ;;  %v7465_v16 = vld [vmem:[#allocation15 + $0x30] sm:$0xff] }
 0x976   :  { %v2037_v55 = vadd.f32 1.0, %v6049_v17  ;;  %v7468_v17 = vld [vmem:[#allocation15 + $0x18] sm:$0xff] }
 0x977   :  { %6050 = vrcp.f32 %v2017_v45  ;;  %v2029_v19 = vand.u32 2147483648, %v2017_v45  ;;  %v2027_v38 = vand.u32 2147483647, %v2017_v45  ;;  %vm2023_vm2 = vweird.f32 %v2017_v45 }
 0x978   :  { %6052 = vrcp.f32 %v2037_v55  ;;  %v2049_v47 = vand.u32 2147483648, %v2037_v55  ;;  %vm2043_vm6 = vweird.f32 %v2037_v55  ;;  %v2047_v12 = vand.u32 2147483647, %v2037_v55 }
 0x979   :  { %v2030_v5 = vor.u32 1.1754944e-38, %v2029_v19  ;;  %vm2028_vm4 = vcmp.eq.f32.partialorder %v2027_v38, 8.507059e+37 }
 0x97a   :  { %v2050_v23 = vor.u32 1.1754944e-38, %v2049_v47  ;;  %vm2048_vm8 = vcmp.eq.f32.partialorder %v2047_v12, 8.507059e+37 }
 0x97d   :  { %v6051_v15 = vpop.eup %6050 }
 0x97e   :  { %v6053_v50 = vpop.eup %6052  ;;  %v2019_v41 = vmul.f32 %v6051_v15, %v2017_v45  ;;  %vm2024_vm15 = vweird.f32 %v6051_v15  ;;  %v7471_v45 = vld [vmem:[#allocation15] sm:$0xff] }
 0x97f   :  { %v2039_v18 = vmul.f32 %v6053_v50, %v2037_v55  ;;  %vm2025_vm3 = vmor %vm2023_vm2, %vm2024_vm15  ;;  %vm2044_vm5 = vweird.f32 %v6053_v50  ;;  %v7477_v55 = vld [vmem:[#allocation2 + $0x4] sm:$0xf] }
 0x980   :  { %v2020_v13 = vsub.f32 1.0, %v2019_v41  ;;  %vm2045_vm7 = vmor %vm2043_vm6, %vm2044_vm5 }
 0x981   :  { %v2040_v8 = vsub.f32 1.0, %v2039_v18 }
 0x982   :  { %v2021_v22 = vmul.f32 %v6051_v15, %v2020_v13 }
 0x983   :  { %v2041_v25 = vmul.f32 %v6053_v50, %v2040_v8 }
 0x984   :  { %v2022_v53 = vadd.f32 %v6051_v15, %v2021_v22 }
 0x985   :  { %v2042_v28 = vadd.f32 %v6053_v50, %v2041_v25 }
 0x986   :  { %v2026_v3 = vsel %vm2025_vm3, %v6051_v15, %v2022_v53  ;;  %v481_v15 = vadd.f32 %v7221_v4, %v7021_v49  ;;  %v6289_v4 = vld [vmem:[%s8660_s28 + $0x1c] sm:$0xf] }
 0x987   :  { %v2031_v27 = vsel %vm2028_vm4, %v2030_v5, %v2026_v3  ;;  %v2046_v11 = vsel %vm2045_vm7, %v6053_v50, %v2042_v28 }
 0x988   :  { %v2053_v39 = vmul.f32 %v2031_v27, %v2012_v34  ;;  %v2051_v40 = vsel %vm2048_vm8, %v2050_v23, %v2046_v11 }
 0x989   :  { %v2056_v42 = vsub.f32 1.0, %v2051_v40  ;;  %v2058_v20 = vmul.f32 %v2051_v40, %v7338_v57  ;;  %v7589_v40 = vld [vmem:[#allocation15 + $0x50] sm:$0xff] }
 0x98a   :  { %v2054_v59 = vadd.f32 %v2053_v39, %v2008_v36 }
 0x98c   :  { %6054 = vtanh.f32 %v2054_v59 }
 0x992   :  { %v6055_v58 = vpop.eup %6054 }
 0x993   :  { %v2057_v51 = vmul.f32 %v6055_v58, %v2056_v42  ;;  %v7601_v58 = vld [vmem:[#allocation15 + $0x28] sm:$0xff] }
 0x995   :  { %v7395_v24 = vadd.f32 %v2058_v20, %v2057_v51  ;;  %v7606_v20 = vld [vmem:[#allocation15 + $0x8] sm:$0xff] }
 0x997   :  { %5767 = vmatmul.msk.f32.vlgmr.msra.gmra.mxu1 %vm484_vm1, %v7395_v24  ;;  %5768 = vmatmul.msk.f32.vlgmr.msra.gmra.mxu2 %vm484_vm1, %v7395_v24 }
 0x998   :  { %5769 = vmatmul.msk.f32.vlgmr.msra.gmra.mxu3 %vm484_vm1, %v7395_v24  ;;  %5770 = vmatmul.msk.f32.vlgmr.msrb.gmra.mxu0 %vm484_vm1, %v7395_v24 }
 0x999   :  { %2418 = vmatpush.msrb.mxu0 %v7397_v21  ;;  %2358 = vmatpush.msra.mxu1 %v7397_v21 }
 0x99a   :  { %2378 = vmatpush.msra.mxu2 %v7410_v30  ;;  %2398 = vmatpush.msra.mxu3 %v7380_v33 }
 0x99b   :  { %2419 = vmatpush.msrb.mxu0 %v7407_v48  ;;  %2359 = vmatpush.msra.mxu1 %v7407_v48 }
 0x99c   :  { %2379 = vmatpush.msra.mxu2 %v7418_v29  ;;  %2399 = vmatpush.msra.mxu3 %v7382_v43 }
 0x99d   :  { %2420 = vmatpush.msrb.mxu0 %v7413_v56  ;;  %2360 = vmatpush.msra.mxu1 %v7413_v56 }
 0x99e   :  { %2380 = vmatpush.msra.mxu2 %v7426_v61  ;;  %2400 = vmatpush.msra.mxu3 %v7385_v6 }
 0x99f   :  { %2421 = vmatpush.msrb.mxu0 %v7421_v44  ;;  %2361 = vmatpush.msra.mxu1 %v7421_v44 }
 0x9a0   :  { %5777 = vmatmul.msk.f32.vlgmr.msra.gmra.mxu0 %vm484_vm1, %v7030_v35  ;;  %2381 = vmatpush.msra.mxu2 %v7432_v10 }
 0x9a1   :  { %2498 = vmatpush.msra.mxu0 %v7410_v30  ;;  %2401 = vmatpush.msra.mxu3 %v7388_v7 }
 0x9a3   :  { %2499 = vmatpush.msra.mxu0 %v7418_v29 }
 0x9a5   :  { %2500 = vmatpush.msra.mxu0 %v7426_v61 }
 0x9a7   :  { %2501 = vmatpush.msra.mxu0 %v7432_v10 }
 0x9a8   :  { %5781 = vmatmul.msk.f32.vlgmr.msrb.gmra.mxu0 %vm484_vm1, %v7077_v9 }
 0x9a9   :  { %2578 = vmatpush.msrb.mxu0 %v7380_v33 }
 0x9ab   :  { %2579 = vmatpush.msrb.mxu0 %v7382_v43 }
 0x9ad   :  { %2580 = vmatpush.msrb.mxu0 %v7385_v6 }
 0x9af   :  { %2581 = vmatpush.msrb.mxu0 %v7388_v7 }
 0x9b0   :  { %5785 = vmatmul.msk.f32.vlgmr.msra.gmra.mxu0 %vm484_vm1, %v7124_v52 }
 0x9b1   :  { %2658 = vmatpush.msra.mxu0 %v7397_v21 }
 0x9b3   :  { %2659 = vmatpush.msra.mxu0 %v7407_v48 }
 0x9b5   :  { %2660 = vmatpush.msra.mxu0 %v7413_v56 }
 0x9b7   :  { %2661 = vmatpush.msra.mxu0 %v7421_v44 }
 0x9b8   :  { %5789 = vmatmul.msk.f32.vlgmr.msrb.gmra.mxu0 %vm484_vm1, %v7276_v46 }
 0x9b9   :  { %2738 = vmatpush.msrb.mxu0 %v7410_v30 }
 0x9bb   :  { %2739 = vmatpush.msrb.mxu0 %v7418_v29 }
 0x9bd   :  { %2740 = vmatpush.msrb.mxu0 %v7426_v61 }
 0x9bf   :  { %2741 = vmatpush.msrb.mxu0 %v7432_v10 }
 0x9c0   :  { %5793 = vmatmul.msk.f32.vlgmr.msra.gmra.mxu0 %vm484_vm1, %v7338_v57 }
 0x9c1   :  { %2833 = vmatpush.msra.mxu0 %v7460_v14 }
 0x9c3   :  { %2834 = vmatpush.msra.mxu0 %v7465_v16 }
 0x9c5   :  { %2835 = vmatpush.msra.mxu0 %v7468_v17 }
 0x9c7   :  { %2836 = vmatpush.msra.mxu0 %v7471_v45 }
 0x9c8   :  { %5797 = vmatmul.msk.f32.vlgmr.msrb.gmra.mxu0 %vm484_vm1, %v7395_v24 }
 0x9c9   :  { %2964 = vmatpush.msrb.mxu0 %v7589_v40 }
 0x9d0   :  { %5801 = vmatmul.msk.f32.vlgmr.msra.gmra.mxu0 %vm484_vm1, %v7477_v55 }
 0xa14   :  { %v2087_v50 = vpop.f32.mrf.mxu1 }
 0xa15   :  { %v2150_v41 = vadd.f32 %v2087_v50, %v481_v15 }
 0xa17   :  { %v5771_v18 = vmul.f32 -1.442695, %v2150_v41  ;;  %v2147_v41 = vpop.f32.mrf.mxu0 }
 0xa19   :  { %6056 = vpow2.f32 %v5771_v18 }
 0xa1f   :  { %v6057_v13 = vpop.eup %6056 }
 0xa20   :  { %v2154_v19 = vadd.f32 1.0, %v6057_v13 }
 0xa22   :  { %6058 = vrcp.f32 %v2154_v19  ;;  %v2166_v60 = vand.u32 2147483648, %v2154_v19  ;;  %v2164_v53 = vand.u32 2147483647, %v2154_v19  ;;  %vm2160_vm10 = vweird.f32 %v2154_v19 }
 0xa24   :  { %v2167_v5 = vor.u32 1.1754944e-38, %v2166_v60  ;;  %vm2165_vm12 = vcmp.eq.f32.partialorder %v2164_v53, 8.507059e+37 }
 0xa28   :  { %v6059_v8 = vpop.eup %6058 }
 0xa29   :  { %v2156_v22 = vmul.f32 %v6059_v8, %v2154_v19  ;;  %vm2161_vm9 = vweird.f32 %v6059_v8 }
 0xa2a   :  { %vm2162_vm11 = vmor %vm2160_vm10, %vm2161_vm9 }
 0xa2b   :  { %v2157_v38 = vsub.f32 1.0, %v2156_v22  ;;  %v2236_v22 = vadd.f32 %v2147_v41, %v7023_v54 }
 0xa2d   :  { %v2158_v25 = vmul.f32 %v6059_v8, %v2157_v38 }
 0xa2f   :  { %v2159_v26 = vadd.f32 %v6059_v8, %v2158_v25  ;;  %v7625_v25 = vpop.permute.xlu2 %1615 }
 0xa30   :  { %8664 = vst [vmem:[#allocation31_spill] sm:$0xff] %v7625_v25 }
 0xa31   :  { %v2163_v34 = vsel %vm2162_vm11, %v6059_v8, %v2159_v26  ;;  %vm1617_vm11 = vcmp.eq.s32.totalorder %v7625_v25, 1 }
 0xa32   :  { %v2168_v49 = vsel %vm2165_vm12, %v2167_v5, %v2163_v34 }
 0xa33   :  { %v2170_v3 = vmul.f32 %v6289_v4, %v2168_v49 }
 0xa35   :  { %5772 = vmatmul.msk.f32.vlgmr.msrb.gmra.mxu1 %vm298_vm0, %v2170_v3  ;;  %5773 = vmatmul.msk.f32.vlgmr.msrb.gmra.mxu2 %vm298_vm0, %v2170_v3 }
 0xa36   :  { %5774 = vmatmul.msk.f32.vlgmr.msrb.gmra.mxu3 %vm298_vm0, %v2170_v3  ;;  %2438 = vmatpush.msrb.mxu1 %v7410_v30  ;;  %vm2284_vm0 = vcmp.eq.s32.totalorder %v7313_v32, 7 }
 0xa37   :  { %2458 = vmatpush.msrb.mxu2 %v7380_v33  ;;  %2478 = vmatpush.msrb.mxu3 %v7397_v21  ;;  %v2285_v27 = vsel %vm2284_vm0, 1, %v6670_v37  ;;  %v2107_v37 = vpop.f32.mrf.mxu2 }
 0xa38   :  { %2439 = vmatpush.msrb.mxu1 %v7418_v29  ;;  %2287 = vperm.xlu1 %5954, %v2285_v27  }
 0xa39   :  { %2459 = vmatpush.msrb.mxu2 %v7382_v43  ;;  %2479 = vmatpush.msrb.mxu3 %v7407_v48 }
 0xa3a   :  { %2440 = vmatpush.msrb.mxu1 %v7426_v61 }
 0xa3b   :  { %2460 = vmatpush.msrb.mxu2 %v7385_v6  ;;  %2480 = vmatpush.msrb.mxu3 %v7413_v56 }
 0xa3c   :  { %2441 = vmatpush.msrb.mxu1 %v7432_v10 }
 0xa3d   :  { %5778 = vmatmul.msk.f32.vlgmr.msra.gmra.mxu1 %vm484_vm1, %v7030_v35  ;;  %5779 = vmatmul.msk.f32.vlgmr.msra.gmra.mxu2 %vm484_vm1, %v7030_v35 }
 0xa3e   :  { %5780 = vmatmul.msk.f32.vlgmr.msra.gmra.mxu3 %vm484_vm1, %v7077_v9  ;;  %2461 = vmatpush.msrb.mxu2 %v7388_v7 }
 0xa3f   :  { %2481 = vmatpush.msrb.mxu3 %v7421_v44  ;;  %2518 = vmatpush.msra.mxu1 %v7380_v33 }
 0xa40   :  { %2538 = vmatpush.msra.mxu2 %v7397_v21 }
 0xa41   :  { %2558 = vmatpush.msra.mxu3 %v7410_v30  ;;  %2519 = vmatpush.msra.mxu1 %v7382_v43 }
 0xa42   :  { %2539 = vmatpush.msra.mxu2 %v7407_v48 }
 0xa43   :  { %2559 = vmatpush.msra.mxu3 %v7418_v29  ;;  %2520 = vmatpush.msra.mxu1 %v7385_v6 }
 0xa44   :  { %2540 = vmatpush.msra.mxu2 %v7413_v56 }
 0xa45   :  { %2560 = vmatpush.msra.mxu3 %v7426_v61  ;;  %5782 = vmatmul.msk.f32.vlgmr.msrb.gmra.mxu1 %vm484_vm1, %v7077_v9 }
 0xa46   :  { %5783 = vmatmul.msk.f32.vlgmr.msrb.gmra.mxu2 %vm484_vm1, %v7124_v52  ;;  %5784 = vmatmul.msk.f32.vlgmr.msrb.gmra.mxu3 %vm484_vm1, %v7124_v52 }
 0xa47   :  { %2521 = vmatpush.msra.mxu1 %v7388_v7  ;;  %2541 = vmatpush.msra.mxu2 %v7421_v44 }
 0xa48   :  { %2561 = vmatpush.msra.mxu3 %v7432_v10 }
 0xa49   :  { %2598 = vmatpush.msrb.mxu1 %v7397_v21  ;;  %2618 = vmatpush.msrb.mxu2 %v7410_v30 }
 0xa4a   :  { %2638 = vmatpush.msrb.mxu3 %v7380_v33 }
 0xa4b   :  { %2599 = vmatpush.msrb.mxu1 %v7407_v48  ;;  %2619 = vmatpush.msrb.mxu2 %v7418_v29 }
 0xa4c   :  { %2639 = vmatpush.msrb.mxu3 %v7382_v43 }
 0xa4d   :  { %2600 = vmatpush.msrb.mxu1 %v7413_v56  ;;  %2620 = vmatpush.msrb.mxu2 %v7426_v61 }
 0xa4e   :  { %5786 = vmatmul.msk.f32.vlgmr.msra.gmra.mxu1 %vm484_vm1, %v7171_v62  ;;  %5787 = vmatmul.msk.f32.vlgmr.msra.gmra.mxu2 %vm484_vm1, %v7171_v62 }
 0xa4f   :  { %5788 = vmatmul.msk.f32.vlgmr.msra.gmra.mxu3 %vm484_vm1, %v7171_v62  ;;  %2601 = vmatpush.msrb.mxu1 %v7421_v44 }
 0xa50   :  { %2640 = vmatpush.msrb.mxu3 %v7385_v6  ;;  %2621 = vmatpush.msrb.mxu2 %v7432_v10 }
 0xa51   :  { %2678 = vmatpush.msra.mxu1 %v7410_v30 }
 0xa52   :  { %2698 = vmatpush.msra.mxu2 %v7380_v33  ;;  %2641 = vmatpush.msrb.mxu3 %v7388_v7 }
 0xa53   :  { %2679 = vmatpush.msra.mxu1 %v7418_v29 }
 0xa54   :  { %2718 = vmatpush.msra.mxu3 %v7397_v21  ;;  %2699 = vmatpush.msra.mxu2 %v7382_v43 }
 0xa55   :  { %2680 = vmatpush.msra.mxu1 %v7426_v61 }
 0xa56   :  { %2719 = vmatpush.msra.mxu3 %v7407_v48  ;;  %5790 = vmatmul.msk.f32.vlgmr.msrb.gmra.mxu1 %vm484_vm1, %v7276_v46 }
 0xa57   :  { %5791 = vmatmul.msk.f32.vlgmr.msrb.gmra.mxu2 %vm484_vm1, %v7276_v46  ;;  %5792 = vmatmul.msk.f32.vlgmr.msrb.gmra.mxu3 %vm484_vm1, %v7338_v57 }
 0xa58   :  { %2700 = vmatpush.msra.mxu2 %v7385_v6  ;;  %2720 = vmatpush.msra.mxu3 %v7413_v56 }
 0xa59   :  { %2681 = vmatpush.msra.mxu1 %v7432_v10 }
 0xa5a   :  { %2701 = vmatpush.msra.mxu2 %v7388_v7  ;;  %2721 = vmatpush.msra.mxu3 %v7421_v44 }
 0xa5b   :  { %2761 = vmatpush.msrb.mxu1 %v7380_v33  ;;  %v2234_v33 = vadd.f32 %v2107_v37, %v7007_v63  ;;  %v7591_v63 = vld [vmem:[#allocation15 + $0x58] sm:$0xff] }
 0xa5c   :  { %2781 = vmatpush.msrb.mxu2 %v7397_v21  ;;  %2801 = vmatpush.msrb.mxu3 %v7410_v30  ;;  %v7608_v21 = vld [vmem:[#allocation15 + $0x10] sm:$0xff] }
 0xa5d   :  { %2762 = vmatpush.msrb.mxu1 %v7382_v43 }
 0xa5e   :  { %2782 = vmatpush.msrb.mxu2 %v7407_v48  ;;  %2802 = vmatpush.msrb.mxu3 %v7418_v29 }
 0xa5f   :  { %2763 = vmatpush.msrb.mxu1 %v7385_v6  ;;  %5795 = vmatmul.msk.f32.vlgmr.msra.gmra.mxu2 %vm484_vm1, %v7395_v24 }
 0xa60   :  { %5794 = vmatmul.msk.f32.vlgmr.msra.gmra.mxu1 %vm484_vm1, %v7338_v57  ;;  %5796 = vmatmul.msk.f32.vlgmr.msra.gmra.mxu3 %vm484_vm1, %v7395_v24 }
 0xa61   :  { %2783 = vmatpush.msrb.mxu2 %v7413_v56  ;;  %2803 = vmatpush.msrb.mxu3 %v7426_v61  ;;  %v7616_v56 = vpop.permute.xlu0 %719 }
 0xa62   :  { %2764 = vmatpush.msrb.mxu1 %v7388_v7  ;;  %v2127_v7 = vpop.f32.mrf.mxu3  ;;  %8662 = vst [vmem:[#allocation29_spill] sm:$0xff] %v7616_v56  ;;  %vm721_vm6 = vcmp.eq.s32.totalorder %v7616_v56, 1 }
 0xa63   :  { %2784 = vmatpush.msrb.mxu2 %v7421_v44  ;;  %2804 = vmatpush.msrb.mxu3 %v7432_v10  ;;  %v2235_v39 = vadd.f32 %v2127_v7, %v7009_v0  ;;  %v7597_v0 = vld [vmem:[#allocation15 + $0x40] sm:$0xff]  ;;  %v7619_v44 = vpop.permute.xlu1 %1167 }
 0xa64   :  { %2853 = vmatpush.msra.mxu1 %v7589_v40  ;;  %8663 = vst [vmem:[#allocation30_spill] sm:$0xff] %v7619_v44  ;;  %vm1169_vm9 = vcmp.eq.s32.totalorder %v7619_v44, 1 }
 0xa65   :  { %2944 = vmatpush.msra.mxu3 %v7460_v14  ;;  %2873 = vmatpush.msra.mxu2 %v7591_v63 }
 0xa67   :  { %2945 = vmatpush.msra.mxu3 %v7465_v16  ;;  %2874 = vmatpush.msra.mxu2 %v7597_v0 }
 0xa69   :  { %2946 = vmatpush.msra.mxu3 %v7468_v17  ;;  %2875 = vmatpush.msra.mxu2 %v7601_v58  ;;  %v7629_v5 = vpop.permute.xlu0 %943 }
 0xa6a   :  { %8665 = vst [vmem:[#allocation32_spill] sm:$0xff] %v7629_v5  ;;  %vm945_vm8 = vcmp.eq.s32.totalorder %v7629_v5, 1 }
 0xa6b   :  { %2947 = vmatpush.msra.mxu3 %v7471_v45  ;;  %2876 = vmatpush.msra.mxu2 %v7608_v21  ;;  %v7631_v3 = vpop.permute.xlu1 %1391 }
 0xa6c   :  { %8666 = vst [vmem:[#allocation33_spill] sm:$0xff] %v7631_v3  ;;  %vm1393_vm10 = vcmp.eq.s32.totalorder %v7631_v3, 1 }
 0xa71   :  { %v7642_v7 = vpop.permute.xlu0 %2063 }
 0xa72   :  { %8668 = vst [vmem:[#allocation35_spill] sm:$0xff] %v7642_v7  ;;  %vm2065_vm0 = vcmp.eq.s32.totalorder %v7642_v7, 1 }
 0xab2   :  { %v2191_v32 = vpop.f32.mrf.mxu1 }
 0xab3   :  { %v2192_v43 = vadd.f32 %v2191_v32, %v7011_v1  ;;  %v7593_v1 = vld [vmem:[#allocation15 + $0x38] sm:$0xff] }
 0xab4   :  { %2854 = vmatpush.msra.mxu1 %v7593_v1  ;;  %2965 = vmatpush.msrb.mxu0 %v7593_v1 }
 0xab5   :  { %v2237_v6 = vadd.f32 %v2234_v33, %v2192_v43  ;;  %v7636_v43 = vpop.permute.xlu2 %1839 }
 0xab6   :  { %8667 = vst [vmem:[#allocation34_spill] sm:$0xff] %v7636_v43  ;;  %vm1841_vm12 = vcmp.eq.s32.totalorder %v7636_v43, 1 }
 0xab7   :  { %v5775_v28 = vmul.f32 -1.442695, %v2237_v6  ;;  %v722_v6 = vsel %vm721_vm6, %v7030_v35, 0.0 }
 0xab8   :  { %v2211_v36 = vpop.f32.mrf.mxu2 }
 0xab9   :  { %6060 = vpow2.f32 %v5775_v28  ;;  %v2212_v47 = vadd.f32 %v2211_v36, %v7013_v2  ;;  %v7599_v2 = vld [vmem:[#allocation15 + $0x20] sm:$0xff]  ;;  %v2231_v13 = vpop.f32.mrf.mxu3  ;;  %v946_v28 = vsel %vm945_vm8, %v7077_v9, %v722_v6 }
 0xaba   :  { %2855 = vmatpush.msra.mxu1 %v7599_v2  ;;  %2966 = vmatpush.msrb.mxu0 %v7599_v2  ;;  %v2232_v53 = vadd.f32 %v2231_v13, %v7025_v31 }
 0xabb   :  { %v2257_v12 = vadd.f32 %v2235_v39, %v2212_v47  ;;  %v7648_v39 = vpop.permute.xlu1 %2287 }
 0xabc   :  { %2856 = vmatpush.msra.mxu1 %v7606_v20  ;;  %2967 = vmatpush.msrb.mxu0 %v7606_v20  ;;  %8669 = vst [vmem:[#allocation36_spill] sm:$0xff] %v7648_v39 }
 0xabd   :  { %v5776_v59 = vmul.f32 -1.442695, %v2257_v12  ;;  %v1170_v12 = vsel %vm1169_vm9, %v7124_v52, %v946_v28 }
 0xabe   :  { %3095 = vmatpush.msra.mxu0 %v7591_v63  ;;  %v1394_v35 = vsel %vm1393_vm10, %v7171_v62, %v1170_v12 }
 0xabf   :  { %v6061_v11 = vpop.eup %6060  ;;  %6062 = vpow2.f32 %v5776_v59 }
 0xac0   :  { %v2241_v23 = vadd.f32 1.0, %v6061_v11  ;;  %3096 = vmatpush.msra.mxu0 %v7597_v0  ;;  %v1618_v11 = vsel %vm1617_vm11, %v7276_v46, %v1394_v35  ;;  %v2343_v46 = vpop.f32.mrf.mxu0 }
 0xac1   :  { %v1842_v52 = vsel %vm1841_vm12, %v7338_v57, %v1618_v11 }
 0xac2   :  { %6064 = vrcp.f32 %v2241_v23  ;;  %v2253_v61 = vand.u32 2147483648, %v2241_v23  ;;  %v2251_v15 = vand.u32 2147483647, %v2241_v23  ;;  %vm2247_vm14 = vweird.f32 %v2241_v23  ;;  %3097 = vmatpush.msra.mxu0 %v7601_v58 }
 0xac3   :  { %v2066_v62 = vsel %vm2065_vm0, %v7395_v24, %v1842_v52 }
 0xac4   :  { %v2254_v8 = vor.u32 1.1754944e-38, %v2253_v61  ;;  %vm2252_vm2 = vcmp.eq.f32.partialorder %v2251_v15, 8.507059e+37  ;;  %3098 = vmatpush.msra.mxu0 %v7608_v21  ;;  %v2306_v15 = vld [vmem:[#allocation16] sm:$0x7] }
 0xac5   :  { %v6063_v42 = vpop.eup %6062  ;;  %v7714_v41 = vperm.slane %v2306_v15, 0 }
 0xac6   :  { %v2261_v51 = vadd.f32 1.0, %v6063_v42 }
 0xac8   :  { %v6065_v48 = vpop.eup %6064  ;;  %6066 = vrcp.f32 %v2261_v51  ;;  %v2273_v49 = vand.u32 2147483648, %v2261_v51  ;;  %v2271_v27 = vand.u32 2147483647, %v2261_v51  ;;  %vm2267_vm4 = vweird.f32 %v2261_v51  ;;  %v7702_v57 = vpop.f32.mrf.mxu0 }
 0xac9   :  { %v2243_v30 = vmul.f32 %v6065_v48, %v2241_v23  ;;  %vm2248_vm13 = vweird.f32 %v6065_v48 }
 0xaca   :  { %vm2249_vm15 = vmor %vm2247_vm14, %vm2248_vm13  ;;  %v2274_v33 = vor.u32 1.1754944e-38, %v2273_v49  ;;  %vm2272_vm7 = vcmp.eq.f32.partialorder %v2271_v27, 8.507059e+37  ;;  %vm2289_vm13 = vcmp.eq.s32.totalorder %v7648_v39, 1  ;;  %vm8640_vm14 = vcmask 257024  }
 0xacb   :  { %v2244_v29 = vsub.f32 1.0, %v2243_v30  ;;  %v2363_v30 = vpop.f32.mrf.mxu1 }
 0xacd   :  { %v2245_v10 = vmul.f32 %v6065_v48, %v2244_v29 }
 0xace   :  { %v6067_v50 = vpop.eup %6066 }
 0xacf   :  { %v2263_v18 = vmul.f32 %v6067_v50, %v2261_v51  ;;  %v2246_v19 = vadd.f32 %v6065_v48, %v2245_v10  ;;  %vm2268_vm3 = vweird.f32 %v6067_v50  ;;  %v2383_v10 = vpop.f32.mrf.mxu2 }
 0xad0   :  { %vm2269_vm5 = vmor %vm2267_vm4, %vm2268_vm3 }
 0xad1   :  { %v2264_v38 = vsub.f32 1.0, %v2263_v18  ;;  %v2250_v60 = vsel %vm2249_vm15, %v6065_v48, %v2246_v19 }
 0xad2   :  { %v2255_v26 = vsel %vm2252_vm2, %v2254_v8, %v2250_v60 }
 0xad3   :  { %v2265_v34 = vmul.f32 %v6067_v50, %v2264_v38  ;;  %v2277_v4 = vmul.f32 %v2255_v26, %v2236_v22  ;;  %v7712_v61 = vpop.f32.mrf.mxu1 }
 0xad5   :  { %v2266_v54 = vadd.f32 %v6067_v50, %v2265_v34  ;;  %v2278_v37 = vadd.f32 %v2277_v4, %v2232_v53 }
 0xad7   :  { %v2270_v32 = vsel %vm2269_vm5, %v6067_v50, %v2266_v54  ;;  %6068 = vtanh.f32 %v2278_v37  ;;  %v2305_v50 = vld [vmem:[#allocation13] sm:$0x7]  ;;  %v7720_v8 = vpop.f32.mrf.mxu2 }
 0xad8   :  { %v2275_v31 = vsel %vm2272_vm7, %v2274_v33, %v2270_v32  ;;  %v7716_v13 = vperm.slane %v2305_v50, 0  ;;  %v7738_v6 = vperm.slane %v2305_v50, 1 }
 0xad9   :  { %v2280_v36 = vsub.f32 1.0, %v2275_v31  ;;  %v2282_v9 = vmul.f32 %v2275_v31, %v7395_v24  ;;  %v7704_v24 = vpop.f32.mrf.mxu0  ;;  %v7736_v31 = vperm.slane %v2306_v15, 1 }
 0xada   :  { %v2344_v38 = vadd.f32 %v2343_v46, %v7716_v13 }
 0xadb   :  { %v7718_v19 = vpop.f32.mrf.mxu1 }
 0xadd   :  { %v6069_v47 = vpop.eup %6068 }
 0xade   :  { %v2281_v59 = vmul.f32 %v6069_v47, %v2280_v36  ;;  %v2364_v47 = vadd.f32 %v2363_v30, %v7738_v6 }
 0xadf   :  { %v7726_v34 = vpop.f32.mrf.mxu2 }
 0xae0   :  { %v2283_v23 = vadd.f32 %v2282_v9, %v2281_v59 }
 0xae1   :  { %v7706_v51 = vpop.f32.mrf.mxu0 }
 0xae2   :  { %v2290_v42 = vsel %vm2289_vm13, %v2283_v23, %v2066_v62  ;;  %5798 = vmatmul.msk.f32.vlgmr.msrb.gmra.mxu1 %vm484_vm1, %v2283_v23  ;;  %5799 = vmatmul.msk.f32.vlgmr.msrb.gmra.mxu2 %vm484_vm1, %v2283_v23 }
 0xae3   :  { %2292 = vst.msk [vmem:[%s8633_s19] sm:$0xf] %vm8640_vm14, %v2290_v42  ;;  %5800 = vmatmul.msk.f32.vlgmr.msrb.gmra.mxu3 %vm484_vm1, %v2283_v23  ;;  %2984 = vmatpush.msrb.mxu1 %v7591_v63  ;;  %v7724_v26 = vpop.f32.mrf.mxu1  ;;  %v7744_v23 = vperm.slane %v2306_v15, 2 }
 0xae4   :  { %3055 = vmatpush.msrb.mxu2 %v7460_v14  ;;  %3075 = vmatpush.msrb.mxu3 %v7589_v40 }
 0xae5   :  { %2985 = vmatpush.msrb.mxu1 %v7597_v0 }
 0xae6   :  { %3056 = vmatpush.msrb.mxu2 %v7465_v16  ;;  %3076 = vmatpush.msrb.mxu3 %v7593_v1 }
 0xae7   :  { %2986 = vmatpush.msrb.mxu1 %v7601_v58  ;;  %v7730_v27 = vpop.f32.mrf.mxu2 }
 0xae8   :  { %3057 = vmatpush.msrb.mxu2 %v7468_v17  ;;  %3077 = vmatpush.msrb.mxu3 %v7599_v2 }
 0xae9   :  { %2987 = vmatpush.msrb.mxu1 %v7608_v21  ;;  %v7708_v48 = vpop.f32.mrf.mxu0 }
 0xaea   :  { %5802 = vmatmul.msk.f32.vlgmr.msra.gmra.mxu1 %vm484_vm1, %v7477_v55  ;;  %5803 = vmatmul.msk.f32.vlgmr.msra.gmra.mxu2 %vm484_vm1, %v7477_v55 }
 0xaeb   :  { %3058 = vmatpush.msrb.mxu2 %v7471_v45  ;;  %3078 = vmatpush.msrb.mxu3 %v7606_v20  ;;  %v7728_v4 = vpop.f32.mrf.mxu1 }
 0xaec   :  { %3166 = vmatpush.msra.mxu1 %v7460_v14 }
 0xaed   :  { %3186 = vmatpush.msra.mxu2 %v7589_v40 }
 0xaee   :  { %3167 = vmatpush.msra.mxu1 %v7465_v16 }
 0xaef   :  { %3187 = vmatpush.msra.mxu2 %v7593_v1  ;;  %v7734_v32 = vpop.f32.mrf.mxu2 }
 0xaf0   :  { %3168 = vmatpush.msra.mxu1 %v7468_v17 }
 0xaf1   :  { %3188 = vmatpush.msra.mxu2 %v7599_v2  ;;  %v7710_v29 = vpop.f32.mrf.mxu0 }
 0xaf2   :  { %3169 = vmatpush.msra.mxu1 %v7471_v45 }
 0xaf3   :  { %3189 = vmatpush.msra.mxu2 %v7606_v20 }
 0xaf9   :  { %v2838_v18 = vpop.f32.mrf.mxu0 }
 0xafa   :  { %v2839_v22 = vadd.f32 %v2838_v18, %v7714_v41 }
 0xafc   :  { %v2881_v60 = vadd.f32 %v2839_v22, %v2344_v38 }
 0xafe   :  { %v5804_v53 = vmul.f32 -1.442695, %v2881_v60 }
 0xb00   :  { %6070 = vpow2.f32 %v5804_v53 }
 0xb06   :  { %v6071_v49 = vpop.eup %6070 }
 0xb07   :  { %v2885_v54 = vadd.f32 1.0, %v6071_v49 }
 0xb09   :  { %6072 = vrcp.f32 %v2885_v54  ;;  %v2897_v18 = vand.u32 2147483648, %v2885_v54  ;;  %vm2891_vm2 = vweird.f32 %v2885_v54  ;;  %v2895_v38 = vand.u32 2147483647, %v2885_v54 }
 0xb0b   :  { %v2898_v53 = vor.u32 1.1754944e-38, %v2897_v18  ;;  %vm2896_vm4 = vcmp.eq.f32.partialorder %v2895_v38, 8.507059e+37 }
 0xb0f   :  { %v6073_v33 = vpop.eup %6072 }
 0xb10   :  { %v2887_v36 = vmul.f32 %v6073_v33, %v2885_v54  ;;  %vm2892_vm15 = vweird.f32 %v6073_v33 }
 0xb11   :  { %vm2893_vm3 = vmor %vm2891_vm2, %vm2892_vm15 }
 0xb12   :  { %v2888_v9 = vsub.f32 1.0, %v2887_v36 }
 0xb14   :  { %v2889_v52 = vmul.f32 %v6073_v33, %v2888_v9 }
 0xb16   :  { %v2890_v62 = vadd.f32 %v6073_v33, %v2889_v52 }
 0xb18   :  { %v2894_v60 = vsel %vm2893_vm3, %v6073_v33, %v2890_v62 }
 0xb19   :  { %v2899_v49 = vsel %vm2896_vm4, %v2898_v53, %v2894_v60 }
 0xb5f   :  { %v7732_v37 = vpop.f32.mrf.mxu1 }
 0xb65   :  { %v7742_v35 = vpop.f32.mrf.mxu2 }
 0xb67   :  { %v2858_v28 = vpop.f32.mrf.mxu1 }
 0xb68   :  { %v2859_v12 = vadd.f32 %v2858_v28, %v7736_v31  ;;  %v7747_v28 = vperm.slane %v2305_v50, 2 }
 0xb6a   :  { %v2901_v59 = vadd.f32 %v2859_v12, %v2364_v47  ;;  %v2384_v47 = vadd.f32 %v2383_v10, %v7747_v28 }
 0xb6c   :  { %v5805_v11 = vmul.f32 -1.442695, %v2901_v59 }
 0xb6d   :  { %v2878_v46 = vpop.f32.mrf.mxu2 }
 0xb6e   :  { %6074 = vpow2.f32 %v5805_v11  ;;  %v2879_v30 = vadd.f32 %v2878_v46, %v7744_v23 }
 0xb70   :  { %v2921_v15 = vmul.f32 %v2899_v49, %v2879_v30 }
 0xb72   :  { %v2922_v59 = vadd.f32 %v2921_v15, %v2384_v47  ;;  %v2424_v47 = vadd.f32 %v7702_v57, %v7738_v6 }
 0xb74   :  { %v6075_v42 = vpop.eup %6074 }
 0xb75   :  { %v2905_v22 = vadd.f32 1.0, %v6075_v42 }
 0xb77   :  { %6076 = vrcp.f32 %v2905_v22  ;;  %v2917_v11 = vand.u32 2147483648, %v2905_v22  ;;  %v2915_v54 = vand.u32 2147483647, %v2905_v22  ;;  %vm2911_vm7 = vweird.f32 %v2905_v22 }
 0xb78   :  { %6078 = vtanh.f32 %v2922_v59 }
 0xb79   :  { %v2918_v33 = vor.u32 1.1754944e-38, %v2917_v11  ;;  %vm2916_vm2 = vcmp.eq.f32.partialorder %v2915_v54, 8.507059e+37 }
 0xb7d   :  { %v6077_v36 = vpop.eup %6076 }
 0xb7e   :  { %v2907_v12 = vmul.f32 %v6077_v36, %v2905_v22  ;;  %vm2912_vm5 = vweird.f32 %v6077_v36  ;;  %v6079_v18 = vpop.eup %6078 }
 0xb7f   :  { %vm2913_vm15 = vmor %vm2911_vm7, %vm2912_vm5 }
 0xb80   :  { %v2908_v9 = vsub.f32 1.0, %v2907_v12 }
 0xb82   :  { %v2909_v52 = vmul.f32 %v6077_v36, %v2908_v9 }
 0xb84   :  { %v2910_v42 = vadd.f32 %v6077_v36, %v2909_v52 }
 0xb86   :  { %v2914_v62 = vsel %vm2913_vm15, %v6077_v36, %v2910_v42 }
 0xb87   :  { %v2919_v50 = vsel %vm2916_vm2, %v2918_v33, %v2914_v62 }
 0xb88   :  { %v2924_v46 = vsub.f32 1.0, %v2919_v50  ;;  %v2926_v10 = vmul.f32 %v2919_v50, %v7477_v55  ;;  %v2403_v55 = vpop.f32.mrf.mxu3 }
 0xb89   :  { %v2404_v52 = vadd.f32 %v2403_v55, %v7716_v13 }
 0xb8a   :  { %v2925_v38 = vmul.f32 %v6079_v18, %v2924_v46 }
 0xb8c   :  { %v7751_v30 = vadd.f32 %v2926_v10, %v2925_v38 }
 0xb8e   :  { %5806 = vmatmul.msk.f32.vlgmr.msra.gmra.mxu3 %vm484_vm1, %v7751_v30  ;;  %5807 = vmatmul.msk.f32.vlgmr.msrb.gmra.mxu0 %vm484_vm1, %v7751_v30 }
 0xb8f   :  { %5808 = vmatmul.msk.f32.vlgmr.msrb.gmra.mxu1 %vm484_vm1, %v7751_v30  ;;  %3206 = vmatpush.msra.mxu3 %v7591_v63 }
 0xb90   :  { %3277 = vmatpush.msrb.mxu0 %v7460_v14  ;;  %3297 = vmatpush.msrb.mxu1 %v7589_v40  ;;  %v7771_v22 = vpop.f32.mrf.mxu3 }
 0xb91   :  { %3207 = vmatpush.msra.mxu3 %v7597_v0 }
 0xb92   :  { %3278 = vmatpush.msrb.mxu0 %v7465_v16  ;;  %3298 = vmatpush.msrb.mxu1 %v7593_v1 }
 0xb93   :  { %3208 = vmatpush.msra.mxu3 %v7601_v58 }
 0xb94   :  { %3279 = vmatpush.msrb.mxu0 %v7468_v17  ;;  %3299 = vmatpush.msrb.mxu1 %v7599_v2 }
 0xb95   :  { %3209 = vmatpush.msra.mxu3 %v7608_v21 }
 0xb96   :  { %3280 = vmatpush.msrb.mxu0 %v7471_v45  ;;  %3300 = vmatpush.msrb.mxu1 %v7606_v20 }
 0xb98   :  { %v7773_v60 = vpop.f32.mrf.mxu3 }
 0xba0   :  { %v7775_v53 = vpop.f32.mrf.mxu3 }
 0xba8   :  { %v7777_v49 = vpop.f32.mrf.mxu3 }
 0xbb0   :  { %v7779_v15 = vpop.f32.mrf.mxu3 }
 0xc0b   :  { %v2969_v36 = vpop.f32.mrf.mxu0 }
 0xc0c   :  { %v2970_v12 = vadd.f32 %v2969_v36, %v7736_v31 }
 0xc0e   :  { %v3012_v59 = vadd.f32 %v2970_v12, %v2424_v47 }
 0xc10   :  { %v5810_v9 = vmul.f32 -1.442695, %v3012_v59 }
 0xc11   :  { %v2949_v11 = vpop.f32.mrf.mxu3 }
 0xc12   :  { %6080 = vpow2.f32 %v5810_v9  ;;  %v2950_v54 = vadd.f32 %v2949_v11, %v7714_v41 }
 0xc14   :  { %v2992_v42 = vadd.f32 %v2950_v54, %v2404_v52  ;;  %v2989_v52 = vpop.f32.mrf.mxu1 }
 0xc16   :  { %v5809_v33 = vmul.f32 -1.442695, %v2992_v42 }
 0xc18   :  { %v6081_v62 = vpop.eup %6080  ;;  %6082 = vpow2.f32 %v5809_v33  ;;  %v2990_v33 = vadd.f32 %v2989_v52, %v7744_v23 }
 0xc19   :  { %v3016_v50 = vadd.f32 1.0, %v6081_v62 }
 0xc1b   :  { %6084 = vrcp.f32 %v3016_v50  ;;  %vm3022_vm2 = vweird.f32 %v3016_v50  ;;  %v3026_v7 = vand.u32 2147483647, %v3016_v50 }
 0xc1e   :  { %v6083_v46 = vpop.eup %6082 }
 0xc1f   :  { %v2996_v18 = vadd.f32 1.0, %v6083_v46 }
 0xc21   :  { %6086 = vrcp.f32 %v2996_v18  ;;  %v6085_v57 = vpop.eup %6084  ;;  %v3008_v59 = vand.u32 2147483648, %v2996_v18  ;;  %v3006_v9 = vand.u32 2147483647, %v2996_v18  ;;  %vm3002_vm4 = vweird.f32 %v2996_v18 }
 0xc22   :  { %v3018_v38 = vmul.f32 %v6085_v57, %v3016_v50  ;;  %vm3023_vm15 = vweird.f32 %v6085_v57 }
 0xc23   :  { %v3009_v42 = vor.u32 1.1754944e-38, %v3008_v59  ;;  %vm3007_vm7 = vcmp.eq.f32.partialorder %v3006_v9, 8.507059e+37  ;;  %vm3024_vm14 = vmor %vm3022_vm2, %vm3023_vm15 }
 0xc24   :  { %v3019_v47 = vsub.f32 1.0, %v3018_v38  ;;  %v2444_v38 = vadd.f32 %v7712_v61, %v7747_v28  ;;  %v2464_v61 = vadd.f32 %v7720_v8, %v7716_v13 }
 0xc26   :  { %v3020_v11 = vmul.f32 %v6085_v57, %v3019_v47 }
 0xc27   :  { %v6087_v10 = vpop.eup %6086 }
 0xc28   :  { %v2998_v36 = vmul.f32 %v6087_v10, %v2996_v18  ;;  %vm3003_vm3 = vweird.f32 %v6087_v10  ;;  %v3021_v46 = vadd.f32 %v6085_v57, %v3020_v11 }
 0xc29   :  { %vm3004_vm5 = vmor %vm3002_vm4, %vm3003_vm3  ;;  %vm3027_vm3 = vcmp.eq.f32.partialorder %v3026_v7, 8.507059e+37 }
 0xc2a   :  { %v2999_v12 = vsub.f32 1.0, %v2998_v36  ;;  %v3028_v36 = vand.u32 2147483648, %v3016_v50  ;;  %v2484_v50 = vadd.f32 %v7771_v22, %v7738_v6 }
 0xc2c   :  { %v3000_v55 = vmul.f32 %v6087_v10, %v2999_v12  ;;  %v3029_v18 = vor.u32 1.1754944e-38, %v3028_v36 }
 0xc2e   :  { %v3001_v54 = vadd.f32 %v6087_v10, %v3000_v55  ;;  %v3025_v55 = vsel %vm3024_vm14, %v6085_v57, %v3021_v46 }
 0xc2f   :  { %v3030_v59 = vsel %vm3027_vm3, %v3029_v18, %v3025_v55 }
 0xc30   :  { %v3005_v62 = vsel %vm3004_vm5, %v6087_v10, %v3001_v54  ;;  %v3035_v52 = vsub.f32 1.0, %v3030_v59  ;;  %v3037_v9 = vmul.f32 %v3030_v59, %v7751_v30 }
 0xc31   :  { %v3010_v39 = vsel %vm3007_vm7, %v3009_v42, %v3005_v62 }
 0xc32   :  { %v3032_v12 = vmul.f32 %v3010_v39, %v2990_v33 }
 0xc34   :  { %v3033_v47 = vadd.f32 %v3032_v12, %v2444_v38 }
 0xc36   :  { %6088 = vtanh.f32 %v3033_v47 }
 0xc3c   :  { %v6089_v10 = vpop.eup %6088 }
 0xc3d   :  { %v3036_v11 = vmul.f32 %v6089_v10, %v3035_v52 }
 0xc3f   :  { %v7790_v54 = vadd.f32 %v3037_v9, %v3036_v11 }
 0xc41   :  { %5811 = vmatmul.msk.f32.vlgmr.msrb.gmra.mxu2 %vm484_vm1, %v7790_v54  ;;  %5812 = vmatmul.msk.f32.vlgmr.msrb.gmra.mxu3 %vm484_vm1, %v7790_v54 }
 0xc42   :  { %5813 = vmatmul.msk.f32.vlgmr.msra.gmra.mxu0 %vm484_vm1, %v7790_v54  ;;  %3317 = vmatpush.msrb.mxu2 %v7591_v63 }
 0xc43   :  { %3388 = vmatpush.msrb.mxu3 %v7460_v14  ;;  %3408 = vmatpush.msra.mxu0 %v7589_v40 }
 0xc44   :  { %3318 = vmatpush.msrb.mxu2 %v7597_v0 }
 0xc45   :  { %3389 = vmatpush.msrb.mxu3 %v7465_v16  ;;  %3409 = vmatpush.msra.mxu0 %v7593_v1 }
 0xc46   :  { %3319 = vmatpush.msrb.mxu2 %v7601_v58 }
 0xc47   :  { %3390 = vmatpush.msrb.mxu3 %v7468_v17  ;;  %3410 = vmatpush.msra.mxu0 %v7599_v2 }
 0xc48   :  { %3320 = vmatpush.msrb.mxu2 %v7608_v21 }
 0xc49   :  { %3391 = vmatpush.msrb.mxu3 %v7471_v45  ;;  %3411 = vmatpush.msra.mxu0 %v7606_v20 }
 0xcc4   :  { %v3060_v7 = vpop.f32.mrf.mxu2  ;;  %v3080_v39 = vpop.f32.mrf.mxu3 }
 0xcc5   :  { %v3061_v57 = vadd.f32 %v3060_v7, %v7714_v41  ;;  %v3081_v42 = vadd.f32 %v3080_v39, %v7736_v31  ;;  %v3100_v39 = vpop.f32.mrf.mxu0 }
 0xcc7   :  { %v3103_v33 = vadd.f32 %v3061_v57, %v2464_v61  ;;  %v3123_v62 = vadd.f32 %v3081_v42, %v2484_v50  ;;  %v3101_v42 = vadd.f32 %v3100_v39, %v7744_v23 }
 0xcc9   :  { %v5814_v46 = vmul.f32 -1.442695, %v3103_v33  ;;  %v5815_v38 = vmul.f32 -1.442695, %v3123_v62 }
 0xccb   :  { %6090 = vpow2.f32 %v5814_v46 }
 0xccc   :  { %6092 = vpow2.f32 %v5815_v38  ;;  %v2504_v38 = vadd.f32 %v7704_v24, %v7747_v28  ;;  %v2524_v24 = vadd.f32 %v7718_v19, %v7716_v13 }
 0xcd1   :  { %v6091_v36 = vpop.eup %6090 }
 0xcd2   :  { %v6093_v12 = vpop.eup %6092  ;;  %v3107_v47 = vadd.f32 1.0, %v6091_v36 }
 0xcd3   :  { %v3127_v55 = vadd.f32 1.0, %v6093_v12 }
 0xcd4   :  { %6094 = vrcp.f32 %v3107_v47  ;;  %v3119_v10 = vand.u32 2147483648, %v3107_v47  ;;  %v3117_v7 = vand.u32 2147483647, %v3107_v47  ;;  %vm3113_vm4 = vweird.f32 %v3107_v47 }
 0xcd5   :  { %6096 = vrcp.f32 %v3127_v55  ;;  %v3139_v12 = vand.u32 2147483648, %v3127_v55  ;;  %vm3133_vm2 = vweird.f32 %v3127_v55 }
 0xcd6   :  { %v3120_v57 = vor.u32 1.1754944e-38, %v3119_v10  ;;  %vm3118_vm7 = vcmp.eq.f32.partialorder %v3117_v7, 8.507059e+37 }
 0xcda   :  { %v6095_v8 = vpop.eup %6094 }
 0xcdb   :  { %v6097_v18 = vpop.eup %6096  ;;  %v3109_v59 = vmul.f32 %v6095_v8, %v3107_v47  ;;  %vm3114_vm14 = vweird.f32 %v6095_v8  ;;  %v3140_v47 = vor.u32 1.1754944e-38, %v3139_v12 }
 0xcdc   :  { %v3129_v22 = vmul.f32 %v6097_v18, %v3127_v55  ;;  %vm3115_vm5 = vmor %vm3113_vm4, %vm3114_vm14  ;;  %vm3134_vm15 = vweird.f32 %v6097_v18 }
 0xcdd   :  { %v3110_v52 = vsub.f32 1.0, %v3109_v59  ;;  %v3137_v59 = vand.u32 2147483647, %v3127_v55  ;;  %vm3135_vm3 = vmor %vm3133_vm2, %vm3134_vm15 }
 0xcde   :  { %v3130_v9 = vsub.f32 1.0, %v3129_v22 }
 0xcdf   :  { %v3111_v11 = vmul.f32 %v6095_v8, %v3110_v52  ;;  %vm3138_vm14 = vcmp.eq.f32.partialorder %v3137_v59, 8.507059e+37 }
 0xce0   :  { %v3131_v61 = vmul.f32 %v6097_v18, %v3130_v9 }
 0xce1   :  { %v3112_v50 = vadd.f32 %v6095_v8, %v3111_v11 }
 0xce2   :  { %v3132_v46 = vadd.f32 %v6097_v18, %v3131_v61 }
 0xce3   :  { %v3116_v33 = vsel %vm3115_vm5, %v6095_v8, %v3112_v50 }
 0xce4   :  { %v3121_v62 = vsel %vm3118_vm7, %v3120_v57, %v3116_v33  ;;  %v3136_v52 = vsel %vm3135_vm3, %v6097_v18, %v3132_v46 }
 0xce5   :  { %v3143_v36 = vmul.f32 %v3121_v62, %v3101_v42  ;;  %v3141_v10 = vsel %vm3138_vm14, %v3140_v47, %v3136_v52 }
 0xce6   :  { %v3146_v9 = vsub.f32 1.0, %v3141_v10  ;;  %v3148_v7 = vmul.f32 %v3141_v10, %v7790_v54 }
 0xce7   :  { %v3144_v22 = vadd.f32 %v3143_v36, %v2504_v38 }
 0xce9   :  { %6098 = vtanh.f32 %v3144_v22 }
 0xcef   :  { %v6099_v8 = vpop.eup %6098 }
 0xcf0   :  { %v3147_v11 = vmul.f32 %v6099_v8, %v3146_v9 }
 0xcf2   :  { %v7820_v39 = vadd.f32 %v3148_v7, %v3147_v11 }
 0xcf4   :  { %5816 = vmatmul.msk.f32.vlgmr.msra.gmra.mxu1 %vm484_vm1, %v7820_v39  ;;  %5817 = vmatmul.msk.f32.vlgmr.msra.gmra.mxu2 %vm484_vm1, %v7820_v39 }
 0xcf5   :  { %5818 = vmatmul.msk.f32.vlgmr.msra.gmra.mxu3 %vm484_vm1, %v7820_v39  ;;  %3428 = vmatpush.msra.mxu1 %v7591_v63 }
 0xcf6   :  { %3499 = vmatpush.msra.mxu2 %v7460_v14  ;;  %3519 = vmatpush.msra.mxu3 %v7589_v40 }
 0xcf7   :  { %3429 = vmatpush.msra.mxu1 %v7597_v0 }
 0xcf8   :  { %3500 = vmatpush.msra.mxu2 %v7465_v16  ;;  %3520 = vmatpush.msra.mxu3 %v7593_v1 }
 0xcf9   :  { %3430 = vmatpush.msra.mxu1 %v7601_v58 }
 0xcfa   :  { %3501 = vmatpush.msra.mxu2 %v7468_v17  ;;  %3521 = vmatpush.msra.mxu3 %v7599_v2  ;;  %v2544_v17 = vadd.f32 %v7726_v34, %v7738_v6 }
 0xcfb   :  { %3431 = vmatpush.msra.mxu1 %v7608_v21 }
 0xcfc   :  { %3502 = vmatpush.msra.mxu2 %v7471_v45  ;;  %3522 = vmatpush.msra.mxu3 %v7606_v20 }
 0xd71   :  { %v3171_v14 = vpop.f32.mrf.mxu1 }
 0xd72   :  { %v3172_v16 = vadd.f32 %v3171_v14, %v7714_v41  ;;  %v2564_v14 = vadd.f32 %v7773_v60, %v7747_v28 }
 0xd74   :  { %v3214_v55 = vadd.f32 %v3172_v16, %v2524_v24 }
 0xd76   :  { %v5819_v18 = vmul.f32 -1.442695, %v3214_v55 }
 0xd77   :  { %v3191_v61 = vpop.f32.mrf.mxu2 }
 0xd78   :  { %6100 = vpow2.f32 %v5819_v18  ;;  %v3192_v50 = vadd.f32 %v3191_v61, %v7736_v31  ;;  %v3211_v52 = vpop.f32.mrf.mxu3 }
 0xd79   :  { %v3212_v11 = vadd.f32 %v3211_v52, %v7744_v23 }
 0xd7a   :  { %v3234_v57 = vadd.f32 %v3192_v50, %v2544_v17 }
 0xd7c   :  { %v5820_v42 = vmul.f32 -1.442695, %v3234_v57 }
 0xd7e   :  { %v6101_v45 = vpop.eup %6100  ;;  %6102 = vpow2.f32 %v5820_v42 }
 0xd7f   :  { %v3218_v33 = vadd.f32 1.0, %v6101_v45 }
 0xd81   :  { %6104 = vrcp.f32 %v3218_v33  ;;  %v3230_v12 = vand.u32 2147483648, %v3218_v33  ;;  %v3228_v22 = vand.u32 2147483647, %v3218_v33  ;;  %vm3224_vm5 = vweird.f32 %v3218_v33 }
 0xd83   :  { %v3231_v9 = vor.u32 1.1754944e-38, %v3230_v12  ;;  %vm3229_vm15 = vcmp.eq.f32.partialorder %v3228_v22, 8.507059e+37  ;;  %v6292_v12 = vld [vmem:[#allocation15 + $0x18] sm:$0xff] }
 0xd84   :  { %v6103_v62 = vpop.eup %6102 }
 0xd85   :  { %v3238_v46 = vadd.f32 1.0, %v6103_v62 }
 0xd87   :  { %v6105_v19 = vpop.eup %6104  ;;  %6106 = vrcp.f32 %v3238_v46  ;;  %v3250_v55 = vand.u32 2147483648, %v3238_v46  ;;  %v3248_v61 = vand.u32 2147483647, %v3238_v46  ;;  %vm3244_vm3 = vweird.f32 %v3238_v46 }
 0xd88   :  { %v3220_v38 = vmul.f32 %v6105_v19, %v3218_v33  ;;  %vm3225_vm4 = vweird.f32 %v6105_v19 }
 0xd89   :  { %vm3226_vm7 = vmor %vm3224_vm5, %vm3225_vm4  ;;  %v3251_v57 = vor.u32 1.1754944e-38, %v3250_v55  ;;  %vm3249_vm4 = vcmp.eq.f32.partialorder %v3248_v61, 8.507059e+37 }
 0xd8a   :  { %v3221_v36 = vsub.f32 1.0, %v3220_v38 }
 0xd8c   :  { %v3222_v59 = vmul.f32 %v6105_v19, %v3221_v36  ;;  %v6291_v36 = vld [vmem:[#allocation15 + $0x30] sm:$0xff] }
 0xd8d   :  { %v6107_v34 = vpop.eup %6106 }
 0xd8e   :  { %v3240_v47 = vmul.f32 %v6107_v34, %v3238_v46  ;;  %v3223_v10 = vadd.f32 %v6105_v19, %v3222_v59  ;;  %vm3245_vm2 = vweird.f32 %v6107_v34  ;;  %v6290_v46 = vld [vmem:[#allocation15 + $0x48] sm:$0xff]  ;;  %v6293_v59 = vld [vmem:[#allocation15] sm:$0xff] }
 0xd8f   :  { %vm3246_vm14 = vmor %vm3244_vm3, %vm3245_vm2 }
 0xd90   :  { %v3241_v8 = vsub.f32 1.0, %v3240_v47  ;;  %v3227_v7 = vsel %vm3226_vm7, %v6105_v19, %v3223_v10 }
 0xd91   :  { %v3232_v24 = vsel %vm3229_vm15, %v3231_v9, %v3227_v7 }
 0xd92   :  { %v3242_v16 = vmul.f32 %v6107_v34, %v3241_v8  ;;  %v3254_v18 = vmul.f32 %v3232_v24, %v3212_v11 }
 0xd94   :  { %v3243_v17 = vadd.f32 %v6107_v34, %v3242_v16  ;;  %v3255_v50 = vadd.f32 %v3254_v18, %v2564_v14 }
 0xd96   :  { %v3247_v42 = vsel %vm3246_vm14, %v6107_v34, %v3243_v17  ;;  %6108 = vtanh.f32 %v3255_v50  ;;  %v2584_v34 = vadd.f32 %v7706_v51, %v7716_v13 }
 0xd97   :  { %v3252_v45 = vsel %vm3249_vm4, %v3251_v57, %v3247_v42 }
 0xd98   :  { %v3257_v33 = vsub.f32 1.0, %v3252_v45  ;;  %v3259_v60 = vmul.f32 %v3252_v45, %v7820_v39 }
 0xd9c   :  { %v6109_v62 = vpop.eup %6108 }
 0xd9d   :  { %v3258_v19 = vmul.f32 %v6109_v62, %v3257_v33 }
 0xd9f   :  { %v7850_v38 = vadd.f32 %v3259_v60, %v3258_v19 }
 0xda1   :  { %5821 = vmatmul.msk.f32.vlgmr.msrb.gmra.mxu0 %vm484_vm1, %v7850_v38  ;;  %5822 = vmatmul.msk.f32.vlgmr.msrb.gmra.mxu1 %vm484_vm1, %v7850_v38 }
 0xda2   :  { %5823 = vmatmul.msk.f32.vlgmr.msrb.gmra.mxu2 %vm484_vm1, %v7850_v38  ;;  %3539 = vmatpush.msrb.mxu0 %v7591_v63 }
 0xda3   :  { %3610 = vmatpush.msrb.mxu1 %v6290_v46  ;;  %3630 = vmatpush.msrb.mxu2 %v7589_v40 }
 0xda4   :  { %3540 = vmatpush.msrb.mxu0 %v7597_v0 }
 0xda5   :  { %3611 = vmatpush.msrb.mxu1 %v6291_v36  ;;  %3631 = vmatpush.msrb.mxu2 %v7593_v1  ;;  %v2604_v1 = vadd.f32 %v7724_v26, %v7738_v6  ;;  %v2624_v36 = vadd.f32 %v7730_v27, %v7747_v28 }
 0xda6   :  { %3541 = vmatpush.msrb.mxu0 %v7601_v58 }
 0xda7   :  { %3612 = vmatpush.msrb.mxu1 %v6292_v12  ;;  %3632 = vmatpush.msrb.mxu2 %v7599_v2 }
 0xda8   :  { %3542 = vmatpush.msrb.mxu0 %v7608_v21 }
 0xda9   :  { %3613 = vmatpush.msrb.mxu1 %v6293_v59  ;;  %3633 = vmatpush.msrb.mxu2 %v7606_v20 }
 0xe1e   :  { %v3282_v22 = vpop.f32.mrf.mxu0  ;;  %v3302_v40 = vpop.f32.mrf.mxu1 }
 0xe1f   :  { %v3283_v52 = vadd.f32 %v3282_v22, %v7714_v41  ;;  %v3303_v47 = vadd.f32 %v3302_v40, %v7736_v31 }
 0xe21   :  { %v3325_v10 = vadd.f32 %v3283_v52, %v2584_v34  ;;  %v3345_v2 = vadd.f32 %v3303_v47, %v2604_v1 }
 0xe23   :  { %v5824_v9 = vmul.f32 -1.442695, %v3325_v10  ;;  %v5825_v8 = vmul.f32 -1.442695, %v3345_v2 }
 0xe25   :  { %6110 = vpow2.f32 %v5824_v9  ;;  %v3322_v42 = vpop.f32.mrf.mxu2 }
 0xe26   :  { %6112 = vpow2.f32 %v5825_v8  ;;  %v3323_v62 = vadd.f32 %v3322_v42, %v7744_v23 }
 0xe2b   :  { %v6111_v11 = vpop.eup %6110 }
 0xe2c   :  { %v6113_v20 = vpop.eup %6112  ;;  %v3329_v7 = vadd.f32 1.0, %v6111_v11  ;;  %v2664_v11 = vadd.f32 %v7708_v48, %v7738_v6 }
 0xe2d   :  { %v3349_v14 = vadd.f32 1.0, %v6113_v20 }
 0xe2e   :  { %6114 = vrcp.f32 %v3329_v7  ;;  %v3341_v61 = vand.u32 2147483648, %v3329_v7  ;;  %v3339_v50 = vand.u32 2147483647, %v3329_v7  ;;  %vm3335_vm7 = vweird.f32 %v3329_v7 }
 0xe2f   :  { %6116 = vrcp.f32 %v3349_v14  ;;  %v3361_v12 = vand.u32 2147483648, %v3349_v14  ;;  %vm3355_vm14 = vweird.f32 %v3349_v14  ;;  %v3359_v22 = vand.u32 2147483647, %v3349_v14 }
 0xe30   :  { %v3342_v33 = vor.u32 1.1754944e-38, %v3341_v61  ;;  %vm3340_vm2 = vcmp.eq.f32.partialorder %v3339_v50, 8.507059e+37  ;;  %v7909_v61 = vld [vmem:[%s8627_s13 + $0x8] sm:$0xff]  ;;  %v7916_v50 = vld [vmem:[%s8627_s13] sm:$0xff] }
 0xe31   :  { %v3362_v1 = vor.u32 1.1754944e-38, %v3361_v12 }
 0xe34   :  { %v6115_v51 = vpop.eup %6114 }
 0xe35   :  { %v6117_v24 = vpop.eup %6116  ;;  %v3331_v16 = vmul.f32 %v6115_v51, %v3329_v7  ;;  %vm3336_vm5 = vweird.f32 %v6115_v51 }
 0xe36   :  { %v3351_v26 = vmul.f32 %v6117_v24, %v3349_v14  ;;  %vm3337_vm15 = vmor %vm3335_vm7, %vm3336_vm5  ;;  %vm3356_vm3 = vweird.f32 %v6117_v24  ;;  %vm3360_vm5 = vcmp.eq.f32.partialorder %v3359_v22, 8.507059e+37 }
 0xe37   :  { %v3332_v55 = vsub.f32 1.0, %v3331_v16  ;;  %vm3357_vm4 = vmor %vm3355_vm14, %vm3356_vm3 }
 0xe38   :  { %v3352_v18 = vsub.f32 1.0, %v3351_v26 }
 0xe39   :  { %v3333_v17 = vmul.f32 %v6115_v51, %v3332_v55 }
 0xe3a   :  { %v3353_v57 = vmul.f32 %v6117_v24, %v3352_v18  ;;  %v7897_v18 = vld [vmem:[%s8627_s13 + $0x18] sm:$0xff] }
 0xe3b   :  { %v3334_v45 = vadd.f32 %v6115_v51, %v3333_v17 }
 0xe3c   :  { %v3354_v46 = vadd.f32 %v6117_v24, %v3353_v57 }
 0xe3d   :  { %v3338_v19 = vsel %vm3337_vm15, %v6115_v51, %v3334_v45 }
 0xe3e   :  { %v3343_v60 = vsel %vm3340_vm2, %v3342_v33, %v3338_v19  ;;  %v3358_v34 = vsel %vm3357_vm4, %v6117_v24, %v3354_v46  ;;  %v2644_v24 = vadd.f32 %v7775_v53, %v7716_v13  ;;  %v7902_v53 = vld [vmem:[%s8627_s13 + $0x10] sm:$0xff] }
 0xe3f   :  { %v3365_v59 = vmul.f32 %v3343_v60, %v3323_v62  ;;  %v3363_v52 = vsel %vm3360_vm5, %v3362_v1, %v3358_v34 }
 0xe40   :  { %v3368_v47 = vsub.f32 1.0, %v3363_v52  ;;  %v3370_v9 = vmul.f32 %v3363_v52, %v7850_v38  ;;  %v2684_v52 = vadd.f32 %v7728_v4, %v7747_v28  ;;  %v7943_v4 = vld [vmem:[#allocation19 + $0x60] sm:$0xff] }
 0xe41   :  { %v3366_v40 = vadd.f32 %v3365_v59, %v2624_v36 }
 0xe43   :  { %6118 = vtanh.f32 %v3366_v40 }
 0xe49   :  { %v6119_v10 = vpop.eup %6118 }
 0xe4a   :  { %v3369_v2 = vmul.f32 %v6119_v10, %v3368_v47 }
 0xe4c   :  { %v7876_v8 = vadd.f32 %v3370_v9, %v3369_v2 }
 0xe4e   :  { %5826 = vmatmul.msk.f32.vlgmr.msrb.gmra.mxu3 %vm484_vm1, %v7876_v8  ;;  %5827 = vmatmul.msk.f32.vlgmr.msra.gmra.mxu0 %vm484_vm1, %v7876_v8 }
 0xe4f   :  { %5828 = vmatmul.msk.f32.vlgmr.msra.gmra.mxu1 %vm484_vm1, %v7876_v8  ;;  %3650 = vmatpush.msrb.mxu3 %v7591_v63 }
 0xe50   :  { %3758 = vmatpush.msra.mxu0 %v7897_v18  ;;  %3778 = vmatpush.msra.mxu1 %v7897_v18 }
 0xe51   :  { %3651 = vmatpush.msrb.mxu3 %v7597_v0 }
 0xe52   :  { %3759 = vmatpush.msra.mxu0 %v7902_v53  ;;  %3779 = vmatpush.msra.mxu1 %v7902_v53 }
 0xe53   :  { %3652 = vmatpush.msrb.mxu3 %v7601_v58 }
 0xe54   :  { %3760 = vmatpush.msra.mxu0 %v7909_v61  ;;  %3780 = vmatpush.msra.mxu1 %v7909_v61 }
 0xe55   :  { %3653 = vmatpush.msrb.mxu3 %v7608_v21 }
 0xe56   :  { %3761 = vmatpush.msra.mxu0 %v7916_v50  ;;  %3781 = vmatpush.msra.mxu1 %v7916_v50 }
 0xecb   :  { %v3413_v27 = vpop.f32.mrf.mxu0 }
 0xecc   :  { %v3414_v20 = vadd.f32 %v3413_v27, %v7736_v31  ;;  %v3433_v36 = vpop.f32.mrf.mxu1 }
 0xecd   :  { %v3434_v22 = vadd.f32 %v3433_v36, %v7744_v23 }
 0xece   :  { %v3456_v7 = vadd.f32 %v3414_v20, %v2664_v11 }
 0xed0   :  { %v5830_v14 = vmul.f32 -1.442695, %v3456_v7 }
 0xed1   :  { %v3393_v51 = vpop.f32.mrf.mxu3 }
 0xed2   :  { %6120 = vpow2.f32 %v5830_v14  ;;  %v3394_v63 = vadd.f32 %v3393_v51, %v7714_v41 }
 0xed4   :  { %v3436_v0 = vadd.f32 %v3394_v63, %v2644_v24 }
 0xed6   :  { %v5829_v16 = vmul.f32 -1.442695, %v3436_v0  ;;  %v7950_v0 = vld [vmem:[#allocation19 + $0x40] sm:$0xff] }
 0xed8   :  { %v6121_v58 = vpop.eup %6120  ;;  %6122 = vpow2.f32 %v5829_v16  ;;  %v7953_v16 = vld [vmem:[#allocation19 + $0x20] sm:$0xff] }
 0xed9   :  { %v3460_v21 = vadd.f32 1.0, %v6121_v58  ;;  %v7956_v58 = vld [vmem:[#allocation19] sm:$0xff] }
 0xedb   :  { %6124 = vrcp.f32 %v3460_v21  ;;  %v3472_v47 = vand.u32 2147483648, %v3460_v21  ;;  %vm3466_vm4 = vweird.f32 %v3460_v21  ;;  %v3470_v2 = vand.u32 2147483647, %v3460_v21 }
 0xedd   :  { %v3473_v11 = vor.u32 1.1754944e-38, %v3472_v47 }
 0xede   :  { %v6123_v26 = vpop.eup %6122 }
 0xedf   :  { %v3440_v55 = vadd.f32 1.0, %v6123_v26 }
 0xee1   :  { %6126 = vrcp.f32 %v3440_v55  ;;  %v6125_v48 = vpop.eup %6124  ;;  %v3452_v62 = vand.u32 2147483648, %v3440_v55  ;;  %v3450_v60 = vand.u32 2147483647, %v3440_v55  ;;  %vm3446_vm15 = vweird.f32 %v3440_v55 }
 0xee2   :  { %v3462_v17 = vmul.f32 %v6125_v48, %v3460_v21  ;;  %vm3467_vm14 = vweird.f32 %v6125_v48  ;;  %v7962_v21 = vld [vmem:[#allocation2 + $0x8] sm:$0xf] }
 0xee3   :  { %v3453_v59 = vor.u32 1.1754944e-38, %v3452_v62  ;;  %vm3451_vm3 = vcmp.eq.f32.partialorder %v3450_v60, 8.507059e+37  ;;  %vm3468_vm5 = vmor %vm3466_vm4, %vm3467_vm14 }
 0xee4   :  { %v3463_v45 = vsub.f32 1.0, %v3462_v17  ;;  %v2704_v17 = vadd.f32 %v7734_v32, %v7716_v13 }
 0xee6   :  { %v3464_v46 = vmul.f32 %v6125_v48, %v3463_v45 }
 0xee7   :  { %v6127_v57 = vpop.eup %6126 }
 0xee8   :  { %v3442_v42 = vmul.f32 %v6127_v57, %v3440_v55  ;;  %vm3447_vm7 = vweird.f32 %v6127_v57  ;;  %v3465_v34 = vadd.f32 %v6125_v48, %v3464_v46 }
 0xee9   :  { %vm3448_vm2 = vmor %vm3446_vm15, %vm3447_vm7  ;;  %vm3471_vm7 = vcmp.eq.f32.partialorder %v3470_v2, 8.507059e+37 }
 0xeea   :  { %v3443_v33 = vsub.f32 1.0, %v3442_v42  ;;  %v3469_v27 = vsel %vm3468_vm5, %v6125_v48, %v3465_v34  ;;  %v7979_v34 = vld [vmem:[#allocation21 + $0x30] sm:$0xff] }
 0xeeb   :  { %v3474_v20 = vsel %vm3471_vm7, %v3473_v11, %v3469_v27 }
 0xeec   :  { %v3444_v19 = vmul.f32 %v6127_v57, %v3443_v33  ;;  %v3479_v7 = vsub.f32 1.0, %v3474_v20  ;;  %v3481_v51 = vmul.f32 %v3474_v20, %v7876_v8 }
 0xeee   :  { %v3445_v12 = vadd.f32 %v6127_v57, %v3444_v19 }
 0xef0   :  { %v3449_v40 = vsel %vm3448_vm2, %v6127_v57, %v3445_v12  ;;  %v2724_v57 = vadd.f32 %v7777_v49, %v7738_v6 }
 0xef1   :  { %v3454_v1 = vsel %vm3451_vm3, %v3453_v59, %v3449_v40  ;;  %v7974_v59 = vld [vmem:[#allocation21 + $0x48] sm:$0xff]  ;;  %v7976_v40 = vld [vmem:[#allocation18] ss:$0 sm:$0xff] }
 0xef2   :  { %v3476_v10 = vmul.f32 %v3454_v1, %v3434_v22  ;;  %v7982_v1 = vld [vmem:[#allocation21 + $0x18] sm:$0xff] }
 0xef4   :  { %v3477_v9 = vadd.f32 %v3476_v10, %v2684_v52  ;;  %v7984_v52 = vld [vmem:[#allocation21] sm:$0xff] }
 0xef6   :  { %6128 = vtanh.f32 %v3477_v9 }
 0xefc   :  { %v6129_v14 = vpop.eup %6128 }
 0xefd   :  { %v3480_v24 = vmul.f32 %v6129_v14, %v3479_v7 }
 0xeff   :  { %v7926_v63 = vadd.f32 %v3481_v51, %v3480_v24 }
 0xf01   :  { %8670 = vst [vmem:[#allocation37_spill] sm:$0xff] %v7926_v63  ;;  %5831 = vmatmul.msk.f32.vlgmr.msra.gmra.mxu2 %vm484_vm1, %v7926_v63  ;;  %5832 = vmatmul.msk.f32.vlgmr.msra.gmra.mxu3 %vm484_vm1, %v7926_v63 }
 0xf02   :  { %5833 = vmatmul.msk.f32.vlgmr.msrb.gmra.mxu0 %vm484_vm1, %v7926_v63  ;;  %3798 = vmatpush.msra.mxu2 %v7897_v18 }
 0xf03   :  { %3838 = vmatpush.msrb.mxu0 %v7897_v18  ;;  %3818 = vmatpush.msra.mxu3 %v7897_v18 }
 0xf04   :  { %3799 = vmatpush.msra.mxu2 %v7902_v53 }
 0xf05   :  { %3839 = vmatpush.msrb.mxu0 %v7902_v53  ;;  %3819 = vmatpush.msra.mxu3 %v7902_v53 }
 0xf06   :  { %3800 = vmatpush.msra.mxu2 %v7909_v61 }
 0xf07   :  { %3840 = vmatpush.msrb.mxu0 %v7909_v61  ;;  %3820 = vmatpush.msra.mxu3 %v7909_v61 }
 0xf08   :  { %3801 = vmatpush.msra.mxu2 %v7916_v50 }
 0xf09   :  { %3841 = vmatpush.msrb.mxu0 %v7916_v50  ;;  %3821 = vmatpush.msra.mxu3 %v7916_v50 }
 0xf0a   :  { %5842 = vmatmul.msk.f32.vlgmr.msra.gmra.mxu0 %vm484_vm1, %v7751_v30 }
 0xf0b   :  { %3926 = vmatpush.msra.mxu0 %v7943_v4 }
 0xf0d   :  { %3927 = vmatpush.msra.mxu0 %v7950_v0 }
 0xf0f   :  { %3928 = vmatpush.msra.mxu0 %v7953_v16 }
 0xf11   :  { %3929 = vmatpush.msra.mxu0 %v7956_v58 }
 0xf12   :  { %5846 = vmatmul.msk.f32.vlgmr.msrb.gmra.mxu0 %vm484_vm1, %v7876_v8 }
 0xf13   :  { %4037 = vmatpush.msrb.mxu0 %v7974_v59 }
 0xf15   :  { %4038 = vmatpush.msrb.mxu0 %v7979_v34 }
 0xf17   :  { %4039 = vmatpush.msrb.mxu0 %v7982_v1 }
 0xf19   :  { %4040 = vmatpush.msrb.mxu0 %v7984_v52 }
 0xf1a   :  { %5850 = vmatmul.msk.f32.vlgmr.msra.gmra.mxu0 %vm484_vm1, %v7962_v21 }
 0xf7f   :  { %v3544_v26 = vpop.f32.mrf.mxu0 }
 0xf84   :  { %v3504_v55 = vpop.f32.mrf.mxu2  ;;  %v3524_v48 = vpop.f32.mrf.mxu3 }
 0xf85   :  { %v3505_v42 = vadd.f32 %v3504_v55, %v7714_v41  ;;  %v3525_v45 = vadd.f32 %v3524_v48, %v7736_v31 }
 0xf87   :  { %v3547_v33 = vadd.f32 %v3505_v42, %v2704_v17  ;;  %v3567_v62 = vadd.f32 %v3525_v45, %v2724_v57  ;;  %v3763_v19 = vpop.f32.mrf.mxu0 }
 0xf88   :  { %v3764_v47 = vadd.f32 %v7976_v40, %v3763_v19 }
 0xf89   :  { %v5834_v60 = vmul.f32 -1.442695, %v3547_v33  ;;  %v5835_v46 = vmul.f32 -1.442695, %v3567_v62  ;;  %v3545_v33 = vadd.f32 %v3544_v26, %v7744_v23 }
 0xf8b   :  { %6130 = vpow2.f32 %v5834_v60 }
 0xf8c   :  { %6132 = vpow2.f32 %v5835_v46 }
 0xf8f   :  { %v7972_v36 = vpop.f32.mrf.mxu0 }
 0xf90   :  { %8671 = vst [vmem:[#allocation38_spill] sm:$0xff] %v7972_v36 }
 0xf91   :  { %v6131_v12 = vpop.eup %6130 }
 0xf92   :  { %v6133_v32 = vpop.eup %6132  ;;  %v3551_v22 = vadd.f32 1.0, %v6131_v12  ;;  %v7990_v12 = vld [vmem:[#allocation19 + $0x68] sm:$0xff] }
 0xf93   :  { %v3571_v49 = vadd.f32 1.0, %v6133_v32  ;;  %v2744_v32 = vadd.f32 %v7710_v29, %v7747_v28  ;;  %4178 = vmatpush.msra.mxu0 %v7990_v12  ;;  %v8001_v29 = vld [vmem:[#allocation19 + $0x8] sm:$0xff] }
 0xf94   :  { %6134 = vrcp.f32 %v3551_v22  ;;  %v3563_v51 = vand.u32 2147483648, %v3551_v22  ;;  %v3561_v48 = vand.u32 2147483647, %v3551_v22  ;;  %vm3557_vm2 = vweird.f32 %v3551_v22 }
 0xf95   :  { %6136 = vrcp.f32 %v3571_v49  ;;  %vm3577_vm5 = vweird.f32 %v3571_v49 }
 0xf96   :  { %v3564_v45 = vor.u32 1.1754944e-38, %v3563_v51  ;;  %vm3562_vm14 = vcmp.eq.f32.partialorder %v3561_v48, 8.507059e+37 }
 0xf97   :  { %v3931_v10 = vpop.f32.mrf.mxu0 }
 0xf98   :  { %v3994_v2 = vadd.f32 %v3931_v10, %v3764_v47  ;;  %v3583_v10 = vand.u32 2147483648, %v3571_v49 }
 0xf9a   :  { %v6135_v9 = vpop.eup %6134  ;;  %v5854_v27 = vmul.f32 -1.442695, %v3994_v2  ;;  %v7995_v2 = vld [vmem:[#allocation19 + $0x48] sm:$0xff] }
 0xf9b   :  { %v6137_v11 = vpop.eup %6136  ;;  %v3553_v20 = vmul.f32 %v6135_v9, %v3551_v22  ;;  %vm3558_vm15 = vweird.f32 %v6135_v9  ;;  %v3581_v22 = vand.u32 2147483647, %v3571_v49  ;;  %4179 = vmatpush.msra.mxu0 %v7995_v2 }
 0xf9c   :  { %v3573_v7 = vmul.f32 %v6137_v11, %v3571_v49  ;;  %6138 = vpow2.f32 %v5854_v27  ;;  %vm3559_vm3 = vmor %vm3557_vm2, %vm3558_vm15  ;;  %vm3578_vm4 = vweird.f32 %v6137_v11  ;;  %v7998_v27 = vld [vmem:[#allocation19 + $0x28] sm:$0xff] }
 0xf9d   :  { %v3554_v14 = vsub.f32 1.0, %v3553_v20  ;;  %vm3579_vm7 = vmor %vm3577_vm5, %vm3578_vm4  ;;  %v3584_v20 = vor.u32 1.1754944e-38, %v3583_v10  ;;  %4180 = vmatpush.msra.mxu0 %v7998_v27  ;;  %vm3582_vm15 = vcmp.eq.f32.partialorder %v3581_v22, 8.507059e+37  ;;  %v8049_v10 = vld [vmem:[#allocation21 + $0x20] sm:$0xff]  ;;  %v8054_v22 = vld [vmem:[#allocation19 + $0x10] sm:$0xff] }
 0xf9e   :  { %v3574_v24 = vsub.f32 1.0, %v3573_v7 }
 0xf9f   :  { %v3555_v55 = vmul.f32 %v6135_v9, %v3554_v14  ;;  %4181 = vmatpush.msra.mxu0 %v8001_v29 }
 0xfa0   :  { %v3575_v17 = vmul.f32 %v6137_v11, %v3574_v24 }
 0xfa1   :  { %v3556_v57 = vadd.f32 %v6135_v9, %v3555_v55 }
 0xfa2   :  { %v6139_v42 = vpop.eup %6138  ;;  %v3576_v46 = vadd.f32 %v6137_v11, %v3575_v17 }
 0xfa3   :  { %v3560_v62 = vsel %vm3559_vm3, %v6135_v9, %v3556_v57  ;;  %v3998_v19 = vadd.f32 1.0, %v6139_v42 }
 0xfa4   :  { %v3565_v60 = vsel %vm3562_vm14, %v3564_v45, %v3560_v62  ;;  %v3580_v9 = vsel %vm3579_vm7, %v6137_v11, %v3576_v46 }
 0xfa5   :  { %v3587_v47 = vmul.f32 %v3565_v60, %v3545_v33  ;;  %6140 = vrcp.f32 %v3998_v19  ;;  %v3585_v14 = vsel %vm3582_vm15, %v3584_v20, %v3580_v9  ;;  %v4010_v11 = vand.u32 2147483648, %v3998_v19  ;;  %v8058_v9 = vld [vmem:[#allocation21 + $0x58] sm:$0xff]  ;;  %v8071_v20 = vld [vmem:[#allocation21 + $0x28] sm:$0xff] }
 0xfa6   :  { %v3590_v51 = vsub.f32 1.0, %v3585_v14  ;;  %v3592_v48 = vmul.f32 %v3585_v14, %v7926_v63  ;;  %v4008_v42 = vand.u32 2147483647, %v3998_v19  ;;  %vm4004_vm3 = vweird.f32 %v3998_v19 }
 0xfa7   :  { %v3588_v26 = vadd.f32 %v3587_v47, %v2744_v32  ;;  %v4011_v62 = vor.u32 1.1754944e-38, %v4010_v11  ;;  %v8027_v47 = vld [vmem:[#allocation19 + $0x70] sm:$0xff]  ;;  %v2787_v11 = vadd.f32 %v7742_v35, %v7738_v6  ;;  %v8109_v6 = vld [vmem:[#allocation19 + $0x38] sm:$0xff] }
 0xfa8   :  { %vm4009_vm4 = vcmp.eq.f32.partialorder %v4008_v42, 8.507059e+37 }
 0xfa9   :  { %6142 = vtanh.f32 %v3588_v26  ;;  %v8056_v26 = vld [vmem:[#allocation21 + $0x8] sm:$0xff] }
 0xfaa   :  { %8673 = vst [vmem:[#allocation40_spill] sm:$0xff] %v8056_v26 }
 0xfab   :  { %v6141_v7 = vpop.eup %6140 }
 0xfac   :  { %v4000_v49 = vmul.f32 %v6141_v7, %v3998_v19  ;;  %vm4005_vm2 = vweird.f32 %v6141_v7  ;;  %v8021_v19 = vld [vmem:[#allocation21 + $0x50] sm:$0xff] }
 0xfad   :  { %vm4006_vm14 = vmor %vm4004_vm3, %vm4005_vm2 }
 0xfae   :  { %v4001_v24 = vsub.f32 1.0, %v4000_v49  ;;  %v2767_v49 = vadd.f32 %v7732_v37, %v7716_v13  ;;  %v8105_v37 = vld [vmem:[#allocation19 + $0x58] sm:$0xff] }
 0xfaf   :  { %v6143_v55 = vpop.eup %6142 }
 0xfb0   :  { %v3591_v17 = vmul.f32 %v6143_v55, %v3590_v51  ;;  %v4002_v57 = vmul.f32 %v6141_v7, %v4001_v24 }
 0xfb2   :  { %v8005_v45 = vadd.f32 %v3592_v48, %v3591_v17  ;;  %v4003_v33 = vadd.f32 %v6141_v7, %v4002_v57 }
 0xfb4   :  { %8672 = vst [vmem:[#allocation39_spill] sm:$0xff] %v8005_v45  ;;  %v4007_v60 = vsel %vm4006_vm14, %v6141_v7, %v4003_v33  ;;  %5836 = vmatmul.msk.f32.vlgmr.msrb.gmra.mxu1 %vm484_vm1, %v8005_v45  ;;  %5837 = vmatmul.msk.f32.vlgmr.msrb.gmra.mxu2 %vm484_vm1, %v8005_v45  ;;  %v8077_v7 = vld [vmem:[#allocation21 + $0x10] sm:$0xff] }
 0xfb5   :  { %5838 = vmatmul.msk.f32.vlgmr.msrb.gmra.mxu3 %vm484_vm1, %v8005_v45  ;;  %v4012_v46 = vsel %vm4009_vm4, %v4011_v62, %v4007_v60  ;;  %3858 = vmatpush.msrb.mxu1 %v7897_v18  ;;  %8674 = vst [vmem:[#allocation41_spill] sm:$0xff] %v8077_v7  ;;  %v8101_v60 = vld [vmem:[#allocation19 + $0x78] sm:$0xff] }
 0xfb6   :  { %v4014_v32 = vmul.f32 %v4012_v46, %v7751_v30  ;;  %3878 = vmatpush.msrb.mxu2 %v7897_v18  ;;  %3901 = vmatpush.msrb.mxu3 %v7897_v18  ;;  %v8037_v18 = vld [vmem:[#allocation19 + $0x50] sm:$0xff]  ;;  %v8113_v46 = vld [vmem:[#allocation19 + $0x18] sm:$0xff] }
 0xfb7   :  { %3859 = vmatpush.msrb.mxu1 %v7902_v53 }
 0xfb8   :  { %5855 = vmatmul.msk.f32.vlgmr.msrb.gmra.mxu0 %vm484_vm1, %v4014_v32  ;;  %3879 = vmatpush.msrb.mxu2 %v7902_v53 }
 0xfb9   :  { %3860 = vmatpush.msrb.mxu1 %v7909_v61  ;;  %3902 = vmatpush.msrb.mxu3 %v7902_v53  ;;  %v8041_v53 = vld [vmem:[#allocation21 + $0x38] sm:$0xff] }
 0xfba   :  { %3880 = vmatpush.msrb.mxu2 %v7909_v61  ;;  %4282 = vmatpush.msrb.mxu0 %v8021_v19 }
 0xfbb   :  { %3861 = vmatpush.msrb.mxu1 %v7916_v50  ;;  %3903 = vmatpush.msrb.mxu3 %v7909_v61  ;;  %v8043_v61 = vld [vmem:[#allocation19 + $0x30] sm:$0xff] }
 0xfbc   :  { %5843 = vmatmul.msk.f32.vlgmr.msra.gmra.mxu1 %vm484_vm1, %v7790_v54  ;;  %5844 = vmatmul.msk.f32.vlgmr.msra.gmra.mxu2 %vm484_vm1, %v7820_v39 }
 0xfbd   :  { %5845 = vmatmul.msk.f32.vlgmr.msra.gmra.mxu3 %vm484_vm1, %v7850_v38  ;;  %3881 = vmatpush.msrb.mxu2 %v7916_v50 }
 0xfbe   :  { %3946 = vmatpush.msra.mxu1 %v7990_v12  ;;  %3904 = vmatpush.msrb.mxu3 %v7916_v50  ;;  %v8067_v50 = vld [vmem:[#allocation21 + $0x40] sm:$0xff] }
 0xfbf   :  { %3966 = vmatpush.msra.mxu2 %v8027_v47  ;;  %4283 = vmatpush.msrb.mxu0 %v8041_v53 }
 0xfc0   :  { %3947 = vmatpush.msra.mxu1 %v7995_v2  ;;  %3986 = vmatpush.msra.mxu3 %v8101_v60 }
 0xfc1   :  { %3967 = vmatpush.msra.mxu2 %v8037_v18  ;;  %4284 = vmatpush.msrb.mxu0 %v8049_v10 }
 0xfc2   :  { %3948 = vmatpush.msra.mxu1 %v7998_v27  ;;  %3987 = vmatpush.msra.mxu3 %v8105_v37 }
 0xfc3   :  { %3968 = vmatpush.msra.mxu2 %v8043_v61  ;;  %4285 = vmatpush.msrb.mxu0 %v8056_v26 }
 0xfc4   :  { %5847 = vmatmul.msk.f32.vlgmr.msrb.gmra.mxu1 %vm484_vm1, %v7926_v63  ;;  %5848 = vmatmul.msk.f32.vlgmr.msrb.gmra.mxu2 %vm484_vm1, %v8005_v45 }
 0xfc5   :  { %3949 = vmatpush.msra.mxu1 %v8001_v29  ;;  %3969 = vmatpush.msra.mxu2 %v8054_v22 }
 0xfc6   :  { %3988 = vmatpush.msra.mxu3 %v8109_v6 }
 0xfc7   :  { %4057 = vmatpush.msrb.mxu1 %v8021_v19  ;;  %4077 = vmatpush.msrb.mxu2 %v8058_v9 }
 0xfc8   :  { %3989 = vmatpush.msra.mxu3 %v8113_v46 }
 0xfc9   :  { %4058 = vmatpush.msrb.mxu1 %v8041_v53  ;;  %4078 = vmatpush.msrb.mxu2 %v8067_v50 }
 0xfcb   :  { %4059 = vmatpush.msrb.mxu1 %v8049_v10  ;;  %4079 = vmatpush.msrb.mxu2 %v8071_v20 }
 0xfcc   :  { %5851 = vmatmul.msk.f32.vlgmr.msra.gmra.mxu1 %vm484_vm1, %v7962_v21  ;;  %5852 = vmatmul.msk.f32.vlgmr.msra.gmra.mxu2 %vm484_vm1, %v7962_v21 }
 0xfcd   :  { %4060 = vmatpush.msrb.mxu1 %v8056_v26  ;;  %4080 = vmatpush.msrb.mxu2 %v8077_v7 }
 0xfcf   :  { %4198 = vmatpush.msra.mxu1 %v8027_v47  ;;  %4218 = vmatpush.msra.mxu2 %v8101_v60 }
 0xfd1   :  { %4199 = vmatpush.msra.mxu1 %v8037_v18  ;;  %4219 = vmatpush.msra.mxu2 %v8105_v37 }
 0xfd3   :  { %4200 = vmatpush.msra.mxu1 %v8043_v61  ;;  %4220 = vmatpush.msra.mxu2 %v8109_v6 }
 0xfd4   :  { %5856 = vmatmul.msk.f32.vlgmr.msrb.gmra.mxu1 %vm484_vm1, %v4014_v32  ;;  %5857 = vmatmul.msk.f32.vlgmr.msrb.gmra.mxu2 %vm484_vm1, %v4014_v32 }
 0xfd5   :  { %4201 = vmatpush.msra.mxu1 %v8054_v22  ;;  %4221 = vmatpush.msra.mxu2 %v8113_v46 }
 0xfd7   :  { %4302 = vmatpush.msrb.mxu1 %v8058_v9  ;;  %4376 = vmatpush.msrb.mxu2 %v7943_v4 }
 0xfd9   :  { %4303 = vmatpush.msrb.mxu1 %v8067_v50  ;;  %4377 = vmatpush.msrb.mxu2 %v7950_v0 }
 0xfdb   :  { %4304 = vmatpush.msrb.mxu1 %v8071_v20  ;;  %4378 = vmatpush.msrb.mxu2 %v7953_v16 }
 0xfdd   :  { %4305 = vmatpush.msrb.mxu1 %v8077_v7  ;;  %4379 = vmatpush.msrb.mxu2 %v7956_v58 }
0x1031   :  { %v3615_v14 = vpop.f32.mrf.mxu1 }
0x1032   :  { %v3616_v51 = vadd.f32 %v3615_v14, %v7714_v41 }
0x1034   :  { %v3658_v24 = vadd.f32 %v3616_v51, %v2767_v49 }
0x1036   :  { %v5839_v55 = vmul.f32 -1.442695, %v3658_v24 }
0x1037   :  { %v3635_v48 = vpop.f32.mrf.mxu2 }
0x1038   :  { %6144 = vpow2.f32 %v5839_v55  ;;  %v3636_v17 = vadd.f32 %v3635_v48, %v7736_v31  ;;  %v3655_v55 = vpop.f32.mrf.mxu3 }
0x103a   :  { %v3678_v57 = vadd.f32 %v3636_v17, %v2787_v11 }
0x103c   :  { %v5840_v42 = vmul.f32 -1.442695, %v3678_v57 }
0x103e   :  { %v6145_v33 = vpop.eup %6144  ;;  %6146 = vpow2.f32 %v5840_v42  ;;  %v3656_v42 = vadd.f32 %v3655_v55, %v7744_v23 }
0x103f   :  { %v3662_v62 = vadd.f32 1.0, %v6145_v33 }
0x1041   :  { %6148 = vrcp.f32 %v3662_v62  ;;  %v3674_v14 = vand.u32 2147483648, %v3662_v62  ;;  %v3672_v51 = vand.u32 2147483647, %v3662_v62  ;;  %vm3668_vm7 = vweird.f32 %v3662_v62 }
0x1043   :  { %v3675_v17 = vor.u32 1.1754944e-38, %v3674_v14  ;;  %vm3673_vm2 = vcmp.eq.f32.partialorder %v3672_v51, 8.507059e+37 }
0x1044   :  { %v6147_v13 = vpop.eup %6146 }
0x1045   :  { %v3682_v41 = vadd.f32 1.0, %v6147_v13  ;;  %v2807_v13 = vadd.f32 %v7779_v15, %v7747_v28  ;;  %v2928_v28 = vsel %vm721_vm6, %v7751_v30, 0.0 }
0x1046   :  { %v3039_v15 = vsel %vm945_vm8, %v7790_v54, %v2928_v28  ;;  %v4042_v28 = vpop.f32.mrf.mxu0 }
0x1047   :  { %v6149_v31 = vpop.eup %6148  ;;  %6150 = vrcp.f32 %v3682_v41  ;;  %v3694_v36 = vand.u32 2147483648, %v3682_v41  ;;  %vm3688_vm14 = vweird.f32 %v3682_v41 }
0x1048   :  { %v3664_v35 = vmul.f32 %v6149_v31, %v3662_v62  ;;  %vm3669_vm5 = vweird.f32 %v6149_v31  ;;  %v3692_v62 = vand.u32 2147483647, %v3682_v41 }
0x1049   :  { %vm3670_vm15 = vmor %vm3668_vm7, %vm3669_vm5  ;;  %vm8678_vm7 = vcmask 257024  }
0x104a   :  { %v3665_v32 = vsub.f32 1.0, %v3664_v35  ;;  %vm3693_vm5 = vcmp.eq.f32.partialorder %v3692_v62, 8.507059e+37  ;;  %v3720_v62 = vld [vmem:[%s8631_s17] sm:$0x7] }
0x104c   :  { %v3666_v49 = vmul.f32 %v6149_v31, %v3665_v32 }
0x104d   :  { %v6151_v24 = vpop.eup %6150 }
0x104e   :  { %v3684_v48 = vmul.f32 %v6151_v24, %v3682_v41  ;;  %v3667_v11 = vadd.f32 %v6149_v31, %v3666_v49  ;;  %vm3689_vm3 = vweird.f32 %v6151_v24  ;;  %v3150_v41 = vsel %vm1169_vm9, %v7820_v39, %v3039_v15 }
0x104f   :  { %vm3690_vm4 = vmor %vm3688_vm14, %vm3689_vm3 }
0x1050   :  { %v3685_v57 = vsub.f32 1.0, %v3684_v48  ;;  %v3671_v33 = vsel %vm3670_vm15, %v6149_v31, %v3667_v11  ;;  %v3695_v48 = vor.u32 1.1754944e-38, %v3694_v36  ;;  %v3261_v36 = vsel %vm1393_vm10, %v7850_v38, %v3150_v41 }
0x1051   :  { %v3676_v35 = vsel %vm3673_vm2, %v3675_v17, %v3671_v33  ;;  %v3372_v30 = vsel %vm1617_vm11, %v7876_v8, %v3261_v36  ;;  %v8167_v33 = vpop.f32.mrf.mxu1  ;;  %v8189_v41 = vperm.slane %v3720_v62, 1 }
0x1052   :  { %v3686_v32 = vmul.f32 %v6151_v24, %v3685_v57  ;;  %v3698_v49 = vmul.f32 %v3676_v35, %v3656_v42  ;;  %v8171_v35 = vpop.f32.mrf.mxu2 }
0x1054   :  { %v3687_v14 = vadd.f32 %v6151_v24, %v3686_v32  ;;  %v3699_v7 = vadd.f32 %v3698_v49, %v2807_v13  ;;  %v3721_v32 = vld [vmem:[%s8632_s18] sm:$0x7] }
0x1056   :  { %v3691_v26 = vsel %vm3690_vm4, %v6151_v24, %v3687_v14  ;;  %6152 = vtanh.f32 %v3699_v7  ;;  %v3483_v24 = vsel %vm1841_vm12, %v7926_v63, %v3372_v30 }
0x1057   :  { %v3696_v23 = vsel %vm3693_vm5, %v3695_v48, %v3691_v26  ;;  %v3594_v17 = vsel %vm2065_vm0, %v8005_v45, %v3483_v24  ;;  %v8181_v48 = vperm.slane %v3721_v32, 0 }
0x1058   :  { %v3701_v31 = vsub.f32 1.0, %v3696_v23  ;;  %v3703_v26 = vmul.f32 %v3696_v23, %v8005_v45  ;;  %v8183_v23 = vperm.slane %v3720_v62, 0 }
0x1059   :  { %v8169_v13 = vpop.f32.mrf.mxu1 }
0x105a   :  { %v8179_v14 = vpop.f32.mrf.mxu2 }
0x105b   :  { %8679 = vst [vmem:[#allocation43_spill] sm:$0xff] %v8179_v14 }
0x105c   :  { %v6153_v51 = vpop.eup %6152 }
0x105d   :  { %v3702_v7 = vmul.f32 %v6153_v51, %v3701_v31  ;;  %v4043_v31 = vadd.f32 %v4042_v28, %v8183_v23  ;;  %v8187_v51 = vperm.slane %v3721_v32, 1 }
0x105f   :  { %v8143_v55 = vadd.f32 %v3703_v26, %v3702_v7 }
0x1061   :  { %8675 = vst [vmem:[#allocation42_spill] sm:$0xff] %v8143_v55  ;;  %v3705_v42 = vsel %vm2289_vm13, %v8143_v55, %v3594_v17  ;;  %5849 = vmatmul.msk.f32.vlgmr.msrb.gmra.mxu3 %vm484_vm1, %v8143_v55  ;;  %v3951_v49 = vpop.f32.mrf.mxu1 }
0x1062   :  { %5841 = vst.msk [vmem:[%s8633_s19 + $0x4] sm:$0xf] %vm8678_vm7, %v3705_v42  ;;  %4158 = vmatpush.msrb.mxu3 %v7943_v4  ;;  %v4092_v15 = vadd.f32 %v8181_v48, %v3951_v49  ;;  %v3971_v26 = vpop.f32.mrf.mxu2 }
0x1063   :  { %v4093_v30 = vadd.f32 %v8187_v51, %v3971_v26 }
0x1064   :  { %4159 = vmatpush.msrb.mxu3 %v7950_v0  ;;  %v4095_v36 = vadd.f32 %v4092_v15, %v4043_v31  ;;  %v8193_v15 = vpop.f32.mrf.mxu3 }
0x1066   :  { %4160 = vmatpush.msrb.mxu3 %v7953_v16  ;;  %v5858_v17 = vmul.f32 -1.442695, %v4095_v36 }
0x1068   :  { %4161 = vmatpush.msrb.mxu3 %v7956_v58  ;;  %6154 = vpow2.f32 %v5858_v17  ;;  %v8199_v17 = vperm.slane %v3720_v62, 2 }
0x1069   :  { %5853 = vmatmul.msk.f32.vlgmr.msra.gmra.mxu3 %vm484_vm1, %v7962_v21  ;;  %v4062_v7 = vpop.f32.mrf.mxu1 }
0x106a   :  { %4262 = vmatpush.msra.mxu3 %v7974_v59  ;;  %v4063_v24 = vadd.f32 %v4062_v7, %v8189_v41  ;;  %v4082_v56 = vpop.f32.mrf.mxu2 }
0x106c   :  { %4263 = vmatpush.msra.mxu3 %v7979_v34  ;;  %v4115_v42 = vadd.f32 %v4093_v30, %v4063_v24 }
0x106e   :  { %4264 = vmatpush.msra.mxu3 %v7982_v1  ;;  %v5859_v57 = vmul.f32 -1.442695, %v4115_v42  ;;  %v6155_v11 = vpop.eup %6154 }
0x106f   :  { %v4099_v49 = vadd.f32 1.0, %v6155_v11 }
0x1070   :  { %4265 = vmatpush.msra.mxu3 %v7984_v52  ;;  %6156 = vpow2.f32 %v5859_v57  ;;  %v8197_v57 = vperm.slane %v3721_v32, 2  ;;  %v4083_v32 = vadd.f32 %v4082_v56, %v8199_v17  ;;  %v3784_v56 = vadd.f32 %v7976_v40, %v8167_v33 }
0x1071   :  { %6158 = vrcp.f32 %v4099_v49  ;;  %v4111_v24 = vand.u32 2147483648, %v4099_v49  ;;  %vm4105_vm2 = vweird.f32 %v4099_v49  ;;  %v4109_v11 = vand.u32 2147483647, %v4099_v49 }
0x1073   :  { %vm4110_vm14 = vcmp.eq.f32.partialorder %v4109_v11, 8.507059e+37 }
0x1076   :  { %v6157_v43 = vpop.eup %6156 }
0x1077   :  { %v4119_v28 = vadd.f32 1.0, %v6157_v43  ;;  %v6159_v25 = vpop.eup %6158 }
0x1078   :  { %v4101_v3 = vmul.f32 %v6159_v25, %v4099_v49  ;;  %vm4106_vm15 = vweird.f32 %v6159_v25 }
0x1079   :  { %6160 = vrcp.f32 %v4119_v28  ;;  %vm4107_vm3 = vmor %vm4105_vm2, %vm4106_vm15  ;;  %vm4125_vm5 = vweird.f32 %v4119_v28  ;;  %v4129_v49 = vand.u32 2147483647, %v4119_v28 }
0x107a   :  { %v4102_v44 = vsub.f32 1.0, %v4101_v3  ;;  %v4112_v3 = vor.u32 1.1754944e-38, %v4111_v24 }
0x107b   :  { %vm4130_vm15 = vcmp.eq.f32.partialorder %v4129_v49, 8.507059e+37 }
0x107c   :  { %v4103_v5 = vmul.f32 %v6159_v25, %v4102_v44 }
0x107e   :  { %v4104_v30 = vadd.f32 %v6159_v25, %v4103_v5 }
0x107f   :  { %v6161_v31 = vpop.eup %6160 }
0x1080   :  { %v4121_v26 = vmul.f32 %v6161_v31, %v4119_v28  ;;  %v4108_v42 = vsel %vm4107_vm3, %v6159_v25, %v4104_v30  ;;  %vm4126_vm4 = vweird.f32 %v6161_v31 }
0x1081   :  { %vm4127_vm7 = vmor %vm4125_vm5, %vm4126_vm4 }
0x1082   :  { %v4122_v36 = vsub.f32 1.0, %v4121_v26  ;;  %v4113_v26 = vsel %vm4110_vm14, %v4112_v3, %v4108_v42 }
0x1084   :  { %v4123_v43 = vmul.f32 %v6161_v31, %v4122_v36 }
0x1086   :  { %v4124_v5 = vadd.f32 %v6161_v31, %v4123_v43 }
0x1088   :  { %v4128_v62 = vsel %vm4127_vm7, %v6161_v31, %v4124_v5 }
0x10e4   :  { %v8195_v7 = vpop.f32.mrf.mxu3 }
0x10e5   :  { %8680 = vst [vmem:[#allocation44_spill] sm:$0xff] %v8195_v7  ;;  %v4131_v7 = vand.u32 2147483648, %v4119_v28 }
0x10e7   :  { %v4132_v14 = vor.u32 1.1754944e-38, %v4131_v7 }
0x10e9   :  { %v4133_v25 = vsel %vm4130_vm15, %v4132_v14, %v4128_v62 }
0x10ea   :  { %v4138_v30 = vsub.f32 1.0, %v4133_v25  ;;  %v4140_v11 = vmul.f32 %v4133_v25, %v7962_v21  ;;  %v8682_v25 = vld [vmem:[#allocation41_spill] sm:$0xff] }
0x10ec   :  { %v3991_v55 = vpop.f32.mrf.mxu3 }
0x10ed   :  { %v4094_v44 = vadd.f32 %v8197_v57, %v3991_v55 }
0x10ef   :  { %v4135_v45 = vmul.f32 %v4113_v26, %v4094_v44 }
0x10f1   :  { %v4136_v36 = vadd.f32 %v4135_v45, %v4083_v32 }
0x10f3   :  { %6162 = vtanh.f32 %v4136_v36 }
0x10f9   :  { %v6163_v24 = vpop.eup %6162 }
0x10fa   :  { %v4139_v55 = vmul.f32 %v6163_v24, %v4138_v30 }
0x10fc   :  { %v8204_v42 = vadd.f32 %v4140_v11, %v4139_v55 }
0x10fe   :  { %5860 = vmatmul.msk.f32.vlgmr.msrb.gmra.mxu3 %vm484_vm1, %v8204_v42  ;;  %5861 = vmatmul.msk.f32.vlgmr.msra.gmra.mxu0 %vm484_vm1, %v8204_v42 }
0x10ff   :  { %5862 = vmatmul.msk.f32.vlgmr.msra.gmra.mxu1 %vm484_vm1, %v8204_v42  ;;  %5863 = vmatmul.msk.f32.vlgmr.msra.gmra.mxu2 %vm484_vm1, %v8204_v42 }
0x1100   :  { %4396 = vmatpush.msrb.mxu3 %v7990_v12  ;;  %4416 = vmatpush.msra.mxu0 %v8027_v47 }
0x1101   :  { %4436 = vmatpush.msra.mxu1 %v8101_v60  ;;  %4480 = vmatpush.msra.mxu2 %v7974_v59 }
0x1102   :  { %4397 = vmatpush.msrb.mxu3 %v7995_v2  ;;  %4417 = vmatpush.msra.mxu0 %v8037_v18 }
0x1103   :  { %4437 = vmatpush.msra.mxu1 %v8105_v37  ;;  %4481 = vmatpush.msra.mxu2 %v7979_v34 }
0x1104   :  { %4398 = vmatpush.msrb.mxu3 %v7998_v27  ;;  %4418 = vmatpush.msra.mxu0 %v8043_v61 }
0x1105   :  { %4438 = vmatpush.msra.mxu1 %v8109_v6  ;;  %4482 = vmatpush.msra.mxu2 %v7982_v1 }
0x1106   :  { %4399 = vmatpush.msrb.mxu3 %v8001_v29  ;;  %4419 = vmatpush.msra.mxu0 %v8054_v22 }
0x1107   :  { %4439 = vmatpush.msra.mxu1 %v8113_v46  ;;  %4483 = vmatpush.msra.mxu2 %v7984_v52 }
0x117b   :  { %v4183_v30 = vpop.f32.mrf.mxu0 }
0x117c   :  { %v4203_v24 = vpop.f32.mrf.mxu1 }
0x117d   :  { %v4311_v11 = vadd.f32 %v4203_v24, %v8187_v51 }
0x1181   :  { %v4163_v21 = vpop.f32.mrf.mxu3 }
0x1182   :  { %v4226_v45 = vadd.f32 %v4163_v21, %v3784_v56 }
0x1184   :  { %v5864_v14 = vmul.f32 -1.442695, %v4226_v45 }
0x1186   :  { %6164 = vpow2.f32 %v5864_v14 }
0x118c   :  { %v6165_v28 = vpop.eup %6164 }
0x118d   :  { %v4230_v31 = vadd.f32 1.0, %v6165_v28  ;;  %v4310_v28 = vadd.f32 %v4183_v30, %v8181_v48 }
0x118f   :  { %6166 = vrcp.f32 %v4230_v31  ;;  %v4242_v44 = vand.u32 2147483648, %v4230_v31  ;;  %v4240_v5 = vand.u32 2147483647, %v4230_v31  ;;  %vm4236_vm3 = vweird.f32 %v4230_v31 }
0x1191   :  { %v4243_v49 = vor.u32 1.1754944e-38, %v4242_v44  ;;  %vm4241_vm4 = vcmp.eq.f32.partialorder %v4240_v5, 8.507059e+37 }
0x1195   :  { %v6167_v7 = vpop.eup %6166 }
0x1196   :  { %v4232_v43 = vmul.f32 %v6167_v7, %v4230_v31  ;;  %vm4237_vm2 = vweird.f32 %v6167_v7 }
0x1197   :  { %vm4238_vm14 = vmor %vm4236_vm3, %vm4237_vm2 }
0x1198   :  { %v4233_v3 = vsub.f32 1.0, %v4232_v43 }
0x119a   :  { %v4234_v26 = vmul.f32 %v6167_v7, %v4233_v3 }
0x119c   :  { %v4235_v32 = vadd.f32 %v6167_v7, %v4234_v26 }
0x119e   :  { %v4239_v36 = vsel %vm4238_vm14, %v6167_v7, %v4235_v32 }
0x119f   :  { %v4244_v33 = vsel %vm4241_vm4, %v4243_v49, %v4239_v36 }
0x11a0   :  { %v4246_v62 = vmul.f32 %v4244_v33, %v7790_v54  ;;  %v8681_v54 = vld [vmem:[#allocation40_spill] sm:$0xff] }
0x11a2   :  { %5865 = vmatmul.msk.f32.vlgmr.msra.gmra.mxu3 %vm484_vm1, %v4246_v62  ;;  %5866 = vmatmul.msk.f32.vlgmr.msrb.gmra.mxu0 %vm484_vm1, %v4246_v62 }
0x11a3   :  { %5867 = vmatmul.msk.f32.vlgmr.msrb.gmra.mxu1 %vm484_vm1, %v4246_v62  ;;  %4500 = vmatpush.msra.mxu3 %v8021_v19 }
0x11a4   :  { %4520 = vmatpush.msrb.mxu0 %v8058_v9  ;;  %4594 = vmatpush.msrb.mxu1 %v7943_v4 }
0x11a5   :  { %4501 = vmatpush.msra.mxu3 %v8041_v53 }
0x11a6   :  { %4521 = vmatpush.msrb.mxu0 %v8067_v50  ;;  %4595 = vmatpush.msrb.mxu1 %v7950_v0 }
0x11a7   :  { %4502 = vmatpush.msra.mxu3 %v8049_v10 }
0x11a8   :  { %4522 = vmatpush.msrb.mxu0 %v8071_v20  ;;  %4596 = vmatpush.msrb.mxu1 %v7953_v16 }
0x11a9   :  { %4503 = vmatpush.msra.mxu3 %v8681_v54 }
0x11aa   :  { %4523 = vmatpush.msrb.mxu0 %v8682_v25  ;;  %4597 = vmatpush.msrb.mxu1 %v7956_v58 }
0x121f   :  { %v4287_v55 = vpop.f32.mrf.mxu0 }
0x1220   :  { %v4288_v56 = vadd.f32 %v4287_v55, %v8189_v41 }
0x1222   :  { %v4333_v21 = vadd.f32 %v4311_v11, %v4288_v56  ;;  %v4223_v56 = vpop.f32.mrf.mxu2 }
0x1224   :  { %v5869_v45 = vmul.f32 -1.442695, %v4333_v21 }
0x1225   :  { %v4267_v14 = vpop.f32.mrf.mxu3 }
0x1226   :  { %6168 = vpow2.f32 %v5869_v45  ;;  %v4268_v31 = vadd.f32 %v4267_v14, %v8183_v23  ;;  %v4307_v14 = vpop.f32.mrf.mxu1 }
0x1228   :  { %v4313_v7 = vadd.f32 %v4310_v28, %v4268_v31  ;;  %v4312_v31 = vadd.f32 %v4223_v56, %v8197_v57 }
0x122a   :  { %v5868_v43 = vmul.f32 -1.442695, %v4313_v7 }
0x122c   :  { %v6169_v3 = vpop.eup %6168  ;;  %6170 = vpow2.f32 %v5868_v43 }
0x122d   :  { %v4337_v44 = vadd.f32 1.0, %v6169_v3 }
0x122f   :  { %6172 = vrcp.f32 %v4337_v44  ;;  %vm4343_vm14 = vweird.f32 %v4337_v44 }
0x1232   :  { %v6171_v26 = vpop.eup %6170 }
0x1233   :  { %v4317_v5 = vadd.f32 1.0, %v6171_v26  ;;  %v4349_v26 = vand.u32 2147483648, %v4337_v44 }
0x1235   :  { %6174 = vrcp.f32 %v4317_v5  ;;  %v6173_v32 = vpop.eup %6172  ;;  %v4329_v55 = vand.u32 2147483648, %v4317_v5  ;;  %v4327_v11 = vand.u32 2147483647, %v4317_v5  ;;  %vm4323_vm7 = vweird.f32 %v4317_v5 }
0x1236   :  { %v4339_v49 = vmul.f32 %v6173_v32, %v4337_v44  ;;  %vm4344_vm3 = vweird.f32 %v6173_v32 }
0x1237   :  { %v4330_v28 = vor.u32 1.1754944e-38, %v4329_v55  ;;  %vm4328_vm2 = vcmp.eq.f32.partialorder %v4327_v11, 8.507059e+37  ;;  %vm4345_vm4 = vmor %vm4343_vm14, %vm4344_vm3 }
0x1238   :  { %v4340_v62 = vsub.f32 1.0, %v4339_v49  ;;  %v4308_v49 = vadd.f32 %v4307_v14, %v8199_v17 }
0x123a   :  { %v4341_v21 = vmul.f32 %v6173_v32, %v4340_v62 }
0x123b   :  { %v6175_v36 = vpop.eup %6174 }
0x123c   :  { %v4319_v33 = vmul.f32 %v6175_v36, %v4317_v5  ;;  %vm4324_vm5 = vweird.f32 %v6175_v36  ;;  %v4342_v43 = vadd.f32 %v6173_v32, %v4341_v21  ;;  %v4350_v5 = vor.u32 1.1754944e-38, %v4349_v26 }
0x123d   :  { %vm4325_vm15 = vmor %vm4323_vm7, %vm4324_vm5 }
0x123e   :  { %v4320_v24 = vsub.f32 1.0, %v4319_v33 }
0x1240   :  { %v4321_v30 = vmul.f32 %v6175_v36, %v4320_v24  ;;  %v4347_v24 = vand.u32 2147483647, %v4337_v44 }
0x1242   :  { %v4322_v45 = vadd.f32 %v6175_v36, %v4321_v30  ;;  %v4346_v30 = vsel %vm4345_vm4, %v6173_v32, %v4342_v43  ;;  %vm4348_vm5 = vcmp.eq.f32.partialorder %v4347_v24, 8.507059e+37 }
0x1243   :  { %v4351_v55 = vsel %vm4348_vm5, %v4350_v5, %v4346_v30 }
0x1244   :  { %v4326_v7 = vsel %vm4325_vm15, %v6175_v36, %v4322_v45  ;;  %v4356_v63 = vsub.f32 1.0, %v4351_v55  ;;  %v4358_v11 = vmul.f32 %v4351_v55, %v8204_v42 }
0x1245   :  { %v4331_v3 = vsel %vm4328_vm2, %v4330_v28, %v4326_v7 }
0x1246   :  { %v4353_v33 = vmul.f32 %v4331_v3, %v4312_v31 }
0x1248   :  { %v4354_v62 = vadd.f32 %v4353_v33, %v4308_v49 }
0x124a   :  { %6176 = vtanh.f32 %v4354_v62 }
0x1250   :  { %v6177_v56 = vpop.eup %6176 }
0x1251   :  { %v4357_v36 = vmul.f32 %v6177_v56, %v4356_v63  ;;  %v3804_v63 = vadd.f32 %v7976_v40, %v8171_v35 }
0x1253   :  { %v8255_v21 = vadd.f32 %v4358_v11, %v4357_v36 }
0x1255   :  { %5870 = vmatmul.msk.f32.vlgmr.msrb.gmra.mxu2 %vm484_vm1, %v8255_v21  ;;  %5871 = vmatmul.msk.f32.vlgmr.msrb.gmra.mxu3 %vm484_vm1, %v8255_v21 }
0x1256   :  { %5872 = vmatmul.msk.f32.vlgmr.msra.gmra.mxu0 %vm484_vm1, %v8255_v21  ;;  %5873 = vmatmul.msk.f32.vlgmr.msra.gmra.mxu1 %vm484_vm1, %v8255_v21 }
0x1257   :  { %4614 = vmatpush.msrb.mxu2 %v7990_v12  ;;  %4634 = vmatpush.msrb.mxu3 %v8027_v47 }
0x1258   :  { %4654 = vmatpush.msra.mxu0 %v8101_v60  ;;  %4698 = vmatpush.msra.mxu1 %v7974_v59 }
0x1259   :  { %4615 = vmatpush.msrb.mxu2 %v7995_v2  ;;  %4635 = vmatpush.msrb.mxu3 %v8037_v18 }
0x125a   :  { %4655 = vmatpush.msra.mxu0 %v8105_v37  ;;  %4699 = vmatpush.msra.mxu1 %v7979_v34 }
0x125b   :  { %4616 = vmatpush.msrb.mxu2 %v7998_v27  ;;  %4636 = vmatpush.msrb.mxu3 %v8043_v61 }
0x125c   :  { %4656 = vmatpush.msra.mxu0 %v8109_v6  ;;  %4700 = vmatpush.msra.mxu1 %v7982_v1 }
0x125d   :  { %4617 = vmatpush.msrb.mxu2 %v8001_v29  ;;  %4637 = vmatpush.msrb.mxu3 %v8054_v22 }
0x125e   :  { %4657 = vmatpush.msra.mxu0 %v8113_v46  ;;  %4701 = vmatpush.msra.mxu1 %v7984_v52 }
0x12d8   :  { %v4381_v59 = vpop.f32.mrf.mxu2 }
0x12d9   :  { %v4444_v34 = vadd.f32 %v4381_v59, %v3804_v63 }
0x12db   :  { %v5874_v12 = vmul.f32 -1.442695, %v4444_v34 }
0x12dd   :  { %6178 = vpow2.f32 %v5874_v12 }
0x12e3   :  { %v6179_v44 = vpop.eup %6178 }
0x12e4   :  { %v4448_v32 = vadd.f32 1.0, %v6179_v44 }
0x12e6   :  { %6180 = vrcp.f32 %v4448_v32  ;;  %v4460_v28 = vand.u32 2147483648, %v4448_v32  ;;  %v4458_v7 = vand.u32 2147483647, %v4448_v32  ;;  %vm4454_vm15 = vweird.f32 %v4448_v32 }
0x12e8   :  { %v4461_v52 = vor.u32 1.1754944e-38, %v4460_v28  ;;  %vm4459_vm3 = vcmp.eq.f32.partialorder %v4458_v7, 8.507059e+37  ;;  %v4441_v28 = vpop.f32.mrf.mxu1 }
0x12ec   :  { %v6181_v45 = vpop.eup %6180 }
0x12ed   :  { %v4450_v1 = vmul.f32 %v6181_v45, %v4448_v32  ;;  %vm4455_vm7 = vweird.f32 %v6181_v45 }
0x12ee   :  { %vm4456_vm2 = vmor %vm4454_vm15, %vm4455_vm7 }
0x12ef   :  { %v4451_v14 = vsub.f32 1.0, %v4450_v1 }
0x12f1   :  { %v4452_v31 = vmul.f32 %v6181_v45, %v4451_v14 }
0x12f3   :  { %v4453_v43 = vadd.f32 %v6181_v45, %v4452_v31 }
0x12f5   :  { %v4457_v3 = vsel %vm4456_vm2, %v6181_v45, %v4453_v43 }
0x12f6   :  { %v4462_v40 = vsel %vm4459_vm3, %v4461_v52, %v4457_v3  ;;  %v4530_v3 = vadd.f32 %v4441_v28, %v8197_v57 }
0x12f7   :  { %v4464_v35 = vmul.f32 %v4462_v40, %v7820_v39  ;;  %v4401_v39 = vpop.f32.mrf.mxu3 }
0x12f9   :  { %5875 = vmatmul.msk.f32.vlgmr.msra.gmra.mxu2 %vm484_vm1, %v4464_v35  ;;  %5876 = vmatmul.msk.f32.vlgmr.msra.gmra.mxu3 %vm484_vm1, %v4464_v35 }
0x12fa   :  { %5877 = vmatmul.msk.f32.vlgmr.msrb.gmra.mxu0 %vm484_vm1, %v4464_v35  ;;  %4718 = vmatpush.msra.mxu2 %v8021_v19 }
0x12fb   :  { %4738 = vmatpush.msra.mxu3 %v8058_v9  ;;  %4812 = vmatpush.msrb.mxu0 %v7943_v4  ;;  %v4421_v4 = vpop.f32.mrf.mxu0 }
0x12fc   :  { %4719 = vmatpush.msra.mxu2 %v8041_v53  ;;  %v4529_v33 = vadd.f32 %v4421_v4, %v8187_v51 }
0x12fd   :  { %4739 = vmatpush.msra.mxu3 %v8067_v50  ;;  %4813 = vmatpush.msrb.mxu0 %v7950_v0  ;;  %v4528_v0 = vadd.f32 %v4401_v39, %v8181_v48 }
0x12fe   :  { %4720 = vmatpush.msra.mxu2 %v8049_v10 }
0x12ff   :  { %4740 = vmatpush.msra.mxu3 %v8071_v20  ;;  %4814 = vmatpush.msrb.mxu0 %v7953_v16 }
0x1300   :  { %4721 = vmatpush.msra.mxu2 %v8681_v54 }
0x1301   :  { %4741 = vmatpush.msra.mxu3 %v8682_v25  ;;  %4815 = vmatpush.msrb.mxu0 %v7956_v58 }
0x1377   :  { %v4525_v43 = vpop.f32.mrf.mxu0 }
0x1378   :  { %v4526_v4 = vadd.f32 %v4525_v43, %v8199_v17 }
0x137c   :  { %v4485_v26 = vpop.f32.mrf.mxu2  ;;  %v4505_v49 = vpop.f32.mrf.mxu3 }
0x137d   :  { %v4486_v24 = vadd.f32 %v4485_v26, %v8183_v23  ;;  %v4506_v62 = vadd.f32 %v4505_v49, %v8189_v41 }
0x137f   :  { %v4531_v30 = vadd.f32 %v4528_v0, %v4486_v24  ;;  %v4551_v16 = vadd.f32 %v4529_v33, %v4506_v62 }
0x1381   :  { %v5878_v5 = vmul.f32 -1.442695, %v4531_v30  ;;  %v5879_v55 = vmul.f32 -1.442695, %v4551_v16 }
0x1383   :  { %6182 = vpow2.f32 %v5878_v5 }
0x1384   :  { %6184 = vpow2.f32 %v5879_v55 }
0x1389   :  { %v6183_v56 = vpop.eup %6182 }
0x138a   :  { %v6185_v58 = vpop.eup %6184  ;;  %v4535_v36 = vadd.f32 1.0, %v6183_v56 }
0x138b   :  { %v4555_v11 = vadd.f32 1.0, %v6185_v58 }
0x138c   :  { %6186 = vrcp.f32 %v4535_v36  ;;  %v4547_v32 = vand.u32 2147483648, %v4535_v36  ;;  %v4545_v14 = vand.u32 2147483647, %v4535_v36  ;;  %vm4541_vm4 = vweird.f32 %v4535_v36 }
0x138d   :  { %6188 = vrcp.f32 %v4555_v11  ;;  %v4567_v49 = vand.u32 2147483648, %v4555_v11  ;;  %vm4561_vm2 = vweird.f32 %v4555_v11  ;;  %v4565_v33 = vand.u32 2147483647, %v4555_v11 }
0x138e   :  { %v4548_v52 = vor.u32 1.1754944e-38, %v4547_v32  ;;  %vm4546_vm7 = vcmp.eq.f32.partialorder %v4545_v14, 8.507059e+37 }
0x138f   :  { %v4568_v62 = vor.u32 1.1754944e-38, %v4567_v49 }
0x1392   :  { %v6187_v63 = vpop.eup %6186 }
0x1393   :  { %v6189_v59 = vpop.eup %6188  ;;  %v4537_v34 = vmul.f32 %v6187_v63, %v4535_v36  ;;  %vm4542_vm14 = vweird.f32 %v6187_v63  ;;  %v8316_v36 = vld [vmem:[#allocation19 + $0x68] sm:$0xff] }
0x1394   :  { %v4557_v12 = vmul.f32 %v6189_v59, %v4555_v11  ;;  %vm4543_vm5 = vmor %vm4541_vm4, %vm4542_vm14  ;;  %vm4562_vm15 = vweird.f32 %v6189_v59  ;;  %vm4566_vm14 = vcmp.eq.f32.partialorder %v4565_v33, 8.507059e+37  ;;  %v8321_v11 = vld [vmem:[#allocation21 + $0x48] sm:$0xff] }
0x1395   :  { %v4538_v44 = vsub.f32 1.0, %v4537_v34  ;;  %vm4563_vm3 = vmor %vm4561_vm2, %vm4562_vm15 }
0x1396   :  { %v4558_v45 = vsub.f32 1.0, %v4557_v12 }
0x1397   :  { %v4539_v1 = vmul.f32 %v6187_v63, %v4538_v44 }
0x1398   :  { %v4559_v31 = vmul.f32 %v6189_v59, %v4558_v45 }
0x1399   :  { %v4540_v7 = vadd.f32 %v6187_v63, %v4539_v1 }
0x139a   :  { %v4560_v39 = vadd.f32 %v6189_v59, %v4559_v31 }
0x139b   :  { %v4544_v40 = vsel %vm4543_vm5, %v6187_v63, %v4540_v7  ;;  %v8327_v63 = vld [vmem:[#allocation21 + $0x30] sm:$0xff] }
0x139c   :  { %v4549_v35 = vsel %vm4546_vm7, %v4548_v52, %v4544_v40  ;;  %v4564_v24 = vsel %vm4563_vm3, %v6189_v59, %v4560_v39  ;;  %v8352_v52 = vld [vmem:[#allocation19 + $0x60] sm:$0xff] }
0x139d   :  { %v4571_v26 = vmul.f32 %v4549_v35, %v4530_v3  ;;  %v4569_v30 = vsel %vm4566_vm14, %v4568_v62, %v4564_v24  ;;  %v8357_v3 = vld [vmem:[#allocation19 + $0x40] sm:$0xff] }
0x139e   :  { %v4574_v16 = vsub.f32 1.0, %v4569_v30  ;;  %v4576_v56 = vmul.f32 %v4569_v30, %v8255_v21 }
0x139f   :  { %v4572_v0 = vadd.f32 %v4571_v26, %v4526_v4 }
0x13a1   :  { %6190 = vtanh.f32 %v4572_v0 }
0x13a7   :  { %v6191_v5 = vpop.eup %6190 }
0x13a8   :  { %v4575_v55 = vmul.f32 %v6191_v5, %v4574_v16 }
0x13aa   :  { %v8306_v58 = vadd.f32 %v4576_v56, %v4575_v55 }
0x13ac   :  { %5880 = vmatmul.msk.f32.vlgmr.msrb.gmra.mxu1 %vm484_vm1, %v8306_v58  ;;  %5881 = vmatmul.msk.f32.vlgmr.msrb.gmra.mxu2 %vm484_vm1, %v8306_v58 }
0x13ad   :  { %5882 = vmatmul.msk.f32.vlgmr.msrb.gmra.mxu3 %vm484_vm1, %v8306_v58  ;;  %5883 = vmatmul.msk.f32.vlgmr.msra.gmra.mxu0 %vm484_vm1, %v8306_v58 }
0x13ae   :  { %4832 = vmatpush.msrb.mxu1 %v8316_v36  ;;  %4852 = vmatpush.msrb.mxu2 %v8027_v47  ;;  %v8333_v47 = vld [vmem:[#allocation21 + $0x18] sm:$0xff] }
0x13af   :  { %4872 = vmatpush.msrb.mxu3 %v8101_v60  ;;  %4916 = vmatpush.msra.mxu0 %v8321_v11 }
0x13b0   :  { %4833 = vmatpush.msrb.mxu1 %v7995_v2  ;;  %4853 = vmatpush.msrb.mxu2 %v8037_v18  ;;  %v8339_v2 = vld [vmem:[#allocation21] sm:$0xff]  ;;  %v8342_v18 = vld [vmem:[#allocation18] ss:$0 sm:$0xff] }
0x13b1   :  { %4873 = vmatpush.msrb.mxu3 %v8105_v37  ;;  %4917 = vmatpush.msra.mxu0 %v8327_v63 }
0x13b2   :  { %4834 = vmatpush.msrb.mxu1 %v7998_v27  ;;  %4854 = vmatpush.msrb.mxu2 %v8043_v61  ;;  %v3824_v27 = vadd.f32 %v8342_v18, %v8193_v15 }
0x13b3   :  { %4874 = vmatpush.msrb.mxu3 %v8109_v6  ;;  %4918 = vmatpush.msra.mxu0 %v8333_v47 }
0x13b4   :  { %4835 = vmatpush.msrb.mxu1 %v8001_v29  ;;  %4855 = vmatpush.msrb.mxu2 %v8054_v22 }
0x13b5   :  { %4875 = vmatpush.msrb.mxu3 %v8113_v46  ;;  %4919 = vmatpush.msra.mxu0 %v8339_v2 }
0x1429   :  { %v4599_v61 = vpop.f32.mrf.mxu1 }
0x142a   :  { %v4662_v59 = vadd.f32 %v4599_v61, %v3824_v27  ;;  %v4659_v61 = vpop.f32.mrf.mxu0 }
0x142c   :  { %v5884_v34 = vmul.f32 -1.442695, %v4662_v59 }
0x142e   :  { %6192 = vpow2.f32 %v5884_v34 }
0x1434   :  { %v6193_v12 = vpop.eup %6192 }
0x1435   :  { %v4666_v44 = vadd.f32 1.0, %v6193_v12 }
0x1437   :  { %6194 = vrcp.f32 %v4666_v44  ;;  %v4678_v45 = vand.u32 2147483648, %v4666_v44  ;;  %v4676_v14 = vand.u32 2147483647, %v4666_v44  ;;  %vm4672_vm5 = vweird.f32 %v4666_v44 }
0x1439   :  { %v4679_v31 = vor.u32 1.1754944e-38, %v4678_v45  ;;  %vm4677_vm15 = vcmp.eq.f32.partialorder %v4676_v14, 8.507059e+37 }
0x143d   :  { %v6195_v29 = vpop.eup %6194 }
0x143e   :  { %v4668_v22 = vmul.f32 %v6195_v29, %v4666_v44  ;;  %vm4673_vm4 = vweird.f32 %v6195_v29 }
0x143f   :  { %vm4674_vm7 = vmor %vm4672_vm5, %vm4673_vm4 }
0x1440   :  { %v4669_v32 = vsub.f32 1.0, %v4668_v22 }
0x1442   :  { %v4670_v1 = vmul.f32 %v6195_v29, %v4669_v32 }
0x1444   :  { %v4671_v28 = vadd.f32 %v6195_v29, %v4670_v1 }
0x1446   :  { %v4675_v7 = vsel %vm4674_vm7, %v6195_v29, %v4671_v28  ;;  %v4748_v29 = vadd.f32 %v4659_v61, %v8197_v57 }
0x1447   :  { %v4680_v15 = vsel %vm4677_vm15, %v4679_v31, %v4675_v7 }
0x1448   :  { %v4682_v43 = vmul.f32 %v4680_v15, %v7850_v38  ;;  %v8362_v38 = vld [vmem:[#allocation19 + $0x20] sm:$0xff] }
0x144a   :  { %5885 = vmatmul.msk.f32.vlgmr.msra.gmra.mxu1 %vm484_vm1, %v4682_v43  ;;  %5886 = vmatmul.msk.f32.vlgmr.msra.gmra.mxu2 %vm484_vm1, %v4682_v43 }
0x144b   :  { %5887 = vmatmul.msk.f32.vlgmr.msra.gmra.mxu3 %vm484_vm1, %v4682_v43  ;;  %4936 = vmatpush.msra.mxu1 %v8021_v19  ;;  %v8367_v19 = vld [vmem:[#allocation19] sm:$0xff] }
0x144c   :  { %4956 = vmatpush.msra.mxu2 %v8058_v9  ;;  %5030 = vmatpush.msra.mxu3 %v8352_v52 }
0x144d   :  { %4937 = vmatpush.msra.mxu1 %v8041_v53  ;;  %v4619_v53 = vpop.f32.mrf.mxu2 }
0x144e   :  { %4957 = vmatpush.msra.mxu2 %v8067_v50  ;;  %5031 = vmatpush.msra.mxu3 %v8357_v3  ;;  %v4746_v50 = vadd.f32 %v4619_v53, %v8181_v48 }
0x144f   :  { %4938 = vmatpush.msra.mxu1 %v8049_v10 }
0x1450   :  { %4958 = vmatpush.msra.mxu2 %v8071_v20  ;;  %5032 = vmatpush.msra.mxu3 %v8362_v38  ;;  %v4639_v20 = vpop.f32.mrf.mxu3 }
0x1451   :  { %4939 = vmatpush.msra.mxu1 %v8681_v54  ;;  %v4747_v4 = vadd.f32 %v4639_v20, %v8187_v51 }
0x1452   :  { %4959 = vmatpush.msra.mxu2 %v8682_v25  ;;  %5033 = vmatpush.msra.mxu3 %v8367_v19 }
0x14c7   :  { %v4703_v9 = vpop.f32.mrf.mxu1 }
0x14c8   :  { %v4704_v10 = vadd.f32 %v4703_v9, %v8183_v23 }
0x14ca   :  { %v4749_v40 = vadd.f32 %v4746_v50, %v4704_v10 }
0x14cc   :  { %v5888_v35 = vmul.f32 -1.442695, %v4749_v40 }
0x14cd   :  { %v4723_v39 = vpop.f32.mrf.mxu2 }
0x14ce   :  { %6196 = vpow2.f32 %v5888_v35  ;;  %v4724_v54 = vadd.f32 %v4723_v39, %v8189_v41  ;;  %v4743_v34 = vpop.f32.mrf.mxu3 }
0x14cf   :  { %v4744_v45 = vadd.f32 %v4743_v34, %v8199_v17 }
0x14d0   :  { %v4769_v25 = vadd.f32 %v4747_v4, %v4724_v54  ;;  %v8388_v4 = vld [vmem:[#allocation19 + $0x70] sm:$0xff]  ;;  %v8393_v54 = vld [vmem:[#allocation19 + $0x48] sm:$0xff] }
0x14d2   :  { %v5889_v26 = vmul.f32 -1.442695, %v4769_v25  ;;  %v8396_v25 = vld [vmem:[#allocation19 + $0x50] sm:$0xff] }
0x14d4   :  { %v6197_v49 = vpop.eup %6196  ;;  %6198 = vpow2.f32 %v5889_v26  ;;  %v8401_v26 = vld [vmem:[#allocation19 + $0x28] sm:$0xff] }
0x14d5   :  { %v4753_v33 = vadd.f32 1.0, %v6197_v49  ;;  %v8404_v49 = vld [vmem:[#allocation19 + $0x30] sm:$0xff] }
0x14d7   :  { %6200 = vrcp.f32 %v4753_v33  ;;  %v4765_v5 = vand.u32 2147483648, %v4753_v33  ;;  %v4763_v56 = vand.u32 2147483647, %v4753_v33  ;;  %vm4759_vm3 = vweird.f32 %v4753_v33 }
0x14d9   :  { %v4766_v44 = vor.u32 1.1754944e-38, %v4765_v5  ;;  %vm4764_vm4 = vcmp.eq.f32.partialorder %v4763_v56, 8.507059e+37 }
0x14da   :  { %v6199_v0 = vpop.eup %6198 }
0x14db   :  { %v4773_v24 = vadd.f32 1.0, %v6199_v0 }
0x14dd   :  { %v6201_v62 = vpop.eup %6200  ;;  %6202 = vrcp.f32 %v4773_v24  ;;  %v4785_v28 = vand.u32 2147483648, %v4773_v24  ;;  %v4783_v7 = vand.u32 2147483647, %v4773_v24  ;;  %vm4779_vm7 = vweird.f32 %v4773_v24 }
0x14de   :  { %v4755_v30 = vmul.f32 %v6201_v62, %v4753_v33  ;;  %vm4760_vm2 = vweird.f32 %v6201_v62  ;;  %v8412_v33 = vld [vmem:[#allocation19 + $0x10] sm:$0xff] }
0x14df   :  { %vm4761_vm14 = vmor %vm4759_vm3, %vm4760_vm2  ;;  %v4786_v9 = vor.u32 1.1754944e-38, %v4785_v28  ;;  %vm4784_vm2 = vcmp.eq.f32.partialorder %v4783_v7, 8.507059e+37  ;;  %v8444_v28 = vld [vmem:[#allocation21 + $0x8] sm:$0xff] }
0x14e0   :  { %v4756_v16 = vsub.f32 1.0, %v4755_v30 }
0x14e2   :  { %v4757_v55 = vmul.f32 %v6201_v62, %v4756_v16 }
0x14e3   :  { %v6203_v27 = vpop.eup %6202 }
0x14e4   :  { %v4775_v59 = vmul.f32 %v6203_v27, %v4773_v24  ;;  %v4758_v12 = vadd.f32 %v6201_v62, %v4757_v55  ;;  %vm4780_vm5 = vweird.f32 %v6203_v27 }
0x14e5   :  { %vm4781_vm15 = vmor %vm4779_vm7, %vm4780_vm5 }
0x14e6   :  { %v4776_v22 = vsub.f32 1.0, %v4775_v59  ;;  %v4762_v32 = vsel %vm4761_vm14, %v6201_v62, %v4758_v12 }
0x14e7   :  { %v4767_v1 = vsel %vm4764_vm4, %v4766_v44, %v4762_v32  ;;  %v8426_v32 = vld [vmem:[#allocation21 + $0x58] sm:$0xff] }
0x14e8   :  { %v4777_v14 = vmul.f32 %v6203_v27, %v4776_v22  ;;  %v4789_v31 = vmul.f32 %v4767_v1, %v4748_v29  ;;  %v8423_v22 = vld [vmem:[#allocation21 + $0x50] sm:$0xff]  ;;  %v8437_v1 = vld [vmem:[#allocation21 + $0x20] sm:$0xff] }
0x14ea   :  { %v4778_v15 = vadd.f32 %v6203_v27, %v4777_v14  ;;  %v4790_v43 = vadd.f32 %v4789_v31, %v4744_v45  ;;  %v8430_v45 = vld [vmem:[#allocation21 + $0x38] sm:$0xff]  ;;  %v8440_v14 = vld [vmem:[#allocation21 + $0x28] sm:$0xff]  ;;  %v8447_v31 = vld [vmem:[#allocation21 + $0x10] sm:$0xff] }
0x14ec   :  { %v4782_v53 = vsel %vm4781_vm15, %v6203_v27, %v4778_v15  ;;  %6204 = vtanh.f32 %v4790_v43 }
0x14ed   :  { %v4787_v50 = vsel %vm4784_vm2, %v4786_v9, %v4782_v53 }
0x14ee   :  { %v4792_v10 = vsub.f32 1.0, %v4787_v50  ;;  %v4794_v35 = vmul.f32 %v4787_v50, %v8306_v58 }
0x14f2   :  { %v6205_v40 = vpop.eup %6204 }
0x14f3   :  { %v4793_v20 = vmul.f32 %v6205_v40, %v4792_v10 }
0x14f5   :  { %v8377_v39 = vadd.f32 %v4794_v35, %v4793_v20 }
0x14f7   :  { %5890 = vmatmul.msk.f32.vlgmr.msrb.gmra.mxu0 %vm484_vm1, %v8377_v39  ;;  %5891 = vmatmul.msk.f32.vlgmr.msrb.gmra.mxu1 %vm484_vm1, %v8377_v39 }
0x14f8   :  { %5892 = vmatmul.msk.f32.vlgmr.msrb.gmra.mxu2 %vm484_vm1, %v8377_v39  ;;  %5893 = vmatmul.msk.f32.vlgmr.msrb.gmra.mxu3 %vm484_vm1, %v8377_v39 }
0x14f9   :  { %5050 = vmatpush.msrb.mxu0 %v8316_v36  ;;  %5070 = vmatpush.msrb.mxu1 %v8388_v4 }
0x14fa   :  { %5090 = vmatpush.msrb.mxu2 %v8101_v60  ;;  %5134 = vmatpush.msrb.mxu3 %v8321_v11  ;;  %v8409_v60 = vld [vmem:[#allocation19 + $0x8] sm:$0xff] }
0x14fb   :  { %5051 = vmatpush.msrb.mxu0 %v8393_v54  ;;  %5071 = vmatpush.msrb.mxu1 %v8396_v25 }
0x14fc   :  { %5091 = vmatpush.msrb.mxu2 %v8105_v37  ;;  %5135 = vmatpush.msrb.mxu3 %v8327_v63  ;;  %v8683_v37 = vld [vmem:[#allocation38_spill] sm:$0xff] }
0x14fd   :  { %5052 = vmatpush.msrb.mxu0 %v8401_v26  ;;  %5072 = vmatpush.msrb.mxu1 %v8404_v49  ;;  %v3844_v0 = vadd.f32 %v8342_v18, %v8683_v37 }
0x14fe   :  { %5092 = vmatpush.msrb.mxu2 %v8109_v6  ;;  %5136 = vmatpush.msrb.mxu3 %v8333_v47 }
0x14ff   :  { %5053 = vmatpush.msrb.mxu0 %v8409_v60  ;;  %5073 = vmatpush.msrb.mxu1 %v8412_v33 }
0x1500   :  { %5093 = vmatpush.msrb.mxu2 %v8113_v46  ;;  %5137 = vmatpush.msrb.mxu3 %v8339_v2 }
0x1574   :  { %v4817_v24 = vpop.f32.mrf.mxu0  ;;  %v4837_v7 = vpop.f32.mrf.mxu1 }
0x1575   :  { %v4880_v62 = vadd.f32 %v4817_v24, %v3844_v0  ;;  %v4964_v9 = vadd.f32 %v4837_v7, %v8181_v48 }
0x1577   :  { %v5894_v6 = vmul.f32 -1.442695, %v4880_v62 }
0x1579   :  { %6206 = vpow2.f32 %v5894_v6 }
0x157b   :  { %v4857_v15 = vpop.f32.mrf.mxu2 }
0x157c   :  { %v4965_v50 = vadd.f32 %v4857_v15, %v8187_v51 }
0x157f   :  { %v6207_v30 = vpop.eup %6206 }
0x1580   :  { %v4884_v16 = vadd.f32 1.0, %v6207_v30 }
0x1582   :  { %6208 = vrcp.f32 %v4884_v16  ;;  %v4896_v27 = vand.u32 2147483648, %v4884_v16  ;;  %v4894_v59 = vand.u32 2147483647, %v4884_v16  ;;  %vm4890_vm14 = vweird.f32 %v4884_v16 }
0x1584   :  { %v4897_v34 = vor.u32 1.1754944e-38, %v4896_v27  ;;  %vm4895_vm5 = vcmp.eq.f32.partialorder %v4894_v59, 8.507059e+37 }
0x1588   :  { %v6209_v5 = vpop.eup %6208 }
0x1589   :  { %v4886_v55 = vmul.f32 %v6209_v5, %v4884_v16  ;;  %vm4891_vm3 = vweird.f32 %v6209_v5 }
0x158a   :  { %vm4892_vm4 = vmor %vm4890_vm14, %vm4891_vm3 }
0x158b   :  { %v4887_v56 = vsub.f32 1.0, %v4886_v55 }
0x158d   :  { %v4888_v61 = vmul.f32 %v6209_v5, %v4887_v56 }
0x158f   :  { %v4889_v46 = vadd.f32 %v6209_v5, %v4888_v61 }
0x1591   :  { %v4893_v12 = vsel %vm4892_vm4, %v6209_v5, %v4889_v46 }
0x1592   :  { %v4898_v44 = vsel %vm4895_vm5, %v4897_v34, %v4893_v12  ;;  %v4877_v12 = vpop.f32.mrf.mxu3 }
0x1593   :  { %v4900_v29 = vmul.f32 %v4898_v44, %v7876_v8  ;;  %v8433_v8 = vld [vmem:[#allocation21 + $0x40] sm:$0xff] }
0x1595   :  { %5895 = vmatmul.msk.f32.vlgmr.msra.gmra.mxu0 %vm484_vm1, %v4900_v29  ;;  %5896 = vmatmul.msk.f32.vlgmr.msra.gmra.mxu1 %vm484_vm1, %v4900_v29 }
0x1596   :  { %5897 = vmatmul.msk.f32.vlgmr.msra.gmra.mxu2 %vm484_vm1, %v4900_v29  ;;  %5154 = vmatpush.msra.mxu0 %v8423_v22 }
0x1597   :  { %5174 = vmatpush.msra.mxu1 %v8426_v32  ;;  %5248 = vmatpush.msra.mxu2 %v8352_v52 }
0x1598   :  { %5155 = vmatpush.msra.mxu0 %v8430_v45 }
0x1599   :  { %5175 = vmatpush.msra.mxu1 %v8433_v8  ;;  %5249 = vmatpush.msra.mxu2 %v8357_v3 }
0x159a   :  { %5156 = vmatpush.msra.mxu0 %v8437_v1 }
0x159b   :  { %5176 = vmatpush.msra.mxu1 %v8440_v14  ;;  %5250 = vmatpush.msra.mxu2 %v8362_v38 }
0x159c   :  { %5157 = vmatpush.msra.mxu0 %v8444_v28 }
0x159d   :  { %5177 = vmatpush.msra.mxu1 %v8447_v31  ;;  %5251 = vmatpush.msra.mxu2 %v8367_v19 }
0x1612   :  { %v4921_v43 = vpop.f32.mrf.mxu0  ;;  %v4941_v53 = vpop.f32.mrf.mxu1 }
0x1613   :  { %v4922_v10 = vadd.f32 %v4921_v43, %v8183_v23  ;;  %v4942_v40 = vadd.f32 %v4941_v53, %v8189_v41  ;;  %v4966_v43 = vadd.f32 %v4877_v12, %v8197_v57 }
0x1615   :  { %v4967_v20 = vadd.f32 %v4964_v9, %v4922_v10  ;;  %v4987_v35 = vadd.f32 %v4965_v50, %v4942_v40 }
0x1617   :  { %v5898_v37 = vmul.f32 -1.442695, %v4967_v20  ;;  %v5899_v0 = vmul.f32 -1.442695, %v4987_v35 }
0x1619   :  { %6210 = vpow2.f32 %v5898_v37  ;;  %v4961_v7 = vpop.f32.mrf.mxu2 }
0x161a   :  { %6212 = vpow2.f32 %v5899_v0  ;;  %v4962_v40 = vadd.f32 %v4961_v7, %v8199_v17 }
0x161f   :  { %v6211_v24 = vpop.eup %6210 }
0x1620   :  { %v6213_v62 = vpop.eup %6212  ;;  %v4971_v6 = vadd.f32 1.0, %v6211_v24 }
0x1621   :  { %v4991_v30 = vadd.f32 1.0, %v6213_v62 }
0x1622   :  { %6214 = vrcp.f32 %v4971_v6  ;;  %v4983_v59 = vand.u32 2147483648, %v4971_v6  ;;  %v4981_v34 = vand.u32 2147483647, %v4971_v6  ;;  %vm4977_vm15 = vweird.f32 %v4971_v6 }
0x1623   :  { %6216 = vrcp.f32 %v4991_v30  ;;  %v5003_v10 = vand.u32 2147483648, %v4991_v30  ;;  %vm4997_vm4 = vweird.f32 %v4991_v30  ;;  %v5001_v35 = vand.u32 2147483647, %v4991_v30 }
0x1624   :  { %v4984_v15 = vor.u32 1.1754944e-38, %v4983_v59  ;;  %vm4982_vm3 = vcmp.eq.f32.partialorder %v4981_v34, 8.507059e+37  ;;  %v8488_v59 = vld [vmem:[#allocation19 + $0x18] sm:$0xff] }
0x1625   :  { %v5004_v24 = vor.u32 1.1754944e-38, %v5003_v10 }
0x1628   :  { %v6215_v16 = vpop.eup %6214 }
0x1629   :  { %v6217_v5 = vpop.eup %6216  ;;  %v4973_v55 = vmul.f32 %v6215_v16, %v4971_v6  ;;  %vm4978_vm7 = vweird.f32 %v6215_v16 }
0x162a   :  { %v4993_v56 = vmul.f32 %v6217_v5, %v4991_v30  ;;  %vm4979_vm2 = vmor %vm4977_vm15, %vm4978_vm7  ;;  %vm4998_vm14 = vweird.f32 %v6217_v5  ;;  %vm5002_vm7 = vcmp.eq.f32.partialorder %v5001_v35, 8.507059e+37  ;;  %v8470_v30 = vld [vmem:[#allocation19 + $0x78] sm:$0xff] }
0x162b   :  { %v4974_v27 = vsub.f32 1.0, %v4973_v55  ;;  %vm4999_vm5 = vmor %vm4997_vm4, %vm4998_vm14 }
0x162c   :  { %v4994_v61 = vsub.f32 1.0, %v4993_v56 }
0x162d   :  { %v4975_v46 = vmul.f32 %v6215_v16, %v4974_v27 }
0x162e   :  { %v4995_v44 = vmul.f32 %v6217_v5, %v4994_v61  ;;  %v8482_v61 = vld [vmem:[#allocation19 + $0x38] sm:$0xff] }
0x162f   :  { %v4976_v29 = vadd.f32 %v6215_v16, %v4975_v46  ;;  %v3864_v46 = vadd.f32 %v8342_v18, %v8169_v13 }
0x1630   :  { %v4996_v50 = vadd.f32 %v6217_v5, %v4995_v44 }
0x1631   :  { %v4980_v53 = vsel %vm4979_vm2, %v6215_v16, %v4976_v29 }
0x1632   :  { %v4985_v9 = vsel %vm4982_vm3, %v4984_v15, %v4980_v53  ;;  %v5000_v0 = vsel %vm4999_vm5, %v6217_v5, %v4996_v50  ;;  %v8476_v5 = vld [vmem:[#allocation19 + $0x58] sm:$0xff] }
0x1633   :  { %v5007_v20 = vmul.f32 %v4985_v9, %v4966_v43  ;;  %v5005_v62 = vsel %vm5002_vm7, %v5004_v24, %v5000_v0 }
0x1634   :  { %v5010_v6 = vsub.f32 1.0, %v5005_v62  ;;  %v5012_v56 = vmul.f32 %v5005_v62, %v8377_v39 }
0x1635   :  { %v5008_v37 = vadd.f32 %v5007_v20, %v4962_v40 }
0x1637   :  { %6218 = vtanh.f32 %v5008_v37  ;;  %v8684_v37 = vld [vmem:[#allocation37_spill] sm:$0xff] }
0x163d   :  { %v6219_v55 = vpop.eup %6218 }
0x163e   :  { %v5011_v16 = vmul.f32 %v6219_v55, %v5010_v6 }
0x1640   :  { %v8458_v27 = vadd.f32 %v5012_v56, %v5011_v16 }
0x1642   :  { %5900 = vmatmul.msk.f32.vlgmr.msra.gmra.mxu3 %vm484_vm1, %v8458_v27  ;;  %5901 = vmatmul.msk.f32.vlgmr.msrb.gmra.mxu0 %vm484_vm1, %v8458_v27 }
0x1643   :  { %5902 = vmatmul.msk.f32.vlgmr.msrb.gmra.mxu1 %vm484_vm1, %v8458_v27  ;;  %5903 = vmatmul.msk.f32.vlgmr.msrb.gmra.mxu2 %vm484_vm1, %v8458_v27 }
0x1644   :  { %5268 = vmatpush.msra.mxu3 %v8316_v36  ;;  %5288 = vmatpush.msrb.mxu0 %v8388_v4 }
0x1645   :  { %5308 = vmatpush.msrb.mxu1 %v8470_v30  ;;  %5352 = vmatpush.msrb.mxu2 %v8321_v11 }
0x1646   :  { %5269 = vmatpush.msra.mxu3 %v8393_v54  ;;  %5289 = vmatpush.msrb.mxu0 %v8396_v25 }
0x1647   :  { %5309 = vmatpush.msrb.mxu1 %v8476_v5  ;;  %5353 = vmatpush.msrb.mxu2 %v8327_v63 }
0x1648   :  { %5270 = vmatpush.msra.mxu3 %v8401_v26  ;;  %5290 = vmatpush.msrb.mxu0 %v8404_v49 }
0x1649   :  { %5310 = vmatpush.msrb.mxu1 %v8482_v61  ;;  %5354 = vmatpush.msrb.mxu2 %v8333_v47 }
0x164a   :  { %5271 = vmatpush.msra.mxu3 %v8409_v60  ;;  %5291 = vmatpush.msrb.mxu0 %v8412_v33 }
0x164b   :  { %5311 = vmatpush.msrb.mxu1 %v8488_v59  ;;  %5355 = vmatpush.msrb.mxu2 %v8339_v2 }
0x16bf   :  { %v5055_v24 = vpop.f32.mrf.mxu0 }
0x16c5   :  { %v5035_v34 = vpop.f32.mrf.mxu3 }
0x16c6   :  { %v5098_v12 = vadd.f32 %v5035_v34, %v3864_v46  ;;  %v5182_v46 = vadd.f32 %v5055_v24, %v8181_v48 }
0x16c8   :  { %v5904_v44 = vmul.f32 -1.442695, %v5098_v12 }
0x16ca   :  { %6220 = vpow2.f32 %v5904_v44 }
0x16d0   :  { %v6221_v29 = vpop.eup %6220 }
0x16d1   :  { %v5102_v7 = vadd.f32 1.0, %v6221_v29 }
0x16d3   :  { %6222 = vrcp.f32 %v5102_v7  ;;  %v5114_v9 = vand.u32 2147483648, %v5102_v7  ;;  %v5112_v10 = vand.u32 2147483647, %v5102_v7  ;;  %vm5108_vm2 = vweird.f32 %v5102_v7 }
0x16d5   :  { %v5115_v20 = vor.u32 1.1754944e-38, %v5114_v9  ;;  %vm5113_vm14 = vcmp.eq.f32.partialorder %v5112_v10, 8.507059e+37 }
0x16d9   :  { %v6223_v15 = vpop.eup %6222 }
0x16da   :  { %v5104_v43 = vmul.f32 %v6223_v15, %v5102_v7  ;;  %vm5109_vm15 = vweird.f32 %v6223_v15 }
0x16db   :  { %vm5110_vm3 = vmor %vm5108_vm2, %vm5109_vm15 }
0x16dc   :  { %v5105_v53 = vsub.f32 1.0, %v5104_v43 }
0x16de   :  { %v5106_v50 = vmul.f32 %v6223_v15, %v5105_v53 }
0x16e0   :  { %v5107_v40 = vadd.f32 %v6223_v15, %v5106_v50 }
0x16e2   :  { %v5111_v35 = vsel %vm5110_vm3, %v6223_v15, %v5107_v40 }
0x16e3   :  { %v5116_v13 = vsel %vm5113_vm14, %v5115_v20, %v5111_v35 }
0x16e4   :  { %v5118_v0 = vmul.f32 %v5116_v13, %v8684_v37  ;;  %v5095_v13 = vpop.f32.mrf.mxu2 }
0x16e6   :  { %5905 = vmatmul.msk.f32.vlgmr.msrb.gmra.mxu3 %vm484_vm1, %v5118_v0  ;;  %5906 = vmatmul.msk.f32.vlgmr.msra.gmra.mxu0 %vm484_vm1, %v5118_v0 }
0x16e7   :  { %5907 = vmatmul.msk.f32.vlgmr.msra.gmra.mxu1 %vm484_vm1, %v5118_v0  ;;  %5372 = vmatpush.msrb.mxu3 %v8423_v22 }
0x16e8   :  { %5392 = vmatpush.msra.mxu0 %v8426_v32  ;;  %5466 = vmatpush.msra.mxu1 %v8352_v52  ;;  %v5075_v52 = vpop.f32.mrf.mxu1 }
0x16e9   :  { %5373 = vmatpush.msrb.mxu3 %v8430_v45  ;;  %v5183_v6 = vadd.f32 %v5075_v52, %v8187_v51 }
0x16ea   :  { %5393 = vmatpush.msra.mxu0 %v8433_v8  ;;  %5467 = vmatpush.msra.mxu1 %v8357_v3 }
0x16eb   :  { %5374 = vmatpush.msrb.mxu3 %v8437_v1 }
0x16ec   :  { %5394 = vmatpush.msra.mxu0 %v8440_v14  ;;  %5468 = vmatpush.msra.mxu1 %v8362_v38 }
0x16ed   :  { %5375 = vmatpush.msrb.mxu3 %v8444_v28 }
0x16ee   :  { %5395 = vmatpush.msra.mxu0 %v8447_v31  ;;  %5469 = vmatpush.msra.mxu1 %v8367_v19 }
0x1763   :  { %v5159_v62 = vpop.f32.mrf.mxu0 }
0x1764   :  { %v5160_v55 = vadd.f32 %v5159_v62, %v8189_v41  ;;  %v5179_v24 = vpop.f32.mrf.mxu1  ;;  %v5184_v62 = vadd.f32 %v5095_v13, %v8197_v57 }
0x1766   :  { %v5205_v3 = vadd.f32 %v5183_v6, %v5160_v55 }
0x1768   :  { %v5909_v16 = vmul.f32 -1.442695, %v5205_v3 }
0x1769   :  { %v5139_v56 = vpop.f32.mrf.mxu3 }
0x176a   :  { %6224 = vpow2.f32 %v5909_v16  ;;  %v5140_v38 = vadd.f32 %v5139_v56, %v8183_v23  ;;  %v5180_v56 = vadd.f32 %v5179_v24, %v8199_v17 }
0x176c   :  { %v5185_v34 = vadd.f32 %v5182_v46, %v5140_v38 }
0x176e   :  { %v5908_v12 = vmul.f32 -1.442695, %v5185_v34 }
0x1770   :  { %v6225_v44 = vpop.eup %6224  ;;  %6226 = vpow2.f32 %v5908_v12 }
0x1771   :  { %v5209_v19 = vadd.f32 1.0, %v6225_v44 }
0x1773   :  { %6228 = vrcp.f32 %v5209_v19  ;;  %v5221_v16 = vand.u32 2147483648, %v5209_v19  ;;  %vm5215_vm3 = vweird.f32 %v5209_v19  ;;  %v5219_v38 = vand.u32 2147483647, %v5209_v19 }
0x1775   :  { %v5222_v44 = vor.u32 1.1754944e-38, %v5221_v16 }
0x1776   :  { %v6227_v29 = vpop.eup %6226 }
0x1777   :  { %v5189_v7 = vadd.f32 1.0, %v6227_v29 }
0x1779   :  { %6230 = vrcp.f32 %v5189_v7  ;;  %v6229_v15 = vpop.eup %6228  ;;  %v5201_v40 = vand.u32 2147483648, %v5189_v7  ;;  %v5199_v35 = vand.u32 2147483647, %v5189_v7  ;;  %vm5195_vm5 = vweird.f32 %v5189_v7 }
0x177a   :  { %v5211_v43 = vmul.f32 %v6229_v15, %v5209_v19  ;;  %vm5216_vm2 = vweird.f32 %v6229_v15 }
0x177b   :  { %v5202_v52 = vor.u32 1.1754944e-38, %v5201_v40  ;;  %vm5200_vm15 = vcmp.eq.f32.partialorder %v5199_v35, 8.507059e+37  ;;  %vm5217_vm14 = vmor %vm5215_vm3, %vm5216_vm2 }
0x177c   :  { %v5212_v50 = vsub.f32 1.0, %v5211_v43 }
0x177e   :  { %v5213_v37 = vmul.f32 %v6229_v15, %v5212_v50 }
0x177f   :  { %v6231_v53 = vpop.eup %6230 }
0x1780   :  { %v5191_v9 = vmul.f32 %v6231_v53, %v5189_v7  ;;  %vm5196_vm4 = vweird.f32 %v6231_v53  ;;  %v5214_v55 = vadd.f32 %v6229_v15, %v5213_v37 }
0x1781   :  { %vm5197_vm7 = vmor %vm5195_vm5, %vm5196_vm4  ;;  %vm5220_vm4 = vcmp.eq.f32.partialorder %v5219_v38, 8.507059e+37 }
0x1782   :  { %v5192_v10 = vsub.f32 1.0, %v5191_v9  ;;  %v5218_v12 = vsel %vm5217_vm14, %v6229_v15, %v5214_v55  ;;  %v8686_v15 = vld [vmem:[#allocation39_spill] sm:$0xff] }
0x1783   :  { %v5223_v29 = vsel %vm5220_vm4, %v5222_v44, %v5218_v12 }
0x1784   :  { %v5193_v20 = vmul.f32 %v6231_v53, %v5192_v10  ;;  %v5228_v7 = vsub.f32 1.0, %v5223_v29  ;;  %v5230_v9 = vmul.f32 %v5223_v29, %v8458_v27 }
0x1786   :  { %v5194_v0 = vadd.f32 %v6231_v53, %v5193_v20 }
0x1788   :  { %v5198_v6 = vsel %vm5197_vm7, %v6231_v53, %v5194_v0 }
0x1789   :  { %v5203_v3 = vsel %vm5200_vm15, %v5202_v52, %v5198_v6 }
0x178a   :  { %v5225_v46 = vmul.f32 %v5203_v3, %v5184_v62 }
0x178c   :  { %v5226_v34 = vadd.f32 %v5225_v46, %v5180_v56 }
0x178e   :  { %6232 = vtanh.f32 %v5226_v34 }
0x1794   :  { %v6233_v43 = vpop.eup %6232 }
0x1795   :  { %v5229_v53 = vmul.f32 %v6233_v43, %v5228_v7 }
0x1797   :  { %v8517_v50 = vadd.f32 %v5230_v9, %v5229_v53 }
0x1799   :  { %5910 = vmatmul.msk.f32.vlgmr.msra.gmra.mxu2 %vm484_vm1, %v8517_v50  ;;  %5911 = vmatmul.msk.f32.vlgmr.msra.gmra.mxu3 %vm484_vm1, %v8517_v50 }
0x179a   :  { %5912 = vmatmul.msk.f32.vlgmr.msrb.gmra.mxu0 %vm484_vm1, %v8517_v50  ;;  %5913 = vmatmul.msk.f32.vlgmr.msrb.gmra.mxu1 %vm484_vm1, %v8517_v50 }
0x179b   :  { %5486 = vmatpush.msra.mxu2 %v8316_v36  ;;  %5506 = vmatpush.msra.mxu3 %v8388_v4  ;;  %v8685_v36 = vld [vmem:[#allocation43_spill] sm:$0xff] }
0x179c   :  { %5526 = vmatpush.msrb.mxu0 %v8470_v30  ;;  %5570 = vmatpush.msrb.mxu1 %v8321_v11  ;;  %v3884_v11 = vadd.f32 %v8342_v18, %v8685_v36 }
0x179d   :  { %5487 = vmatpush.msra.mxu2 %v8393_v54  ;;  %5507 = vmatpush.msra.mxu3 %v8396_v25 }
0x179e   :  { %5527 = vmatpush.msrb.mxu0 %v8476_v5  ;;  %5571 = vmatpush.msrb.mxu1 %v8327_v63 }
0x179f   :  { %5488 = vmatpush.msra.mxu2 %v8401_v26  ;;  %5508 = vmatpush.msra.mxu3 %v8404_v49 }
0x17a0   :  { %5528 = vmatpush.msrb.mxu0 %v8482_v61  ;;  %5572 = vmatpush.msrb.mxu1 %v8333_v47 }
0x17a1   :  { %5489 = vmatpush.msra.mxu2 %v8409_v60  ;;  %5509 = vmatpush.msra.mxu3 %v8412_v33 }
0x17a2   :  { %5529 = vmatpush.msrb.mxu0 %v8488_v59  ;;  %5573 = vmatpush.msrb.mxu1 %v8339_v2 }
0x1817   :  { %v5293_v20 = vpop.f32.mrf.mxu0  ;;  %v5313_v12 = vpop.f32.mrf.mxu1 }
0x1818   :  { %v5402_v53 = vadd.f32 %v5313_v12, %v8197_v57 }
0x181c   :  { %v5253_v63 = vpop.f32.mrf.mxu2  ;;  %v5273_v40 = vpop.f32.mrf.mxu3 }
0x181d   :  { %v5316_v4 = vadd.f32 %v5253_v63, %v3884_v11 }
0x181f   :  { %v5914_v54 = vmul.f32 -1.442695, %v5316_v4 }
0x1821   :  { %6234 = vpow2.f32 %v5914_v54 }
0x1827   :  { %v6235_v25 = vpop.eup %6234 }
0x1828   :  { %v5320_v26 = vadd.f32 1.0, %v6235_v25 }
0x182a   :  { %6236 = vrcp.f32 %v5320_v26  ;;  %v5332_v60 = vand.u32 2147483648, %v5320_v26  ;;  %v5330_v33 = vand.u32 2147483647, %v5320_v26  ;;  %vm5326_vm7 = vweird.f32 %v5320_v26 }
0x182c   :  { %v5333_v2 = vor.u32 1.1754944e-38, %v5332_v60  ;;  %vm5331_vm2 = vcmp.eq.f32.partialorder %v5330_v33, 8.507059e+37 }
0x1830   :  { %v6237_v49 = vpop.eup %6236 }
0x1831   :  { %v5322_v47 = vmul.f32 %v6237_v49, %v5320_v26  ;;  %vm5327_vm5 = vweird.f32 %v6237_v49 }
0x1832   :  { %vm5328_vm15 = vmor %vm5326_vm7, %vm5327_vm5 }
0x1833   :  { %v5323_v30 = vsub.f32 1.0, %v5322_v47 }
0x1835   :  { %v5324_v5 = vmul.f32 %v6237_v49, %v5323_v30 }
0x1837   :  { %v5325_v61 = vadd.f32 %v6237_v49, %v5324_v5 }
0x1839   :  { %v5329_v59 = vsel %vm5328_vm15, %v6237_v49, %v5325_v61 }
0x183a   :  { %v5334_v19 = vsel %vm5331_vm2, %v5333_v2, %v5329_v59  ;;  %v8687_v59 = vld [vmem:[#allocation44_spill] sm:$0xff] }
0x183b   :  { %v5336_v10 = vmul.f32 %v5334_v19, %v8686_v15  ;;  %v3907_v19 = vadd.f32 %v8342_v18, %v8687_v59 }
0x183d   :  { %5915 = vmatmul.msk.f32.vlgmr.msrb.gmra.mxu2 %vm484_vm1, %v5336_v10  ;;  %5916 = vmatmul.msk.f32.vlgmr.msrb.gmra.mxu3 %vm484_vm1, %v5336_v10 }
0x183e   :  { %5917 = vmatmul.msk.f32.vlgmr.msra.gmra.mxu0 %vm484_vm1, %v5336_v10  ;;  %5590 = vmatpush.msrb.mxu2 %v8423_v22  ;;  %v5401_v22 = vadd.f32 %v5293_v20, %v8187_v51 }
0x183f   :  { %5610 = vmatpush.msrb.mxu3 %v8426_v32  ;;  %v5400_v32 = vadd.f32 %v5273_v40, %v8181_v48 }
0x1840   :  { %5591 = vmatpush.msrb.mxu2 %v8430_v45 }
0x1841   :  { %5611 = vmatpush.msrb.mxu3 %v8433_v8 }
0x1842   :  { %5592 = vmatpush.msrb.mxu2 %v8437_v1 }
0x1843   :  { %5612 = vmatpush.msrb.mxu3 %v8440_v14 }
0x1844   :  { %5593 = vmatpush.msrb.mxu2 %v8444_v28 }
0x1845   :  { %5613 = vmatpush.msrb.mxu3 %v8447_v31 }
0x18bb   :  { %v5397_v7 = vpop.f32.mrf.mxu0 }
0x18bc   :  { %v5398_v63 = vadd.f32 %v5397_v7, %v8199_v17 }
0x18c0   :  { %v5357_v35 = vpop.f32.mrf.mxu2  ;;  %v5377_v13 = vpop.f32.mrf.mxu3 }
0x18c1   :  { %v5358_v45 = vadd.f32 %v5357_v35, %v8183_v23  ;;  %v5378_v8 = vadd.f32 %v5377_v13, %v8189_v41 }
0x18c3   :  { %v5403_v37 = vadd.f32 %v5400_v32, %v5358_v45  ;;  %v5423_v1 = vadd.f32 %v5401_v22, %v5378_v8 }
0x18c5   :  { %v5918_v0 = vmul.f32 -1.442695, %v5403_v37  ;;  %v5919_v14 = vmul.f32 -1.442695, %v5423_v1 }
0x18c7   :  { %6238 = vpow2.f32 %v5918_v0 }
0x18c8   :  { %6240 = vpow2.f32 %v5919_v14 }
0x18cd   :  { %v6239_v28 = vpop.eup %6238 }
0x18ce   :  { %v6241_v31 = vpop.eup %6240  ;;  %v5407_v24 = vadd.f32 1.0, %v6239_v28  ;;  %v8688_v28 = vld [vmem:[#allocation42_spill] sm:$0xff] }
0x18cf   :  { %v5427_v52 = vadd.f32 1.0, %v6241_v31 }
0x18d0   :  { %6242 = vrcp.f32 %v5407_v24  ;;  %v5419_v56 = vand.u32 2147483648, %v5407_v24  ;;  %v5417_v34 = vand.u32 2147483647, %v5407_v24  ;;  %vm5413_vm14 = vweird.f32 %v5407_v24 }
0x18d1   :  { %6244 = vrcp.f32 %v5427_v52  ;;  %v5439_v54 = vand.u32 2147483648, %v5427_v52  ;;  %vm5433_vm15 = vweird.f32 %v5427_v52  ;;  %v5437_v25 = vand.u32 2147483647, %v5427_v52 }
0x18d2   :  { %v5420_v43 = vor.u32 1.1754944e-38, %v5419_v56  ;;  %vm5418_vm5 = vcmp.eq.f32.partialorder %v5417_v34, 8.507059e+37 }
0x18d3   :  { %v5440_v47 = vor.u32 1.1754944e-38, %v5439_v54 }
0x18d6   :  { %v6243_v62 = vpop.eup %6242 }
0x18d7   :  { %v6245_v6 = vpop.eup %6244  ;;  %v5409_v55 = vmul.f32 %v6243_v62, %v5407_v24  ;;  %vm5414_vm3 = vweird.f32 %v6243_v62 }
0x18d8   :  { %v5429_v3 = vmul.f32 %v6245_v6, %v5427_v52  ;;  %vm5415_vm4 = vmor %vm5413_vm14, %vm5414_vm3  ;;  %vm5434_vm7 = vweird.f32 %v6245_v6  ;;  %vm5438_vm3 = vcmp.eq.f32.partialorder %v5437_v25, 8.507059e+37 }
0x18d9   :  { %v5410_v16 = vsub.f32 1.0, %v5409_v55  ;;  %vm5435_vm2 = vmor %vm5433_vm15, %vm5434_vm7 }
0x18da   :  { %v5430_v46 = vsub.f32 1.0, %v5429_v3 }
0x18db   :  { %v5411_v38 = vmul.f32 %v6243_v62, %v5410_v16 }
0x18dc   :  { %v5431_v44 = vmul.f32 %v6245_v6, %v5430_v46 }
0x18dd   :  { %v5412_v29 = vadd.f32 %v6243_v62, %v5411_v38 }
0x18de   :  { %v5432_v11 = vadd.f32 %v6245_v6, %v5431_v44 }
0x18df   :  { %v5416_v9 = vsel %vm5415_vm4, %v6243_v62, %v5412_v29 }
0x18e0   :  { %v5421_v36 = vsel %vm5418_vm5, %v5420_v43, %v5416_v9  ;;  %v5436_v49 = vsel %vm5435_vm2, %v6245_v6, %v5432_v11 }
0x18e1   :  { %v5443_v4 = vmul.f32 %v5421_v36, %v5402_v53  ;;  %v5441_v30 = vsel %vm5438_vm3, %v5440_v47, %v5436_v49 }
0x18e2   :  { %v5446_v60 = vsub.f32 1.0, %v5441_v30  ;;  %v5448_v61 = vmul.f32 %v5441_v30, %v8517_v50 }
0x18e3   :  { %v5444_v26 = vadd.f32 %v5443_v4, %v5398_v63 }
0x18e5   :  { %6246 = vtanh.f32 %v5444_v26 }
0x18eb   :  { %v6247_v5 = vpop.eup %6246 }
0x18ec   :  { %v5447_v33 = vmul.f32 %v6247_v5, %v5446_v60 }
0x18ee   :  { %v8564_v2 = vadd.f32 %v5448_v61, %v5447_v33 }
0x18f0   :  { %5920 = vmatmul.msk.f32.vlgmr.msra.gmra.mxu1 %vm484_vm1, %v8564_v2  ;;  %5921 = vmatmul.msk.f32.vlgmr.msra.gmra.mxu2 %vm484_vm1, %v8564_v2 }
0x18f1   :  { %5922 = vmatmul.msk.f32.vlgmr.msra.gmra.mxu3 %vm484_vm1, %v8564_v2  ;;  %5923 = vmatmul.msk.f32.vlgmr.msrb.gmra.mxu0 %vm484_vm1, %v8564_v2 }
0x196d   :  { %v5471_v15 = vpop.f32.mrf.mxu1 }
0x196e   :  { %v5534_v10 = vadd.f32 %v5471_v15, %v3907_v19  ;;  %v5531_v63 = vpop.f32.mrf.mxu0 }
0x196f   :  { %v5620_v26 = vadd.f32 %v5531_v63, %v8197_v57 }
0x1970   :  { %v5924_v40 = vmul.f32 -1.442695, %v5534_v10 }
0x1972   :  { %6248 = vpow2.f32 %v5924_v40 }
0x1973   :  { %v5491_v24 = vpop.f32.mrf.mxu2 }
0x1974   :  { %v5618_v62 = vadd.f32 %v5491_v24, %v8181_v48  ;;  %v5511_v3 = vpop.f32.mrf.mxu3 }
0x1975   :  { %v5619_v46 = vadd.f32 %v5511_v3, %v8187_v51 }
0x1978   :  { %v6249_v20 = vpop.eup %6248 }
0x1979   :  { %v5538_v35 = vadd.f32 1.0, %v6249_v20 }
0x197b   :  { %6250 = vrcp.f32 %v5538_v35  ;;  %v5550_v45 = vand.u32 2147483648, %v5538_v35  ;;  %v5548_v37 = vand.u32 2147483647, %v5538_v35  ;;  %vm5544_vm4 = vweird.f32 %v5538_v35 }
0x197d   :  { %v5551_v0 = vor.u32 1.1754944e-38, %v5550_v45  ;;  %vm5549_vm7 = vcmp.eq.f32.partialorder %v5548_v37, 8.507059e+37 }
0x1981   :  { %v6251_v13 = vpop.eup %6250 }
0x1982   :  { %v5540_v22 = vmul.f32 %v6251_v13, %v5538_v35  ;;  %vm5545_vm14 = vweird.f32 %v6251_v13  ;;  %v4142_v35 = vsel %vm721_vm6, %v8204_v42, 0.0  ;;  %vm8697_vm6 = vcmask 257024  }
0x1983   :  { %vm5546_vm5 = vmor %vm5544_vm4, %vm5545_vm14 }
0x1984   :  { %v5541_v32 = vsub.f32 1.0, %v5540_v22 }
0x1986   :  { %v5542_v8 = vmul.f32 %v6251_v13, %v5541_v32 }
0x1988   :  { %v5543_v1 = vadd.f32 %v6251_v13, %v5542_v8 }
0x198a   :  { %v5547_v14 = vsel %vm5546_vm5, %v6251_v13, %v5543_v1  ;;  %v4360_v13 = vsel %vm945_vm8, %v8255_v21, %v4142_v35 }
0x198b   :  { %v5552_v18 = vsel %vm5549_vm7, %v5551_v0, %v5547_v14  ;;  %v4578_v8 = vsel %vm1169_vm9, %v8306_v58, %v4360_v13 }
0x198c   :  { %v5554_v31 = vmul.f32 %v5552_v18, %v8688_v28  ;;  %v4796_v1 = vsel %vm1393_vm10, %v8377_v39, %v4578_v8 }
0x198d   :  { %v5014_v42 = vsel %vm1617_vm11, %v8458_v27, %v4796_v1 }
0x198e   :  { %5925 = vmatmul.msk.f32.vlgmr.msrb.gmra.mxu1 %vm484_vm1, %v5554_v31  ;;  %5926 = vmatmul.msk.f32.vlgmr.msrb.gmra.mxu2 %vm484_vm1, %v5554_v31  ;;  %v5232_v21 = vsel %vm1841_vm12, %v8517_v50, %v5014_v42 }
0x198f   :  { %5927 = vmatmul.msk.f32.vlgmr.msrb.gmra.mxu3 %vm484_vm1, %v5554_v31  ;;  %v5450_v58 = vsel %vm2065_vm0, %v8564_v2, %v5232_v21 }
0x1a0b   :  { %v5575_v52 = vpop.f32.mrf.mxu1 }
0x1a0c   :  { %v5576_v6 = vadd.f32 %v5575_v52, %v8183_v23 }
0x1a0e   :  { %v5621_v55 = vadd.f32 %v5618_v62, %v5576_v6 }
0x1a10   :  { %v5928_v16 = vmul.f32 -1.442695, %v5621_v55 }
0x1a11   :  { %v5595_v56 = vpop.f32.mrf.mxu2 }
0x1a12   :  { %6252 = vpow2.f32 %v5928_v16  ;;  %v5596_v38 = vadd.f32 %v5595_v56, %v8189_v41  ;;  %v5615_v41 = vpop.f32.mrf.mxu3 }
0x1a13   :  { %v5616_v30 = vadd.f32 %v5615_v41, %v8199_v17 }
0x1a14   :  { %v5641_v34 = vadd.f32 %v5619_v46, %v5596_v38 }
0x1a16   :  { %v5929_v12 = vmul.f32 -1.442695, %v5641_v34 }
0x1a18   :  { %v6253_v44 = vpop.eup %6252  ;;  %6254 = vpow2.f32 %v5929_v12 }
0x1a19   :  { %v5625_v29 = vadd.f32 1.0, %v6253_v44 }
0x1a1b   :  { %6256 = vrcp.f32 %v5625_v29  ;;  %v5637_v9 = vand.u32 2147483648, %v5625_v29  ;;  %v5635_v11 = vand.u32 2147483647, %v5625_v29  ;;  %vm5631_vm15 = vweird.f32 %v5625_v29 }
0x1a1d   :  { %v5638_v25 = vor.u32 1.1754944e-38, %v5637_v9  ;;  %vm5636_vm3 = vcmp.eq.f32.partialorder %v5635_v11, 8.507059e+37 }
0x1a1e   :  { %v6255_v7 = vpop.eup %6254 }
0x1a1f   :  { %v5645_v43 = vadd.f32 1.0, %v6255_v7 }
0x1a21   :  { %v6257_v48 = vpop.eup %6256  ;;  %6258 = vrcp.f32 %v5645_v43  ;;  %v5657_v33 = vand.u32 2147483648, %v5645_v43  ;;  %v5655_v59 = vand.u32 2147483647, %v5645_v43  ;;  %vm5651_vm4 = vweird.f32 %v5645_v43 }
0x1a22   :  { %v5627_v23 = vmul.f32 %v6257_v48, %v5625_v29  ;;  %vm5632_vm1 = vweird.f32 %v6257_v48 }
0x1a23   :  { %vm5633_vm2 = vmor %vm5631_vm15, %vm5632_vm1  ;;  %v5658_v40 = vor.u32 1.1754944e-38, %v5657_v33  ;;  %vm5656_vm7 = vcmp.eq.f32.partialorder %v5655_v59, 8.507059e+37 }
0x1a24   :  { %v5628_v53 = vsub.f32 1.0, %v5627_v23 }
0x1a26   :  { %v5629_v36 = vmul.f32 %v6257_v48, %v5628_v53 }
0x1a27   :  { %v6259_v51 = vpop.eup %6258 }
0x1a28   :  { %v5647_v4 = vmul.f32 %v6259_v51, %v5645_v43  ;;  %v5630_v54 = vadd.f32 %v6257_v48, %v5629_v36  ;;  %vm5652_vm14 = vweird.f32 %v6259_v51 }
0x1a29   :  { %vm5653_vm5 = vmor %vm5651_vm4, %vm5652_vm14 }
0x1a2a   :  { %v5648_v49 = vsub.f32 1.0, %v5647_v4  ;;  %v5634_v47 = vsel %vm5633_vm2, %v6257_v48, %v5630_v54 }
0x1a2b   :  { %v5639_v60 = vsel %vm5636_vm3, %v5638_v25, %v5634_v47 }
0x1a2c   :  { %v5649_v5 = vmul.f32 %v6259_v51, %v5648_v49  ;;  %v5661_v61 = vmul.f32 %v5639_v60, %v5620_v26 }
0x1a2e   :  { %v5650_v19 = vadd.f32 %v6259_v51, %v5649_v5  ;;  %v5662_v15 = vadd.f32 %v5661_v61, %v5616_v30 }
0x1a30   :  { %v5654_v10 = vsel %vm5653_vm5, %v6259_v51, %v5650_v19  ;;  %6260 = vtanh.f32 %v5662_v15 }
0x1a31   :  { %v5659_v57 = vsel %vm5656_vm7, %v5658_v40, %v5654_v10 }
0x1a32   :  { %v5664_v22 = vsub.f32 1.0, %v5659_v57  ;;  %v5666_v14 = vmul.f32 %v5659_v57, %v8564_v2 }
0x1a36   :  { %v6261_v32 = vpop.eup %6260 }
0x1a37   :  { %v5665_v0 = vmul.f32 %v6261_v32, %v5664_v22 }
0x1a39   :  { %v5667_v31 = vadd.f32 %v5666_v14, %v5665_v0 }
0x1a3b   :  { %v5668_v62 = vsel %vm2289_vm13, %v5667_v31, %v5450_v58 }
0x1a3c   :  { %5930 = vst.msk [vmem:[%s8633_s19 + $0x8] sm:$0xf] %vm8697_vm6, %v5668_v62 }
0x1a3d   :  { %5675 = vsyncpa [#allocation3], 1 }
0x1a3e   :  { %5676 = vsyncpa [#allocation5], 1 }
0x1a3f   :  { %5677 = vsyncpa [#allocation8], 1 }
0x1a40   :  { %5678 = vsyncpa [#allocation11], 1 }
0x1a41   :  { %5679 = vsyncpa [#allocation14], 1 }
0x1a42   :  { %5680 = vsyncpa [#allocation17], 1 }
0x1a43   :  { %5681 = vsyncpa [#allocation20], 1 }

</bundles_post_ra>
